<compile_context>
chip_gen: v5e
topology: v5e:2x2
jax: 0.10.0
libtpu: 0.0.40
codegen_flags: <defaults>
</compile_context>

<pallas_src>
import functools

import jax
import jax.numpy as jnp
from jax.experimental import pallas as pl
from jax.experimental.pallas import tpu as pltpu


def _cp(n_parallel=1):
    return pltpu.CompilerParams(dimension_semantics=("parallel",) * n_parallel)


# ---------------------------------------------------------------------------
# In-kernel math helpers
# ---------------------------------------------------------------------------
_SQRT1_2 = 0.7071067811865476


def _erf_f32(x):
    # TODO(synk): erf via the Abramowitz & Stegun 7.1.26 rational approximation
    # (|abs err| < 1.5e-7, float32-exact for nn.GELU) so Mosaic lowers natively.
    p = 0.3275911
    a1, a2, a3, a4, a5 = (0.254829592, -0.284496736, 1.421413741,
                          -1.453152027, 1.061405429)
    ax = jnp.abs(x)
    t = 1.0 / (1.0 + p * ax)
    poly = t * (a1 + t * (a2 + t * (a3 + t * (a4 + t * a5))))
    y = 1.0 - poly * jnp.exp(-ax * ax)
    return jnp.where(x < 0.0, -y, y)


def _gelu_exact(x):
    return 0.5 * x * (1.0 + _erf_f32(x * _SQRT1_2))


def _layernorm(x, g, b):
    mean = jnp.mean(x, axis=-1, keepdims=True)
    var = jnp.mean(jnp.square(x - mean), axis=-1, keepdims=True)
    return (x - mean) * jax.lax.rsqrt(var + 1e-5) * g + b


# ---------------------------------------------------------------------------
# Patch embedding kernel: (im2col columns) @ W + b  ->  LayerNorm
# ---------------------------------------------------------------------------
def _pe_kernel(xc_ref, w_ref, b_ref, g_ref, be_ref, o_ref):
    y = jnp.dot(xc_ref[0].astype(jnp.bfloat16), w_ref[...],
                preferred_element_type=jnp.float32) + b_ref[...]
    o_ref[0] = _layernorm(y, g_ref[...], be_ref[...])


def pallas_patch_embed(xcols, w_bf16, b, gamma, beta):
    B, T, K = xcols.shape
    N = w_bf16.shape[1]
    return pl.pallas_call(
        _pe_kernel,
        grid=(B,),
        in_specs=[pl.BlockSpec((1, T, K), lambda i: (i, 0, 0)),
                  pl.BlockSpec((K, N), lambda i: (0, 0)),
                  pl.BlockSpec((1, N), lambda i: (0, 0)),
                  pl.BlockSpec((1, N), lambda i: (0, 0)),
                  pl.BlockSpec((1, N), lambda i: (0, 0))],
        out_specs=pl.BlockSpec((1, T, N), lambda i: (i, 0, 0)),
        out_shape=jax.ShapeDtypeStruct((B, T, N), jnp.float32),
        compiler_params=_cp(1),
    )(xcols, w_bf16, b, gamma, beta)


# ---------------------------------------------------------------------------
# Final classifier head kernel: LayerNorm(cls) @ W + b   (single grid step)
# ---------------------------------------------------------------------------
def _head_kernel(x_ref, g_ref, b_ref, w_ref, wb_ref, o_ref):
    xn = _layernorm(x_ref[...], g_ref[...], b_ref[...])
    o_ref[...] = jnp.dot(xn.astype(jnp.bfloat16), w_ref[...],
                         preferred_element_type=jnp.float32) + wb_ref[...]


def pallas_ln_head(x2d, gamma, beta, w_bf16, b):
    M, C = x2d.shape
    N = w_bf16.shape[1]
    return pl.pallas_call(
        _head_kernel,
        grid=(1,),
        in_specs=[pl.BlockSpec((M, C), lambda i: (0, 0)),
                  pl.BlockSpec((1, C), lambda i: (0, 0)),
                  pl.BlockSpec((1, C), lambda i: (0, 0)),
                  pl.BlockSpec((C, N), lambda i: (0, 0)),
                  pl.BlockSpec((1, N), lambda i: (0, 0))],
        out_specs=pl.BlockSpec((M, N), lambda i: (0, 0)),
        out_shape=jax.ShapeDtypeStruct((M, N), jnp.float32),
        compiler_params=_cp(1),
    )(x2d, gamma, beta, w_bf16, b)


# ---------------------------------------------------------------------------
# Fully fused CvT transformer block kernel (one grid step per batch element)
# ---------------------------------------------------------------------------
def _block_kernel(x_ref, ln1g_ref, ln1b_ref, dww_ref, bns_ref, bnt_ref,
                  sel_ref, wqkv_ref, bqkv_ref, wo_ref, bo_ref,
                  ln2g_ref, ln2b_ref, w1_ref, b1_ref, w2_ref, b2_ref,
                  o_ref,
                  pad_sc, q_sc, k_sc, v_sc, kf_sc, vf_sc,
                  *, H, W, ks, pad, num_heads, with_cls):
    f32, bf16 = jnp.float32, jnp.bfloat16
    C = x_ref.shape[-1]
    cls_off = 1 if with_cls else 0

    x = x_ref[0]                                              # (T, C) float32
    xn = _layernorm(x, ln1g_ref[...], ln1b_ref[...])          # LN1 (incl. cls)

    # --- zero-padded, LayerNormed image assembled in VMEM (no XLA pad) ------
    pad_sc[...] = jnp.zeros(pad_sc.shape, pad_sc.dtype)
    for i in range(H):
        pad_sc[pad + i, pad:pad + W, :] = (
            xn[cls_off + i * W:cls_off + (i + 1) * W, :])

    # --- depthwise ks x ks conv (stride 1) for q/k/v sharing one image read -
    accq = acck = accv = None
    for kh in range(ks):
        for kw in range(ks):
            win = pad_sc[kh:kh + H, kw:kw + W, :]             # (H, W, C)
            tap = kh * ks + kw
            wq = dww_ref[0, tap:tap + 1, :].reshape(1, 1, C)
            wk = dww_ref[1, tap:tap + 1, :].reshape(1, 1, C)
            wv = dww_ref[2, tap:tap + 1, :].reshape(1, 1, C)
            if accq is None:
                accq, acck, accv = win * wq, win * wk, win * wv
            else:
                accq += win * wq
                acck += win * wk
                accv += win * wv
    # eval-mode BatchNorm folded to per-channel scale/shift
    accq = accq * bns_ref[0:1, :].reshape(1, 1, C) + bnt_ref[0:1, :].reshape(1, 1, C)
    acck = acck * bns_ref[1:2, :].reshape(1, 1, C) + bnt_ref[1:2, :].reshape(1, 1, C)
    accv = accv * bns_ref[2:3, :].reshape(1, 1, C) + bnt_ref[2:3, :].reshape(1, 1, C)

    # --- flatten to token matrices via static row stores (no reshapes) ------
    for i in range(H):
        q_sc[cls_off + i * W:cls_off + (i + 1) * W, :] = accq[i]
        kf_sc[i * W:(i + 1) * W, :] = acck[i]
        vf_sc[i * W:(i + 1) * W, :] = accv[i]

    # --- stride_kv subsample via 0/1 selection matmul; stays in VMEM --------
    selb = sel_ref[...]                                       # (Tk_body, T_body) bf16
    k_sc[cls_off:, :] = jnp.dot(selb, kf_sc[...].astype(bf16),
                                preferred_element_type=f32)
    v_sc[cls_off:, :] = jnp.dot(selb, vf_sc[...].astype(bf16),
                                preferred_element_type=f32)
    if with_cls:                                              # cls prepend in VMEM
        q_sc[0:1, :] = xn[0:1, :]
        k_sc[0:1, :] = xn[0:1, :]
        v_sc[0:1, :] = xn[0:1, :]

    # --- linear q/k/v projections (attention scale pre-folded into q) -------
    qp = jnp.dot(q_sc[...].astype(bf16), wqkv_ref[0],
                 preferred_element_type=f32) + bqkv_ref[0:1, :]
    kp = jnp.dot(k_sc[...].astype(bf16), wqkv_ref[1],
                 preferred_element_type=f32) + bqkv_ref[1:2, :]
    vp = jnp.dot(v_sc[...].astype(bf16), wqkv_ref[2],
                 preferred_element_type=f32) + bqkv_ref[2:3, :]

    # --- per-head attention; head merge folded into the output projection ---
    hd = C // num_heads
    o_acc = None
    for h in range(num_heads):
        lo = h * hd
        qh = qp[:, lo:lo + hd]
        kh_ = kp[:, lo:lo + hd]
        vh = vp[:, lo:lo + hd]
        s = jax.lax.dot_general(qh.astype(bf16), kh_.astype(bf16),
                                (((1,), (1,)), ((), ())),
                                preferred_element_type=f32)    # (Tq, Tk)
        s = s - jnp.max(s, axis=-1, keepdims=True)
        e = jnp.exp(s)
        p = e * pl.reciprocal(jnp.sum(e, axis=-1, keepdims=True), approx=True)
        ctx = jnp.dot(p.astype(bf16), vh.astype(bf16),
                      preferred_element_type=f32)              # (Tq, hd)
        part = jnp.dot(ctx.astype(bf16), wo_ref[lo:lo + hd, :],
                       preferred_element_type=f32)             # (Tq, C)
        o_acc = part if o_acc is None else o_acc + part
    y = x + o_acc + bo_ref[...]                                # attention residual

    # --- LN2 + MLP (exact-erf GELU) + residual, hidden never leaves VMEM ----
    yn = _layernorm(y, ln2g_ref[...], ln2b_ref[...])
    hmid = jnp.dot(yn.astype(bf16), w1_ref[...],
                   preferred_element_type=f32) + b1_ref[...]
    hmid = _gelu_exact(hmid)
    o_ref[0] = y + jnp.dot(hmid.astype(bf16), w2_ref[...],
                           preferred_element_type=f32) + b2_ref[...]


def pallas_block(x, blk, sel, cfg_i, H, W):
    """One fused CvT transformer block: (B, T, C) -> (B, T, C)."""
    B, T, C = x.shape
    ks = cfg_i["kernel_size"]
    pad = cfg_i["padding_q"]
    skv = cfg_i["stride_kv"]
    with_cls = cfg_i["with_cls"]
    num_heads = cfg_i["num_heads"]
    # TODO(synk): stride_q != 1 or padding_q != padding_kv would need their own
    # in-kernel selection path; the ConvVT defaults used here satisfy both.
    assert cfg_i["stride_q"] == 1 and cfg_i["padding_q"] == cfg_i["padding_kv"]
    assert H + 2 * pad - ks + 1 == H and W + 2 * pad - ks + 1 == W
    cls_off = 1 if with_cls else 0
    assert T == cls_off + H * W
    Hk = (H - 1) // skv + 1
    Wk = (W - 1) // skv + 1
    Tk = cls_off + Hk * Wk
    Hd = blk["fc1_w"].shape[1]

    kern = functools.partial(_block_kernel, H=H, W=W, ks=ks, pad=pad,
                             num_heads=num_heads, with_cls=with_cls)
    full2 = lambda shp: pl.BlockSpec(shp, lambda b: (0, 0))
    full3 = lambda shp: pl.BlockSpec(shp, lambda b: (0, 0, 0))
    return pl.pallas_call(
        kern,
        grid=(B,),
        in_specs=[pl.BlockSpec((1, T, C), lambda b: (b, 0, 0)),   # x
                  full2((1, C)), full2((1, C)),                   # LN1 gamma/beta
                  full3((3, ks * ks, C)),                         # depthwise conv w
                  full2((3, C)), full2((3, C)),                   # BN scale/shift
                  full2((Hk * Wk, H * W)),                        # stride_kv selector
                  full3((3, C, C)), full2((3, C)),                # q/k/v linear proj
                  full2((C, C)), full2((1, C)),                   # output proj
                  full2((1, C)), full2((1, C)),                   # LN2 gamma/beta
                  full2((C, Hd)), full2((1, Hd)),                 # fc1
                  full2((Hd, C)), full2((1, C))],                 # fc2
        out_specs=pl.BlockSpec((1, T, C), lambda b: (b, 0, 0)),
        out_shape=jax.ShapeDtypeStruct((B, T, C), jnp.float32),
        scratch_shapes=[pltpu.VMEM((H + 2 * pad, W + 2 * pad, C), jnp.float32),
                        pltpu.VMEM((T, C), jnp.float32),          # q tokens
                        pltpu.VMEM((Tk, C), jnp.float32),         # k tokens
                        pltpu.VMEM((Tk, C), jnp.float32),         # v tokens
                        pltpu.VMEM((H * W, C), jnp.float32),      # full-res k conv
                        pltpu.VMEM((H * W, C), jnp.float32)],     # full-res v conv
        compiler_params=_cp(1),
    )(x, blk["ln1_g"], blk["ln1_b"], blk["dw_w"], blk["bn_scale"],
      blk["bn_shift"], sel, blk["w_qkv"], blk["b_qkv"], blk["proj_w"],
      blk["proj_b"], blk["ln2_g"], blk["ln2_b"], blk["fc1_w"], blk["fc1_b"],
      blk["fc2_w"], blk["fc2_b"])


# ---------------------------------------------------------------------------
# Plain-JAX glue (patch-embed im2col only; everything else is in-kernel)
# ---------------------------------------------------------------------------
def _extract_patches_nhwc(x, k, stride, pad):
    """x:(B,H,W,C) -> (B,Ho,Wo,k*k,C); tap index = kh*k + kw (matches torch)."""
    # TODO(synk): strided window extraction kept as XLA glue (3 uses per forward);
    # no robust in-kernel equivalent for two-axis strided gathers at these shapes.
    B, H, W, C = x.shape
    xp = jnp.pad(x, ((0, 0), (pad, pad), (pad, pad), (0, 0)))
    Ho = (H + 2 * pad - k) // stride + 1
    Wo = (W + 2 * pad - k) // stride + 1
    taps = []
    for kh in range(k):
        for kw in range(k):
            taps.append(
                xp[:, kh:kh + stride * Ho:stride, kw:kw + stride * Wo:stride, :]
            )
    cols = jnp.stack(taps, axis=3)  # (B, Ho, Wo, KK, C)
    return cols, Ho, Wo


def patch_embed(x_nhwc, sp, cfg_i):
    """CVTEmbedding: Conv2d as im2col + fused (matmul + bias + LayerNorm)."""
    B, _, _, Cin = x_nhwc.shape
    ps, st, pd = cfg_i["patch_size"], cfg_i["patch_stride"], cfg_i["patch_padding"]
    cols, Ho, Wo = _extract_patches_nhwc(x_nhwc, ps, st, pd)
    xcol = jnp.transpose(cols, (0, 1, 2, 4, 3)).reshape(B, Ho * Wo, Cin * ps * ps)
    y = pallas_patch_embed(xcol, sp["pe_w"], sp["pe_b"], sp["pe_ln_g"], sp["pe_ln_b"])
    return y, Ho, Wo


def stage_forward(x_nhwc, sp, cfg_i):
    tokens, H, W = patch_embed(x_nhwc, sp, cfg_i)
    B, _, C = tokens.shape
    if cfg_i["with_cls"]:
        cls = jnp.broadcast_to(sp["cls_token"], (B, 1, C))
        tokens = jnp.concatenate([cls, tokens], axis=1)
    for blk in sp["blocks"]:
        tokens = pallas_block(tokens, blk, sp["sel_kv"], cfg_i, H, W)
    if cfg_i["with_cls"]:
        cls_tokens = tokens[:, :1, :]
        body = tokens[:, 1:, :]
    else:
        cls_tokens = None
        body = tokens
    return body.reshape(B, H, W, C), cls_tokens  # stay NHWC between stages


def convvt_forward(fp, x_nchw, cfg):
    x = jnp.transpose(x_nchw, (0, 2, 3, 1))  # NCHW -> NHWC once
    cls_tokens = None
    for i in range(cfg["num_stages"]):
        x, cls_tokens = stage_forward(x, fp["stages"][i], cfg["stage_cfgs"][i])
    B, _, C = cls_tokens.shape
    # torch: norm(cls) -> squeeze -> head   (fused LayerNorm + Linear kernel)
    return pallas_ln_head(cls_tokens.reshape(B, C), fp["norm_g"], fp["norm_b"],
                          fp["head_w"], fp["head_b"])


# ---------------------------------------------------------------------------
# Config + deterministic synthetic parameter init (+ one-time weight prep)
# ---------------------------------------------------------------------------
def make_config():
    num_stages = 3
    cfg = {
        "num_stages": num_stages,
        "img_size": 32,
        "in_channels": 3,
        "n_classes": 10,
        "patch_size": [7, 3, 3],
        "patch_stride": [4, 2, 2],
        "patch_padding": [2, 1, 1],
        "embedding_dim": [16, 32, 64],
        "num_heads": [1, 2, 4],
        "depth": [1, 1, 2],
        "mlp_ratio": [4.0, 4.0, 4.0],
        "kernel_size": [3, 3, 3],
        "padding_q": [1, 1, 1],
        "padding_kv": [1, 1, 1],
        "stride_kv": [2, 2, 2],
        "stride_q": [1, 1, 1],
    }
    cfg["stage_cfgs"] = [
        {
            "patch_size": cfg["patch_size"][i],
            "patch_stride": cfg["patch_stride"][i],
            "patch_padding": cfg["patch_padding"][i],
            "num_heads": cfg["num_heads"][i],
            "kernel_size": cfg["kernel_size"][i],
            "padding_q": cfg["padding_q"][i],
            "padding_kv": cfg["padding_kv"][i],
            "stride_kv": cfg["stride_kv"][i],
            "stride_q": cfg["stride_q"][i],
            "with_cls": i == num_stages - 1,
        }
        for i in range(num_stages)
    ]
    return cfg


def init_params(key, cfg):
    keys = iter(jax.random.split(key, 1024))

    def nrm(shape, std=0.02):
        return jax.random.normal(next(keys), shape, jnp.float32) * std

    params = {"stages": []}
    c_in = cfg["in_channels"]
    for i in range(cfg["num_stages"]):
        dim = cfg["embedding_dim"][i]
        ks = cfg["kernel_size"][i]
        ps = cfg["patch_size"][i]
        hidden = int(dim * cfg["mlp_ratio"][i])
        sp = {
            "pe_w": nrm((dim, c_in, ps, ps), 0.05),   # torch Conv2d layout (Cout,Cin,kh,kw)
            "pe_b": nrm((dim,), 0.02),
            "pe_ln_g": 1.0 + nrm((dim,), 0.02),
            "pe_ln_b": nrm((dim,), 0.02),
            "blocks": [],
        }
        if i == cfg["num_stages"] - 1:
            sp["cls_token"] = nrm((1, 1, dim), 0.02)
        for _ in range(cfg["depth"][i]):
            blk = {
                "ln1_g": 1.0 + nrm((dim,), 0.02), "ln1_b": nrm((dim,), 0.02),
                "ln2_g": 1.0 + nrm((dim,), 0.02), "ln2_b": nrm((dim,), 0.02),
                "proj_w": nrm((dim, dim), 0.02), "proj_b": nrm((dim,), 0.02),
                "fc1_w": nrm((dim, hidden), 0.02), "fc1_b": nrm((hidden,), 0.02),
                "fc2_w": nrm((hidden, dim), 0.02), "fc2_b": nrm((dim,), 0.02),
            }
            for name in ("q", "k", "v"):
                blk[f"dw_{name}_w"] = nrm((dim, 1, ks, ks), 0.1)   # depthwise conv weight
                blk[f"bn_{name}_g"] = 1.0 + nrm((dim,), 0.02)
                blk[f"bn_{name}_b"] = nrm((dim,), 0.02)
                blk[f"bn_{name}_rm"] = nrm((dim,), 0.02)
                blk[f"bn_{name}_rv"] = 1.0 + jnp.abs(nrm((dim,), 0.1))
                blk[f"proj_{name}_w"] = nrm((dim, dim), 0.02)      # stored (in, out)
                blk[f"proj_{name}_b"] = nrm((dim,), 0.02)
            sp["blocks"].append(blk)
        params["stages"].append(sp)
        c_in = dim
    d_last = cfg["embedding_dim"][-1]
    params["norm_g"] = 1.0 + nrm((d_last,), 0.02)
    params["norm_b"] = nrm((d_last,), 0.02)
    params["head_w"] = nrm((d_last, cfg["n_classes"]), 0.02)
    params["head_b"] = nrm((cfg["n_classes"],), 0.02)
    return params


def prepare_params(params, cfg):
    """One-time prep: fold BN (eval) + attention scale, stack q/k/v, bf16
    matmul weights, per-stage stride_kv selection matrices."""
    bf16 = jnp.bfloat16
    fp = {"stages": []}
    c_in = cfg["in_channels"]
    size = cfg["img_size"]
    for i, sp in enumerate(params["stages"]):
        dim = cfg["embedding_dim"][i]
        ps = cfg["patch_size"][i]
        ks = cfg["kernel_size"][i]
        size = (size + 2 * cfg["patch_padding"][i] - ps) // cfg["patch_stride"][i] + 1
        H = W = size
        skv = cfg["stride_kv"][i]
        Hk, Wk = (H - 1) // skv + 1, (W - 1) // skv + 1
        rows = jnp.arange(Hk * Wk)
        src = (rows // Wk) * skv * W + (rows % Wk) * skv
        sel = (jnp.arange(H * W)[None, :] == src[:, None]).astype(bf16)
        scale = float(dim) ** -0.5  # CvT scales attention by full dim_out**-0.5
        fsp = {
            "pe_w": sp["pe_w"].reshape(dim, c_in * ps * ps).T.astype(bf16),  # (K, Cout)
            "pe_b": sp["pe_b"].reshape(1, dim),
            "pe_ln_g": sp["pe_ln_g"].reshape(1, dim),
            "pe_ln_b": sp["pe_ln_b"].reshape(1, dim),
            "sel_kv": sel,                                       # (Hk*Wk, H*W) bf16
            "blocks": [],
        }
        if "cls_token" in sp:
            fsp["cls_token"] = sp["cls_token"]
        for blk in sp["blocks"]:
            scales, shifts = [], []
            for n in ("q", "k", "v"):
                s = blk[f"bn_{n}_g"] / jnp.sqrt(blk[f"bn_{n}_rv"] + 1e-5)
                scales.append(s)
                shifts.append(blk[f"bn_{n}_b"] - blk[f"bn_{n}_rm"] * s)
            fblk = {
                "ln1_g": blk["ln1_g"].reshape(1, dim), "ln1_b": blk["ln1_b"].reshape(1, dim),
                "ln2_g": blk["ln2_g"].reshape(1, dim), "ln2_b": blk["ln2_b"].reshape(1, dim),
                # depthwise conv weights (torch (C,1,kh,kw)) -> (3, KK, C), f32 (VPU path)
                "dw_w": jnp.stack([blk[f"dw_{n}_w"].reshape(dim, ks * ks).T
                                   for n in ("q", "k", "v")]).astype(jnp.float32),
                "bn_scale": jnp.stack(scales).astype(jnp.float32),   # (3, C)
                "bn_shift": jnp.stack(shifts).astype(jnp.float32),   # (3, C)
                # attention scale folded into the q projection (constant folding)
                "w_qkv": jnp.stack([blk["proj_q_w"] * scale, blk["proj_k_w"],
                                    blk["proj_v_w"]]).astype(bf16),  # (3, C, C)
                "b_qkv": jnp.stack([blk["proj_q_b"] * scale, blk["proj_k_b"],
                                    blk["proj_v_b"]]),               # (3, C)
                "proj_w": blk["proj_w"].astype(bf16),
                "proj_b": blk["proj_b"].reshape(1, dim),
                "fc1_w": blk["fc1_w"].astype(bf16),
                "fc1_b": blk["fc1_b"].reshape(1, -1),
                "fc2_w": blk["fc2_w"].astype(bf16),
                "fc2_b": blk["fc2_b"].reshape(1, dim),
            }
            fsp["blocks"].append(fblk)
        fp["stages"].append(fsp)
        c_in = dim
    d = cfg["embedding_dim"][-1]
    fp["norm_g"] = params["norm_g"].reshape(1, d)
    fp["norm_b"] = params["norm_b"].reshape(1, d)
    fp["head_w"] = params["head_w"].astype(bf16)
    fp["head_b"] = params["head_b"].reshape(1, -1)
    return fp


if __name__ == "__main__":
    cfg = make_config()
    root = jax.random.PRNGKey(0)
    pkey, xkey = jax.random.split(root)
    params = init_params(pkey, cfg)
    fparams = prepare_params(params, cfg)
    x = jax.random.normal(
        xkey, (2, cfg["in_channels"], cfg["img_size"], cfg["img_size"]), jnp.float32
    )

    fwd = jax.jit(lambda p, xx: convvt_forward(p, xx, cfg))
    out = jax.block_until_ready(fwd(fparams, x))

    assert out.shape == (2, cfg["n_classes"]), out.shape
    assert bool(jnp.all(jnp.isfinite(out)))
    print("KERNEL_OK")
</pallas_src>

<mosaic_0001>
module attributes {stable_mosaic.version = 11 : i64} {
  func.func @_pe_kernel(%arg0: i32, %arg1: memref<1x64x147xf32, #tpu.memory_space<vmem>>, %arg2: memref<147x16xbf16, #tpu.memory_space<vmem>>, %arg3: memref<1x16xf32, #tpu.memory_space<vmem>>, %arg4: memref<1x16xf32, #tpu.memory_space<vmem>>, %arg5: memref<1x16xf32, #tpu.memory_space<vmem>>, %arg6: memref<1x64x16xf32, #tpu.memory_space<vmem>>) attributes {dimension_semantics = [#tpu.dimension_semantics<parallel>], iteration_bounds = array<i64: 2>, scalar_prefetch = 0 : i64, scratch_operands = 0 : i64, tpu.core_type = #tpu.core_type<tc>, window_params = [{transform_indices = @transform_0, window_bounds = array<i64: 1, 64, 147>}, {pipeline_mode = #tpu.pipeline_mode<synchronous>, transform_indices = @transform_1, window_bounds = array<i64: 147, 16>}, {pipeline_mode = #tpu.pipeline_mode<synchronous>, transform_indices = @transform_2, window_bounds = array<i64: 1, 16>}, {pipeline_mode = #tpu.pipeline_mode<synchronous>, transform_indices = @transform_3, window_bounds = array<i64: 1, 16>}, {pipeline_mode = #tpu.pipeline_mode<synchronous>, transform_indices = @transform_4, window_bounds = array<i64: 1, 16>}, {transform_indices = @transform_5, window_bounds = array<i64: 1, 64, 16>}]} {
    %c0 = arith.constant 0 : index
    %c0_0 = arith.constant 0 : index
    %c0_1 = arith.constant 0 : index
    %0 = vector.load %arg1[%c0, %c0_0, %c0_1] : memref<1x64x147xf32, #tpu.memory_space<vmem>>, vector<1x64x147xf32>
    %1 = vector.shape_cast %0 : vector<1x64x147xf32> to vector<64x147xf32>
    %2 = arith.truncf %1 : vector<64x147xf32> to vector<64x147xbf16>
    %c0_2 = arith.constant 0 : index
    %c0_3 = arith.constant 0 : index
    %3 = vector.load %arg2[%c0_2, %c0_3] : memref<147x16xbf16, #tpu.memory_space<vmem>>, vector<147x16xbf16>
    %cst = arith.constant dense<0.000000e+00> : vector<64x16xf32>
    %4 = tpu.matmul %2, %3, %cst {dimension_numbers = #tpu.dot_dimension_numbers<[1], [0], [0], [1], [0, 0, 1, 1], [], []>} : vector<64x147xbf16>, vector<147x16xbf16>, vector<64x16xf32> -> vector<64x16xf32>
    %c0_4 = arith.constant 0 : index
    %c0_5 = arith.constant 0 : index
    %5 = vector.load %arg3[%c0_4, %c0_5] : memref<1x16xf32, #tpu.memory_space<vmem>>, vector<1x16xf32>
    %6 = vector.broadcast %5 : vector<1x16xf32> to vector<64x16xf32>
    %7 = arith.addf %4, %6 : vector<64x16xf32>
    %c0_6 = arith.constant 0 : index
    %c0_7 = arith.constant 0 : index
    %8 = vector.load %arg4[%c0_6, %c0_7] : memref<1x16xf32, #tpu.memory_space<vmem>>, vector<1x16xf32>
    %c0_8 = arith.constant 0 : index
    %c0_9 = arith.constant 0 : index
    %9 = vector.load %arg5[%c0_8, %c0_9] : memref<1x16xf32, #tpu.memory_space<vmem>>, vector<1x16xf32>
    %cst_10 = arith.constant dense<0.000000e+00> : vector<64xf32>
    %10 = vector.multi_reduction <add>, %7, %cst_10 [1] : vector<64x16xf32> to vector<64xf32>
    %11 = vector.shape_cast %10 : vector<64xf32> to vector<64x1xf32>
    %cst_11 = arith.constant 1.600000e+01 : f32
    %12 = vector.broadcast %cst_11 : f32 to vector<64x1xf32>
    %13 = arith.divf %11, %12 : vector<64x1xf32>
    %14 = vector.broadcast %13 : vector<64x1xf32> to vector<64x16xf32>
    %15 = arith.subf %7, %14 : vector<64x16xf32>
    %16 = arith.mulf %15, %15 : vector<64x16xf32>
    %cst_12 = arith.constant dense<0.000000e+00> : vector<64xf32>
    %17 = vector.multi_reduction <add>, %16, %cst_12 [1] : vector<64x16xf32> to vector<64xf32>
    %18 = vector.shape_cast %17 : vector<64xf32> to vector<64x1xf32>
    %cst_13 = arith.constant 1.600000e+01 : f32
    %19 = vector.broadcast %cst_13 : f32 to vector<64x1xf32>
    %20 = arith.divf %18, %19 : vector<64x1xf32>
    %21 = vector.broadcast %13 : vector<64x1xf32> to vector<64x16xf32>
    %22 = arith.subf %7, %21 : vector<64x16xf32>
    %cst_14 = arith.constant 9.99999974E-6 : f32
    %23 = vector.broadcast %cst_14 : f32 to vector<64x1xf32>
    %24 = arith.addf %20, %23 : vector<64x1xf32>
    %25 = math.rsqrt %24 : vector<64x1xf32>
    %26 = vector.broadcast %25 : vector<64x1xf32> to vector<64x16xf32>
    %27 = arith.mulf %22, %26 : vector<64x16xf32>
    %28 = vector.broadcast %8 : vector<1x16xf32> to vector<64x16xf32>
    %29 = arith.mulf %27, %28 : vector<64x16xf32>
    %30 = vector.broadcast %9 : vector<1x16xf32> to vector<64x16xf32>
    %31 = arith.addf %29, %30 : vector<64x16xf32>
    %c0_15 = arith.constant 0 : index
    %c0_16 = arith.constant 0 : index
    %c0_17 = arith.constant 0 : index
    %32 = vector.load %arg6[%c0_15, %c0_16, %c0_17] : memref<1x64x16xf32, #tpu.memory_space<vmem>>, vector<1x64x16xf32>
    %33 = vector.shape_cast %32 : vector<1x64x16xf32> to vector<64x16xf32>
    %34 = vector.shape_cast %31 : vector<64x16xf32> to vector<1x64x16xf32>
    tpu.vector_store %arg6[%c0_15, %c0_16, %c0_17], %34 {strides = array<i32>} : memref<1x64x16xf32, #tpu.memory_space<vmem>>, vector<1x64x16xf32>,
    return
  }
  func.func @transform_0(%arg0: i32) -> (i32, i32, i32) {
    %c0_i32 = arith.constant 0 : i32
    %c0_i32_0 = arith.constant 0 : i32
    %c0_i32_1 = arith.constant 0 : i32
    return %arg0, %c0_i32, %c0_i32_0 : i32, i32, i32
  }
  func.func @transform_1(%arg0: i32) -> (i32, i32) {
    %c0_i32 = arith.constant 0 : i32
    %c0_i32_0 = arith.constant 0 : i32
    %c0_i32_1 = arith.constant 0 : i32
    return %c0_i32, %c0_i32_0 : i32, i32
  }
  func.func @transform_2(%arg0: i32) -> (i32, i32) {
    %c0_i32 = arith.constant 0 : i32
    %c0_i32_0 = arith.constant 0 : i32
    %c0_i32_1 = arith.constant 0 : i32
    return %c0_i32, %c0_i32_0 : i32, i32
  }
  func.func @transform_3(%arg0: i32) -> (i32, i32) {
    %c0_i32 = arith.constant 0 : i32
    %c0_i32_0 = arith.constant 0 : i32
    %c0_i32_1 = arith.constant 0 : i32
    return %c0_i32, %c0_i32_0 : i32, i32
  }
  func.func @transform_4(%arg0: i32) -> (i32, i32) {
    %c0_i32 = arith.constant 0 : i32
    %c0_i32_0 = arith.constant 0 : i32
    %c0_i32_1 = arith.constant 0 : i32
    return %c0_i32, %c0_i32_0 : i32, i32
  }
  func.func @transform_5(%arg0: i32) -> (i32, i32, i32) {
    %c0_i32 = arith.constant 0 : i32
    %c0_i32_0 = arith.constant 0 : i32
    %c0_i32_1 = arith.constant 0 : i32
    return %arg0, %c0_i32, %c0_i32_0 : i32, i32, i32
  }
}

module attributes {stable_mosaic.version = 11 : i64} {
  func.func @_block_kernel(%arg0: i32, %arg1: memref<1x64x16xf32, #tpu.memory_space<vmem>>, %arg2: memref<1x16xf32, #tpu.memory_space<vmem>>, %arg3: memref<1x16xf32, #tpu.memory_space<vmem>>, %arg4: memref<3x9x16xf32, #tpu.memory_space<vmem>>, %arg5: memref<3x16xf32, #tpu.memory_space<vmem>>, %arg6: memref<3x16xf32, #tpu.memory_space<vmem>>, %arg7: memref<16x64xbf16, #tpu.memory_space<vmem>>, %arg8: memref<3x16x16xbf16, #tpu.memory_space<vmem>>, %arg9: memref<3x16xf32, #tpu.memory_space<vmem>>, %arg10: memref<16x16xbf16, #tpu.memory_space<vmem>>, %arg11: memref<1x16xf32, #tpu.memory_space<vmem>>, %arg12: memref<1x16xf32, #tpu.memory_space<vmem>>, %arg13: memref<1x16xf32, #tpu.memory_space<vmem>>, %arg14: memref<16x64xbf16, #tpu.memory_space<vmem>>, %arg15: memref<1x64xf32, #tpu.memory_space<vmem>>, %arg16: memref<64x16xbf16, #tpu.memory_space<vmem>>, %arg17: memref<1x16xf32, #tpu.memory_space<vmem>>, %arg18: memref<1x64x16xf32, #tpu.memory_space<vmem>>, %arg19: memref<10x10x16xf32, #tpu.memory_space<vmem>>, %arg20: memref<64x16xf32, #tpu.memory_space<vmem>>, %arg21: memref<16x16xf32, #tpu.memory_space<vmem>>, %arg22: memref<16x16xf32, #tpu.memory_space<vmem>>, %arg23: memref<64x16xf32, #tpu.memory_space<vmem>>, %arg24: memref<64x16xf32, #tpu.memory_space<vmem>>) attributes {dimension_semantics = [#tpu.dimension_semantics<parallel>], iteration_bounds = array<i64: 2>, scalar_prefetch = 0 : i64, scratch_operands = 6 : i64, tpu.core_type = #tpu.core_type<tc>, window_params = [{transform_indices = @transform_0, window_bounds = array<i64: 1, 64, 16>}, {pipeline_mode = #tpu.pipeline_mode<synchronous>, transform_indices = @transform_1, window_bounds = array<i64: 1, 16>}, {pipeline_mode = #tpu.pipeline_mode<synchronous>, transform_indices = @transform_2, window_bounds = array<i64: 1, 16>}, {pipeline_mode = #tpu.pipeline_mode<synchronous>, transform_indices = @transform_3, window_bounds = array<i64: 3, 9, 16>}, {pipeline_mode = #tpu.pipeline_mode<synchronous>, transform_indices = @transform_4, window_bounds = array<i64: 3, 16>}, {pipeline_mode = #tpu.pipeline_mode<synchronous>, transform_indices = @transform_5, window_bounds = array<i64: 3, 16>}, {pipeline_mode = #tpu.pipeline_mode<synchronous>, transform_indices = @transform_6, window_bounds = array<i64: 16, 64>}, {pipeline_mode = #tpu.pipeline_mode<synchronous>, transform_indices = @transform_7, window_bounds = array<i64: 3, 16, 16>}, {pipeline_mode = #tpu.pipeline_mode<synchronous>, transform_indices = @transform_8, window_bounds = array<i64: 3, 16>}, {pipeline_mode = #tpu.pipeline_mode<synchronous>, transform_indices = @transform_9, window_bounds = array<i64: 16, 16>}, {pipeline_mode = #tpu.pipeline_mode<synchronous>, transform_indices = @transform_10, window_bounds = array<i64: 1, 16>}, {pipeline_mode = #tpu.pipeline_mode<synchronous>, transform_indices = @transform_11, window_bounds = array<i64: 1, 16>}, {pipeline_mode = #tpu.pipeline_mode<synchronous>, transform_indices = @transform_12, window_bounds = array<i64: 1, 16>}, {pipeline_mode = #tpu.pipeline_mode<synchronous>, transform_indices = @transform_13, window_bounds = array<i64: 16, 64>}, {pipeline_mode = #tpu.pipeline_mode<synchronous>, transform_indices = @transform_14, window_bounds = array<i64: 1, 64>}, {pipeline_mode = #tpu.pipeline_mode<synchronous>, transform_indices = @transform_15, window_bounds = array<i64: 64, 16>}, {pipeline_mode = #tpu.pipeline_mode<synchronous>, transform_indices = @transform_16, window_bounds = array<i64: 1, 16>}, {transform_indices = @transform_17, window_bounds = array<i64: 1, 64, 16>}]} {
    %c0 = arith.constant 0 : index
    %c0_0 = arith.constant 0 : index
    %c0_1 = arith.constant 0 : index
    %0 = vector.load %arg1[%c0, %c0_0, %c0_1] : memref<1x64x16xf32, #tpu.memory_space<vmem>>, vector<1x64x16xf32>
    %1 = vector.shape_cast %0 : vector<1x64x16xf32> to vector<64x16xf32>
    %c0_2 = arith.constant 0 : index
    %c0_3 = arith.constant 0 : index
    %2 = vector.load %arg2[%c0_2, %c0_3] : memref<1x16xf32, #tpu.memory_space<vmem>>, vector<1x16xf32>
    %c0_4 = arith.constant 0 : index
    %c0_5 = arith.constant 0 : index
    %3 = vector.load %arg3[%c0_4, %c0_5] : memref<1x16xf32, #tpu.memory_space<vmem>>, vector<1x16xf32>
    %cst = arith.constant dense<0.000000e+00> : vector<64xf32>
    %4 = vector.multi_reduction <add>, %1, %cst [1] : vector<64x16xf32> to vector<64xf32>
    %5 = vector.shape_cast %4 : vector<64xf32> to vector<64x1xf32>
    %cst_6 = arith.constant 1.600000e+01 : f32
    %6 = vector.broadcast %cst_6 : f32 to vector<64x1xf32>
    %7 = arith.divf %5, %6 : vector<64x1xf32>
    %8 = vector.broadcast %7 : vector<64x1xf32> to vector<64x16xf32>
    %9 = arith.subf %1, %8 : vector<64x16xf32>
    %10 = arith.mulf %9, %9 : vector<64x16xf32>
    %cst_7 = arith.constant dense<0.000000e+00> : vector<64xf32>
    %11 = vector.multi_reduction <add>, %10, %cst_7 [1] : vector<64x16xf32> to vector<64xf32>
    %12 = vector.shape_cast %11 : vector<64xf32> to vector<64x1xf32>
    %cst_8 = arith.constant 1.600000e+01 : f32
    %13 = vector.broadcast %cst_8 : f32 to vector<64x1xf32>
    %14 = arith.divf %12, %13 : vector<64x1xf32>
    %15 = vector.broadcast %7 : vector<64x1xf32> to vector<64x16xf32>
    %16 = arith.subf %1, %15 : vector<64x16xf32>
    %cst_9 = arith.constant 9.99999974E-6 : f32
    %17 = vector.broadcast %cst_9 : f32 to vector<64x1xf32>
    %18 = arith.addf %14, %17 : vector<64x1xf32>
    %19 = math.rsqrt %18 : vector<64x1xf32>
    %20 = vector.broadcast %19 : vector<64x1xf32> to vector<64x16xf32>
    %21 = arith.mulf %16, %20 : vector<64x16xf32>
    %22 = vector.broadcast %2 : vector<1x16xf32> to vector<64x16xf32>
    %23 = arith.mulf %21, %22 : vector<64x16xf32>
    %24 = vector.broadcast %3 : vector<1x16xf32> to vector<64x16xf32>
    %25 = arith.addf %23, %24 : vector<64x16xf32>
    %cst_10 = arith.constant 0.000000e+00 : f32
    %26 = vector.broadcast %cst_10 : f32 to vector<10x10x16xf32>
    %c0_11 = arith.constant 0 : index
    %c0_12 = arith.constant 0 : index
    %c0_13 = arith.constant 0 : index
    %27 = vector.load %arg19[%c0_11, %c0_12, %c0_13] : memref<10x10x16xf32, #tpu.memory_space<vmem>>, vector<10x10x16xf32>
    tpu.vector_store %arg19[%c0_11, %c0_12, %c0_13], %26 {strides = array<i32>} : memref<10x10x16xf32, #tpu.memory_space<vmem>>, vector<10x10x16xf32>,
    %28 = vector.extract_strided_slice %25 {offsets = [0, 0], sizes = [8, 16], strides = [1, 1]} : vector<64x16xf32> to vector<8x16xf32>
    %c1 = arith.constant 1 : index
    %c1_14 = arith.constant 1 : index
    %c0_15 = arith.constant 0 : index
    %29 = vector.load %arg19[%c1, %c1_14, %c0_15] : memref<10x10x16xf32, #tpu.memory_space<vmem>>, vector<1x8x16xf32>
    %30 = vector.shape_cast %29 : vector<1x8x16xf32> to vector<8x16xf32>
    %31 = vector.shape_cast %28 : vector<8x16xf32> to vector<1x8x16xf32>
    tpu.vector_store %arg19[%c1, %c1_14, %c0_15], %31 {strides = array<i32>} : memref<10x10x16xf32, #tpu.memory_space<vmem>>, vector<1x8x16xf32>,
    %32 = vector.extract_strided_slice %25 {offsets = [8, 0], sizes = [8, 16], strides = [1, 1]} : vector<64x16xf32> to vector<8x16xf32>
    %c2 = arith.constant 2 : index
    %c1_16 = arith.constant 1 : index
    %c0_17 = arith.constant 0 : index
    %33 = vector.load %arg19[%c2, %c1_16, %c0_17] : memref<10x10x16xf32, #tpu.memory_space<vmem>>, vector<1x8x16xf32>
    %34 = vector.shape_cast %33 : vector<1x8x16xf32> to vector<8x16xf32>
    %35 = vector.shape_cast %32 : vector<8x16xf32> to vector<1x8x16xf32>
    tpu.vector_store %arg19[%c2, %c1_16, %c0_17], %35 {strides = array<i32>} : memref<10x10x16xf32, #tpu.memory_space<vmem>>, vector<1x8x16xf32>,
    %36 = vector.extract_strided_slice %25 {offsets = [16, 0], sizes = [8, 16], strides = [1, 1]} : vector<64x16xf32> to vector<8x16xf32>
    %c3 = arith.constant 3 : index
    %c1_18 = arith.constant 1 : index
    %c0_19 = arith.constant 0 : index
    %37 = vector.load %arg19[%c3, %c1_18, %c0_19] : memref<10x10x16xf32, #tpu.memory_space<vmem>>, vector<1x8x16xf32>
    %38 = vector.shape_cast %37 : vector<1x8x16xf32> to vector<8x16xf32>
    %39 = vector.shape_cast %36 : vector<8x16xf32> to vector<1x8x16xf32>
    tpu.vector_store %arg19[%c3, %c1_18, %c0_19], %39 {strides = array<i32>} : memref<10x10x16xf32, #tpu.memory_space<vmem>>, vector<1x8x16xf32>,
    %40 = vector.extract_strided_slice %25 {offsets = [24, 0], sizes = [8, 16], strides = [1, 1]} : vector<64x16xf32> to vector<8x16xf32>
    %c4 = arith.constant 4 : index
    %c1_20 = arith.constant 1 : index
    %c0_21 = arith.constant 0 : index
    %41 = vector.load %arg19[%c4, %c1_20, %c0_21] : memref<10x10x16xf32, #tpu.memory_space<vmem>>, vector<1x8x16xf32>
    %42 = vector.shape_cast %41 : vector<1x8x16xf32> to vector<8x16xf32>
    %43 = vector.shape_cast %40 : vector<8x16xf32> to vector<1x8x16xf32>
    tpu.vector_store %arg19[%c4, %c1_20, %c0_21], %43 {strides = array<i32>} : memref<10x10x16xf32, #tpu.memory_space<vmem>>, vector<1x8x16xf32>,
    %44 = vector.extract_strided_slice %25 {offsets = [32, 0], sizes = [8, 16], strides = [1, 1]} : vector<64x16xf32> to vector<8x16xf32>
    %c5 = arith.constant 5 : index
    %c1_22 = arith.constant 1 : index
    %c0_23 = arith.constant 0 : index
    %45 = vector.load %arg19[%c5, %c1_22, %c0_23] : memref<10x10x16xf32, #tpu.memory_space<vmem>>, vector<1x8x16xf32>
    %46 = vector.shape_cast %45 : vector<1x8x16xf32> to vector<8x16xf32>
    %47 = vector.shape_cast %44 : vector<8x16xf32> to vector<1x8x16xf32>
    tpu.vector_store %arg19[%c5, %c1_22, %c0_23], %47 {strides = array<i32>} : memref<10x10x16xf32, #tpu.memory_space<vmem>>, vector<1x8x16xf32>,
    %48 = vector.extract_strided_slice %25 {offsets = [40, 0], sizes = [8, 16], strides = [1, 1]} : vector<64x16xf32> to vector<8x16xf32>
    %c6 = arith.constant 6 : index
    %c1_24 = arith.constant 1 : index
    %c0_25 = arith.constant 0 : index
    %49 = vector.load %arg19[%c6, %c1_24, %c0_25] : memref<10x10x16xf32, #tpu.memory_space<vmem>>, vector<1x8x16xf32>
    %50 = vector.shape_cast %49 : vector<1x8x16xf32> to vector<8x16xf32>
    %51 = vector.shape_cast %48 : vector<8x16xf32> to vector<1x8x16xf32>
    tpu.vector_store %arg19[%c6, %c1_24, %c0_25], %51 {strides = array<i32>} : memref<10x10x16xf32, #tpu.memory_space<vmem>>, vector<1x8x16xf32>,
    %52 = vector.extract_strided_slice %25 {offsets = [48, 0], sizes = [8, 16], strides = [1, 1]} : vector<64x16xf32> to vector<8x16xf32>
    %c7 = arith.constant 7 : index
    %c1_26 = arith.constant 1 : index
    %c0_27 = arith.constant 0 : index
    %53 = vector.load %arg19[%c7, %c1_26, %c0_27] : memref<10x10x16xf32, #tpu.memory_space<vmem>>, vector<1x8x16xf32>
    %54 = vector.shape_cast %53 : vector<1x8x16xf32> to vector<8x16xf32>
    %55 = vector.shape_cast %52 : vector<8x16xf32> to vector<1x8x16xf32>
    tpu.vector_store %arg19[%c7, %c1_26, %c0_27], %55 {strides = array<i32>} : memref<10x10x16xf32, #tpu.memory_space<vmem>>, vector<1x8x16xf32>,
    %56 = vector.extract_strided_slice %25 {offsets = [56, 0], sizes = [8, 16], strides = [1, 1]} : vector<64x16xf32> to vector<8x16xf32>
    %c8 = arith.constant 8 : index
    %c1_28 = arith.constant 1 : index
    %c0_29 = arith.constant 0 : index
    %57 = vector.load %arg19[%c8, %c1_28, %c0_29] : memref<10x10x16xf32, #tpu.memory_space<vmem>>, vector<1x8x16xf32>
    %58 = vector.shape_cast %57 : vector<1x8x16xf32> to vector<8x16xf32>
    %59 = vector.shape_cast %56 : vector<8x16xf32> to vector<1x8x16xf32>
    tpu.vector_store %arg19[%c8, %c1_28, %c0_29], %59 {strides = array<i32>} : memref<10x10x16xf32, #tpu.memory_space<vmem>>, vector<1x8x16xf32>,
    %c0_30 = arith.constant 0 : index
    %c0_31 = arith.constant 0 : index
    %c0_32 = arith.constant 0 : index
    %60 = vector.load %arg19[%c0_30, %c0_31, %c0_32] : memref<10x10x16xf32, #tpu.memory_space<vmem>>, vector<8x8x16xf32>
    %c0_33 = arith.constant 0 : index
    %c0_34 = arith.constant 0 : index
    %c0_35 = arith.constant 0 : index
    %61 = vector.load %arg4[%c0_33, %c0_34, %c0_35] : memref<3x9x16xf32, #tpu.memory_space<vmem>>, vector<1x1x16xf32>
    %62 = vector.shape_cast %61 : vector<1x1x16xf32> to vector<1x16xf32>
    %63 = vector.shape_cast %62 : vector<1x16xf32> to vector<1x1x16xf32>
    %c1_36 = arith.constant 1 : index
    %c0_37 = arith.constant 0 : index
    %c0_38 = arith.constant 0 : index
    %64 = vector.load %arg4[%c1_36, %c0_37, %c0_38] : memref<3x9x16xf32, #tpu.memory_space<vmem>>, vector<1x1x16xf32>
    %65 = vector.shape_cast %64 : vector<1x1x16xf32> to vector<1x16xf32>
    %66 = vector.shape_cast %65 : vector<1x16xf32> to vector<1x1x16xf32>
    %c2_39 = arith.constant 2 : index
    %c0_40 = arith.constant 0 : index
    %c0_41 = arith.constant 0 : index
    %67 = vector.load %arg4[%c2_39, %c0_40, %c0_41] : memref<3x9x16xf32, #tpu.memory_space<vmem>>, vector<1x1x16xf32>
    %68 = vector.shape_cast %67 : vector<1x1x16xf32> to vector<1x16xf32>
    %69 = vector.shape_cast %68 : vector<1x16xf32> to vector<1x1x16xf32>
    %70 = vector.broadcast %63 : vector<1x1x16xf32> to vector<8x8x16xf32>
    %71 = arith.mulf %60, %70 : vector<8x8x16xf32>
    %72 = vector.broadcast %66 : vector<1x1x16xf32> to vector<8x8x16xf32>
    %73 = arith.mulf %60, %72 : vector<8x8x16xf32>
    %74 = vector.broadcast %69 : vector<1x1x16xf32> to vector<8x8x16xf32>
    %75 = arith.mulf %60, %74 : vector<8x8x16xf32>
    %c0_42 = arith.constant 0 : index
    %c1_43 = arith.constant 1 : index
    %c0_44 = arith.constant 0 : index
    %76 = vector.load %arg19[%c0_42, %c1_43, %c0_44] : memref<10x10x16xf32, #tpu.memory_space<vmem>>, vector<8x8x16xf32>
    %c0_45 = arith.constant 0 : index
    %c1_46 = arith.constant 1 : index
    %c0_47 = arith.constant 0 : index
    %77 = vector.load %arg4[%c0_45, %c1_46, %c0_47] : memref<3x9x16xf32, #tpu.memory_space<vmem>>, vector<1x1x16xf32>
    %78 = vector.shape_cast %77 : vector<1x1x16xf32> to vector<1x16xf32>
    %79 = vector.shape_cast %78 : vector<1x16xf32> to vector<1x1x16xf32>
    %c1_48 = arith.constant 1 : index
    %c1_49 = arith.constant 1 : index
    %c0_50 = arith.constant 0 : index
    %80 = vector.load %arg4[%c1_48, %c1_49, %c0_50] : memref<3x9x16xf32, #tpu.memory_space<vmem>>, vector<1x1x16xf32>
    %81 = vector.shape_cast %80 : vector<1x1x16xf32> to vector<1x16xf32>
    %82 = vector.shape_cast %81 : vector<1x16xf32> to vector<1x1x16xf32>
    %c2_51 = arith.constant 2 : index
    %c1_52 = arith.constant 1 : index
    %c0_53 = arith.constant 0 : index
    %83 = vector.load %arg4[%c2_51, %c1_52, %c0_53] : memref<3x9x16xf32, #tpu.memory_space<vmem>>, vector<1x1x16xf32>
    %84 = vector.shape_cast %83 : vector<1x1x16xf32> to vector<1x16xf32>
    %85 = vector.shape_cast %84 : vector<1x16xf32> to vector<1x1x16xf32>
    %86 = vector.broadcast %79 : vector<1x1x16xf32> to vector<8x8x16xf32>
    %87 = arith.mulf %76, %86 : vector<8x8x16xf32>
    %88 = arith.addf %71, %87 : vector<8x8x16xf32>
    %89 = vector.broadcast %82 : vector<1x1x16xf32> to vector<8x8x16xf32>
    %90 = arith.mulf %76, %89 : vector<8x8x16xf32>
    %91 = arith.addf %73, %90 : vector<8x8x16xf32>
    %92 = vector.broadcast %85 : vector<1x1x16xf32> to vector<8x8x16xf32>
    %93 = arith.mulf %76, %92 : vector<8x8x16xf32>
    %94 = arith.addf %75, %93 : vector<8x8x16xf32>
    %c0_54 = arith.constant 0 : index
    %c2_55 = arith.constant 2 : index
    %c0_56 = arith.constant 0 : index
    %95 = vector.load %arg19[%c0_54, %c2_55, %c0_56] : memref<10x10x16xf32, #tpu.memory_space<vmem>>, vector<8x8x16xf32>
    %c0_57 = arith.constant 0 : index
    %c2_58 = arith.constant 2 : index
    %c0_59 = arith.constant 0 : index
    %96 = vector.load %arg4[%c0_57, %c2_58, %c0_59] : memref<3x9x16xf32, #tpu.memory_space<vmem>>, vector<1x1x16xf32>
    %97 = vector.shape_cast %96 : vector<1x1x16xf32> to vector<1x16xf32>
    %98 = vector.shape_cast %97 : vector<1x16xf32> to vector<1x1x16xf32>
    %c1_60 = arith.constant 1 : index
    %c2_61 = arith.constant 2 : index
    %c0_62 = arith.constant 0 : index
    %99 = vector.load %arg4[%c1_60, %c2_61, %c0_62] : memref<3x9x16xf32, #tpu.memory_space<vmem>>, vector<1x1x16xf32>
    %100 = vector.shape_cast %99 : vector<1x1x16xf32> to vector<1x16xf32>
    %101 = vector.shape_cast %100 : vector<1x16xf32> to vector<1x1x16xf32>
    %c2_63 = arith.constant 2 : index
    %c2_64 = arith.constant 2 : index
    %c0_65 = arith.constant 0 : index
    %102 = vector.load %arg4[%c2_63, %c2_64, %c0_65] : memref<3x9x16xf32, #tpu.memory_space<vmem>>, vector<1x1x16xf32>
    %103 = vector.shape_cast %102 : vector<1x1x16xf32> to vector<1x16xf32>
    %104 = vector.shape_cast %103 : vector<1x16xf32> to vector<1x1x16xf32>
    %105 = vector.broadcast %98 : vector<1x1x16xf32> to vector<8x8x16xf32>
    %106 = arith.mulf %95, %105 : vector<8x8x16xf32>
    %107 = arith.addf %88, %106 : vector<8x8x16xf32>
    %108 = vector.broadcast %101 : vector<1x1x16xf32> to vector<8x8x16xf32>
    %109 = arith.mulf %95, %108 : vector<8x8x16xf32>
    %110 = arith.addf %91, %109 : vector<8x8x16xf32>
    %111 = vector.broadcast %104 : vector<1x1x16xf32> to vector<8x8x16xf32>
    %112 = arith.mulf %95, %111 : vector<8x8x16xf32>
    %113 = arith.addf %94, %112 : vector<8x8x16xf32>
    %c1_66 = arith.constant 1 : index
    %c0_67 = arith.constant 0 : index
    %c0_68 = arith.constant 0 : index
    %114 = vector.load %arg19[%c1_66, %c0_67, %c0_68] : memref<10x10x16xf32, #tpu.memory_space<vmem>>, vector<8x8x16xf32>
    %c0_69 = arith.constant 0 : index
    %c3_70 = arith.constant 3 : index
    %c0_71 = arith.constant 0 : index
    %115 = vector.load %arg4[%c0_69, %c3_70, %c0_71] : memref<3x9x16xf32, #tpu.memory_space<vmem>>, vector<1x1x16xf32>
    %116 = vector.shape_cast %115 : vector<1x1x16xf32> to vector<1x16xf32>
    %117 = vector.shape_cast %116 : vector<1x16xf32> to vector<1x1x16xf32>
    %c1_72 = arith.constant 1 : index
    %c3_73 = arith.constant 3 : index
    %c0_74 = arith.constant 0 : index
    %118 = vector.load %arg4[%c1_72, %c3_73, %c0_74] : memref<3x9x16xf32, #tpu.memory_space<vmem>>, vector<1x1x16xf32>
    %119 = vector.shape_cast %118 : vector<1x1x16xf32> to vector<1x16xf32>
    %120 = vector.shape_cast %119 : vector<1x16xf32> to vector<1x1x16xf32>
    %c2_75 = arith.constant 2 : index
    %c3_76 = arith.constant 3 : index
    %c0_77 = arith.constant 0 : index
    %121 = vector.load %arg4[%c2_75, %c3_76, %c0_77] : memref<3x9x16xf32, #tpu.memory_space<vmem>>, vector<1x1x16xf32>
    %122 = vector.shape_cast %121 : vector<1x1x16xf32> to vector<1x16xf32>
    %123 = vector.shape_cast %122 : vector<1x16xf32> to vector<1x1x16xf32>
    %124 = vector.broadcast %117 : vector<1x1x16xf32> to vector<8x8x16xf32>
    %125 = arith.mulf %114, %124 : vector<8x8x16xf32>
    %126 = arith.addf %107, %125 : vector<8x8x16xf32>
    %127 = vector.broadcast %120 : vector<1x1x16xf32> to vector<8x8x16xf32>
    %128 = arith.mulf %114, %127 : vector<8x8x16xf32>
    %129 = arith.addf %110, %128 : vector<8x8x16xf32>
    %130 = vector.broadcast %123 : vector<1x1x16xf32> to vector<8x8x16xf32>
    %131 = arith.mulf %114, %130 : vector<8x8x16xf32>
    %132 = arith.addf %113, %131 : vector<8x8x16xf32>
    %c1_78 = arith.constant 1 : index
    %c1_79 = arith.constant 1 : index
    %c0_80 = arith.constant 0 : index
    %133 = vector.load %arg19[%c1_78, %c1_79, %c0_80] : memref<10x10x16xf32, #tpu.memory_space<vmem>>, vector<8x8x16xf32>
    %c0_81 = arith.constant 0 : index
    %c4_82 = arith.constant 4 : index
    %c0_83 = arith.constant 0 : index
    %134 = vector.load %arg4[%c0_81, %c4_82, %c0_83] : memref<3x9x16xf32, #tpu.memory_space<vmem>>, vector<1x1x16xf32>
    %135 = vector.shape_cast %134 : vector<1x1x16xf32> to vector<1x16xf32>
    %136 = vector.shape_cast %135 : vector<1x16xf32> to vector<1x1x16xf32>
    %c1_84 = arith.constant 1 : index
    %c4_85 = arith.constant 4 : index
    %c0_86 = arith.constant 0 : index
    %137 = vector.load %arg4[%c1_84, %c4_85, %c0_86] : memref<3x9x16xf32, #tpu.memory_space<vmem>>, vector<1x1x16xf32>
    %138 = vector.shape_cast %137 : vector<1x1x16xf32> to vector<1x16xf32>
    %139 = vector.shape_cast %138 : vector<1x16xf32> to vector<1x1x16xf32>
    %c2_87 = arith.constant 2 : index
    %c4_88 = arith.constant 4 : index
    %c0_89 = arith.constant 0 : index
    %140 = vector.load %arg4[%c2_87, %c4_88, %c0_89] : memref<3x9x16xf32, #tpu.memory_space<vmem>>, vector<1x1x16xf32>
    %141 = vector.shape_cast %140 : vector<1x1x16xf32> to vector<1x16xf32>
    %142 = vector.shape_cast %141 : vector<1x16xf32> to vector<1x1x16xf32>
    %143 = vector.broadcast %136 : vector<1x1x16xf32> to vector<8x8x16xf32>
    %144 = arith.mulf %133, %143 : vector<8x8x16xf32>
    %145 = arith.addf %126, %144 : vector<8x8x16xf32>
    %146 = vector.broadcast %139 : vector<1x1x16xf32> to vector<8x8x16xf32>
    %147 = arith.mulf %133, %146 : vector<8x8x16xf32>
    %148 = arith.addf %129, %147 : vector<8x8x16xf32>
    %149 = vector.broadcast %142 : vector<1x1x16xf32> to vector<8x8x16xf32>
    %150 = arith.mulf %133, %149 : vector<8x8x16xf32>
    %151 = arith.addf %132, %150 : vector<8x8x16xf32>
    %c1_90 = arith.constant 1 : index
    %c2_91 = arith.constant 2 : index
    %c0_92 = arith.constant 0 : index
    %152 = vector.load %arg19[%c1_90, %c2_91, %c0_92] : memref<10x10x16xf32, #tpu.memory_space<vmem>>, vector<8x8x16xf32>
    %c0_93 = arith.constant 0 : index
    %c5_94 = arith.constant 5 : index
    %c0_95 = arith.constant 0 : index
    %153 = vector.load %arg4[%c0_93, %c5_94, %c0_95] : memref<3x9x16xf32, #tpu.memory_space<vmem>>, vector<1x1x16xf32>
    %154 = vector.shape_cast %153 : vector<1x1x16xf32> to vector<1x16xf32>
    %155 = vector.shape_cast %154 : vector<1x16xf32> to vector<1x1x16xf32>
    %c1_96 = arith.constant 1 : index
    %c5_97 = arith.constant 5 : index
    %c0_98 = arith.constant 0 : index
    %156 = vector.load %arg4[%c1_96, %c5_97, %c0_98] : memref<3x9x16xf32, #tpu.memory_space<vmem>>, vector<1x1x16xf32>
    %157 = vector.shape_cast %156 : vector<1x1x16xf32> to vector<1x16xf32>
    %158 = vector.shape_cast %157 : vector<1x16xf32> to vector<1x1x16xf32>
    %c2_99 = arith.constant 2 : index
    %c5_100 = arith.constant 5 : index
    %c0_101 = arith.constant 0 : index
    %159 = vector.load %arg4[%c2_99, %c5_100, %c0_101] : memref<3x9x16xf32, #tpu.memory_space<vmem>>, vector<1x1x16xf32>
    %160 = vector.shape_cast %159 : vector<1x1x16xf32> to vector<1x16xf32>
    %161 = vector.shape_cast %160 : vector<1x16xf32> to vector<1x1x16xf32>
    %162 = vector.broadcast %155 : vector<1x1x16xf32> to vector<8x8x16xf32>
    %163 = arith.mulf %152, %162 : vector<8x8x16xf32>
    %164 = arith.addf %145, %163 : vector<8x8x16xf32>
    %165 = vector.broadcast %158 : vector<1x1x16xf32> to vector<8x8x16xf32>
    %166 = arith.mulf %152, %165 : vector<8x8x16xf32>
    %167 = arith.addf %148, %166 : vector<8x8x16xf32>
    %168 = vector.broadcast %161 : vector<1x1x16xf32> to vector<8x8x16xf32>
    %169 = arith.mulf %152, %168 : vector<8x8x16xf32>
    %170 = arith.addf %151, %169 : vector<8x8x16xf32>
    %c2_102 = arith.constant 2 : index
    %c0_103 = arith.constant 0 : index
    %c0_104 = arith.constant 0 : index
    %171 = vector.load %arg19[%c2_102, %c0_103, %c0_104] : memref<10x10x16xf32, #tpu.memory_space<vmem>>, vector<8x8x16xf32>
    %c0_105 = arith.constant 0 : index
    %c6_106 = arith.constant 6 : index
    %c0_107 = arith.constant 0 : index
    %172 = vector.load %arg4[%c0_105, %c6_106, %c0_107] : memref<3x9x16xf32, #tpu.memory_space<vmem>>, vector<1x1x16xf32>
    %173 = vector.shape_cast %172 : vector<1x1x16xf32> to vector<1x16xf32>
    %174 = vector.shape_cast %173 : vector<1x16xf32> to vector<1x1x16xf32>
    %c1_108 = arith.constant 1 : index
    %c6_109 = arith.constant 6 : index
    %c0_110 = arith.constant 0 : index
    %175 = vector.load %arg4[%c1_108, %c6_109, %c0_110] : memref<3x9x16xf32, #tpu.memory_space<vmem>>, vector<1x1x16xf32>
    %176 = vector.shape_cast %175 : vector<1x1x16xf32> to vector<1x16xf32>
    %177 = vector.shape_cast %176 : vector<1x16xf32> to vector<1x1x16xf32>
    %c2_111 = arith.constant 2 : index
    %c6_112 = arith.constant 6 : index
    %c0_113 = arith.constant 0 : index
    %178 = vector.load %arg4[%c2_111, %c6_112, %c0_113] : memref<3x9x16xf32, #tpu.memory_space<vmem>>, vector<1x1x16xf32>
    %179 = vector.shape_cast %178 : vector<1x1x16xf32> to vector<1x16xf32>
    %180 = vector.shape_cast %179 : vector<1x16xf32> to vector<1x1x16xf32>
    %181 = vector.broadcast %174 : vector<1x1x16xf32> to vector<8x8x16xf32>
    %182 = arith.mulf %171, %181 : vector<8x8x16xf32>
    %183 = arith.addf %164, %182 : vector<8x8x16xf32>
    %184 = vector.broadcast %177 : vector<1x1x16xf32> to vector<8x8x16xf32>
    %185 = arith.mulf %171, %184 : vector<8x8x16xf32>
    %186 = arith.addf %167, %185 : vector<8x8x16xf32>
    %187 = vector.broadcast %180 : vector<1x1x16xf32> to vector<8x8x16xf32>
    %188 = arith.mulf %171, %187 : vector<8x8x16xf32>
    %189 = arith.addf %170, %188 : vector<8x8x16xf32>
    %c2_114 = arith.constant 2 : index
    %c1_115 = arith.constant 1 : index
    %c0_116 = arith.constant 0 : index
    %190 = vector.load %arg19[%c2_114, %c1_115, %c0_116] : memref<10x10x16xf32, #tpu.memory_space<vmem>>, vector<8x8x16xf32>
    %c0_117 = arith.constant 0 : index
    %c7_118 = arith.constant 7 : index
    %c0_119 = arith.constant 0 : index
    %191 = vector.load %arg4[%c0_117, %c7_118, %c0_119] : memref<3x9x16xf32, #tpu.memory_space<vmem>>, vector<1x1x16xf32>
    %192 = vector.shape_cast %191 : vector<1x1x16xf32> to vector<1x16xf32>
    %193 = vector.shape_cast %192 : vector<1x16xf32> to vector<1x1x16xf32>
    %c1_120 = arith.constant 1 : index
    %c7_121 = arith.constant 7 : index
    %c0_122 = arith.constant 0 : index
    %194 = vector.load %arg4[%c1_120, %c7_121, %c0_122] : memref<3x9x16xf32, #tpu.memory_space<vmem>>, vector<1x1x16xf32>
    %195 = vector.shape_cast %194 : vector<1x1x16xf32> to vector<1x16xf32>
    %196 = vector.shape_cast %195 : vector<1x16xf32> to vector<1x1x16xf32>
    %c2_123 = arith.constant 2 : index
    %c7_124 = arith.constant 7 : index
    %c0_125 = arith.constant 0 : index
    %197 = vector.load %arg4[%c2_123, %c7_124, %c0_125] : memref<3x9x16xf32, #tpu.memory_space<vmem>>, vector<1x1x16xf32>
    %198 = vector.shape_cast %197 : vector<1x1x16xf32> to vector<1x16xf32>
    %199 = vector.shape_cast %198 : vector<1x16xf32> to vector<1x1x16xf32>
    %200 = vector.broadcast %193 : vector<1x1x16xf32> to vector<8x8x16xf32>
    %201 = arith.mulf %190, %200 : vector<8x8x16xf32>
    %202 = arith.addf %183, %201 : vector<8x8x16xf32>
    %203 = vector.broadcast %196 : vector<1x1x16xf32> to vector<8x8x16xf32>
    %204 = arith.mulf %190, %203 : vector<8x8x16xf32>
    %205 = arith.addf %186, %204 : vector<8x8x16xf32>
    %206 = vector.broadcast %199 : vector<1x1x16xf32> to vector<8x8x16xf32>
    %207 = arith.mulf %190, %206 : vector<8x8x16xf32>
    %208 = arith.addf %189, %207 : vector<8x8x16xf32>
    %c2_126 = arith.constant 2 : index
    %c2_127 = arith.constant 2 : index
    %c0_128 = arith.constant 0 : index
    %209 = vector.load %arg19[%c2_126, %c2_127, %c0_128] : memref<10x10x16xf32, #tpu.memory_space<vmem>>, vector<8x8x16xf32>
    %c0_129 = arith.constant 0 : index
    %c8_130 = arith.constant 8 : index
    %c0_131 = arith.constant 0 : index
    %210 = vector.load %arg4[%c0_129, %c8_130, %c0_131] : memref<3x9x16xf32, #tpu.memory_space<vmem>>, vector<1x1x16xf32>
    %211 = vector.shape_cast %210 : vector<1x1x16xf32> to vector<1x16xf32>
    %212 = vector.shape_cast %211 : vector<1x16xf32> to vector<1x1x16xf32>
    %c1_132 = arith.constant 1 : index
    %c8_133 = arith.constant 8 : index
    %c0_134 = arith.constant 0 : index
    %213 = vector.load %arg4[%c1_132, %c8_133, %c0_134] : memref<3x9x16xf32, #tpu.memory_space<vmem>>, vector<1x1x16xf32>
    %214 = vector.shape_cast %213 : vector<1x1x16xf32> to vector<1x16xf32>
    %215 = vector.shape_cast %214 : vector<1x16xf32> to vector<1x1x16xf32>
    %c2_135 = arith.constant 2 : index
    %c8_136 = arith.constant 8 : index
    %c0_137 = arith.constant 0 : index
    %216 = vector.load %arg4[%c2_135, %c8_136, %c0_137] : memref<3x9x16xf32, #tpu.memory_space<vmem>>, vector<1x1x16xf32>
    %217 = vector.shape_cast %216 : vector<1x1x16xf32> to vector<1x16xf32>
    %218 = vector.shape_cast %217 : vector<1x16xf32> to vector<1x1x16xf32>
    %219 = vector.broadcast %212 : vector<1x1x16xf32> to vector<8x8x16xf32>
    %220 = arith.mulf %209, %219 : vector<8x8x16xf32>
    %221 = arith.addf %202, %220 : vector<8x8x16xf32>
    %222 = vector.broadcast %215 : vector<1x1x16xf32> to vector<8x8x16xf32>
    %223 = arith.mulf %209, %222 : vector<8x8x16xf32>
    %224 = arith.addf %205, %223 : vector<8x8x16xf32>
    %225 = vector.broadcast %218 : vector<1x1x16xf32> to vector<8x8x16xf32>
    %226 = arith.mulf %209, %225 : vector<8x8x16xf32>
    %227 = arith.addf %208, %226 : vector<8x8x16xf32>
    %c0_138 = arith.constant 0 : index
    %c0_139 = arith.constant 0 : index
    %228 = vector.load %arg5[%c0_138, %c0_139] : memref<3x16xf32, #tpu.memory_space<vmem>>, vector<1x16xf32>
    %229 = vector.shape_cast %228 : vector<1x16xf32> to vector<1x1x16xf32>
    %230 = vector.broadcast %229 : vector<1x1x16xf32> to vector<8x8x16xf32>
    %231 = arith.mulf %221, %230 : vector<8x8x16xf32>
    %c0_140 = arith.constant 0 : index
    %c0_141 = arith.constant 0 : index
    %232 = vector.load %arg6[%c0_140, %c0_141] : memref<3x16xf32, #tpu.memory_space<vmem>>, vector<1x16xf32>
    %233 = vector.shape_cast %232 : vector<1x16xf32> to vector<1x1x16xf32>
    %234 = vector.broadcast %233 : vector<1x1x16xf32> to vector<8x8x16xf32>
    %235 = arith.addf %231, %234 : vector<8x8x16xf32>
    %c1_142 = arith.constant 1 : index
    %c0_143 = arith.constant 0 : index
    %236 = vector.load %arg5[%c1_142, %c0_143] : memref<3x16xf32, #tpu.memory_space<vmem>>, vector<1x16xf32>
    %237 = vector.shape_cast %236 : vector<1x16xf32> to vector<1x1x16xf32>
    %238 = vector.broadcast %237 : vector<1x1x16xf32> to vector<8x8x16xf32>
    %239 = arith.mulf %224, %238 : vector<8x8x16xf32>
    %c1_144 = arith.constant 1 : index
    %c0_145 = arith.constant 0 : index
    %240 = vector.load %arg6[%c1_144, %c0_145] : memref<3x16xf32, #tpu.memory_space<vmem>>, vector<1x16xf32>
    %241 = vector.shape_cast %240 : vector<1x16xf32> to vector<1x1x16xf32>
    %242 = vector.broadcast %241 : vector<1x1x16xf32> to vector<8x8x16xf32>
    %243 = arith.addf %239, %242 : vector<8x8x16xf32>
    %c2_146 = arith.constant 2 : index
    %c0_147 = arith.constant 0 : index
    %244 = vector.load %arg5[%c2_146, %c0_147] : memref<3x16xf32, #tpu.memory_space<vmem>>, vector<1x16xf32>
    %245 = vector.shape_cast %244 : vector<1x16xf32> to vector<1x1x16xf32>
    %246 = vector.broadcast %245 : vector<1x1x16xf32> to vector<8x8x16xf32>
    %247 = arith.mulf %227, %246 : vector<8x8x16xf32>
    %c2_148 = arith.constant 2 : index
    %c0_149 = arith.constant 0 : index
    %248 = vector.load %arg6[%c2_148, %c0_149] : memref<3x16xf32, #tpu.memory_space<vmem>>, vector<1x16xf32>
    %249 = vector.shape_cast %248 : vector<1x16xf32> to vector<1x1x16xf32>
    %250 = vector.broadcast %249 : vector<1x1x16xf32> to vector<8x8x16xf32>
    %251 = arith.addf %247, %250 : vector<8x8x16xf32>
    %252 = vector.extract_strided_slice %235 {offsets = [0, 0, 0], sizes = [1, 8, 16], strides = [1, 1, 1]} : vector<8x8x16xf32> to vector<1x8x16xf32>
    %253 = vector.shape_cast %252 : vector<1x8x16xf32> to vector<8x16xf32>
    %c0_150 = arith.constant 0 : index
    %c0_151 = arith.constant 0 : index
    %254 = vector.load %arg20[%c0_150, %c0_151] : memref<64x16xf32, #tpu.memory_space<vmem>>, vector<8x16xf32>
    tpu.vector_store %arg20[%c0_150, %c0_151], %253 {strides = array<i32>} : memref<64x16xf32, #tpu.memory_space<vmem>>, vector<8x16xf32>,
    %255 = vector.extract_strided_slice %243 {offsets = [0, 0, 0], sizes = [1, 8, 16], strides = [1, 1, 1]} : vector<8x8x16xf32> to vector<1x8x16xf32>
    %256 = vector.shape_cast %255 : vector<1x8x16xf32> to vector<8x16xf32>
    %c0_152 = arith.constant 0 : index
    %c0_153 = arith.constant 0 : index
    %257 = vector.load %arg23[%c0_152, %c0_153] : memref<64x16xf32, #tpu.memory_space<vmem>>, vector<8x16xf32>
    tpu.vector_store %arg23[%c0_152, %c0_153], %256 {strides = array<i32>} : memref<64x16xf32, #tpu.memory_space<vmem>>, vector<8x16xf32>,
    %258 = vector.extract_strided_slice %251 {offsets = [0, 0, 0], sizes = [1, 8, 16], strides = [1, 1, 1]} : vector<8x8x16xf32> to vector<1x8x16xf32>
    %259 = vector.shape_cast %258 : vector<1x8x16xf32> to vector<8x16xf32>
    %c0_154 = arith.constant 0 : index
    %c0_155 = arith.constant 0 : index
    %260 = vector.load %arg24[%c0_154, %c0_155] : memref<64x16xf32, #tpu.memory_space<vmem>>, vector<8x16xf32>
    tpu.vector_store %arg24[%c0_154, %c0_155], %259 {strides = array<i32>} : memref<64x16xf32, #tpu.memory_space<vmem>>, vector<8x16xf32>,
    %261 = vector.extract_strided_slice %235 {offsets = [1, 0, 0], sizes = [1, 8, 16], strides = [1, 1, 1]} : vector<8x8x16xf32> to vector<1x8x16xf32>
    %262 = vector.shape_cast %261 : vector<1x8x16xf32> to vector<8x16xf32>
    %c8_156 = arith.constant 8 : index
    %c0_157 = arith.constant 0 : index
    %263 = vector.load %arg20[%c8_156, %c0_157] : memref<64x16xf32, #tpu.memory_space<vmem>>, vector<8x16xf32>
    tpu.vector_store %arg20[%c8_156, %c0_157], %262 {strides = array<i32>} : memref<64x16xf32, #tpu.memory_space<vmem>>, vector<8x16xf32>,
    %264 = vector.extract_strided_slice %243 {offsets = [1, 0, 0], sizes = [1, 8, 16], strides = [1, 1, 1]} : vector<8x8x16xf32> to vector<1x8x16xf32>
    %265 = vector.shape_cast %264 : vector<1x8x16xf32> to vector<8x16xf32>
    %c8_158 = arith.constant 8 : index
    %c0_159 = arith.constant 0 : index
    %266 = vector.load %arg23[%c8_158, %c0_159] : memref<64x16xf32, #tpu.memory_space<vmem>>, vector<8x16xf32>
    tpu.vector_store %arg23[%c8_158, %c0_159], %265 {strides = array<i32>} : memref<64x16xf32, #tpu.memory_space<vmem>>, vector<8x16xf32>,
    %267 = vector.extract_strided_slice %251 {offsets = [1, 0, 0], sizes = [1, 8, 16], strides = [1, 1, 1]} : vector<8x8x16xf32> to vector<1x8x16xf32>
    %268 = vector.shape_cast %267 : vector<1x8x16xf32> to vector<8x16xf32>
    %c8_160 = arith.constant 8 : index
    %c0_161 = arith.constant 0 : index
    %269 = vector.load %arg24[%c8_160, %c0_161] : memref<64x16xf32, #tpu.memory_space<vmem>>, vector<8x16xf32>
    tpu.vector_store %arg24[%c8_160, %c0_161], %268 {strides = array<i32>} : memref<64x16xf32, #tpu.memory_space<vmem>>, vector<8x16xf32>,
    %270 = vector.extract_strided_slice %235 {offsets = [2, 0, 0], sizes = [1, 8, 16], strides = [1, 1, 1]} : vector<8x8x16xf32> to vector<1x8x16xf32>
    %271 = vector.shape_cast %270 : vector<1x8x16xf32> to vector<8x16xf32>
    %c16 = arith.constant 16 : index
    %c0_162 = arith.constant 0 : index
    %272 = vector.load %arg20[%c16, %c0_162] : memref<64x16xf32, #tpu.memory_space<vmem>>, vector<8x16xf32>
    tpu.vector_store %arg20[%c16, %c0_162], %271 {strides = array<i32>} : memref<64x16xf32, #tpu.memory_space<vmem>>, vector<8x16xf32>,
    %273 = vector.extract_strided_slice %243 {offsets = [2, 0, 0], sizes = [1, 8, 16], strides = [1, 1, 1]} : vector<8x8x16xf32> to vector<1x8x16xf32>
    %274 = vector.shape_cast %273 : vector<1x8x16xf32> to vector<8x16xf32>
    %c16_163 = arith.constant 16 : index
    %c0_164 = arith.constant 0 : index
    %275 = vector.load %arg23[%c16_163, %c0_164] : memref<64x16xf32, #tpu.memory_space<vmem>>, vector<8x16xf32>
    tpu.vector_store %arg23[%c16_163, %c0_164], %274 {strides = array<i32>} : memref<64x16xf32, #tpu.memory_space<vmem>>, vector<8x16xf32>,
    %276 = vector.extract_strided_slice %251 {offsets = [2, 0, 0], sizes = [1, 8, 16], strides = [1, 1, 1]} : vector<8x8x16xf32> to vector<1x8x16xf32>
    %277 = vector.shape_cast %276 : vector<1x8x16xf32> to vector<8x16xf32>
    %c16_165 = arith.constant 16 : index
    %c0_166 = arith.constant 0 : index
    %278 = vector.load %arg24[%c16_165, %c0_166] : memref<64x16xf32, #tpu.memory_space<vmem>>, vector<8x16xf32>
    tpu.vector_store %arg24[%c16_165, %c0_166], %277 {strides = array<i32>} : memref<64x16xf32, #tpu.memory_space<vmem>>, vector<8x16xf32>,
    %279 = vector.extract_strided_slice %235 {offsets = [3, 0, 0], sizes = [1, 8, 16], strides = [1, 1, 1]} : vector<8x8x16xf32> to vector<1x8x16xf32>
    %280 = vector.shape_cast %279 : vector<1x8x16xf32> to vector<8x16xf32>
    %c24 = arith.constant 24 : index
    %c0_167 = arith.constant 0 : index
    %281 = vector.load %arg20[%c24, %c0_167] : memref<64x16xf32, #tpu.memory_space<vmem>>, vector<8x16xf32>
    tpu.vector_store %arg20[%c24, %c0_167], %280 {strides = array<i32>} : memref<64x16xf32, #tpu.memory_space<vmem>>, vector<8x16xf32>,
    %282 = vector.extract_strided_slice %243 {offsets = [3, 0, 0], sizes = [1, 8, 16], strides = [1, 1, 1]} : vector<8x8x16xf32> to vector<1x8x16xf32>
    %283 = vector.shape_cast %282 : vector<1x8x16xf32> to vector<8x16xf32>
    %c24_168 = arith.constant 24 : index
    %c0_169 = arith.constant 0 : index
    %284 = vector.load %arg23[%c24_168, %c0_169] : memref<64x16xf32, #tpu.memory_space<vmem>>, vector<8x16xf32>
    tpu.vector_store %arg23[%c24_168, %c0_169], %283 {strides = array<i32>} : memref<64x16xf32, #tpu.memory_space<vmem>>, vector<8x16xf32>,
    %285 = vector.extract_strided_slice %251 {offsets = [3, 0, 0], sizes = [1, 8, 16], strides = [1, 1, 1]} : vector<8x8x16xf32> to vector<1x8x16xf32>
    %286 = vector.shape_cast %285 : vector<1x8x16xf32> to vector<8x16xf32>
    %c24_170 = arith.constant 24 : index
    %c0_171 = arith.constant 0 : index
    %287 = vector.load %arg24[%c24_170, %c0_171] : memref<64x16xf32, #tpu.memory_space<vmem>>, vector<8x16xf32>
    tpu.vector_store %arg24[%c24_170, %c0_171], %286 {strides = array<i32>} : memref<64x16xf32, #tpu.memory_space<vmem>>, vector<8x16xf32>,
    %288 = vector.extract_strided_slice %235 {offsets = [4, 0, 0], sizes = [1, 8, 16], strides = [1, 1, 1]} : vector<8x8x16xf32> to vector<1x8x16xf32>
    %289 = vector.shape_cast %288 : vector<1x8x16xf32> to vector<8x16xf32>
    %c32 = arith.constant 32 : index
    %c0_172 = arith.constant 0 : index
    %290 = vector.load %arg20[%c32, %c0_172] : memref<64x16xf32, #tpu.memory_space<vmem>>, vector<8x16xf32>
    tpu.vector_store %arg20[%c32, %c0_172], %289 {strides = array<i32>} : memref<64x16xf32, #tpu.memory_space<vmem>>, vector<8x16xf32>,
    %291 = vector.extract_strided_slice %243 {offsets = [4, 0, 0], sizes = [1, 8, 16], strides = [1, 1, 1]} : vector<8x8x16xf32> to vector<1x8x16xf32>
    %292 = vector.shape_cast %291 : vector<1x8x16xf32> to vector<8x16xf32>
    %c32_173 = arith.constant 32 : index
    %c0_174 = arith.constant 0 : index
    %293 = vector.load %arg23[%c32_173, %c0_174] : memref<64x16xf32, #tpu.memory_space<vmem>>, vector<8x16xf32>
    tpu.vector_store %arg23[%c32_173, %c0_174], %292 {strides = array<i32>} : memref<64x16xf32, #tpu.memory_space<vmem>>, vector<8x16xf32>,
    %294 = vector.extract_strided_slice %251 {offsets = [4, 0, 0], sizes = [1, 8, 16], strides = [1, 1, 1]} : vector<8x8x16xf32> to vector<1x8x16xf32>
    %295 = vector.shape_cast %294 : vector<1x8x16xf32> to vector<8x16xf32>
    %c32_175 = arith.constant 32 : index
    %c0_176 = arith.constant 0 : index
    %296 = vector.load %arg24[%c32_175, %c0_176] : memref<64x16xf32, #tpu.memory_space<vmem>>, vector<8x16xf32>
    tpu.vector_store %arg24[%c32_175, %c0_176], %295 {strides = array<i32>} : memref<64x16xf32, #tpu.memory_space<vmem>>, vector<8x16xf32>,
    %297 = vector.extract_strided_slice %235 {offsets = [5, 0, 0], sizes = [1, 8, 16], strides = [1, 1, 1]} : vector<8x8x16xf32> to vector<1x8x16xf32>
    %298 = vector.shape_cast %297 : vector<1x8x16xf32> to vector<8x16xf32>
    %c40 = arith.constant 40 : index
    %c0_177 = arith.constant 0 : index
    %299 = vector.load %arg20[%c40, %c0_177] : memref<64x16xf32, #tpu.memory_space<vmem>>, vector<8x16xf32>
    tpu.vector_store %arg20[%c40, %c0_177], %298 {strides = array<i32>} : memref<64x16xf32, #tpu.memory_space<vmem>>, vector<8x16xf32>,
    %300 = vector.extract_strided_slice %243 {offsets = [5, 0, 0], sizes = [1, 8, 16], strides = [1, 1, 1]} : vector<8x8x16xf32> to vector<1x8x16xf32>
    %301 = vector.shape_cast %300 : vector<1x8x16xf32> to vector<8x16xf32>
    %c40_178 = arith.constant 40 : index
    %c0_179 = arith.constant 0 : index
    %302 = vector.load %arg23[%c40_178, %c0_179] : memref<64x16xf32, #tpu.memory_space<vmem>>, vector<8x16xf32>
    tpu.vector_store %arg23[%c40_178, %c0_179], %301 {strides = array<i32>} : memref<64x16xf32, #tpu.memory_space<vmem>>, vector<8x16xf32>,
    %303 = vector.extract_strided_slice %251 {offsets = [5, 0, 0], sizes = [1, 8, 16], strides = [1, 1, 1]} : vector<8x8x16xf32> to vector<1x8x16xf32>
    %304 = vector.shape_cast %303 : vector<1x8x16xf32> to vector<8x16xf32>
    %c40_180 = arith.constant 40 : index
    %c0_181 = arith.constant 0 : index
    %305 = vector.load %arg24[%c40_180, %c0_181] : memref<64x16xf32, #tpu.memory_space<vmem>>, vector<8x16xf32>
    tpu.vector_store %arg24[%c40_180, %c0_181], %304 {strides = array<i32>} : memref<64x16xf32, #tpu.memory_space<vmem>>, vector<8x16xf32>,
    %306 = vector.extract_strided_slice %235 {offsets = [6, 0, 0], sizes = [1, 8, 16], strides = [1, 1, 1]} : vector<8x8x16xf32> to vector<1x8x16xf32>
    %307 = vector.shape_cast %306 : vector<1x8x16xf32> to vector<8x16xf32>
    %c48 = arith.constant 48 : index
    %c0_182 = arith.constant 0 : index
    %308 = vector.load %arg20[%c48, %c0_182] : memref<64x16xf32, #tpu.memory_space<vmem>>, vector<8x16xf32>
    tpu.vector_store %arg20[%c48, %c0_182], %307 {strides = array<i32>} : memref<64x16xf32, #tpu.memory_space<vmem>>, vector<8x16xf32>,
    %309 = vector.extract_strided_slice %243 {offsets = [6, 0, 0], sizes = [1, 8, 16], strides = [1, 1, 1]} : vector<8x8x16xf32> to vector<1x8x16xf32>
    %310 = vector.shape_cast %309 : vector<1x8x16xf32> to vector<8x16xf32>
    %c48_183 = arith.constant 48 : index
    %c0_184 = arith.constant 0 : index
    %311 = vector.load %arg23[%c48_183, %c0_184] : memref<64x16xf32, #tpu.memory_space<vmem>>, vector<8x16xf32>
    tpu.vector_store %arg23[%c48_183, %c0_184], %310 {strides = array<i32>} : memref<64x16xf32, #tpu.memory_space<vmem>>, vector<8x16xf32>,
    %312 = vector.extract_strided_slice %251 {offsets = [6, 0, 0], sizes = [1, 8, 16], strides = [1, 1, 1]} : vector<8x8x16xf32> to vector<1x8x16xf32>
    %313 = vector.shape_cast %312 : vector<1x8x16xf32> to vector<8x16xf32>
    %c48_185 = arith.constant 48 : index
    %c0_186 = arith.constant 0 : index
    %314 = vector.load %arg24[%c48_185, %c0_186] : memref<64x16xf32, #tpu.memory_space<vmem>>, vector<8x16xf32>
    tpu.vector_store %arg24[%c48_185, %c0_186], %313 {strides = array<i32>} : memref<64x16xf32, #tpu.memory_space<vmem>>, vector<8x16xf32>,
    %315 = vector.extract_strided_slice %235 {offsets = [7, 0, 0], sizes = [1, 8, 16], strides = [1, 1, 1]} : vector<8x8x16xf32> to vector<1x8x16xf32>
    %316 = vector.shape_cast %315 : vector<1x8x16xf32> to vector<8x16xf32>
    %c56 = arith.constant 56 : index
    %c0_187 = arith.constant 0 : index
    %317 = vector.load %arg20[%c56, %c0_187] : memref<64x16xf32, #tpu.memory_space<vmem>>, vector<8x16xf32>
    tpu.vector_store %arg20[%c56, %c0_187], %316 {strides = array<i32>} : memref<64x16xf32, #tpu.memory_space<vmem>>, vector<8x16xf32>,
    %318 = vector.extract_strided_slice %243 {offsets = [7, 0, 0], sizes = [1, 8, 16], strides = [1, 1, 1]} : vector<8x8x16xf32> to vector<1x8x16xf32>
    %319 = vector.shape_cast %318 : vector<1x8x16xf32> to vector<8x16xf32>
    %c56_188 = arith.constant 56 : index
    %c0_189 = arith.constant 0 : index
    %320 = vector.load %arg23[%c56_188, %c0_189] : memref<64x16xf32, #tpu.memory_space<vmem>>, vector<8x16xf32>
    tpu.vector_store %arg23[%c56_188, %c0_189], %319 {strides = array<i32>} : memref<64x16xf32, #tpu.memory_space<vmem>>, vector<8x16xf32>,
    %321 = vector.extract_strided_slice %251 {offsets = [7, 0, 0], sizes = [1, 8, 16], strides = [1, 1, 1]} : vector<8x8x16xf32> to vector<1x8x16xf32>
    %322 = vector.shape_cast %321 : vector<1x8x16xf32> to vector<8x16xf32>
    %c56_190 = arith.constant 56 : index
    %c0_191 = arith.constant 0 : index
    %323 = vector.load %arg24[%c56_190, %c0_191] : memref<64x16xf32, #tpu.memory_space<vmem>>, vector<8x16xf32>
    tpu.vector_store %arg24[%c56_190, %c0_191], %322 {strides = array<i32>} : memref<64x16xf32, #tpu.memory_space<vmem>>, vector<8x16xf32>,
    %c0_192 = arith.constant 0 : index
    %c0_193 = arith.constant 0 : index
    %324 = vector.load %arg7[%c0_192, %c0_193] : memref<16x64xbf16, #tpu.memory_space<vmem>>, vector<16x64xbf16>
    %c0_194 = arith.constant 0 : index
    %c0_195 = arith.constant 0 : index
    %325 = vector.load %arg23[%c0_194, %c0_195] : memref<64x16xf32, #tpu.memory_space<vmem>>, vector<64x16xf32>
    %326 = arith.truncf %325 : vector<64x16xf32> to vector<64x16xbf16>
    %cst_196 = arith.constant dense<0.000000e+00> : vector<16x16xf32>
    %327 = tpu.matmul %324, %326, %cst_196 {dimension_numbers = #tpu.dot_dimension_numbers<[1], [0], [0], [1], [0, 0, 1, 1], [], []>} : vector<16x64xbf16>, vector<64x16xbf16>, vector<16x16xf32> -> vector<16x16xf32>
    %c0_197 = arith.constant 0 : index
    %c0_198 = arith.constant 0 : index
    %328 = vector.load %arg21[%c0_197, %c0_198] : memref<16x16xf32, #tpu.memory_space<vmem>>, vector<16x16xf32>
    tpu.vector_store %arg21[%c0_197, %c0_198], %327 {strides = array<i32>} : memref<16x16xf32, #tpu.memory_space<vmem>>, vector<16x16xf32>,
    %c0_199 = arith.constant 0 : index
    %c0_200 = arith.constant 0 : index
    %329 = vector.load %arg24[%c0_199, %c0_200] : memref<64x16xf32, #tpu.memory_space<vmem>>, vector<64x16xf32>
    %330 = arith.truncf %329 : vector<64x16xf32> to vector<64x16xbf16>
    %cst_201 = arith.constant dense<0.000000e+00> : vector<16x16xf32>
    %331 = tpu.matmul %324, %330, %cst_201 {dimension_numbers = #tpu.dot_dimension_numbers<[1], [0], [0], [1], [0, 0, 1, 1], [], []>} : vector<16x64xbf16>, vector<64x16xbf16>, vector<16x16xf32> -> vector<16x16xf32>
    %c0_202 = arith.constant 0 : index
    %c0_203 = arith.constant 0 : index
    %332 = vector.load %arg22[%c0_202, %c0_203] : memref<16x16xf32, #tpu.memory_space<vmem>>, vector<16x16xf32>
    tpu.vector_store %arg22[%c0_202, %c0_203], %331 {strides = array<i32>} : memref<16x16xf32, #tpu.memory_space<vmem>>, vector<16x16xf32>,
    %c0_204 = arith.constant 0 : index
    %c0_205 = arith.constant 0 : index
    %333 = vector.load %arg20[%c0_204, %c0_205] : memref<64x16xf32, #tpu.memory_space<vmem>>, vector<64x16xf32>
    %334 = arith.truncf %333 : vector<64x16xf32> to vector<64x16xbf16>
    %c0_206 = arith.constant 0 : index
    %c0_207 = arith.constant 0 : index
    %c0_208 = arith.constant 0 : index
    %335 = vector.load %arg8[%c0_206, %c0_207, %c0_208] : memref<3x16x16xbf16, #tpu.memory_space<vmem>>, vector<1x16x16xbf16>
    %336 = vector.shape_cast %335 : vector<1x16x16xbf16> to vector<16x16xbf16>
    %cst_209 = arith.constant dense<0.000000e+00> : vector<64x16xf32>
    %337 = tpu.matmul %334, %336, %cst_209 {dimension_numbers = #tpu.dot_dimension_numbers<[1], [0], [0], [1], [0, 0, 1, 1], [], []>} : vector<64x16xbf16>, vector<16x16xbf16>, vector<64x16xf32> -> vector<64x16xf32>
    %c0_210 = arith.constant 0 : index
    %c0_211 = arith.constant 0 : index
    %338 = vector.load %arg9[%c0_210, %c0_211] : memref<3x16xf32, #tpu.memory_space<vmem>>, vector<1x16xf32>
    %339 = vector.broadcast %338 : vector<1x16xf32> to vector<64x16xf32>
    %340 = arith.addf %337, %339 : vector<64x16xf32>
    %c0_212 = arith.constant 0 : index
    %c0_213 = arith.constant 0 : index
    %341 = vector.load %arg21[%c0_212, %c0_213] : memref<16x16xf32, #tpu.memory_space<vmem>>, vector<16x16xf32>
    %342 = arith.truncf %341 : vector<16x16xf32> to vector<16x16xbf16>
    %c1_214 = arith.constant 1 : index
    %c0_215 = arith.constant 0 : index
    %c0_216 = arith.constant 0 : index
    %343 = vector.load %arg8[%c1_214, %c0_215, %c0_216] : memref<3x16x16xbf16, #tpu.memory_space<vmem>>, vector<1x16x16xbf16>
    %344 = vector.shape_cast %343 : vector<1x16x16xbf16> to vector<16x16xbf16>
    %cst_217 = arith.constant dense<0.000000e+00> : vector<16x16xf32>
    %345 = tpu.matmul %342, %344, %cst_217 {dimension_numbers = #tpu.dot_dimension_numbers<[1], [0], [0], [1], [0, 0, 1, 1], [], []>} : vector<16x16xbf16>, vector<16x16xbf16>, vector<16x16xf32> -> vector<16x16xf32>
    %c1_218 = arith.constant 1 : index
    %c0_219 = arith.constant 0 : index
    %346 = vector.load %arg9[%c1_218, %c0_219] : memref<3x16xf32, #tpu.memory_space<vmem>>, vector<1x16xf32>
    %347 = vector.broadcast %346 : vector<1x16xf32> to vector<16x16xf32>
    %348 = arith.addf %345, %347 : vector<16x16xf32>
    %c0_220 = arith.constant 0 : index
    %c0_221 = arith.constant 0 : index
    %349 = vector.load %arg22[%c0_220, %c0_221] : memref<16x16xf32, #tpu.memory_space<vmem>>, vector<16x16xf32>
    %350 = arith.truncf %349 : vector<16x16xf32> to vector<16x16xbf16>
    %c2_222 = arith.constant 2 : index
    %c0_223 = arith.constant 0 : index
    %c0_224 = arith.constant 0 : index
    %351 = vector.load %arg8[%c2_222, %c0_223, %c0_224] : memref<3x16x16xbf16, #tpu.memory_space<vmem>>, vector<1x16x16xbf16>
    %352 = vector.shape_cast %351 : vector<1x16x16xbf16> to vector<16x16xbf16>
    %cst_225 = arith.constant dense<0.000000e+00> : vector<16x16xf32>
    %353 = tpu.matmul %350, %352, %cst_225 {dimension_numbers = #tpu.dot_dimension_numbers<[1], [0], [0], [1], [0, 0, 1, 1], [], []>} : vector<16x16xbf16>, vector<16x16xbf16>, vector<16x16xf32> -> vector<16x16xf32>
    %c2_226 = arith.constant 2 : index
    %c0_227 = arith.constant 0 : index
    %354 = vector.load %arg9[%c2_226, %c0_227] : memref<3x16xf32, #tpu.memory_space<vmem>>, vector<1x16xf32>
    %355 = vector.broadcast %354 : vector<1x16xf32> to vector<16x16xf32>
    %356 = arith.addf %353, %355 : vector<16x16xf32>
    %357 = arith.truncf %340 : vector<64x16xf32> to vector<64x16xbf16>
    %358 = arith.truncf %348 : vector<16x16xf32> to vector<16x16xbf16>
    %cst_228 = arith.constant dense<0.000000e+00> : vector<64x16xf32>
    %359 = tpu.matmul %357, %358, %cst_228 {dimension_numbers = #tpu.dot_dimension_numbers<[1], [1], [0], [0], [0, 0, 1, 0], [], []>} : vector<64x16xbf16>, vector<16x16xbf16>, vector<64x16xf32> -> vector<64x16xf32>
    %cst_229 = arith.constant dense<0xFF800000> : vector<64xf32>
    %360 = vector.multi_reduction <maximumf>, %359, %cst_229 [1] : vector<64x16xf32> to vector<64xf32>
    %361 = vector.shape_cast %360 : vector<64xf32> to vector<64x1xf32>
    %362 = vector.broadcast %361 : vector<64x1xf32> to vector<64x16xf32>
    %363 = arith.subf %359, %362 : vector<64x16xf32>
    %364 = math.exp %363 : vector<64x16xf32>
    %cst_230 = arith.constant dense<0.000000e+00> : vector<64xf32>
    %365 = vector.multi_reduction <add>, %364, %cst_230 [1] : vector<64x16xf32> to vector<64xf32>
    %366 = vector.shape_cast %365 : vector<64xf32> to vector<64x1xf32>
    %367 = tpu.reciprocal %366 {approx = true} : vector<64x1xf32> -> vector<64x1xf32>
    %368 = vector.broadcast %367 : vector<64x1xf32> to vector<64x16xf32>
    %369 = arith.mulf %364, %368 : vector<64x16xf32>
    %370 = arith.truncf %369 : vector<64x16xf32> to vector<64x16xbf16>
    %371 = arith.truncf %356 : vector<16x16xf32> to vector<16x16xbf16>
    %cst_231 = arith.constant dense<0.000000e+00> : vector<64x16xf32>
    %372 = tpu.matmul %370, %371, %cst_231 {dimension_numbers = #tpu.dot_dimension_numbers<[1], [0], [0], [1], [0, 0, 1, 1], [], []>} : vector<64x16xbf16>, vector<16x16xbf16>, vector<64x16xf32> -> vector<64x16xf32>
    %373 = arith.truncf %372 : vector<64x16xf32> to vector<64x16xbf16>
    %c0_232 = arith.constant 0 : index
    %c0_233 = arith.constant 0 : index
    %374 = vector.load %arg10[%c0_232, %c0_233] : memref<16x16xbf16, #tpu.memory_space<vmem>>, vector<16x16xbf16>
    %cst_234 = arith.constant dense<0.000000e+00> : vector<64x16xf32>
    %375 = tpu.matmul %373, %374, %cst_234 {dimension_numbers = #tpu.dot_dimension_numbers<[1], [0], [0], [1], [0, 0, 1, 1], [], []>} : vector<64x16xbf16>, vector<16x16xbf16>, vector<64x16xf32> -> vector<64x16xf32>
    %376 = arith.addf %1, %375 : vector<64x16xf32>
    %c0_235 = arith.constant 0 : index
    %c0_236 = arith.constant 0 : index
    %377 = vector.load %arg11[%c0_235, %c0_236] : memref<1x16xf32, #tpu.memory_space<vmem>>, vector<1x16xf32>
    %378 = vector.broadcast %377 : vector<1x16xf32> to vector<64x16xf32>
    %379 = arith.addf %376, %378 : vector<64x16xf32>
    %c0_237 = arith.constant 0 : index
    %c0_238 = arith.constant 0 : index
    %380 = vector.load %arg12[%c0_237, %c0_238] : memref<1x16xf32, #tpu.memory_space<vmem>>, vector<1x16xf32>
    %c0_239 = arith.constant 0 : index
    %c0_240 = arith.constant 0 : index
    %381 = vector.load %arg13[%c0_239, %c0_240] : memref<1x16xf32, #tpu.memory_space<vmem>>, vector<1x16xf32>
    %cst_241 = arith.constant dense<0.000000e+00> : vector<64xf32>
    %382 = vector.multi_reduction <add>, %379, %cst_241 [1] : vector<64x16xf32> to vector<64xf32>
    %383 = vector.shape_cast %382 : vector<64xf32> to vector<64x1xf32>
    %cst_242 = arith.constant 1.600000e+01 : f32
    %384 = vector.broadcast %cst_242 : f32 to vector<64x1xf32>
    %385 = arith.divf %383, %384 : vector<64x1xf32>
    %386 = vector.broadcast %385 : vector<64x1xf32> to vector<64x16xf32>
    %387 = arith.subf %379, %386 : vector<64x16xf32>
    %388 = arith.mulf %387, %387 : vector<64x16xf32>
    %cst_243 = arith.constant dense<0.000000e+00> : vector<64xf32>
    %389 = vector.multi_reduction <add>, %388, %cst_243 [1] : vector<64x16xf32> to vector<64xf32>
    %390 = vector.shape_cast %389 : vector<64xf32> to vector<64x1xf32>
    %cst_244 = arith.constant 1.600000e+01 : f32
    %391 = vector.broadcast %cst_244 : f32 to vector<64x1xf32>
    %392 = arith.divf %390, %391 : vector<64x1xf32>
    %393 = vector.broadcast %385 : vector<64x1xf32> to vector<64x16xf32>
    %394 = arith.subf %379, %393 : vector<64x16xf32>
    %cst_245 = arith.constant 9.99999974E-6 : f32
    %395 = vector.broadcast %cst_245 : f32 to vector<64x1xf32>
    %396 = arith.addf %392, %395 : vector<64x1xf32>
    %397 = math.rsqrt %396 : vector<64x1xf32>
    %398 = vector.broadcast %397 : vector<64x1xf32> to vector<64x16xf32>
    %399 = arith.mulf %394, %398 : vector<64x16xf32>
    %400 = vector.broadcast %380 : vector<1x16xf32> to vector<64x16xf32>
    %401 = arith.mulf %399, %400 : vector<64x16xf32>
    %402 = vector.broadcast %381 : vector<1x16xf32> to vector<64x16xf32>
    %403 = arith.addf %401, %402 : vector<64x16xf32>
    %404 = arith.truncf %403 : vector<64x16xf32> to vector<64x16xbf16>
    %c0_246 = arith.constant 0 : index
    %c0_247 = arith.constant 0 : index
    %405 = vector.load %arg14[%c0_246, %c0_247] : memref<16x64xbf16, #tpu.memory_space<vmem>>, vector<16x64xbf16>
    %cst_248 = arith.constant dense<0.000000e+00> : vector<64x64xf32>
    %406 = tpu.matmul %404, %405, %cst_248 {dimension_numbers = #tpu.dot_dimension_numbers<[1], [0], [0], [1], [0, 0, 1, 1], [], []>} : vector<64x16xbf16>, vector<16x64xbf16>, vector<64x64xf32> -> vector<64x64xf32>
    %c0_249 = arith.constant 0 : index
    %c0_250 = arith.constant 0 : index
    %407 = vector.load %arg15[%c0_249, %c0_250] : memref<1x64xf32, #tpu.memory_space<vmem>>, vector<1x64xf32>
    %408 = vector.broadcast %407 : vector<1x64xf32> to vector<64x64xf32>
    %409 = arith.addf %406, %408 : vector<64x64xf32>
    %cst_251 = arith.constant 5.000000e-01 : f32
    %410 = vector.broadcast %cst_251 : f32 to vector<64x64xf32>
    %411 = arith.mulf %410, %409 : vector<64x64xf32>
    %cst_252 = arith.constant 0.707106769 : f32
    %412 = vector.broadcast %cst_252 : f32 to vector<64x64xf32>
    %413 = arith.mulf %409, %412 : vector<64x64xf32>
    %414 = math.absf %413 : vector<64x64xf32>
    %cst_253 = arith.constant 0.327591091 : f32
    %415 = vector.broadcast %cst_253 : f32 to vector<64x64xf32>
    %416 = arith.mulf %415, %414 : vector<64x64xf32>
    %cst_254 = arith.constant 1.000000e+00 : f32
    %417 = vector.broadcast %cst_254 : f32 to vector<64x64xf32>
    %418 = arith.addf %417, %416 : vector<64x64xf32>
    %cst_255 = arith.constant 1.000000e+00 : f32
    %419 = vector.broadcast %cst_255 : f32 to vector<64x64xf32>
    %420 = arith.divf %419, %418 : vector<64x64xf32>
    %cst_256 = arith.constant 1.06140542 : f32
    %421 = vector.broadcast %cst_256 : f32 to vector<64x64xf32>
    %422 = arith.mulf %420, %421 : vector<64x64xf32>
    %cst_257 = arith.constant -1.45315206 : f32
    %423 = vector.broadcast %cst_257 : f32 to vector<64x64xf32>
    %424 = arith.addf %423, %422 : vector<64x64xf32>
    %425 = arith.mulf %420, %424 : vector<64x64xf32>
    %cst_258 = arith.constant 1.42141378 : f32
    %426 = vector.broadcast %cst_258 : f32 to vector<64x64xf32>
    %427 = arith.addf %426, %425 : vector<64x64xf32>
    %428 = arith.mulf %420, %427 : vector<64x64xf32>
    %cst_259 = arith.constant -0.284496725 : f32
    %429 = vector.broadcast %cst_259 : f32 to vector<64x64xf32>
    %430 = arith.addf %429, %428 : vector<64x64xf32>
    %431 = arith.mulf %420, %430 : vector<64x64xf32>
    %cst_260 = arith.constant 0.254829586 : f32
    %432 = vector.broadcast %cst_260 : f32 to vector<64x64xf32>
    %433 = arith.addf %432, %431 : vector<64x64xf32>
    %434 = arith.mulf %420, %433 : vector<64x64xf32>
    %cst_261 = arith.constant 0.000000e+00 : f32
    %435 = vector.broadcast %cst_261 : f32 to vector<64x64xf32>
    %436 = arith.subf %435, %414 : vector<64x64xf32>
    %437 = arith.mulf %436, %414 : vector<64x64xf32>
    %438 = math.exp %437 : vector<64x64xf32>
    %439 = arith.mulf %434, %438 : vector<64x64xf32>
    %cst_262 = arith.constant 1.000000e+00 : f32
    %440 = vector.broadcast %cst_262 : f32 to vector<64x64xf32>
    %441 = arith.subf %440, %439 : vector<64x64xf32>
    %cst_263 = arith.constant 0.000000e+00 : f32
    %442 = vector.broadcast %cst_263 : f32 to vector<64x64xf32>
    %443 = arith.cmpf olt, %413, %442 : vector<64x64xf32>
    %cst_264 = arith.constant 0.000000e+00 : f32
    %444 = vector.broadcast %cst_264 : f32 to vector<64x64xf32>
    %445 = arith.subf %444, %441 : vector<64x64xf32>
    %446 = arith.select %443, %445, %441 : vector<64x64xi1>, vector<64x64xf32>
    %cst_265 = arith.constant 1.000000e+00 : f32
    %447 = vector.broadcast %cst_265 : f32 to vector<64x64xf32>
    %448 = arith.addf %447, %446 : vector<64x64xf32>
    %449 = arith.mulf %411, %448 : vector<64x64xf32>
    %450 = arith.truncf %449 : vector<64x64xf32> to vector<64x64xbf16>
    %c0_266 = arith.constant 0 : index
    %c0_267 = arith.constant 0 : index
    %451 = vector.load %arg16[%c0_266, %c0_267] : memref<64x16xbf16, #tpu.memory_space<vmem>>, vector<64x16xbf16>
    %cst_268 = arith.constant dense<0.000000e+00> : vector<64x16xf32>
    %452 = tpu.matmul %450, %451, %cst_268 {dimension_numbers = #tpu.dot_dimension_numbers<[1], [0], [0], [1], [0, 0, 1, 1], [], []>} : vector<64x64xbf16>, vector<64x16xbf16>, vector<64x16xf32> -> vector<64x16xf32>
    %453 = arith.addf %379, %452 : vector<64x16xf32>
    %c0_269 = arith.constant 0 : index
    %c0_270 = arith.constant 0 : index
    %454 = vector.load %arg17[%c0_269, %c0_270] : memref<1x16xf32, #tpu.memory_space<vmem>>, vector<1x16xf32>
    %455 = vector.broadcast %454 : vector<1x16xf32> to vector<64x16xf32>
    %456 = arith.addf %453, %455 : vector<64x16xf32>
    %c0_271 = arith.constant 0 : index
    %c0_272 = arith.constant 0 : index
    %c0_273 = arith.constant 0 : index
    %457 = vector.load %arg18[%c0_271, %c0_272, %c0_273] : memref<1x64x16xf32, #tpu.memory_space<vmem>>, vector<1x64x16xf32>
    %458 = vector.shape_cast %457 : vector<1x64x16xf32> to vector<64x16xf32>
    %459 = vector.shape_cast %456 : vector<64x16xf32> to vector<1x64x16xf32>
    tpu.vector_store %arg18[%c0_271, %c0_272, %c0_273], %459 {strides = array<i32>} : memref<1x64x16xf32, #tpu.memory_space<vmem>>, vector<1x64x16xf32>,
    return
  }
  func.func @transform_0(%arg0: i32) -> (i32, i32, i32) {
    %c0_i32 = arith.constant 0 : i32
    %c0_i32_0 = arith.constant 0 : i32
    %c0_i32_1 = arith.constant 0 : i32
    return %arg0, %c0_i32, %c0_i32_0 : i32, i32, i32
  }
  func.func @transform_1(%arg0: i32) -> (i32, i32) {
    %c0_i32 = arith.constant 0 : i32
    %c0_i32_0 = arith.constant 0 : i32
    %c0_i32_1 = arith.constant 0 : i32
    return %c0_i32, %c0_i32_0 : i32, i32
  }
  func.func @transform_2(%arg0: i32) -> (i32, i32) {
    %c0_i32 = arith.constant 0 : i32
    %c0_i32_0 = arith.constant 0 : i32
    %c0_i32_1 = arith.constant 0 : i32
    return %c0_i32, %c0_i32_0 : i32, i32
  }
  func.func @transform_3(%arg0: i32) -> (i32, i32, i32) {
    %c0_i32 = arith.constant 0 : i32
    %c0_i32_0 = arith.constant 0 : i32
    %c0_i32_1 = arith.constant 0 : i32
    %c0_i32_2 = arith.constant 0 : i32
    return %c0_i32, %c0_i32_0, %c0_i32_1 : i32, i32, i32
  }
  func.func @transform_4(%arg0: i32) -> (i32, i32) {
    %c0_i32 = arith.constant 0 : i32
    %c0_i32_0 = arith.constant 0 : i32
    %c0_i32_1 = arith.constant 0 : i32
    return %c0_i32, %c0_i32_0 : i32, i32
  }
  func.func @transform_5(%arg0: i32) -> (i32, i32) {
    %c0_i32 = arith.constant 0 : i32
    %c0_i32_0 = arith.constant 0 : i32
    %c0_i32_1 = arith.constant 0 : i32
    return %c0_i32, %c0_i32_0 : i32, i32
  }
  func.func @transform_6(%arg0: i32) -> (i32, i32) {
    %c0_i32 = arith.constant 0 : i32
    %c0_i32_0 = arith.constant 0 : i32
    %c0_i32_1 = arith.constant 0 : i32
    return %c0_i32, %c0_i32_0 : i32, i32
  }
  func.func @transform_7(%arg0: i32) -> (i32, i32, i32) {
    %c0_i32 = arith.constant 0 : i32
    %c0_i32_0 = arith.constant 0 : i32
    %c0_i32_1 = arith.constant 0 : i32
    %c0_i32_2 = arith.constant 0 : i32
    return %c0_i32, %c0_i32_0, %c0_i32_1 : i32, i32, i32
  }
  func.func @transform_8(%arg0: i32) -> (i32, i32) {
    %c0_i32 = arith.constant 0 : i32
    %c0_i32_0 = arith.constant 0 : i32
    %c0_i32_1 = arith.constant 0 : i32
    return %c0_i32, %c0_i32_0 : i32, i32
  }
  func.func @transform_9(%arg0: i32) -> (i32, i32) {
    %c0_i32 = arith.constant 0 : i32
    %c0_i32_0 = arith.constant 0 : i32
    %c0_i32_1 = arith.constant 0 : i32
    return %c0_i32, %c0_i32_0 : i32, i32
  }
  func.func @transform_10(%arg0: i32) -> (i32, i32) {
    %c0_i32 = arith.constant 0 : i32
    %c0_i32_0 = arith.constant 0 : i32
    %c0_i32_1 = arith.constant 0 : i32
    return %c0_i32, %c0_i32_0 : i32, i32
  }
  func.func @transform_11(%arg0: i32) -> (i32, i32) {
    %c0_i32 = arith.constant 0 : i32
    %c0_i32_0 = arith.constant 0 : i32
    %c0_i32_1 = arith.constant 0 : i32
    return %c0_i32, %c0_i32_0 : i32, i32
  }
  func.func @transform_12(%arg0: i32) -> (i32, i32) {
    %c0_i32 = arith.constant 0 : i32
    %c0_i32_0 = arith.constant 0 : i32
    %c0_i32_1 = arith.constant 0 : i32
    return %c0_i32, %c0_i32_0 : i32, i32
  }
  func.func @transform_13(%arg0: i32) -> (i32, i32) {
    %c0_i32 = arith.constant 0 : i32
    %c0_i32_0 = arith.constant 0 : i32
    %c0_i32_1 = arith.constant 0 : i32
    return %c0_i32, %c0_i32_0 : i32, i32
  }
  func.func @transform_14(%arg0: i32) -> (i32, i32) {
    %c0_i32 = arith.constant 0 : i32
    %c0_i32_0 = arith.constant 0 : i32
    %c0_i32_1 = arith.constant 0 : i32
    return %c0_i32, %c0_i32_0 : i32, i32
  }
  func.func @transform_15(%arg0: i32) -> (i32, i32) {
    %c0_i32 = arith.constant 0 : i32
    %c0_i32_0 = arith.constant 0 : i32
    %c0_i32_1 = arith.constant 0 : i32
    return %c0_i32, %c0_i32_0 : i32, i32
  }
  func.func @transform_16(%arg0: i32) -> (i32, i32) {
    %c0_i32 = arith.constant 0 : i32
    %c0_i32_0 = arith.constant 0 : i32
    %c0_i32_1 = arith.constant 0 : i32
    return %c0_i32, %c0_i32_0 : i32, i32
  }
  func.func @transform_17(%arg0: i32) -> (i32, i32, i32) {
    %c0_i32 = arith.constant 0 : i32
    %c0_i32_0 = arith.constant 0 : i32
    %c0_i32_1 = arith.constant 0 : i32
    return %arg0, %c0_i32, %c0_i32_0 : i32, i32, i32
  }
}

module attributes {stable_mosaic.version = 11 : i64} {
  func.func @_pe_kernel(%arg0: i32, %arg1: memref<1x16x144xf32, #tpu.memory_space<vmem>>, %arg2: memref<144x32xbf16, #tpu.memory_space<vmem>>, %arg3: memref<1x32xf32, #tpu.memory_space<vmem>>, %arg4: memref<1x32xf32, #tpu.memory_space<vmem>>, %arg5: memref<1x32xf32, #tpu.memory_space<vmem>>, %arg6: memref<1x16x32xf32, #tpu.memory_space<vmem>>) attributes {dimension_semantics = [#tpu.dimension_semantics<parallel>], iteration_bounds = array<i64: 2>, scalar_prefetch = 0 : i64, scratch_operands = 0 : i64, tpu.core_type = #tpu.core_type<tc>, window_params = [{transform_indices = @transform_0, window_bounds = array<i64: 1, 16, 144>}, {pipeline_mode = #tpu.pipeline_mode<synchronous>, transform_indices = @transform_1, window_bounds = array<i64: 144, 32>}, {pipeline_mode = #tpu.pipeline_mode<synchronous>, transform_indices = @transform_2, window_bounds = array<i64: 1, 32>}, {pipeline_mode = #tpu.pipeline_mode<synchronous>, transform_indices = @transform_3, window_bounds = array<i64: 1, 32>}, {pipeline_mode = #tpu.pipeline_mode<synchronous>, transform_indices = @transform_4, window_bounds = array<i64: 1, 32>}, {transform_indices = @transform_5, window_bounds = array<i64: 1, 16, 32>}]} {
    %c0 = arith.constant 0 : index
    %c0_0 = arith.constant 0 : index
    %c0_1 = arith.constant 0 : index
    %0 = vector.load %arg1[%c0, %c0_0, %c0_1] : memref<1x16x144xf32, #tpu.memory_space<vmem>>, vector<1x16x144xf32>
    %1 = vector.shape_cast %0 : vector<1x16x144xf32> to vector<16x144xf32>
    %2 = arith.truncf %1 : vector<16x144xf32> to vector<16x144xbf16>
    %c0_2 = arith.constant 0 : index
    %c0_3 = arith.constant 0 : index
    %3 = vector.load %arg2[%c0_2, %c0_3] : memref<144x32xbf16, #tpu.memory_space<vmem>>, vector<144x32xbf16>
    %cst = arith.constant dense<0.000000e+00> : vector<16x32xf32>
    %4 = tpu.matmul %2, %3, %cst {dimension_numbers = #tpu.dot_dimension_numbers<[1], [0], [0], [1], [0, 0, 1, 1], [], []>} : vector<16x144xbf16>, vector<144x32xbf16>, vector<16x32xf32> -> vector<16x32xf32>
    %c0_4 = arith.constant 0 : index
    %c0_5 = arith.constant 0 : index
    %5 = vector.load %arg3[%c0_4, %c0_5] : memref<1x32xf32, #tpu.memory_space<vmem>>, vector<1x32xf32>
    %6 = vector.broadcast %5 : vector<1x32xf32> to vector<16x32xf32>
    %7 = arith.addf %4, %6 : vector<16x32xf32>
    %c0_6 = arith.constant 0 : index
    %c0_7 = arith.constant 0 : index
    %8 = vector.load %arg4[%c0_6, %c0_7] : memref<1x32xf32, #tpu.memory_space<vmem>>, vector<1x32xf32>
    %c0_8 = arith.constant 0 : index
    %c0_9 = arith.constant 0 : index
    %9 = vector.load %arg5[%c0_8, %c0_9] : memref<1x32xf32, #tpu.memory_space<vmem>>, vector<1x32xf32>
    %cst_10 = arith.constant dense<0.000000e+00> : vector<16xf32>
    %10 = vector.multi_reduction <add>, %7, %cst_10 [1] : vector<16x32xf32> to vector<16xf32>
    %11 = vector.shape_cast %10 : vector<16xf32> to vector<16x1xf32>
    %cst_11 = arith.constant 3.200000e+01 : f32
    %12 = vector.broadcast %cst_11 : f32 to vector<16x1xf32>
    %13 = arith.divf %11, %12 : vector<16x1xf32>
    %14 = vector.broadcast %13 : vector<16x1xf32> to vector<16x32xf32>
    %15 = arith.subf %7, %14 : vector<16x32xf32>
    %16 = arith.mulf %15, %15 : vector<16x32xf32>
    %cst_12 = arith.constant dense<0.000000e+00> : vector<16xf32>
    %17 = vector.multi_reduction <add>, %16, %cst_12 [1] : vector<16x32xf32> to vector<16xf32>
    %18 = vector.shape_cast %17 : vector<16xf32> to vector<16x1xf32>
    %cst_13 = arith.constant 3.200000e+01 : f32
    %19 = vector.broadcast %cst_13 : f32 to vector<16x1xf32>
    %20 = arith.divf %18, %19 : vector<16x1xf32>
    %21 = vector.broadcast %13 : vector<16x1xf32> to vector<16x32xf32>
    %22 = arith.subf %7, %21 : vector<16x32xf32>
    %cst_14 = arith.constant 9.99999974E-6 : f32
    %23 = vector.broadcast %cst_14 : f32 to vector<16x1xf32>
    %24 = arith.addf %20, %23 : vector<16x1xf32>
    %25 = math.rsqrt %24 : vector<16x1xf32>
    %26 = vector.broadcast %25 : vector<16x1xf32> to vector<16x32xf32>
    %27 = arith.mulf %22, %26 : vector<16x32xf32>
    %28 = vector.broadcast %8 : vector<1x32xf32> to vector<16x32xf32>
    %29 = arith.mulf %27, %28 : vector<16x32xf32>
    %30 = vector.broadcast %9 : vector<1x32xf32> to vector<16x32xf32>
    %31 = arith.addf %29, %30 : vector<16x32xf32>
    %c0_15 = arith.constant 0 : index
    %c0_16 = arith.constant 0 : index
    %c0_17 = arith.constant 0 : index
    %32 = vector.load %arg6[%c0_15, %c0_16, %c0_17] : memref<1x16x32xf32, #tpu.memory_space<vmem>>, vector<1x16x32xf32>
    %33 = vector.shape_cast %32 : vector<1x16x32xf32> to vector<16x32xf32>
    %34 = vector.shape_cast %31 : vector<16x32xf32> to vector<1x16x32xf32>
    tpu.vector_store %arg6[%c0_15, %c0_16, %c0_17], %34 {strides = array<i32>} : memref<1x16x32xf32, #tpu.memory_space<vmem>>, vector<1x16x32xf32>,
    return
  }
  func.func @transform_0(%arg0: i32) -> (i32, i32, i32) {
    %c0_i32 = arith.constant 0 : i32
    %c0_i32_0 = arith.constant 0 : i32
    %c0_i32_1 = arith.constant 0 : i32
    return %arg0, %c0_i32, %c0_i32_0 : i32, i32, i32
  }
  func.func @transform_1(%arg0: i32) -> (i32, i32) {
    %c0_i32 = arith.constant 0 : i32
    %c0_i32_0 = arith.constant 0 : i32
    %c0_i32_1 = arith.constant 0 : i32
    return %c0_i32, %c0_i32_0 : i32, i32
  }
  func.func @transform_2(%arg0: i32) -> (i32, i32) {
    %c0_i32 = arith.constant 0 : i32
    %c0_i32_0 = arith.constant 0 : i32
    %c0_i32_1 = arith.constant 0 : i32
    return %c0_i32, %c0_i32_0 : i32, i32
  }
  func.func @transform_3(%arg0: i32) -> (i32, i32) {
    %c0_i32 = arith.constant 0 : i32
    %c0_i32_0 = arith.constant 0 : i32
    %c0_i32_1 = arith.constant 0 : i32
    return %c0_i32, %c0_i32_0 : i32, i32
  }
  func.func @transform_4(%arg0: i32) -> (i32, i32) {
    %c0_i32 = arith.constant 0 : i32
    %c0_i32_0 = arith.constant 0 : i32
    %c0_i32_1 = arith.constant 0 : i32
    return %c0_i32, %c0_i32_0 : i32, i32
  }
  func.func @transform_5(%arg0: i32) -> (i32, i32, i32) {
    %c0_i32 = arith.constant 0 : i32
    %c0_i32_0 = arith.constant 0 : i32
    %c0_i32_1 = arith.constant 0 : i32
    return %arg0, %c0_i32, %c0_i32_0 : i32, i32, i32
  }
}

module attributes {stable_mosaic.version = 11 : i64} {
  func.func @_block_kernel(%arg0: i32, %arg1: memref<1x16x32xf32, #tpu.memory_space<vmem>>, %arg2: memref<1x32xf32, #tpu.memory_space<vmem>>, %arg3: memref<1x32xf32, #tpu.memory_space<vmem>>, %arg4: memref<3x9x32xf32, #tpu.memory_space<vmem>>, %arg5: memref<3x32xf32, #tpu.memory_space<vmem>>, %arg6: memref<3x32xf32, #tpu.memory_space<vmem>>, %arg7: memref<4x16xbf16, #tpu.memory_space<vmem>>, %arg8: memref<3x32x32xbf16, #tpu.memory_space<vmem>>, %arg9: memref<3x32xf32, #tpu.memory_space<vmem>>, %arg10: memref<32x32xbf16, #tpu.memory_space<vmem>>, %arg11: memref<1x32xf32, #tpu.memory_space<vmem>>, %arg12: memref<1x32xf32, #tpu.memory_space<vmem>>, %arg13: memref<1x32xf32, #tpu.memory_space<vmem>>, %arg14: memref<32x128xbf16, #tpu.memory_space<vmem>>, %arg15: memref<1x128xf32, #tpu.memory_space<vmem>>, %arg16: memref<128x32xbf16, #tpu.memory_space<vmem>>, %arg17: memref<1x32xf32, #tpu.memory_space<vmem>>, %arg18: memref<1x16x32xf32, #tpu.memory_space<vmem>>, %arg19: memref<6x6x32xf32, #tpu.memory_space<vmem>>, %arg20: memref<16x32xf32, #tpu.memory_space<vmem>>, %arg21: memref<4x32xf32, #tpu.memory_space<vmem>>, %arg22: memref<4x32xf32, #tpu.memory_space<vmem>>, %arg23: memref<16x32xf32, #tpu.memory_space<vmem>>, %arg24: memref<16x32xf32, #tpu.memory_space<vmem>>) attributes {dimension_semantics = [#tpu.dimension_semantics<parallel>], iteration_bounds = array<i64: 2>, scalar_prefetch = 0 : i64, scratch_operands = 6 : i64, tpu.core_type = #tpu.core_type<tc>, window_params = [{transform_indices = @transform_0, window_bounds = array<i64: 1, 16, 32>}, {pipeline_mode = #tpu.pipeline_mode<synchronous>, transform_indices = @transform_1, window_bounds = array<i64: 1, 32>}, {pipeline_mode = #tpu.pipeline_mode<synchronous>, transform_indices = @transform_2, window_bounds = array<i64: 1, 32>}, {pipeline_mode = #tpu.pipeline_mode<synchronous>, transform_indices = @transform_3, window_bounds = array<i64: 3, 9, 32>}, {pipeline_mode = #tpu.pipeline_mode<synchronous>, transform_indices = @transform_4, window_bounds = array<i64: 3, 32>}, {pipeline_mode = #tpu.pipeline_mode<synchronous>, transform_indices = @transform_5, window_bounds = array<i64: 3, 32>}, {pipeline_mode = #tpu.pipeline_mode<synchronous>, transform_indices = @transform_6, window_bounds = array<i64: 4, 16>}, {pipeline_mode = #tpu.pipeline_mode<synchronous>, transform_indices = @transform_7, window_bounds = array<i64: 3, 32, 32>}, {pipeline_mode = #tpu.pipeline_mode<synchronous>, transform_indices = @transform_8, window_bounds = array<i64: 3, 32>}, {pipeline_mode = #tpu.pipeline_mode<synchronous>, transform_indices = @transform_9, window_bounds = array<i64: 32, 32>}, {pipeline_mode = #tpu.pipeline_mode<synchronous>, transform_indices = @transform_10, window_bounds = array<i64: 1, 32>}, {pipeline_mode = #tpu.pipeline_mode<synchronous>, transform_indices = @transform_11, window_bounds = array<i64: 1, 32>}, {pipeline_mode = #tpu.pipeline_mode<synchronous>, transform_indices = @transform_12, window_bounds = array<i64: 1, 32>}, {pipeline_mode = #tpu.pipeline_mode<synchronous>, transform_indices = @transform_13, window_bounds = array<i64: 32, 128>}, {pipeline_mode = #tpu.pipeline_mode<synchronous>, transform_indices = @transform_14, window_bounds = array<i64: 1, 128>}, {pipeline_mode = #tpu.pipeline_mode<synchronous>, transform_indices = @transform_15, window_bounds = array<i64: 128, 32>}, {pipeline_mode = #tpu.pipeline_mode<synchronous>, transform_indices = @transform_16, window_bounds = array<i64: 1, 32>}, {transform_indices = @transform_17, window_bounds = array<i64: 1, 16, 32>}]} {
    %c0 = arith.constant 0 : index
    %c0_0 = arith.constant 0 : index
    %c0_1 = arith.constant 0 : index
    %0 = vector.load %arg1[%c0, %c0_0, %c0_1] : memref<1x16x32xf32, #tpu.memory_space<vmem>>, vector<1x16x32xf32>
    %1 = vector.shape_cast %0 : vector<1x16x32xf32> to vector<16x32xf32>
    %c0_2 = arith.constant 0 : index
    %c0_3 = arith.constant 0 : index
    %2 = vector.load %arg2[%c0_2, %c0_3] : memref<1x32xf32, #tpu.memory_space<vmem>>, vector<1x32xf32>
    %c0_4 = arith.constant 0 : index
    %c0_5 = arith.constant 0 : index
    %3 = vector.load %arg3[%c0_4, %c0_5] : memref<1x32xf32, #tpu.memory_space<vmem>>, vector<1x32xf32>
    %cst = arith.constant dense<0.000000e+00> : vector<16xf32>
    %4 = vector.multi_reduction <add>, %1, %cst [1] : vector<16x32xf32> to vector<16xf32>
    %5 = vector.shape_cast %4 : vector<16xf32> to vector<16x1xf32>
    %cst_6 = arith.constant 3.200000e+01 : f32
    %6 = vector.broadcast %cst_6 : f32 to vector<16x1xf32>
    %7 = arith.divf %5, %6 : vector<16x1xf32>
    %8 = vector.broadcast %7 : vector<16x1xf32> to vector<16x32xf32>
    %9 = arith.subf %1, %8 : vector<16x32xf32>
    %10 = arith.mulf %9, %9 : vector<16x32xf32>
    %cst_7 = arith.constant dense<0.000000e+00> : vector<16xf32>
    %11 = vector.multi_reduction <add>, %10, %cst_7 [1] : vector<16x32xf32> to vector<16xf32>
    %12 = vector.shape_cast %11 : vector<16xf32> to vector<16x1xf32>
    %cst_8 = arith.constant 3.200000e+01 : f32
    %13 = vector.broadcast %cst_8 : f32 to vector<16x1xf32>
    %14 = arith.divf %12, %13 : vector<16x1xf32>
    %15 = vector.broadcast %7 : vector<16x1xf32> to vector<16x32xf32>
    %16 = arith.subf %1, %15 : vector<16x32xf32>
    %cst_9 = arith.constant 9.99999974E-6 : f32
    %17 = vector.broadcast %cst_9 : f32 to vector<16x1xf32>
    %18 = arith.addf %14, %17 : vector<16x1xf32>
    %19 = math.rsqrt %18 : vector<16x1xf32>
    %20 = vector.broadcast %19 : vector<16x1xf32> to vector<16x32xf32>
    %21 = arith.mulf %16, %20 : vector<16x32xf32>
    %22 = vector.broadcast %2 : vector<1x32xf32> to vector<16x32xf32>
    %23 = arith.mulf %21, %22 : vector<16x32xf32>
    %24 = vector.broadcast %3 : vector<1x32xf32> to vector<16x32xf32>
    %25 = arith.addf %23, %24 : vector<16x32xf32>
    %cst_10 = arith.constant 0.000000e+00 : f32
    %26 = vector.broadcast %cst_10 : f32 to vector<6x6x32xf32>
    %c0_11 = arith.constant 0 : index
    %c0_12 = arith.constant 0 : index
    %c0_13 = arith.constant 0 : index
    %27 = vector.load %arg19[%c0_11, %c0_12, %c0_13] : memref<6x6x32xf32, #tpu.memory_space<vmem>>, vector<6x6x32xf32>
    tpu.vector_store %arg19[%c0_11, %c0_12, %c0_13], %26 {strides = array<i32>} : memref<6x6x32xf32, #tpu.memory_space<vmem>>, vector<6x6x32xf32>,
    %28 = vector.extract_strided_slice %25 {offsets = [0, 0], sizes = [4, 32], strides = [1, 1]} : vector<16x32xf32> to vector<4x32xf32>
    %c1 = arith.constant 1 : index
    %c1_14 = arith.constant 1 : index
    %c0_15 = arith.constant 0 : index
    %29 = vector.load %arg19[%c1, %c1_14, %c0_15] : memref<6x6x32xf32, #tpu.memory_space<vmem>>, vector<1x4x32xf32>
    %30 = vector.shape_cast %29 : vector<1x4x32xf32> to vector<4x32xf32>
    %31 = vector.shape_cast %28 : vector<4x32xf32> to vector<1x4x32xf32>
    tpu.vector_store %arg19[%c1, %c1_14, %c0_15], %31 {strides = array<i32>} : memref<6x6x32xf32, #tpu.memory_space<vmem>>, vector<1x4x32xf32>,
    %32 = vector.extract_strided_slice %25 {offsets = [4, 0], sizes = [4, 32], strides = [1, 1]} : vector<16x32xf32> to vector<4x32xf32>
    %c2 = arith.constant 2 : index
    %c1_16 = arith.constant 1 : index
    %c0_17 = arith.constant 0 : index
    %33 = vector.load %arg19[%c2, %c1_16, %c0_17] : memref<6x6x32xf32, #tpu.memory_space<vmem>>, vector<1x4x32xf32>
    %34 = vector.shape_cast %33 : vector<1x4x32xf32> to vector<4x32xf32>
    %35 = vector.shape_cast %32 : vector<4x32xf32> to vector<1x4x32xf32>
    tpu.vector_store %arg19[%c2, %c1_16, %c0_17], %35 {strides = array<i32>} : memref<6x6x32xf32, #tpu.memory_space<vmem>>, vector<1x4x32xf32>,
    %36 = vector.extract_strided_slice %25 {offsets = [8, 0], sizes = [4, 32], strides = [1, 1]} : vector<16x32xf32> to vector<4x32xf32>
    %c3 = arith.constant 3 : index
    %c1_18 = arith.constant 1 : index
    %c0_19 = arith.constant 0 : index
    %37 = vector.load %arg19[%c3, %c1_18, %c0_19] : memref<6x6x32xf32, #tpu.memory_space<vmem>>, vector<1x4x32xf32>
    %38 = vector.shape_cast %37 : vector<1x4x32xf32> to vector<4x32xf32>
    %39 = vector.shape_cast %36 : vector<4x32xf32> to vector<1x4x32xf32>
    tpu.vector_store %arg19[%c3, %c1_18, %c0_19], %39 {strides = array<i32>} : memref<6x6x32xf32, #tpu.memory_space<vmem>>, vector<1x4x32xf32>,
    %40 = vector.extract_strided_slice %25 {offsets = [12, 0], sizes = [4, 32], strides = [1, 1]} : vector<16x32xf32> to vector<4x32xf32>
    %c4 = arith.constant 4 : index
    %c1_20 = arith.constant 1 : index
    %c0_21 = arith.constant 0 : index
    %41 = vector.load %arg19[%c4, %c1_20, %c0_21] : memref<6x6x32xf32, #tpu.memory_space<vmem>>, vector<1x4x32xf32>
    %42 = vector.shape_cast %41 : vector<1x4x32xf32> to vector<4x32xf32>
    %43 = vector.shape_cast %40 : vector<4x32xf32> to vector<1x4x32xf32>
    tpu.vector_store %arg19[%c4, %c1_20, %c0_21], %43 {strides = array<i32>} : memref<6x6x32xf32, #tpu.memory_space<vmem>>, vector<1x4x32xf32>,
    %c0_22 = arith.constant 0 : index
    %c0_23 = arith.constant 0 : index
    %c0_24 = arith.constant 0 : index
    %44 = vector.load %arg19[%c0_22, %c0_23, %c0_24] : memref<6x6x32xf32, #tpu.memory_space<vmem>>, vector<4x4x32xf32>
    %c0_25 = arith.constant 0 : index
    %c0_26 = arith.constant 0 : index
    %c0_27 = arith.constant 0 : index
    %45 = vector.load %arg4[%c0_25, %c0_26, %c0_27] : memref<3x9x32xf32, #tpu.memory_space<vmem>>, vector<1x1x32xf32>
    %46 = vector.shape_cast %45 : vector<1x1x32xf32> to vector<1x32xf32>
    %47 = vector.shape_cast %46 : vector<1x32xf32> to vector<1x1x32xf32>
    %c1_28 = arith.constant 1 : index
    %c0_29 = arith.constant 0 : index
    %c0_30 = arith.constant 0 : index
    %48 = vector.load %arg4[%c1_28, %c0_29, %c0_30] : memref<3x9x32xf32, #tpu.memory_space<vmem>>, vector<1x1x32xf32>
    %49 = vector.shape_cast %48 : vector<1x1x32xf32> to vector<1x32xf32>
    %50 = vector.shape_cast %49 : vector<1x32xf32> to vector<1x1x32xf32>
    %c2_31 = arith.constant 2 : index
    %c0_32 = arith.constant 0 : index
    %c0_33 = arith.constant 0 : index
    %51 = vector.load %arg4[%c2_31, %c0_32, %c0_33] : memref<3x9x32xf32, #tpu.memory_space<vmem>>, vector<1x1x32xf32>
    %52 = vector.shape_cast %51 : vector<1x1x32xf32> to vector<1x32xf32>
    %53 = vector.shape_cast %52 : vector<1x32xf32> to vector<1x1x32xf32>
    %54 = vector.broadcast %47 : vector<1x1x32xf32> to vector<4x4x32xf32>
    %55 = arith.mulf %44, %54 : vector<4x4x32xf32>
    %56 = vector.broadcast %50 : vector<1x1x32xf32> to vector<4x4x32xf32>
    %57 = arith.mulf %44, %56 : vector<4x4x32xf32>
    %58 = vector.broadcast %53 : vector<1x1x32xf32> to vector<4x4x32xf32>
    %59 = arith.mulf %44, %58 : vector<4x4x32xf32>
    %c0_34 = arith.constant 0 : index
    %c1_35 = arith.constant 1 : index
    %c0_36 = arith.constant 0 : index
    %60 = vector.load %arg19[%c0_34, %c1_35, %c0_36] : memref<6x6x32xf32, #tpu.memory_space<vmem>>, vector<4x4x32xf32>
    %c0_37 = arith.constant 0 : index
    %c1_38 = arith.constant 1 : index
    %c0_39 = arith.constant 0 : index
    %61 = vector.load %arg4[%c0_37, %c1_38, %c0_39] : memref<3x9x32xf32, #tpu.memory_space<vmem>>, vector<1x1x32xf32>
    %62 = vector.shape_cast %61 : vector<1x1x32xf32> to vector<1x32xf32>
    %63 = vector.shape_cast %62 : vector<1x32xf32> to vector<1x1x32xf32>
    %c1_40 = arith.constant 1 : index
    %c1_41 = arith.constant 1 : index
    %c0_42 = arith.constant 0 : index
    %64 = vector.load %arg4[%c1_40, %c1_41, %c0_42] : memref<3x9x32xf32, #tpu.memory_space<vmem>>, vector<1x1x32xf32>
    %65 = vector.shape_cast %64 : vector<1x1x32xf32> to vector<1x32xf32>
    %66 = vector.shape_cast %65 : vector<1x32xf32> to vector<1x1x32xf32>
    %c2_43 = arith.constant 2 : index
    %c1_44 = arith.constant 1 : index
    %c0_45 = arith.constant 0 : index
    %67 = vector.load %arg4[%c2_43, %c1_44, %c0_45] : memref<3x9x32xf32, #tpu.memory_space<vmem>>, vector<1x1x32xf32>
    %68 = vector.shape_cast %67 : vector<1x1x32xf32> to vector<1x32xf32>
    %69 = vector.shape_cast %68 : vector<1x32xf32> to vector<1x1x32xf32>
    %70 = vector.broadcast %63 : vector<1x1x32xf32> to vector<4x4x32xf32>
    %71 = arith.mulf %60, %70 : vector<4x4x32xf32>
    %72 = arith.addf %55, %71 : vector<4x4x32xf32>
    %73 = vector.broadcast %66 : vector<1x1x32xf32> to vector<4x4x32xf32>
    %74 = arith.mulf %60, %73 : vector<4x4x32xf32>
    %75 = arith.addf %57, %74 : vector<4x4x32xf32>
    %76 = vector.broadcast %69 : vector<1x1x32xf32> to vector<4x4x32xf32>
    %77 = arith.mulf %60, %76 : vector<4x4x32xf32>
    %78 = arith.addf %59, %77 : vector<4x4x32xf32>
    %c0_46 = arith.constant 0 : index
    %c2_47 = arith.constant 2 : index
    %c0_48 = arith.constant 0 : index
    %79 = vector.load %arg19[%c0_46, %c2_47, %c0_48] : memref<6x6x32xf32, #tpu.memory_space<vmem>>, vector<4x4x32xf32>
    %c0_49 = arith.constant 0 : index
    %c2_50 = arith.constant 2 : index
    %c0_51 = arith.constant 0 : index
    %80 = vector.load %arg4[%c0_49, %c2_50, %c0_51] : memref<3x9x32xf32, #tpu.memory_space<vmem>>, vector<1x1x32xf32>
    %81 = vector.shape_cast %80 : vector<1x1x32xf32> to vector<1x32xf32>
    %82 = vector.shape_cast %81 : vector<1x32xf32> to vector<1x1x32xf32>
    %c1_52 = arith.constant 1 : index
    %c2_53 = arith.constant 2 : index
    %c0_54 = arith.constant 0 : index
    %83 = vector.load %arg4[%c1_52, %c2_53, %c0_54] : memref<3x9x32xf32, #tpu.memory_space<vmem>>, vector<1x1x32xf32>
    %84 = vector.shape_cast %83 : vector<1x1x32xf32> to vector<1x32xf32>
    %85 = vector.shape_cast %84 : vector<1x32xf32> to vector<1x1x32xf32>
    %c2_55 = arith.constant 2 : index
    %c2_56 = arith.constant 2 : index
    %c0_57 = arith.constant 0 : index
    %86 = vector.load %arg4[%c2_55, %c2_56, %c0_57] : memref<3x9x32xf32, #tpu.memory_space<vmem>>, vector<1x1x32xf32>
    %87 = vector.shape_cast %86 : vector<1x1x32xf32> to vector<1x32xf32>
    %88 = vector.shape_cast %87 : vector<1x32xf32> to vector<1x1x32xf32>
    %89 = vector.broadcast %82 : vector<1x1x32xf32> to vector<4x4x32xf32>
    %90 = arith.mulf %79, %89 : vector<4x4x32xf32>
    %91 = arith.addf %72, %90 : vector<4x4x32xf32>
    %92 = vector.broadcast %85 : vector<1x1x32xf32> to vector<4x4x32xf32>
    %93 = arith.mulf %79, %92 : vector<4x4x32xf32>
    %94 = arith.addf %75, %93 : vector<4x4x32xf32>
    %95 = vector.broadcast %88 : vector<1x1x32xf32> to vector<4x4x32xf32>
    %96 = arith.mulf %79, %95 : vector<4x4x32xf32>
    %97 = arith.addf %78, %96 : vector<4x4x32xf32>
    %c1_58 = arith.constant 1 : index
    %c0_59 = arith.constant 0 : index
    %c0_60 = arith.constant 0 : index
    %98 = vector.load %arg19[%c1_58, %c0_59, %c0_60] : memref<6x6x32xf32, #tpu.memory_space<vmem>>, vector<4x4x32xf32>
    %c0_61 = arith.constant 0 : index
    %c3_62 = arith.constant 3 : index
    %c0_63 = arith.constant 0 : index
    %99 = vector.load %arg4[%c0_61, %c3_62, %c0_63] : memref<3x9x32xf32, #tpu.memory_space<vmem>>, vector<1x1x32xf32>
    %100 = vector.shape_cast %99 : vector<1x1x32xf32> to vector<1x32xf32>
    %101 = vector.shape_cast %100 : vector<1x32xf32> to vector<1x1x32xf32>
    %c1_64 = arith.constant 1 : index
    %c3_65 = arith.constant 3 : index
    %c0_66 = arith.constant 0 : index
    %102 = vector.load %arg4[%c1_64, %c3_65, %c0_66] : memref<3x9x32xf32, #tpu.memory_space<vmem>>, vector<1x1x32xf32>
    %103 = vector.shape_cast %102 : vector<1x1x32xf32> to vector<1x32xf32>
    %104 = vector.shape_cast %103 : vector<1x32xf32> to vector<1x1x32xf32>
    %c2_67 = arith.constant 2 : index
    %c3_68 = arith.constant 3 : index
    %c0_69 = arith.constant 0 : index
    %105 = vector.load %arg4[%c2_67, %c3_68, %c0_69] : memref<3x9x32xf32, #tpu.memory_space<vmem>>, vector<1x1x32xf32>
    %106 = vector.shape_cast %105 : vector<1x1x32xf32> to vector<1x32xf32>
    %107 = vector.shape_cast %106 : vector<1x32xf32> to vector<1x1x32xf32>
    %108 = vector.broadcast %101 : vector<1x1x32xf32> to vector<4x4x32xf32>
    %109 = arith.mulf %98, %108 : vector<4x4x32xf32>
    %110 = arith.addf %91, %109 : vector<4x4x32xf32>
    %111 = vector.broadcast %104 : vector<1x1x32xf32> to vector<4x4x32xf32>
    %112 = arith.mulf %98, %111 : vector<4x4x32xf32>
    %113 = arith.addf %94, %112 : vector<4x4x32xf32>
    %114 = vector.broadcast %107 : vector<1x1x32xf32> to vector<4x4x32xf32>
    %115 = arith.mulf %98, %114 : vector<4x4x32xf32>
    %116 = arith.addf %97, %115 : vector<4x4x32xf32>
    %c1_70 = arith.constant 1 : index
    %c1_71 = arith.constant 1 : index
    %c0_72 = arith.constant 0 : index
    %117 = vector.load %arg19[%c1_70, %c1_71, %c0_72] : memref<6x6x32xf32, #tpu.memory_space<vmem>>, vector<4x4x32xf32>
    %c0_73 = arith.constant 0 : index
    %c4_74 = arith.constant 4 : index
    %c0_75 = arith.constant 0 : index
    %118 = vector.load %arg4[%c0_73, %c4_74, %c0_75] : memref<3x9x32xf32, #tpu.memory_space<vmem>>, vector<1x1x32xf32>
    %119 = vector.shape_cast %118 : vector<1x1x32xf32> to vector<1x32xf32>
    %120 = vector.shape_cast %119 : vector<1x32xf32> to vector<1x1x32xf32>
    %c1_76 = arith.constant 1 : index
    %c4_77 = arith.constant 4 : index
    %c0_78 = arith.constant 0 : index
    %121 = vector.load %arg4[%c1_76, %c4_77, %c0_78] : memref<3x9x32xf32, #tpu.memory_space<vmem>>, vector<1x1x32xf32>
    %122 = vector.shape_cast %121 : vector<1x1x32xf32> to vector<1x32xf32>
    %123 = vector.shape_cast %122 : vector<1x32xf32> to vector<1x1x32xf32>
    %c2_79 = arith.constant 2 : index
    %c4_80 = arith.constant 4 : index
    %c0_81 = arith.constant 0 : index
    %124 = vector.load %arg4[%c2_79, %c4_80, %c0_81] : memref<3x9x32xf32, #tpu.memory_space<vmem>>, vector<1x1x32xf32>
    %125 = vector.shape_cast %124 : vector<1x1x32xf32> to vector<1x32xf32>
    %126 = vector.shape_cast %125 : vector<1x32xf32> to vector<1x1x32xf32>
    %127 = vector.broadcast %120 : vector<1x1x32xf32> to vector<4x4x32xf32>
    %128 = arith.mulf %117, %127 : vector<4x4x32xf32>
    %129 = arith.addf %110, %128 : vector<4x4x32xf32>
    %130 = vector.broadcast %123 : vector<1x1x32xf32> to vector<4x4x32xf32>
    %131 = arith.mulf %117, %130 : vector<4x4x32xf32>
    %132 = arith.addf %113, %131 : vector<4x4x32xf32>
    %133 = vector.broadcast %126 : vector<1x1x32xf32> to vector<4x4x32xf32>
    %134 = arith.mulf %117, %133 : vector<4x4x32xf32>
    %135 = arith.addf %116, %134 : vector<4x4x32xf32>
    %c1_82 = arith.constant 1 : index
    %c2_83 = arith.constant 2 : index
    %c0_84 = arith.constant 0 : index
    %136 = vector.load %arg19[%c1_82, %c2_83, %c0_84] : memref<6x6x32xf32, #tpu.memory_space<vmem>>, vector<4x4x32xf32>
    %c0_85 = arith.constant 0 : index
    %c5 = arith.constant 5 : index
    %c0_86 = arith.constant 0 : index
    %137 = vector.load %arg4[%c0_85, %c5, %c0_86] : memref<3x9x32xf32, #tpu.memory_space<vmem>>, vector<1x1x32xf32>
    %138 = vector.shape_cast %137 : vector<1x1x32xf32> to vector<1x32xf32>
    %139 = vector.shape_cast %138 : vector<1x32xf32> to vector<1x1x32xf32>
    %c1_87 = arith.constant 1 : index
    %c5_88 = arith.constant 5 : index
    %c0_89 = arith.constant 0 : index
    %140 = vector.load %arg4[%c1_87, %c5_88, %c0_89] : memref<3x9x32xf32, #tpu.memory_space<vmem>>, vector<1x1x32xf32>
    %141 = vector.shape_cast %140 : vector<1x1x32xf32> to vector<1x32xf32>
    %142 = vector.shape_cast %141 : vector<1x32xf32> to vector<1x1x32xf32>
    %c2_90 = arith.constant 2 : index
    %c5_91 = arith.constant 5 : index
    %c0_92 = arith.constant 0 : index
    %143 = vector.load %arg4[%c2_90, %c5_91, %c0_92] : memref<3x9x32xf32, #tpu.memory_space<vmem>>, vector<1x1x32xf32>
    %144 = vector.shape_cast %143 : vector<1x1x32xf32> to vector<1x32xf32>
    %145 = vector.shape_cast %144 : vector<1x32xf32> to vector<1x1x32xf32>
    %146 = vector.broadcast %139 : vector<1x1x32xf32> to vector<4x4x32xf32>
    %147 = arith.mulf %136, %146 : vector<4x4x32xf32>
    %148 = arith.addf %129, %147 : vector<4x4x32xf32>
    %149 = vector.broadcast %142 : vector<1x1x32xf32> to vector<4x4x32xf32>
    %150 = arith.mulf %136, %149 : vector<4x4x32xf32>
    %151 = arith.addf %132, %150 : vector<4x4x32xf32>
    %152 = vector.broadcast %145 : vector<1x1x32xf32> to vector<4x4x32xf32>
    %153 = arith.mulf %136, %152 : vector<4x4x32xf32>
    %154 = arith.addf %135, %153 : vector<4x4x32xf32>
    %c2_93 = arith.constant 2 : index
    %c0_94 = arith.constant 0 : index
    %c0_95 = arith.constant 0 : index
    %155 = vector.load %arg19[%c2_93, %c0_94, %c0_95] : memref<6x6x32xf32, #tpu.memory_space<vmem>>, vector<4x4x32xf32>
    %c0_96 = arith.constant 0 : index
    %c6 = arith.constant 6 : index
    %c0_97 = arith.constant 0 : index
    %156 = vector.load %arg4[%c0_96, %c6, %c0_97] : memref<3x9x32xf32, #tpu.memory_space<vmem>>, vector<1x1x32xf32>
    %157 = vector.shape_cast %156 : vector<1x1x32xf32> to vector<1x32xf32>
    %158 = vector.shape_cast %157 : vector<1x32xf32> to vector<1x1x32xf32>
    %c1_98 = arith.constant 1 : index
    %c6_99 = arith.constant 6 : index
    %c0_100 = arith.constant 0 : index
    %159 = vector.load %arg4[%c1_98, %c6_99, %c0_100] : memref<3x9x32xf32, #tpu.memory_space<vmem>>, vector<1x1x32xf32>
    %160 = vector.shape_cast %159 : vector<1x1x32xf32> to vector<1x32xf32>
    %161 = vector.shape_cast %160 : vector<1x32xf32> to vector<1x1x32xf32>
    %c2_101 = arith.constant 2 : index
    %c6_102 = arith.constant 6 : index
    %c0_103 = arith.constant 0 : index
    %162 = vector.load %arg4[%c2_101, %c6_102, %c0_103] : memref<3x9x32xf32, #tpu.memory_space<vmem>>, vector<1x1x32xf32>
    %163 = vector.shape_cast %162 : vector<1x1x32xf32> to vector<1x32xf32>
    %164 = vector.shape_cast %163 : vector<1x32xf32> to vector<1x1x32xf32>
    %165 = vector.broadcast %158 : vector<1x1x32xf32> to vector<4x4x32xf32>
    %166 = arith.mulf %155, %165 : vector<4x4x32xf32>
    %167 = arith.addf %148, %166 : vector<4x4x32xf32>
    %168 = vector.broadcast %161 : vector<1x1x32xf32> to vector<4x4x32xf32>
    %169 = arith.mulf %155, %168 : vector<4x4x32xf32>
    %170 = arith.addf %151, %169 : vector<4x4x32xf32>
    %171 = vector.broadcast %164 : vector<1x1x32xf32> to vector<4x4x32xf32>
    %172 = arith.mulf %155, %171 : vector<4x4x32xf32>
    %173 = arith.addf %154, %172 : vector<4x4x32xf32>
    %c2_104 = arith.constant 2 : index
    %c1_105 = arith.constant 1 : index
    %c0_106 = arith.constant 0 : index
    %174 = vector.load %arg19[%c2_104, %c1_105, %c0_106] : memref<6x6x32xf32, #tpu.memory_space<vmem>>, vector<4x4x32xf32>
    %c0_107 = arith.constant 0 : index
    %c7 = arith.constant 7 : index
    %c0_108 = arith.constant 0 : index
    %175 = vector.load %arg4[%c0_107, %c7, %c0_108] : memref<3x9x32xf32, #tpu.memory_space<vmem>>, vector<1x1x32xf32>
    %176 = vector.shape_cast %175 : vector<1x1x32xf32> to vector<1x32xf32>
    %177 = vector.shape_cast %176 : vector<1x32xf32> to vector<1x1x32xf32>
    %c1_109 = arith.constant 1 : index
    %c7_110 = arith.constant 7 : index
    %c0_111 = arith.constant 0 : index
    %178 = vector.load %arg4[%c1_109, %c7_110, %c0_111] : memref<3x9x32xf32, #tpu.memory_space<vmem>>, vector<1x1x32xf32>
    %179 = vector.shape_cast %178 : vector<1x1x32xf32> to vector<1x32xf32>
    %180 = vector.shape_cast %179 : vector<1x32xf32> to vector<1x1x32xf32>
    %c2_112 = arith.constant 2 : index
    %c7_113 = arith.constant 7 : index
    %c0_114 = arith.constant 0 : index
    %181 = vector.load %arg4[%c2_112, %c7_113, %c0_114] : memref<3x9x32xf32, #tpu.memory_space<vmem>>, vector<1x1x32xf32>
    %182 = vector.shape_cast %181 : vector<1x1x32xf32> to vector<1x32xf32>
    %183 = vector.shape_cast %182 : vector<1x32xf32> to vector<1x1x32xf32>
    %184 = vector.broadcast %177 : vector<1x1x32xf32> to vector<4x4x32xf32>
    %185 = arith.mulf %174, %184 : vector<4x4x32xf32>
    %186 = arith.addf %167, %185 : vector<4x4x32xf32>
    %187 = vector.broadcast %180 : vector<1x1x32xf32> to vector<4x4x32xf32>
    %188 = arith.mulf %174, %187 : vector<4x4x32xf32>
    %189 = arith.addf %170, %188 : vector<4x4x32xf32>
    %190 = vector.broadcast %183 : vector<1x1x32xf32> to vector<4x4x32xf32>
    %191 = arith.mulf %174, %190 : vector<4x4x32xf32>
    %192 = arith.addf %173, %191 : vector<4x4x32xf32>
    %c2_115 = arith.constant 2 : index
    %c2_116 = arith.constant 2 : index
    %c0_117 = arith.constant 0 : index
    %193 = vector.load %arg19[%c2_115, %c2_116, %c0_117] : memref<6x6x32xf32, #tpu.memory_space<vmem>>, vector<4x4x32xf32>
    %c0_118 = arith.constant 0 : index
    %c8 = arith.constant 8 : index
    %c0_119 = arith.constant 0 : index
    %194 = vector.load %arg4[%c0_118, %c8, %c0_119] : memref<3x9x32xf32, #tpu.memory_space<vmem>>, vector<1x1x32xf32>
    %195 = vector.shape_cast %194 : vector<1x1x32xf32> to vector<1x32xf32>
    %196 = vector.shape_cast %195 : vector<1x32xf32> to vector<1x1x32xf32>
    %c1_120 = arith.constant 1 : index
    %c8_121 = arith.constant 8 : index
    %c0_122 = arith.constant 0 : index
    %197 = vector.load %arg4[%c1_120, %c8_121, %c0_122] : memref<3x9x32xf32, #tpu.memory_space<vmem>>, vector<1x1x32xf32>
    %198 = vector.shape_cast %197 : vector<1x1x32xf32> to vector<1x32xf32>
    %199 = vector.shape_cast %198 : vector<1x32xf32> to vector<1x1x32xf32>
    %c2_123 = arith.constant 2 : index
    %c8_124 = arith.constant 8 : index
    %c0_125 = arith.constant 0 : index
    %200 = vector.load %arg4[%c2_123, %c8_124, %c0_125] : memref<3x9x32xf32, #tpu.memory_space<vmem>>, vector<1x1x32xf32>
    %201 = vector.shape_cast %200 : vector<1x1x32xf32> to vector<1x32xf32>
    %202 = vector.shape_cast %201 : vector<1x32xf32> to vector<1x1x32xf32>
    %203 = vector.broadcast %196 : vector<1x1x32xf32> to vector<4x4x32xf32>
    %204 = arith.mulf %193, %203 : vector<4x4x32xf32>
    %205 = arith.addf %186, %204 : vector<4x4x32xf32>
    %206 = vector.broadcast %199 : vector<1x1x32xf32> to vector<4x4x32xf32>
    %207 = arith.mulf %193, %206 : vector<4x4x32xf32>
    %208 = arith.addf %189, %207 : vector<4x4x32xf32>
    %209 = vector.broadcast %202 : vector<1x1x32xf32> to vector<4x4x32xf32>
    %210 = arith.mulf %193, %209 : vector<4x4x32xf32>
    %211 = arith.addf %192, %210 : vector<4x4x32xf32>
    %c0_126 = arith.constant 0 : index
    %c0_127 = arith.constant 0 : index
    %212 = vector.load %arg5[%c0_126, %c0_127] : memref<3x32xf32, #tpu.memory_space<vmem>>, vector<1x32xf32>
    %213 = vector.shape_cast %212 : vector<1x32xf32> to vector<1x1x32xf32>
    %214 = vector.broadcast %213 : vector<1x1x32xf32> to vector<4x4x32xf32>
    %215 = arith.mulf %205, %214 : vector<4x4x32xf32>
    %c0_128 = arith.constant 0 : index
    %c0_129 = arith.constant 0 : index
    %216 = vector.load %arg6[%c0_128, %c0_129] : memref<3x32xf32, #tpu.memory_space<vmem>>, vector<1x32xf32>
    %217 = vector.shape_cast %216 : vector<1x32xf32> to vector<1x1x32xf32>
    %218 = vector.broadcast %217 : vector<1x1x32xf32> to vector<4x4x32xf32>
    %219 = arith.addf %215, %218 : vector<4x4x32xf32>
    %c1_130 = arith.constant 1 : index
    %c0_131 = arith.constant 0 : index
    %220 = vector.load %arg5[%c1_130, %c0_131] : memref<3x32xf32, #tpu.memory_space<vmem>>, vector<1x32xf32>
    %221 = vector.shape_cast %220 : vector<1x32xf32> to vector<1x1x32xf32>
    %222 = vector.broadcast %221 : vector<1x1x32xf32> to vector<4x4x32xf32>
    %223 = arith.mulf %208, %222 : vector<4x4x32xf32>
    %c1_132 = arith.constant 1 : index
    %c0_133 = arith.constant 0 : index
    %224 = vector.load %arg6[%c1_132, %c0_133] : memref<3x32xf32, #tpu.memory_space<vmem>>, vector<1x32xf32>
    %225 = vector.shape_cast %224 : vector<1x32xf32> to vector<1x1x32xf32>
    %226 = vector.broadcast %225 : vector<1x1x32xf32> to vector<4x4x32xf32>
    %227 = arith.addf %223, %226 : vector<4x4x32xf32>
    %c2_134 = arith.constant 2 : index
    %c0_135 = arith.constant 0 : index
    %228 = vector.load %arg5[%c2_134, %c0_135] : memref<3x32xf32, #tpu.memory_space<vmem>>, vector<1x32xf32>
    %229 = vector.shape_cast %228 : vector<1x32xf32> to vector<1x1x32xf32>
    %230 = vector.broadcast %229 : vector<1x1x32xf32> to vector<4x4x32xf32>
    %231 = arith.mulf %211, %230 : vector<4x4x32xf32>
    %c2_136 = arith.constant 2 : index
    %c0_137 = arith.constant 0 : index
    %232 = vector.load %arg6[%c2_136, %c0_137] : memref<3x32xf32, #tpu.memory_space<vmem>>, vector<1x32xf32>
    %233 = vector.shape_cast %232 : vector<1x32xf32> to vector<1x1x32xf32>
    %234 = vector.broadcast %233 : vector<1x1x32xf32> to vector<4x4x32xf32>
    %235 = arith.addf %231, %234 : vector<4x4x32xf32>
    %236 = vector.extract_strided_slice %219 {offsets = [0, 0, 0], sizes = [1, 4, 32], strides = [1, 1, 1]} : vector<4x4x32xf32> to vector<1x4x32xf32>
    %237 = vector.shape_cast %236 : vector<1x4x32xf32> to vector<4x32xf32>
    %c0_138 = arith.constant 0 : index
    %c0_139 = arith.constant 0 : index
    %238 = vector.load %arg20[%c0_138, %c0_139] : memref<16x32xf32, #tpu.memory_space<vmem>>, vector<4x32xf32>
    tpu.vector_store %arg20[%c0_138, %c0_139], %237 {strides = array<i32>} : memref<16x32xf32, #tpu.memory_space<vmem>>, vector<4x32xf32>,
    %239 = vector.extract_strided_slice %227 {offsets = [0, 0, 0], sizes = [1, 4, 32], strides = [1, 1, 1]} : vector<4x4x32xf32> to vector<1x4x32xf32>
    %240 = vector.shape_cast %239 : vector<1x4x32xf32> to vector<4x32xf32>
    %c0_140 = arith.constant 0 : index
    %c0_141 = arith.constant 0 : index
    %241 = vector.load %arg23[%c0_140, %c0_141] : memref<16x32xf32, #tpu.memory_space<vmem>>, vector<4x32xf32>
    tpu.vector_store %arg23[%c0_140, %c0_141], %240 {strides = array<i32>} : memref<16x32xf32, #tpu.memory_space<vmem>>, vector<4x32xf32>,
    %242 = vector.extract_strided_slice %235 {offsets = [0, 0, 0], sizes = [1, 4, 32], strides = [1, 1, 1]} : vector<4x4x32xf32> to vector<1x4x32xf32>
    %243 = vector.shape_cast %242 : vector<1x4x32xf32> to vector<4x32xf32>
    %c0_142 = arith.constant 0 : index
    %c0_143 = arith.constant 0 : index
    %244 = vector.load %arg24[%c0_142, %c0_143] : memref<16x32xf32, #tpu.memory_space<vmem>>, vector<4x32xf32>
    tpu.vector_store %arg24[%c0_142, %c0_143], %243 {strides = array<i32>} : memref<16x32xf32, #tpu.memory_space<vmem>>, vector<4x32xf32>,
    %245 = vector.extract_strided_slice %219 {offsets = [1, 0, 0], sizes = [1, 4, 32], strides = [1, 1, 1]} : vector<4x4x32xf32> to vector<1x4x32xf32>
    %246 = vector.shape_cast %245 : vector<1x4x32xf32> to vector<4x32xf32>
    %c4_144 = arith.constant 4 : index
    %c0_145 = arith.constant 0 : index
    %247 = vector.load %arg20[%c4_144, %c0_145] : memref<16x32xf32, #tpu.memory_space<vmem>>, vector<4x32xf32>
    tpu.vector_store %arg20[%c4_144, %c0_145], %246 {strides = array<i32>} : memref<16x32xf32, #tpu.memory_space<vmem>>, vector<4x32xf32>,
    %248 = vector.extract_strided_slice %227 {offsets = [1, 0, 0], sizes = [1, 4, 32], strides = [1, 1, 1]} : vector<4x4x32xf32> to vector<1x4x32xf32>
    %249 = vector.shape_cast %248 : vector<1x4x32xf32> to vector<4x32xf32>
    %c4_146 = arith.constant 4 : index
    %c0_147 = arith.constant 0 : index
    %250 = vector.load %arg23[%c4_146, %c0_147] : memref<16x32xf32, #tpu.memory_space<vmem>>, vector<4x32xf32>
    tpu.vector_store %arg23[%c4_146, %c0_147], %249 {strides = array<i32>} : memref<16x32xf32, #tpu.memory_space<vmem>>, vector<4x32xf32>,
    %251 = vector.extract_strided_slice %235 {offsets = [1, 0, 0], sizes = [1, 4, 32], strides = [1, 1, 1]} : vector<4x4x32xf32> to vector<1x4x32xf32>
    %252 = vector.shape_cast %251 : vector<1x4x32xf32> to vector<4x32xf32>
    %c4_148 = arith.constant 4 : index
    %c0_149 = arith.constant 0 : index
    %253 = vector.load %arg24[%c4_148, %c0_149] : memref<16x32xf32, #tpu.memory_space<vmem>>, vector<4x32xf32>
    tpu.vector_store %arg24[%c4_148, %c0_149], %252 {strides = array<i32>} : memref<16x32xf32, #tpu.memory_space<vmem>>, vector<4x32xf32>,
    %254 = vector.extract_strided_slice %219 {offsets = [2, 0, 0], sizes = [1, 4, 32], strides = [1, 1, 1]} : vector<4x4x32xf32> to vector<1x4x32xf32>
    %255 = vector.shape_cast %254 : vector<1x4x32xf32> to vector<4x32xf32>
    %c8_150 = arith.constant 8 : index
    %c0_151 = arith.constant 0 : index
    %256 = vector.load %arg20[%c8_150, %c0_151] : memref<16x32xf32, #tpu.memory_space<vmem>>, vector<4x32xf32>
    tpu.vector_store %arg20[%c8_150, %c0_151], %255 {strides = array<i32>} : memref<16x32xf32, #tpu.memory_space<vmem>>, vector<4x32xf32>,
    %257 = vector.extract_strided_slice %227 {offsets = [2, 0, 0], sizes = [1, 4, 32], strides = [1, 1, 1]} : vector<4x4x32xf32> to vector<1x4x32xf32>
    %258 = vector.shape_cast %257 : vector<1x4x32xf32> to vector<4x32xf32>
    %c8_152 = arith.constant 8 : index
    %c0_153 = arith.constant 0 : index
    %259 = vector.load %arg23[%c8_152, %c0_153] : memref<16x32xf32, #tpu.memory_space<vmem>>, vector<4x32xf32>
    tpu.vector_store %arg23[%c8_152, %c0_153], %258 {strides = array<i32>} : memref<16x32xf32, #tpu.memory_space<vmem>>, vector<4x32xf32>,
    %260 = vector.extract_strided_slice %235 {offsets = [2, 0, 0], sizes = [1, 4, 32], strides = [1, 1, 1]} : vector<4x4x32xf32> to vector<1x4x32xf32>
    %261 = vector.shape_cast %260 : vector<1x4x32xf32> to vector<4x32xf32>
    %c8_154 = arith.constant 8 : index
    %c0_155 = arith.constant 0 : index
    %262 = vector.load %arg24[%c8_154, %c0_155] : memref<16x32xf32, #tpu.memory_space<vmem>>, vector<4x32xf32>
    tpu.vector_store %arg24[%c8_154, %c0_155], %261 {strides = array<i32>} : memref<16x32xf32, #tpu.memory_space<vmem>>, vector<4x32xf32>,
    %263 = vector.extract_strided_slice %219 {offsets = [3, 0, 0], sizes = [1, 4, 32], strides = [1, 1, 1]} : vector<4x4x32xf32> to vector<1x4x32xf32>
    %264 = vector.shape_cast %263 : vector<1x4x32xf32> to vector<4x32xf32>
    %c12 = arith.constant 12 : index
    %c0_156 = arith.constant 0 : index
    %265 = vector.load %arg20[%c12, %c0_156] : memref<16x32xf32, #tpu.memory_space<vmem>>, vector<4x32xf32>
    tpu.vector_store %arg20[%c12, %c0_156], %264 {strides = array<i32>} : memref<16x32xf32, #tpu.memory_space<vmem>>, vector<4x32xf32>,
    %266 = vector.extract_strided_slice %227 {offsets = [3, 0, 0], sizes = [1, 4, 32], strides = [1, 1, 1]} : vector<4x4x32xf32> to vector<1x4x32xf32>
    %267 = vector.shape_cast %266 : vector<1x4x32xf32> to vector<4x32xf32>
    %c12_157 = arith.constant 12 : index
    %c0_158 = arith.constant 0 : index
    %268 = vector.load %arg23[%c12_157, %c0_158] : memref<16x32xf32, #tpu.memory_space<vmem>>, vector<4x32xf32>
    tpu.vector_store %arg23[%c12_157, %c0_158], %267 {strides = array<i32>} : memref<16x32xf32, #tpu.memory_space<vmem>>, vector<4x32xf32>,
    %269 = vector.extract_strided_slice %235 {offsets = [3, 0, 0], sizes = [1, 4, 32], strides = [1, 1, 1]} : vector<4x4x32xf32> to vector<1x4x32xf32>
    %270 = vector.shape_cast %269 : vector<1x4x32xf32> to vector<4x32xf32>
    %c12_159 = arith.constant 12 : index
    %c0_160 = arith.constant 0 : index
    %271 = vector.load %arg24[%c12_159, %c0_160] : memref<16x32xf32, #tpu.memory_space<vmem>>, vector<4x32xf32>
    tpu.vector_store %arg24[%c12_159, %c0_160], %270 {strides = array<i32>} : memref<16x32xf32, #tpu.memory_space<vmem>>, vector<4x32xf32>,
    %c0_161 = arith.constant 0 : index
    %c0_162 = arith.constant 0 : index
    %272 = vector.load %arg7[%c0_161, %c0_162] : memref<4x16xbf16, #tpu.memory_space<vmem>>, vector<4x16xbf16>
    %c0_163 = arith.constant 0 : index
    %c0_164 = arith.constant 0 : index
    %273 = vector.load %arg23[%c0_163, %c0_164] : memref<16x32xf32, #tpu.memory_space<vmem>>, vector<16x32xf32>
    %274 = arith.truncf %273 : vector<16x32xf32> to vector<16x32xbf16>
    %cst_165 = arith.constant dense<0.000000e+00> : vector<4x32xf32>
    %275 = tpu.matmul %272, %274, %cst_165 {dimension_numbers = #tpu.dot_dimension_numbers<[1], [0], [0], [1], [0, 0, 1, 1], [], []>} : vector<4x16xbf16>, vector<16x32xbf16>, vector<4x32xf32> -> vector<4x32xf32>
    %c0_166 = arith.constant 0 : index
    %c0_167 = arith.constant 0 : index
    %276 = vector.load %arg21[%c0_166, %c0_167] : memref<4x32xf32, #tpu.memory_space<vmem>>, vector<4x32xf32>
    tpu.vector_store %arg21[%c0_166, %c0_167], %275 {strides = array<i32>} : memref<4x32xf32, #tpu.memory_space<vmem>>, vector<4x32xf32>,
    %c0_168 = arith.constant 0 : index
    %c0_169 = arith.constant 0 : index
    %277 = vector.load %arg24[%c0_168, %c0_169] : memref<16x32xf32, #tpu.memory_space<vmem>>, vector<16x32xf32>
    %278 = arith.truncf %277 : vector<16x32xf32> to vector<16x32xbf16>
    %cst_170 = arith.constant dense<0.000000e+00> : vector<4x32xf32>
    %279 = tpu.matmul %272, %278, %cst_170 {dimension_numbers = #tpu.dot_dimension_numbers<[1], [0], [0], [1], [0, 0, 1, 1], [], []>} : vector<4x16xbf16>, vector<16x32xbf16>, vector<4x32xf32> -> vector<4x32xf32>
    %c0_171 = arith.constant 0 : index
    %c0_172 = arith.constant 0 : index
    %280 = vector.load %arg22[%c0_171, %c0_172] : memref<4x32xf32, #tpu.memory_space<vmem>>, vector<4x32xf32>
    tpu.vector_store %arg22[%c0_171, %c0_172], %279 {strides = array<i32>} : memref<4x32xf32, #tpu.memory_space<vmem>>, vector<4x32xf32>,
    %c0_173 = arith.constant 0 : index
    %c0_174 = arith.constant 0 : index
    %281 = vector.load %arg20[%c0_173, %c0_174] : memref<16x32xf32, #tpu.memory_space<vmem>>, vector<16x32xf32>
    %282 = arith.truncf %281 : vector<16x32xf32> to vector<16x32xbf16>
    %c0_175 = arith.constant 0 : index
    %c0_176 = arith.constant 0 : index
    %c0_177 = arith.constant 0 : index
    %283 = vector.load %arg8[%c0_175, %c0_176, %c0_177] : memref<3x32x32xbf16, #tpu.memory_space<vmem>>, vector<1x32x32xbf16>
    %284 = vector.shape_cast %283 : vector<1x32x32xbf16> to vector<32x32xbf16>
    %cst_178 = arith.constant dense<0.000000e+00> : vector<16x32xf32>
    %285 = tpu.matmul %282, %284, %cst_178 {dimension_numbers = #tpu.dot_dimension_numbers<[1], [0], [0], [1], [0, 0, 1, 1], [], []>} : vector<16x32xbf16>, vector<32x32xbf16>, vector<16x32xf32> -> vector<16x32xf32>
    %c0_179 = arith.constant 0 : index
    %c0_180 = arith.constant 0 : index
    %286 = vector.load %arg9[%c0_179, %c0_180] : memref<3x32xf32, #tpu.memory_space<vmem>>, vector<1x32xf32>
    %287 = vector.broadcast %286 : vector<1x32xf32> to vector<16x32xf32>
    %288 = arith.addf %285, %287 : vector<16x32xf32>
    %c0_181 = arith.constant 0 : index
    %c0_182 = arith.constant 0 : index
    %289 = vector.load %arg21[%c0_181, %c0_182] : memref<4x32xf32, #tpu.memory_space<vmem>>, vector<4x32xf32>
    %290 = arith.truncf %289 : vector<4x32xf32> to vector<4x32xbf16>
    %c1_183 = arith.constant 1 : index
    %c0_184 = arith.constant 0 : index
    %c0_185 = arith.constant 0 : index
    %291 = vector.load %arg8[%c1_183, %c0_184, %c0_185] : memref<3x32x32xbf16, #tpu.memory_space<vmem>>, vector<1x32x32xbf16>
    %292 = vector.shape_cast %291 : vector<1x32x32xbf16> to vector<32x32xbf16>
    %cst_186 = arith.constant dense<0.000000e+00> : vector<4x32xf32>
    %293 = tpu.matmul %290, %292, %cst_186 {dimension_numbers = #tpu.dot_dimension_numbers<[1], [0], [0], [1], [0, 0, 1, 1], [], []>} : vector<4x32xbf16>, vector<32x32xbf16>, vector<4x32xf32> -> vector<4x32xf32>
    %c1_187 = arith.constant 1 : index
    %c0_188 = arith.constant 0 : index
    %294 = vector.load %arg9[%c1_187, %c0_188] : memref<3x32xf32, #tpu.memory_space<vmem>>, vector<1x32xf32>
    %295 = vector.broadcast %294 : vector<1x32xf32> to vector<4x32xf32>
    %296 = arith.addf %293, %295 : vector<4x32xf32>
    %c0_189 = arith.constant 0 : index
    %c0_190 = arith.constant 0 : index
    %297 = vector.load %arg22[%c0_189, %c0_190] : memref<4x32xf32, #tpu.memory_space<vmem>>, vector<4x32xf32>
    %298 = arith.truncf %297 : vector<4x32xf32> to vector<4x32xbf16>
    %c2_191 = arith.constant 2 : index
    %c0_192 = arith.constant 0 : index
    %c0_193 = arith.constant 0 : index
    %299 = vector.load %arg8[%c2_191, %c0_192, %c0_193] : memref<3x32x32xbf16, #tpu.memory_space<vmem>>, vector<1x32x32xbf16>
    %300 = vector.shape_cast %299 : vector<1x32x32xbf16> to vector<32x32xbf16>
    %cst_194 = arith.constant dense<0.000000e+00> : vector<4x32xf32>
    %301 = tpu.matmul %298, %300, %cst_194 {dimension_numbers = #tpu.dot_dimension_numbers<[1], [0], [0], [1], [0, 0, 1, 1], [], []>} : vector<4x32xbf16>, vector<32x32xbf16>, vector<4x32xf32> -> vector<4x32xf32>
    %c2_195 = arith.constant 2 : index
    %c0_196 = arith.constant 0 : index
    %302 = vector.load %arg9[%c2_195, %c0_196] : memref<3x32xf32, #tpu.memory_space<vmem>>, vector<1x32xf32>
    %303 = vector.broadcast %302 : vector<1x32xf32> to vector<4x32xf32>
    %304 = arith.addf %301, %303 : vector<4x32xf32>
    %305 = vector.extract_strided_slice %288 {offsets = [0, 0], sizes = [16, 16], strides = [1, 1]} : vector<16x32xf32> to vector<16x16xf32>
    %306 = vector.extract_strided_slice %296 {offsets = [0, 0], sizes = [4, 16], strides = [1, 1]} : vector<4x32xf32> to vector<4x16xf32>
    %307 = vector.extract_strided_slice %304 {offsets = [0, 0], sizes = [4, 16], strides = [1, 1]} : vector<4x32xf32> to vector<4x16xf32>
    %308 = arith.truncf %305 : vector<16x16xf32> to vector<16x16xbf16>
    %309 = arith.truncf %306 : vector<4x16xf32> to vector<4x16xbf16>
    %cst_197 = arith.constant dense<0.000000e+00> : vector<16x4xf32>
    %310 = tpu.matmul %308, %309, %cst_197 {dimension_numbers = #tpu.dot_dimension_numbers<[1], [1], [0], [0], [0, 0, 1, 0], [], []>} : vector<16x16xbf16>, vector<4x16xbf16>, vector<16x4xf32> -> vector<16x4xf32>
    %cst_198 = arith.constant dense<0xFF800000> : vector<16xf32>
    %311 = vector.multi_reduction <maximumf>, %310, %cst_198 [1] : vector<16x4xf32> to vector<16xf32>
    %312 = vector.shape_cast %311 : vector<16xf32> to vector<16x1xf32>
    %313 = vector.broadcast %312 : vector<16x1xf32> to vector<16x4xf32>
    %314 = arith.subf %310, %313 : vector<16x4xf32>
    %315 = math.exp %314 : vector<16x4xf32>
    %cst_199 = arith.constant dense<0.000000e+00> : vector<16xf32>
    %316 = vector.multi_reduction <add>, %315, %cst_199 [1] : vector<16x4xf32> to vector<16xf32>
    %317 = vector.shape_cast %316 : vector<16xf32> to vector<16x1xf32>
    %318 = tpu.reciprocal %317 {approx = true} : vector<16x1xf32> -> vector<16x1xf32>
    %319 = vector.broadcast %318 : vector<16x1xf32> to vector<16x4xf32>
    %320 = arith.mulf %315, %319 : vector<16x4xf32>
    %321 = arith.truncf %320 : vector<16x4xf32> to vector<16x4xbf16>
    %322 = arith.truncf %307 : vector<4x16xf32> to vector<4x16xbf16>
    %cst_200 = arith.constant dense<0.000000e+00> : vector<16x16xf32>
    %323 = tpu.matmul %321, %322, %cst_200 {dimension_numbers = #tpu.dot_dimension_numbers<[1], [0], [0], [1], [0, 0, 1, 1], [], []>} : vector<16x4xbf16>, vector<4x16xbf16>, vector<16x16xf32> -> vector<16x16xf32>
    %324 = arith.truncf %323 : vector<16x16xf32> to vector<16x16xbf16>
    %c0_201 = arith.constant 0 : index
    %c0_202 = arith.constant 0 : index
    %325 = vector.load %arg10[%c0_201, %c0_202] : memref<32x32xbf16, #tpu.memory_space<vmem>>, vector<16x32xbf16>
    %cst_203 = arith.constant dense<0.000000e+00> : vector<16x32xf32>
    %326 = tpu.matmul %324, %325, %cst_203 {dimension_numbers = #tpu.dot_dimension_numbers<[1], [0], [0], [1], [0, 0, 1, 1], [], []>} : vector<16x16xbf16>, vector<16x32xbf16>, vector<16x32xf32> -> vector<16x32xf32>
    %327 = vector.extract_strided_slice %288 {offsets = [0, 16], sizes = [16, 16], strides = [1, 1]} : vector<16x32xf32> to vector<16x16xf32>
    %328 = vector.extract_strided_slice %296 {offsets = [0, 16], sizes = [4, 16], strides = [1, 1]} : vector<4x32xf32> to vector<4x16xf32>
    %329 = vector.extract_strided_slice %304 {offsets = [0, 16], sizes = [4, 16], strides = [1, 1]} : vector<4x32xf32> to vector<4x16xf32>
    %330 = arith.truncf %327 : vector<16x16xf32> to vector<16x16xbf16>
    %331 = arith.truncf %328 : vector<4x16xf32> to vector<4x16xbf16>
    %cst_204 = arith.constant dense<0.000000e+00> : vector<16x4xf32>
    %332 = tpu.matmul %330, %331, %cst_204 {dimension_numbers = #tpu.dot_dimension_numbers<[1], [1], [0], [0], [0, 0, 1, 0], [], []>} : vector<16x16xbf16>, vector<4x16xbf16>, vector<16x4xf32> -> vector<16x4xf32>
    %cst_205 = arith.constant dense<0xFF800000> : vector<16xf32>
    %333 = vector.multi_reduction <maximumf>, %332, %cst_205 [1] : vector<16x4xf32> to vector<16xf32>
    %334 = vector.shape_cast %333 : vector<16xf32> to vector<16x1xf32>
    %335 = vector.broadcast %334 : vector<16x1xf32> to vector<16x4xf32>
    %336 = arith.subf %332, %335 : vector<16x4xf32>
    %337 = math.exp %336 : vector<16x4xf32>
    %cst_206 = arith.constant dense<0.000000e+00> : vector<16xf32>
    %338 = vector.multi_reduction <add>, %337, %cst_206 [1] : vector<16x4xf32> to vector<16xf32>
    %339 = vector.shape_cast %338 : vector<16xf32> to vector<16x1xf32>
    %340 = tpu.reciprocal %339 {approx = true} : vector<16x1xf32> -> vector<16x1xf32>
    %341 = vector.broadcast %340 : vector<16x1xf32> to vector<16x4xf32>
    %342 = arith.mulf %337, %341 : vector<16x4xf32>
    %343 = arith.truncf %342 : vector<16x4xf32> to vector<16x4xbf16>
    %344 = arith.truncf %329 : vector<4x16xf32> to vector<4x16xbf16>
    %cst_207 = arith.constant dense<0.000000e+00> : vector<16x16xf32>
    %345 = tpu.matmul %343, %344, %cst_207 {dimension_numbers = #tpu.dot_dimension_numbers<[1], [0], [0], [1], [0, 0, 1, 1], [], []>} : vector<16x4xbf16>, vector<4x16xbf16>, vector<16x16xf32> -> vector<16x16xf32>
    %346 = arith.truncf %345 : vector<16x16xf32> to vector<16x16xbf16>
    %c16 = arith.constant 16 : index
    %c0_208 = arith.constant 0 : index
    %347 = vector.load %arg10[%c16, %c0_208] : memref<32x32xbf16, #tpu.memory_space<vmem>>, vector<16x32xbf16>
    %cst_209 = arith.constant dense<0.000000e+00> : vector<16x32xf32>
    %348 = tpu.matmul %346, %347, %cst_209 {dimension_numbers = #tpu.dot_dimension_numbers<[1], [0], [0], [1], [0, 0, 1, 1], [], []>} : vector<16x16xbf16>, vector<16x32xbf16>, vector<16x32xf32> -> vector<16x32xf32>
    %349 = arith.addf %326, %348 : vector<16x32xf32>
    %350 = arith.addf %1, %349 : vector<16x32xf32>
    %c0_210 = arith.constant 0 : index
    %c0_211 = arith.constant 0 : index
    %351 = vector.load %arg11[%c0_210, %c0_211] : memref<1x32xf32, #tpu.memory_space<vmem>>, vector<1x32xf32>
    %352 = vector.broadcast %351 : vector<1x32xf32> to vector<16x32xf32>
    %353 = arith.addf %350, %352 : vector<16x32xf32>
    %c0_212 = arith.constant 0 : index
    %c0_213 = arith.constant 0 : index
    %354 = vector.load %arg12[%c0_212, %c0_213] : memref<1x32xf32, #tpu.memory_space<vmem>>, vector<1x32xf32>
    %c0_214 = arith.constant 0 : index
    %c0_215 = arith.constant 0 : index
    %355 = vector.load %arg13[%c0_214, %c0_215] : memref<1x32xf32, #tpu.memory_space<vmem>>, vector<1x32xf32>
    %cst_216 = arith.constant dense<0.000000e+00> : vector<16xf32>
    %356 = vector.multi_reduction <add>, %353, %cst_216 [1] : vector<16x32xf32> to vector<16xf32>
    %357 = vector.shape_cast %356 : vector<16xf32> to vector<16x1xf32>
    %cst_217 = arith.constant 3.200000e+01 : f32
    %358 = vector.broadcast %cst_217 : f32 to vector<16x1xf32>
    %359 = arith.divf %357, %358 : vector<16x1xf32>
    %360 = vector.broadcast %359 : vector<16x1xf32> to vector<16x32xf32>
    %361 = arith.subf %353, %360 : vector<16x32xf32>
    %362 = arith.mulf %361, %361 : vector<16x32xf32>
    %cst_218 = arith.constant dense<0.000000e+00> : vector<16xf32>
    %363 = vector.multi_reduction <add>, %362, %cst_218 [1] : vector<16x32xf32> to vector<16xf32>
    %364 = vector.shape_cast %363 : vector<16xf32> to vector<16x1xf32>
    %cst_219 = arith.constant 3.200000e+01 : f32
    %365 = vector.broadcast %cst_219 : f32 to vector<16x1xf32>
    %366 = arith.divf %364, %365 : vector<16x1xf32>
    %367 = vector.broadcast %359 : vector<16x1xf32> to vector<16x32xf32>
    %368 = arith.subf %353, %367 : vector<16x32xf32>
    %cst_220 = arith.constant 9.99999974E-6 : f32
    %369 = vector.broadcast %cst_220 : f32 to vector<16x1xf32>
    %370 = arith.addf %366, %369 : vector<16x1xf32>
    %371 = math.rsqrt %370 : vector<16x1xf32>
    %372 = vector.broadcast %371 : vector<16x1xf32> to vector<16x32xf32>
    %373 = arith.mulf %368, %372 : vector<16x32xf32>
    %374 = vector.broadcast %354 : vector<1x32xf32> to vector<16x32xf32>
    %375 = arith.mulf %373, %374 : vector<16x32xf32>
    %376 = vector.broadcast %355 : vector<1x32xf32> to vector<16x32xf32>
    %377 = arith.addf %375, %376 : vector<16x32xf32>
    %378 = arith.truncf %377 : vector<16x32xf32> to vector<16x32xbf16>
    %c0_221 = arith.constant 0 : index
    %c0_222 = arith.constant 0 : index
    %379 = vector.load %arg14[%c0_221, %c0_222] : memref<32x128xbf16, #tpu.memory_space<vmem>>, vector<32x128xbf16>
    %cst_223 = arith.constant dense<0.000000e+00> : vector<16x128xf32>
    %380 = tpu.matmul %378, %379, %cst_223 {dimension_numbers = #tpu.dot_dimension_numbers<[1], [0], [0], [1], [0, 0, 1, 1], [], []>} : vector<16x32xbf16>, vector<32x128xbf16>, vector<16x128xf32> -> vector<16x128xf32>
    %c0_224 = arith.constant 0 : index
    %c0_225 = arith.constant 0 : index
    %381 = vector.load %arg15[%c0_224, %c0_225] : memref<1x128xf32, #tpu.memory_space<vmem>>, vector<1x128xf32>
    %382 = vector.broadcast %381 : vector<1x128xf32> to vector<16x128xf32>
    %383 = arith.addf %380, %382 : vector<16x128xf32>
    %cst_226 = arith.constant 5.000000e-01 : f32
    %384 = vector.broadcast %cst_226 : f32 to vector<16x128xf32>
    %385 = arith.mulf %384, %383 : vector<16x128xf32>
    %cst_227 = arith.constant 0.707106769 : f32
    %386 = vector.broadcast %cst_227 : f32 to vector<16x128xf32>
    %387 = arith.mulf %383, %386 : vector<16x128xf32>
    %388 = math.absf %387 : vector<16x128xf32>
    %cst_228 = arith.constant 0.327591091 : f32
    %389 = vector.broadcast %cst_228 : f32 to vector<16x128xf32>
    %390 = arith.mulf %389, %388 : vector<16x128xf32>
    %cst_229 = arith.constant 1.000000e+00 : f32
    %391 = vector.broadcast %cst_229 : f32 to vector<16x128xf32>
    %392 = arith.addf %391, %390 : vector<16x128xf32>
    %cst_230 = arith.constant 1.000000e+00 : f32
    %393 = vector.broadcast %cst_230 : f32 to vector<16x128xf32>
    %394 = arith.divf %393, %392 : vector<16x128xf32>
    %cst_231 = arith.constant 1.06140542 : f32
    %395 = vector.broadcast %cst_231 : f32 to vector<16x128xf32>
    %396 = arith.mulf %394, %395 : vector<16x128xf32>
    %cst_232 = arith.constant -1.45315206 : f32
    %397 = vector.broadcast %cst_232 : f32 to vector<16x128xf32>
    %398 = arith.addf %397, %396 : vector<16x128xf32>
    %399 = arith.mulf %394, %398 : vector<16x128xf32>
    %cst_233 = arith.constant 1.42141378 : f32
    %400 = vector.broadcast %cst_233 : f32 to vector<16x128xf32>
    %401 = arith.addf %400, %399 : vector<16x128xf32>
    %402 = arith.mulf %394, %401 : vector<16x128xf32>
    %cst_234 = arith.constant -0.284496725 : f32
    %403 = vector.broadcast %cst_234 : f32 to vector<16x128xf32>
    %404 = arith.addf %403, %402 : vector<16x128xf32>
    %405 = arith.mulf %394, %404 : vector<16x128xf32>
    %cst_235 = arith.constant 0.254829586 : f32
    %406 = vector.broadcast %cst_235 : f32 to vector<16x128xf32>
    %407 = arith.addf %406, %405 : vector<16x128xf32>
    %408 = arith.mulf %394, %407 : vector<16x128xf32>
    %cst_236 = arith.constant 0.000000e+00 : f32
    %409 = vector.broadcast %cst_236 : f32 to vector<16x128xf32>
    %410 = arith.subf %409, %388 : vector<16x128xf32>
    %411 = arith.mulf %410, %388 : vector<16x128xf32>
    %412 = math.exp %411 : vector<16x128xf32>
    %413 = arith.mulf %408, %412 : vector<16x128xf32>
    %cst_237 = arith.constant 1.000000e+00 : f32
    %414 = vector.broadcast %cst_237 : f32 to vector<16x128xf32>
    %415 = arith.subf %414, %413 : vector<16x128xf32>
    %cst_238 = arith.constant 0.000000e+00 : f32
    %416 = vector.broadcast %cst_238 : f32 to vector<16x128xf32>
    %417 = arith.cmpf olt, %387, %416 : vector<16x128xf32>
    %cst_239 = arith.constant 0.000000e+00 : f32
    %418 = vector.broadcast %cst_239 : f32 to vector<16x128xf32>
    %419 = arith.subf %418, %415 : vector<16x128xf32>
    %420 = arith.select %417, %419, %415 : vector<16x128xi1>, vector<16x128xf32>
    %cst_240 = arith.constant 1.000000e+00 : f32
    %421 = vector.broadcast %cst_240 : f32 to vector<16x128xf32>
    %422 = arith.addf %421, %420 : vector<16x128xf32>
    %423 = arith.mulf %385, %422 : vector<16x128xf32>
    %424 = arith.truncf %423 : vector<16x128xf32> to vector<16x128xbf16>
    %c0_241 = arith.constant 0 : index
    %c0_242 = arith.constant 0 : index
    %425 = vector.load %arg16[%c0_241, %c0_242] : memref<128x32xbf16, #tpu.memory_space<vmem>>, vector<128x32xbf16>
    %cst_243 = arith.constant dense<0.000000e+00> : vector<16x32xf32>
    %426 = tpu.matmul %424, %425, %cst_243 {dimension_numbers = #tpu.dot_dimension_numbers<[1], [0], [0], [1], [0, 0, 1, 1], [], []>} : vector<16x128xbf16>, vector<128x32xbf16>, vector<16x32xf32> -> vector<16x32xf32>
    %427 = arith.addf %353, %426 : vector<16x32xf32>
    %c0_244 = arith.constant 0 : index
    %c0_245 = arith.constant 0 : index
    %428 = vector.load %arg17[%c0_244, %c0_245] : memref<1x32xf32, #tpu.memory_space<vmem>>, vector<1x32xf32>
    %429 = vector.broadcast %428 : vector<1x32xf32> to vector<16x32xf32>
    %430 = arith.addf %427, %429 : vector<16x32xf32>
    %c0_246 = arith.constant 0 : index
    %c0_247 = arith.constant 0 : index
    %c0_248 = arith.constant 0 : index
    %431 = vector.load %arg18[%c0_246, %c0_247, %c0_248] : memref<1x16x32xf32, #tpu.memory_space<vmem>>, vector<1x16x32xf32>
    %432 = vector.shape_cast %431 : vector<1x16x32xf32> to vector<16x32xf32>
    %433 = vector.shape_cast %430 : vector<16x32xf32> to vector<1x16x32xf32>
    tpu.vector_store %arg18[%c0_246, %c0_247, %c0_248], %433 {strides = array<i32>} : memref<1x16x32xf32, #tpu.memory_space<vmem>>, vector<1x16x32xf32>,
    return
  }
  func.func @transform_0(%arg0: i32) -> (i32, i32, i32) {
    %c0_i32 = arith.constant 0 : i32
    %c0_i32_0 = arith.constant 0 : i32
    %c0_i32_1 = arith.constant 0 : i32
    return %arg0, %c0_i32, %c0_i32_0 : i32, i32, i32
  }
  func.func @transform_1(%arg0: i32) -> (i32, i32) {
    %c0_i32 = arith.constant 0 : i32
    %c0_i32_0 = arith.constant 0 : i32
    %c0_i32_1 = arith.constant 0 : i32
    return %c0_i32, %c0_i32_0 : i32, i32
  }
  func.func @transform_2(%arg0: i32) -> (i32, i32) {
    %c0_i32 = arith.constant 0 : i32
    %c0_i32_0 = arith.constant 0 : i32
    %c0_i32_1 = arith.constant 0 : i32
    return %c0_i32, %c0_i32_0 : i32, i32
  }
  func.func @transform_3(%arg0: i32) -> (i32, i32, i32) {
    %c0_i32 = arith.constant 0 : i32
    %c0_i32_0 = arith.constant 0 : i32
    %c0_i32_1 = arith.constant 0 : i32
    %c0_i32_2 = arith.constant 0 : i32
    return %c0_i32, %c0_i32_0, %c0_i32_1 : i32, i32, i32
  }
  func.func @transform_4(%arg0: i32) -> (i32, i32) {
    %c0_i32 = arith.constant 0 : i32
    %c0_i32_0 = arith.constant 0 : i32
    %c0_i32_1 = arith.constant 0 : i32
    return %c0_i32, %c0_i32_0 : i32, i32
  }
  func.func @transform_5(%arg0: i32) -> (i32, i32) {
    %c0_i32 = arith.constant 0 : i32
    %c0_i32_0 = arith.constant 0 : i32
    %c0_i32_1 = arith.constant 0 : i32
    return %c0_i32, %c0_i32_0 : i32, i32
  }
  func.func @transform_6(%arg0: i32) -> (i32, i32) {
    %c0_i32 = arith.constant 0 : i32
    %c0_i32_0 = arith.constant 0 : i32
    %c0_i32_1 = arith.constant 0 : i32
    return %c0_i32, %c0_i32_0 : i32, i32
  }
  func.func @transform_7(%arg0: i32) -> (i32, i32, i32) {
    %c0_i32 = arith.constant 0 : i32
    %c0_i32_0 = arith.constant 0 : i32
    %c0_i32_1 = arith.constant 0 : i32
    %c0_i32_2 = arith.constant 0 : i32
    return %c0_i32, %c0_i32_0, %c0_i32_1 : i32, i32, i32
  }
  func.func @transform_8(%arg0: i32) -> (i32, i32) {
    %c0_i32 = arith.constant 0 : i32
    %c0_i32_0 = arith.constant 0 : i32
    %c0_i32_1 = arith.constant 0 : i32
    return %c0_i32, %c0_i32_0 : i32, i32
  }
  func.func @transform_9(%arg0: i32) -> (i32, i32) {
    %c0_i32 = arith.constant 0 : i32
    %c0_i32_0 = arith.constant 0 : i32
    %c0_i32_1 = arith.constant 0 : i32
    return %c0_i32, %c0_i32_0 : i32, i32
  }
  func.func @transform_10(%arg0: i32) -> (i32, i32) {
    %c0_i32 = arith.constant 0 : i32
    %c0_i32_0 = arith.constant 0 : i32
    %c0_i32_1 = arith.constant 0 : i32
    return %c0_i32, %c0_i32_0 : i32, i32
  }
  func.func @transform_11(%arg0: i32) -> (i32, i32) {
    %c0_i32 = arith.constant 0 : i32
    %c0_i32_0 = arith.constant 0 : i32
    %c0_i32_1 = arith.constant 0 : i32
    return %c0_i32, %c0_i32_0 : i32, i32
  }
  func.func @transform_12(%arg0: i32) -> (i32, i32) {
    %c0_i32 = arith.constant 0 : i32
    %c0_i32_0 = arith.constant 0 : i32
    %c0_i32_1 = arith.constant 0 : i32
    return %c0_i32, %c0_i32_0 : i32, i32
  }
  func.func @transform_13(%arg0: i32) -> (i32, i32) {
    %c0_i32 = arith.constant 0 : i32
    %c0_i32_0 = arith.constant 0 : i32
    %c0_i32_1 = arith.constant 0 : i32
    return %c0_i32, %c0_i32_0 : i32, i32
  }
  func.func @transform_14(%arg0: i32) -> (i32, i32) {
    %c0_i32 = arith.constant 0 : i32
    %c0_i32_0 = arith.constant 0 : i32
    %c0_i32_1 = arith.constant 0 : i32
    return %c0_i32, %c0_i32_0 : i32, i32
  }
  func.func @transform_15(%arg0: i32) -> (i32, i32) {
    %c0_i32 = arith.constant 0 : i32
    %c0_i32_0 = arith.constant 0 : i32
    %c0_i32_1 = arith.constant 0 : i32
    return %c0_i32, %c0_i32_0 : i32, i32
  }
  func.func @transform_16(%arg0: i32) -> (i32, i32) {
    %c0_i32 = arith.constant 0 : i32
    %c0_i32_0 = arith.constant 0 : i32
    %c0_i32_1 = arith.constant 0 : i32
    return %c0_i32, %c0_i32_0 : i32, i32
  }
  func.func @transform_17(%arg0: i32) -> (i32, i32, i32) {
    %c0_i32 = arith.constant 0 : i32
    %c0_i32_0 = arith.constant 0 : i32
    %c0_i32_1 = arith.constant 0 : i32
    return %arg0, %c0_i32, %c0_i32_0 : i32, i32, i32
  }
}

module attributes {stable_mosaic.version = 11 : i64} {
  func.func @_pe_kernel(%arg0: i32, %arg1: memref<1x4x288xf32, #tpu.memory_space<vmem>>, %arg2: memref<288x64xbf16, #tpu.memory_space<vmem>>, %arg3: memref<1x64xf32, #tpu.memory_space<vmem>>, %arg4: memref<1x64xf32, #tpu.memory_space<vmem>>, %arg5: memref<1x64xf32, #tpu.memory_space<vmem>>, %arg6: memref<1x4x64xf32, #tpu.memory_space<vmem>>) attributes {dimension_semantics = [#tpu.dimension_semantics<parallel>], iteration_bounds = array<i64: 2>, scalar_prefetch = 0 : i64, scratch_operands = 0 : i64, tpu.core_type = #tpu.core_type<tc>, window_params = [{transform_indices = @transform_0, window_bounds = array<i64: 1, 4, 288>}, {pipeline_mode = #tpu.pipeline_mode<synchronous>, transform_indices = @transform_1, window_bounds = array<i64: 288, 64>}, {pipeline_mode = #tpu.pipeline_mode<synchronous>, transform_indices = @transform_2, window_bounds = array<i64: 1, 64>}, {pipeline_mode = #tpu.pipeline_mode<synchronous>, transform_indices = @transform_3, window_bounds = array<i64: 1, 64>}, {pipeline_mode = #tpu.pipeline_mode<synchronous>, transform_indices = @transform_4, window_bounds = array<i64: 1, 64>}, {transform_indices = @transform_5, window_bounds = array<i64: 1, 4, 64>}]} {
    %c0 = arith.constant 0 : index
    %c0_0 = arith.constant 0 : index
    %c0_1 = arith.constant 0 : index
    %0 = vector.load %arg1[%c0, %c0_0, %c0_1] : memref<1x4x288xf32, #tpu.memory_space<vmem>>, vector<1x4x288xf32>
    %1 = vector.shape_cast %0 : vector<1x4x288xf32> to vector<4x288xf32>
    %2 = arith.truncf %1 : vector<4x288xf32> to vector<4x288xbf16>
    %c0_2 = arith.constant 0 : index
    %c0_3 = arith.constant 0 : index
    %3 = vector.load %arg2[%c0_2, %c0_3] : memref<288x64xbf16, #tpu.memory_space<vmem>>, vector<288x64xbf16>
    %cst = arith.constant dense<0.000000e+00> : vector<4x64xf32>
    %4 = tpu.matmul %2, %3, %cst {dimension_numbers = #tpu.dot_dimension_numbers<[1], [0], [0], [1], [0, 0, 1, 1], [], []>} : vector<4x288xbf16>, vector<288x64xbf16>, vector<4x64xf32> -> vector<4x64xf32>
    %c0_4 = arith.constant 0 : index
    %c0_5 = arith.constant 0 : index
    %5 = vector.load %arg3[%c0_4, %c0_5] : memref<1x64xf32, #tpu.memory_space<vmem>>, vector<1x64xf32>
    %6 = vector.broadcast %5 : vector<1x64xf32> to vector<4x64xf32>
    %7 = arith.addf %4, %6 : vector<4x64xf32>
    %c0_6 = arith.constant 0 : index
    %c0_7 = arith.constant 0 : index
    %8 = vector.load %arg4[%c0_6, %c0_7] : memref<1x64xf32, #tpu.memory_space<vmem>>, vector<1x64xf32>
    %c0_8 = arith.constant 0 : index
    %c0_9 = arith.constant 0 : index
    %9 = vector.load %arg5[%c0_8, %c0_9] : memref<1x64xf32, #tpu.memory_space<vmem>>, vector<1x64xf32>
    %cst_10 = arith.constant dense<0.000000e+00> : vector<4xf32>
    %10 = vector.multi_reduction <add>, %7, %cst_10 [1] : vector<4x64xf32> to vector<4xf32>
    %11 = vector.shape_cast %10 : vector<4xf32> to vector<4x1xf32>
    %cst_11 = arith.constant 6.400000e+01 : f32
    %12 = vector.broadcast %cst_11 : f32 to vector<4x1xf32>
    %13 = arith.divf %11, %12 : vector<4x1xf32>
    %14 = vector.broadcast %13 : vector<4x1xf32> to vector<4x64xf32>
    %15 = arith.subf %7, %14 : vector<4x64xf32>
    %16 = arith.mulf %15, %15 : vector<4x64xf32>
    %cst_12 = arith.constant dense<0.000000e+00> : vector<4xf32>
    %17 = vector.multi_reduction <add>, %16, %cst_12 [1] : vector<4x64xf32> to vector<4xf32>
    %18 = vector.shape_cast %17 : vector<4xf32> to vector<4x1xf32>
    %cst_13 = arith.constant 6.400000e+01 : f32
    %19 = vector.broadcast %cst_13 : f32 to vector<4x1xf32>
    %20 = arith.divf %18, %19 : vector<4x1xf32>
    %21 = vector.broadcast %13 : vector<4x1xf32> to vector<4x64xf32>
    %22 = arith.subf %7, %21 : vector<4x64xf32>
    %cst_14 = arith.constant 9.99999974E-6 : f32
    %23 = vector.broadcast %cst_14 : f32 to vector<4x1xf32>
    %24 = arith.addf %20, %23 : vector<4x1xf32>
    %25 = math.rsqrt %24 : vector<4x1xf32>
    %26 = vector.broadcast %25 : vector<4x1xf32> to vector<4x64xf32>
    %27 = arith.mulf %22, %26 : vector<4x64xf32>
    %28 = vector.broadcast %8 : vector<1x64xf32> to vector<4x64xf32>
    %29 = arith.mulf %27, %28 : vector<4x64xf32>
    %30 = vector.broadcast %9 : vector<1x64xf32> to vector<4x64xf32>
    %31 = arith.addf %29, %30 : vector<4x64xf32>
    %c0_15 = arith.constant 0 : index
    %c0_16 = arith.constant 0 : index
    %c0_17 = arith.constant 0 : index
    %32 = vector.load %arg6[%c0_15, %c0_16, %c0_17] : memref<1x4x64xf32, #tpu.memory_space<vmem>>, vector<1x4x64xf32>
    %33 = vector.shape_cast %32 : vector<1x4x64xf32> to vector<4x64xf32>
    %34 = vector.shape_cast %31 : vector<4x64xf32> to vector<1x4x64xf32>
    tpu.vector_store %arg6[%c0_15, %c0_16, %c0_17], %34 {strides = array<i32>} : memref<1x4x64xf32, #tpu.memory_space<vmem>>, vector<1x4x64xf32>,
    return
  }
  func.func @transform_0(%arg0: i32) -> (i32, i32, i32) {
    %c0_i32 = arith.constant 0 : i32
    %c0_i32_0 = arith.constant 0 : i32
    %c0_i32_1 = arith.constant 0 : i32
    return %arg0, %c0_i32, %c0_i32_0 : i32, i32, i32
  }
  func.func @transform_1(%arg0: i32) -> (i32, i32) {
    %c0_i32 = arith.constant 0 : i32
    %c0_i32_0 = arith.constant 0 : i32
    %c0_i32_1 = arith.constant 0 : i32
    return %c0_i32, %c0_i32_0 : i32, i32
  }
  func.func @transform_2(%arg0: i32) -> (i32, i32) {
    %c0_i32 = arith.constant 0 : i32
    %c0_i32_0 = arith.constant 0 : i32
    %c0_i32_1 = arith.constant 0 : i32
    return %c0_i32, %c0_i32_0 : i32, i32
  }
  func.func @transform_3(%arg0: i32) -> (i32, i32) {
    %c0_i32 = arith.constant 0 : i32
    %c0_i32_0 = arith.constant 0 : i32
    %c0_i32_1 = arith.constant 0 : i32
    return %c0_i32, %c0_i32_0 : i32, i32
  }
  func.func @transform_4(%arg0: i32) -> (i32, i32) {
    %c0_i32 = arith.constant 0 : i32
    %c0_i32_0 = arith.constant 0 : i32
    %c0_i32_1 = arith.constant 0 : i32
    return %c0_i32, %c0_i32_0 : i32, i32
  }
  func.func @transform_5(%arg0: i32) -> (i32, i32, i32) {
    %c0_i32 = arith.constant 0 : i32
    %c0_i32_0 = arith.constant 0 : i32
    %c0_i32_1 = arith.constant 0 : i32
    return %arg0, %c0_i32, %c0_i32_0 : i32, i32, i32
  }
}

module attributes {stable_mosaic.version = 11 : i64} {
  func.func @_block_kernel(%arg0: i32, %arg1: memref<1x5x64xf32, #tpu.memory_space<vmem>>, %arg2: memref<1x64xf32, #tpu.memory_space<vmem>>, %arg3: memref<1x64xf32, #tpu.memory_space<vmem>>, %arg4: memref<3x9x64xf32, #tpu.memory_space<vmem>>, %arg5: memref<3x64xf32, #tpu.memory_space<vmem>>, %arg6: memref<3x64xf32, #tpu.memory_space<vmem>>, %arg7: memref<1x4xbf16, #tpu.memory_space<vmem>>, %arg8: memref<3x64x64xbf16, #tpu.memory_space<vmem>>, %arg9: memref<3x64xf32, #tpu.memory_space<vmem>>, %arg10: memref<64x64xbf16, #tpu.memory_space<vmem>>, %arg11: memref<1x64xf32, #tpu.memory_space<vmem>>, %arg12: memref<1x64xf32, #tpu.memory_space<vmem>>, %arg13: memref<1x64xf32, #tpu.memory_space<vmem>>, %arg14: memref<64x256xbf16, #tpu.memory_space<vmem>>, %arg15: memref<1x256xf32, #tpu.memory_space<vmem>>, %arg16: memref<256x64xbf16, #tpu.memory_space<vmem>>, %arg17: memref<1x64xf32, #tpu.memory_space<vmem>>, %arg18: memref<1x5x64xf32, #tpu.memory_space<vmem>>, %arg19: memref<4x4x64xf32, #tpu.memory_space<vmem>>, %arg20: memref<5x64xf32, #tpu.memory_space<vmem>>, %arg21: memref<2x64xf32, #tpu.memory_space<vmem>>, %arg22: memref<2x64xf32, #tpu.memory_space<vmem>>, %arg23: memref<4x64xf32, #tpu.memory_space<vmem>>, %arg24: memref<4x64xf32, #tpu.memory_space<vmem>>) attributes {dimension_semantics = [#tpu.dimension_semantics<parallel>], iteration_bounds = array<i64: 2>, scalar_prefetch = 0 : i64, scratch_operands = 6 : i64, tpu.core_type = #tpu.core_type<tc>, window_params = [{transform_indices = @transform_0, window_bounds = array<i64: 1, 5, 64>}, {pipeline_mode = #tpu.pipeline_mode<synchronous>, transform_indices = @transform_1, window_bounds = array<i64: 1, 64>}, {pipeline_mode = #tpu.pipeline_mode<synchronous>, transform_indices = @transform_2, window_bounds = array<i64: 1, 64>}, {pipeline_mode = #tpu.pipeline_mode<synchronous>, transform_indices = @transform_3, window_bounds = array<i64: 3, 9, 64>}, {pipeline_mode = #tpu.pipeline_mode<synchronous>, transform_indices = @transform_4, window_bounds = array<i64: 3, 64>}, {pipeline_mode = #tpu.pipeline_mode<synchronous>, transform_indices = @transform_5, window_bounds = array<i64: 3, 64>}, {pipeline_mode = #tpu.pipeline_mode<synchronous>, transform_indices = @transform_6, window_bounds = array<i64: 1, 4>}, {pipeline_mode = #tpu.pipeline_mode<synchronous>, transform_indices = @transform_7, window_bounds = array<i64: 3, 64, 64>}, {pipeline_mode = #tpu.pipeline_mode<synchronous>, transform_indices = @transform_8, window_bounds = array<i64: 3, 64>}, {pipeline_mode = #tpu.pipeline_mode<synchronous>, transform_indices = @transform_9, window_bounds = array<i64: 64, 64>}, {pipeline_mode = #tpu.pipeline_mode<synchronous>, transform_indices = @transform_10, window_bounds = array<i64: 1, 64>}, {pipeline_mode = #tpu.pipeline_mode<synchronous>, transform_indices = @transform_11, window_bounds = array<i64: 1, 64>}, {pipeline_mode = #tpu.pipeline_mode<synchronous>, transform_indices = @transform_12, window_bounds = array<i64: 1, 64>}, {pipeline_mode = #tpu.pipeline_mode<synchronous>, transform_indices = @transform_13, window_bounds = array<i64: 64, 256>}, {pipeline_mode = #tpu.pipeline_mode<synchronous>, transform_indices = @transform_14, window_bounds = array<i64: 1, 256>}, {pipeline_mode = #tpu.pipeline_mode<synchronous>, transform_indices = @transform_15, window_bounds = array<i64: 256, 64>}, {pipeline_mode = #tpu.pipeline_mode<synchronous>, transform_indices = @transform_16, window_bounds = array<i64: 1, 64>}, {transform_indices = @transform_17, window_bounds = array<i64: 1, 5, 64>}]} {
    %c0 = arith.constant 0 : index
    %c0_0 = arith.constant 0 : index
    %c0_1 = arith.constant 0 : index
    %0 = vector.load %arg1[%c0, %c0_0, %c0_1] : memref<1x5x64xf32, #tpu.memory_space<vmem>>, vector<1x5x64xf32>
    %1 = vector.shape_cast %0 : vector<1x5x64xf32> to vector<5x64xf32>
    %c0_2 = arith.constant 0 : index
    %c0_3 = arith.constant 0 : index
    %2 = vector.load %arg2[%c0_2, %c0_3] : memref<1x64xf32, #tpu.memory_space<vmem>>, vector<1x64xf32>
    %c0_4 = arith.constant 0 : index
    %c0_5 = arith.constant 0 : index
    %3 = vector.load %arg3[%c0_4, %c0_5] : memref<1x64xf32, #tpu.memory_space<vmem>>, vector<1x64xf32>
    %cst = arith.constant dense<0.000000e+00> : vector<5xf32>
    %4 = vector.multi_reduction <add>, %1, %cst [1] : vector<5x64xf32> to vector<5xf32>
    %5 = vector.shape_cast %4 : vector<5xf32> to vector<5x1xf32>
    %cst_6 = arith.constant 6.400000e+01 : f32
    %6 = vector.broadcast %cst_6 : f32 to vector<5x1xf32>
    %7 = arith.divf %5, %6 : vector<5x1xf32>
    %8 = vector.broadcast %7 : vector<5x1xf32> to vector<5x64xf32>
    %9 = arith.subf %1, %8 : vector<5x64xf32>
    %10 = arith.mulf %9, %9 : vector<5x64xf32>
    %cst_7 = arith.constant dense<0.000000e+00> : vector<5xf32>
    %11 = vector.multi_reduction <add>, %10, %cst_7 [1] : vector<5x64xf32> to vector<5xf32>
    %12 = vector.shape_cast %11 : vector<5xf32> to vector<5x1xf32>
    %cst_8 = arith.constant 6.400000e+01 : f32
    %13 = vector.broadcast %cst_8 : f32 to vector<5x1xf32>
    %14 = arith.divf %12, %13 : vector<5x1xf32>
    %15 = vector.broadcast %7 : vector<5x1xf32> to vector<5x64xf32>
    %16 = arith.subf %1, %15 : vector<5x64xf32>
    %cst_9 = arith.constant 9.99999974E-6 : f32
    %17 = vector.broadcast %cst_9 : f32 to vector<5x1xf32>
    %18 = arith.addf %14, %17 : vector<5x1xf32>
    %19 = math.rsqrt %18 : vector<5x1xf32>
    %20 = vector.broadcast %19 : vector<5x1xf32> to vector<5x64xf32>
    %21 = arith.mulf %16, %20 : vector<5x64xf32>
    %22 = vector.broadcast %2 : vector<1x64xf32> to vector<5x64xf32>
    %23 = arith.mulf %21, %22 : vector<5x64xf32>
    %24 = vector.broadcast %3 : vector<1x64xf32> to vector<5x64xf32>
    %25 = arith.addf %23, %24 : vector<5x64xf32>
    %cst_10 = arith.constant 0.000000e+00 : f32
    %26 = vector.broadcast %cst_10 : f32 to vector<4x4x64xf32>
    %c0_11 = arith.constant 0 : index
    %c0_12 = arith.constant 0 : index
    %c0_13 = arith.constant 0 : index
    %27 = vector.load %arg19[%c0_11, %c0_12, %c0_13] : memref<4x4x64xf32, #tpu.memory_space<vmem>>, vector<4x4x64xf32>
    tpu.vector_store %arg19[%c0_11, %c0_12, %c0_13], %26 {strides = array<i32>} : memref<4x4x64xf32, #tpu.memory_space<vmem>>, vector<4x4x64xf32>,
    %28 = vector.extract_strided_slice %25 {offsets = [1, 0], sizes = [2, 64], strides = [1, 1]} : vector<5x64xf32> to vector<2x64xf32>
    %c1 = arith.constant 1 : index
    %c1_14 = arith.constant 1 : index
    %c0_15 = arith.constant 0 : index
    %29 = vector.load %arg19[%c1, %c1_14, %c0_15] : memref<4x4x64xf32, #tpu.memory_space<vmem>>, vector<1x2x64xf32>
    %30 = vector.shape_cast %29 : vector<1x2x64xf32> to vector<2x64xf32>
    %31 = vector.shape_cast %28 : vector<2x64xf32> to vector<1x2x64xf32>
    tpu.vector_store %arg19[%c1, %c1_14, %c0_15], %31 {strides = array<i32>} : memref<4x4x64xf32, #tpu.memory_space<vmem>>, vector<1x2x64xf32>,
    %32 = vector.extract_strided_slice %25 {offsets = [3, 0], sizes = [2, 64], strides = [1, 1]} : vector<5x64xf32> to vector<2x64xf32>
    %c2 = arith.constant 2 : index
    %c1_16 = arith.constant 1 : index
    %c0_17 = arith.constant 0 : index
    %33 = vector.load %arg19[%c2, %c1_16, %c0_17] : memref<4x4x64xf32, #tpu.memory_space<vmem>>, vector<1x2x64xf32>
    %34 = vector.shape_cast %33 : vector<1x2x64xf32> to vector<2x64xf32>
    %35 = vector.shape_cast %32 : vector<2x64xf32> to vector<1x2x64xf32>
    tpu.vector_store %arg19[%c2, %c1_16, %c0_17], %35 {strides = array<i32>} : memref<4x4x64xf32, #tpu.memory_space<vmem>>, vector<1x2x64xf32>,
    %c0_18 = arith.constant 0 : index
    %c0_19 = arith.constant 0 : index
    %c0_20 = arith.constant 0 : index
    %36 = vector.load %arg19[%c0_18, %c0_19, %c0_20] : memref<4x4x64xf32, #tpu.memory_space<vmem>>, vector<2x2x64xf32>
    %c0_21 = arith.constant 0 : index
    %c0_22 = arith.constant 0 : index
    %c0_23 = arith.constant 0 : index
    %37 = vector.load %arg4[%c0_21, %c0_22, %c0_23] : memref<3x9x64xf32, #tpu.memory_space<vmem>>, vector<1x1x64xf32>
    %38 = vector.shape_cast %37 : vector<1x1x64xf32> to vector<1x64xf32>
    %39 = vector.shape_cast %38 : vector<1x64xf32> to vector<1x1x64xf32>
    %c1_24 = arith.constant 1 : index
    %c0_25 = arith.constant 0 : index
    %c0_26 = arith.constant 0 : index
    %40 = vector.load %arg4[%c1_24, %c0_25, %c0_26] : memref<3x9x64xf32, #tpu.memory_space<vmem>>, vector<1x1x64xf32>
    %41 = vector.shape_cast %40 : vector<1x1x64xf32> to vector<1x64xf32>
    %42 = vector.shape_cast %41 : vector<1x64xf32> to vector<1x1x64xf32>
    %c2_27 = arith.constant 2 : index
    %c0_28 = arith.constant 0 : index
    %c0_29 = arith.constant 0 : index
    %43 = vector.load %arg4[%c2_27, %c0_28, %c0_29] : memref<3x9x64xf32, #tpu.memory_space<vmem>>, vector<1x1x64xf32>
    %44 = vector.shape_cast %43 : vector<1x1x64xf32> to vector<1x64xf32>
    %45 = vector.shape_cast %44 : vector<1x64xf32> to vector<1x1x64xf32>
    %46 = vector.broadcast %39 : vector<1x1x64xf32> to vector<2x2x64xf32>
    %47 = arith.mulf %36, %46 : vector<2x2x64xf32>
    %48 = vector.broadcast %42 : vector<1x1x64xf32> to vector<2x2x64xf32>
    %49 = arith.mulf %36, %48 : vector<2x2x64xf32>
    %50 = vector.broadcast %45 : vector<1x1x64xf32> to vector<2x2x64xf32>
    %51 = arith.mulf %36, %50 : vector<2x2x64xf32>
    %c0_30 = arith.constant 0 : index
    %c1_31 = arith.constant 1 : index
    %c0_32 = arith.constant 0 : index
    %52 = vector.load %arg19[%c0_30, %c1_31, %c0_32] : memref<4x4x64xf32, #tpu.memory_space<vmem>>, vector<2x2x64xf32>
    %c0_33 = arith.constant 0 : index
    %c1_34 = arith.constant 1 : index
    %c0_35 = arith.constant 0 : index
    %53 = vector.load %arg4[%c0_33, %c1_34, %c0_35] : memref<3x9x64xf32, #tpu.memory_space<vmem>>, vector<1x1x64xf32>
    %54 = vector.shape_cast %53 : vector<1x1x64xf32> to vector<1x64xf32>
    %55 = vector.shape_cast %54 : vector<1x64xf32> to vector<1x1x64xf32>
    %c1_36 = arith.constant 1 : index
    %c1_37 = arith.constant 1 : index
    %c0_38 = arith.constant 0 : index
    %56 = vector.load %arg4[%c1_36, %c1_37, %c0_38] : memref<3x9x64xf32, #tpu.memory_space<vmem>>, vector<1x1x64xf32>
    %57 = vector.shape_cast %56 : vector<1x1x64xf32> to vector<1x64xf32>
    %58 = vector.shape_cast %57 : vector<1x64xf32> to vector<1x1x64xf32>
    %c2_39 = arith.constant 2 : index
    %c1_40 = arith.constant 1 : index
    %c0_41 = arith.constant 0 : index
    %59 = vector.load %arg4[%c2_39, %c1_40, %c0_41] : memref<3x9x64xf32, #tpu.memory_space<vmem>>, vector<1x1x64xf32>
    %60 = vector.shape_cast %59 : vector<1x1x64xf32> to vector<1x64xf32>
    %61 = vector.shape_cast %60 : vector<1x64xf32> to vector<1x1x64xf32>
    %62 = vector.broadcast %55 : vector<1x1x64xf32> to vector<2x2x64xf32>
    %63 = arith.mulf %52, %62 : vector<2x2x64xf32>
    %64 = arith.addf %47, %63 : vector<2x2x64xf32>
    %65 = vector.broadcast %58 : vector<1x1x64xf32> to vector<2x2x64xf32>
    %66 = arith.mulf %52, %65 : vector<2x2x64xf32>
    %67 = arith.addf %49, %66 : vector<2x2x64xf32>
    %68 = vector.broadcast %61 : vector<1x1x64xf32> to vector<2x2x64xf32>
    %69 = arith.mulf %52, %68 : vector<2x2x64xf32>
    %70 = arith.addf %51, %69 : vector<2x2x64xf32>
    %c0_42 = arith.constant 0 : index
    %c2_43 = arith.constant 2 : index
    %c0_44 = arith.constant 0 : index
    %71 = vector.load %arg19[%c0_42, %c2_43, %c0_44] : memref<4x4x64xf32, #tpu.memory_space<vmem>>, vector<2x2x64xf32>
    %c0_45 = arith.constant 0 : index
    %c2_46 = arith.constant 2 : index
    %c0_47 = arith.constant 0 : index
    %72 = vector.load %arg4[%c0_45, %c2_46, %c0_47] : memref<3x9x64xf32, #tpu.memory_space<vmem>>, vector<1x1x64xf32>
    %73 = vector.shape_cast %72 : vector<1x1x64xf32> to vector<1x64xf32>
    %74 = vector.shape_cast %73 : vector<1x64xf32> to vector<1x1x64xf32>
    %c1_48 = arith.constant 1 : index
    %c2_49 = arith.constant 2 : index
    %c0_50 = arith.constant 0 : index
    %75 = vector.load %arg4[%c1_48, %c2_49, %c0_50] : memref<3x9x64xf32, #tpu.memory_space<vmem>>, vector<1x1x64xf32>
    %76 = vector.shape_cast %75 : vector<1x1x64xf32> to vector<1x64xf32>
    %77 = vector.shape_cast %76 : vector<1x64xf32> to vector<1x1x64xf32>
    %c2_51 = arith.constant 2 : index
    %c2_52 = arith.constant 2 : index
    %c0_53 = arith.constant 0 : index
    %78 = vector.load %arg4[%c2_51, %c2_52, %c0_53] : memref<3x9x64xf32, #tpu.memory_space<vmem>>, vector<1x1x64xf32>
    %79 = vector.shape_cast %78 : vector<1x1x64xf32> to vector<1x64xf32>
    %80 = vector.shape_cast %79 : vector<1x64xf32> to vector<1x1x64xf32>
    %81 = vector.broadcast %74 : vector<1x1x64xf32> to vector<2x2x64xf32>
    %82 = arith.mulf %71, %81 : vector<2x2x64xf32>
    %83 = arith.addf %64, %82 : vector<2x2x64xf32>
    %84 = vector.broadcast %77 : vector<1x1x64xf32> to vector<2x2x64xf32>
    %85 = arith.mulf %71, %84 : vector<2x2x64xf32>
    %86 = arith.addf %67, %85 : vector<2x2x64xf32>
    %87 = vector.broadcast %80 : vector<1x1x64xf32> to vector<2x2x64xf32>
    %88 = arith.mulf %71, %87 : vector<2x2x64xf32>
    %89 = arith.addf %70, %88 : vector<2x2x64xf32>
    %c1_54 = arith.constant 1 : index
    %c0_55 = arith.constant 0 : index
    %c0_56 = arith.constant 0 : index
    %90 = vector.load %arg19[%c1_54, %c0_55, %c0_56] : memref<4x4x64xf32, #tpu.memory_space<vmem>>, vector<2x2x64xf32>
    %c0_57 = arith.constant 0 : index
    %c3 = arith.constant 3 : index
    %c0_58 = arith.constant 0 : index
    %91 = vector.load %arg4[%c0_57, %c3, %c0_58] : memref<3x9x64xf32, #tpu.memory_space<vmem>>, vector<1x1x64xf32>
    %92 = vector.shape_cast %91 : vector<1x1x64xf32> to vector<1x64xf32>
    %93 = vector.shape_cast %92 : vector<1x64xf32> to vector<1x1x64xf32>
    %c1_59 = arith.constant 1 : index
    %c3_60 = arith.constant 3 : index
    %c0_61 = arith.constant 0 : index
    %94 = vector.load %arg4[%c1_59, %c3_60, %c0_61] : memref<3x9x64xf32, #tpu.memory_space<vmem>>, vector<1x1x64xf32>
    %95 = vector.shape_cast %94 : vector<1x1x64xf32> to vector<1x64xf32>
    %96 = vector.shape_cast %95 : vector<1x64xf32> to vector<1x1x64xf32>
    %c2_62 = arith.constant 2 : index
    %c3_63 = arith.constant 3 : index
    %c0_64 = arith.constant 0 : index
    %97 = vector.load %arg4[%c2_62, %c3_63, %c0_64] : memref<3x9x64xf32, #tpu.memory_space<vmem>>, vector<1x1x64xf32>
    %98 = vector.shape_cast %97 : vector<1x1x64xf32> to vector<1x64xf32>
    %99 = vector.shape_cast %98 : vector<1x64xf32> to vector<1x1x64xf32>
    %100 = vector.broadcast %93 : vector<1x1x64xf32> to vector<2x2x64xf32>
    %101 = arith.mulf %90, %100 : vector<2x2x64xf32>
    %102 = arith.addf %83, %101 : vector<2x2x64xf32>
    %103 = vector.broadcast %96 : vector<1x1x64xf32> to vector<2x2x64xf32>
    %104 = arith.mulf %90, %103 : vector<2x2x64xf32>
    %105 = arith.addf %86, %104 : vector<2x2x64xf32>
    %106 = vector.broadcast %99 : vector<1x1x64xf32> to vector<2x2x64xf32>
    %107 = arith.mulf %90, %106 : vector<2x2x64xf32>
    %108 = arith.addf %89, %107 : vector<2x2x64xf32>
    %c1_65 = arith.constant 1 : index
    %c1_66 = arith.constant 1 : index
    %c0_67 = arith.constant 0 : index
    %109 = vector.load %arg19[%c1_65, %c1_66, %c0_67] : memref<4x4x64xf32, #tpu.memory_space<vmem>>, vector<2x2x64xf32>
    %c0_68 = arith.constant 0 : index
    %c4 = arith.constant 4 : index
    %c0_69 = arith.constant 0 : index
    %110 = vector.load %arg4[%c0_68, %c4, %c0_69] : memref<3x9x64xf32, #tpu.memory_space<vmem>>, vector<1x1x64xf32>
    %111 = vector.shape_cast %110 : vector<1x1x64xf32> to vector<1x64xf32>
    %112 = vector.shape_cast %111 : vector<1x64xf32> to vector<1x1x64xf32>
    %c1_70 = arith.constant 1 : index
    %c4_71 = arith.constant 4 : index
    %c0_72 = arith.constant 0 : index
    %113 = vector.load %arg4[%c1_70, %c4_71, %c0_72] : memref<3x9x64xf32, #tpu.memory_space<vmem>>, vector<1x1x64xf32>
    %114 = vector.shape_cast %113 : vector<1x1x64xf32> to vector<1x64xf32>
    %115 = vector.shape_cast %114 : vector<1x64xf32> to vector<1x1x64xf32>
    %c2_73 = arith.constant 2 : index
    %c4_74 = arith.constant 4 : index
    %c0_75 = arith.constant 0 : index
    %116 = vector.load %arg4[%c2_73, %c4_74, %c0_75] : memref<3x9x64xf32, #tpu.memory_space<vmem>>, vector<1x1x64xf32>
    %117 = vector.shape_cast %116 : vector<1x1x64xf32> to vector<1x64xf32>
    %118 = vector.shape_cast %117 : vector<1x64xf32> to vector<1x1x64xf32>
    %119 = vector.broadcast %112 : vector<1x1x64xf32> to vector<2x2x64xf32>
    %120 = arith.mulf %109, %119 : vector<2x2x64xf32>
    %121 = arith.addf %102, %120 : vector<2x2x64xf32>
    %122 = vector.broadcast %115 : vector<1x1x64xf32> to vector<2x2x64xf32>
    %123 = arith.mulf %109, %122 : vector<2x2x64xf32>
    %124 = arith.addf %105, %123 : vector<2x2x64xf32>
    %125 = vector.broadcast %118 : vector<1x1x64xf32> to vector<2x2x64xf32>
    %126 = arith.mulf %109, %125 : vector<2x2x64xf32>
    %127 = arith.addf %108, %126 : vector<2x2x64xf32>
    %c1_76 = arith.constant 1 : index
    %c2_77 = arith.constant 2 : index
    %c0_78 = arith.constant 0 : index
    %128 = vector.load %arg19[%c1_76, %c2_77, %c0_78] : memref<4x4x64xf32, #tpu.memory_space<vmem>>, vector<2x2x64xf32>
    %c0_79 = arith.constant 0 : index
    %c5 = arith.constant 5 : index
    %c0_80 = arith.constant 0 : index
    %129 = vector.load %arg4[%c0_79, %c5, %c0_80] : memref<3x9x64xf32, #tpu.memory_space<vmem>>, vector<1x1x64xf32>
    %130 = vector.shape_cast %129 : vector<1x1x64xf32> to vector<1x64xf32>
    %131 = vector.shape_cast %130 : vector<1x64xf32> to vector<1x1x64xf32>
    %c1_81 = arith.constant 1 : index
    %c5_82 = arith.constant 5 : index
    %c0_83 = arith.constant 0 : index
    %132 = vector.load %arg4[%c1_81, %c5_82, %c0_83] : memref<3x9x64xf32, #tpu.memory_space<vmem>>, vector<1x1x64xf32>
    %133 = vector.shape_cast %132 : vector<1x1x64xf32> to vector<1x64xf32>
    %134 = vector.shape_cast %133 : vector<1x64xf32> to vector<1x1x64xf32>
    %c2_84 = arith.constant 2 : index
    %c5_85 = arith.constant 5 : index
    %c0_86 = arith.constant 0 : index
    %135 = vector.load %arg4[%c2_84, %c5_85, %c0_86] : memref<3x9x64xf32, #tpu.memory_space<vmem>>, vector<1x1x64xf32>
    %136 = vector.shape_cast %135 : vector<1x1x64xf32> to vector<1x64xf32>
    %137 = vector.shape_cast %136 : vector<1x64xf32> to vector<1x1x64xf32>
    %138 = vector.broadcast %131 : vector<1x1x64xf32> to vector<2x2x64xf32>
    %139 = arith.mulf %128, %138 : vector<2x2x64xf32>
    %140 = arith.addf %121, %139 : vector<2x2x64xf32>
    %141 = vector.broadcast %134 : vector<1x1x64xf32> to vector<2x2x64xf32>
    %142 = arith.mulf %128, %141 : vector<2x2x64xf32>
    %143 = arith.addf %124, %142 : vector<2x2x64xf32>
    %144 = vector.broadcast %137 : vector<1x1x64xf32> to vector<2x2x64xf32>
    %145 = arith.mulf %128, %144 : vector<2x2x64xf32>
    %146 = arith.addf %127, %145 : vector<2x2x64xf32>
    %c2_87 = arith.constant 2 : index
    %c0_88 = arith.constant 0 : index
    %c0_89 = arith.constant 0 : index
    %147 = vector.load %arg19[%c2_87, %c0_88, %c0_89] : memref<4x4x64xf32, #tpu.memory_space<vmem>>, vector<2x2x64xf32>
    %c0_90 = arith.constant 0 : index
    %c6 = arith.constant 6 : index
    %c0_91 = arith.constant 0 : index
    %148 = vector.load %arg4[%c0_90, %c6, %c0_91] : memref<3x9x64xf32, #tpu.memory_space<vmem>>, vector<1x1x64xf32>
    %149 = vector.shape_cast %148 : vector<1x1x64xf32> to vector<1x64xf32>
    %150 = vector.shape_cast %149 : vector<1x64xf32> to vector<1x1x64xf32>
    %c1_92 = arith.constant 1 : index
    %c6_93 = arith.constant 6 : index
    %c0_94 = arith.constant 0 : index
    %151 = vector.load %arg4[%c1_92, %c6_93, %c0_94] : memref<3x9x64xf32, #tpu.memory_space<vmem>>, vector<1x1x64xf32>
    %152 = vector.shape_cast %151 : vector<1x1x64xf32> to vector<1x64xf32>
    %153 = vector.shape_cast %152 : vector<1x64xf32> to vector<1x1x64xf32>
    %c2_95 = arith.constant 2 : index
    %c6_96 = arith.constant 6 : index
    %c0_97 = arith.constant 0 : index
    %154 = vector.load %arg4[%c2_95, %c6_96, %c0_97] : memref<3x9x64xf32, #tpu.memory_space<vmem>>, vector<1x1x64xf32>
    %155 = vector.shape_cast %154 : vector<1x1x64xf32> to vector<1x64xf32>
    %156 = vector.shape_cast %155 : vector<1x64xf32> to vector<1x1x64xf32>
    %157 = vector.broadcast %150 : vector<1x1x64xf32> to vector<2x2x64xf32>
    %158 = arith.mulf %147, %157 : vector<2x2x64xf32>
    %159 = arith.addf %140, %158 : vector<2x2x64xf32>
    %160 = vector.broadcast %153 : vector<1x1x64xf32> to vector<2x2x64xf32>
    %161 = arith.mulf %147, %160 : vector<2x2x64xf32>
    %162 = arith.addf %143, %161 : vector<2x2x64xf32>
    %163 = vector.broadcast %156 : vector<1x1x64xf32> to vector<2x2x64xf32>
    %164 = arith.mulf %147, %163 : vector<2x2x64xf32>
    %165 = arith.addf %146, %164 : vector<2x2x64xf32>
    %c2_98 = arith.constant 2 : index
    %c1_99 = arith.constant 1 : index
    %c0_100 = arith.constant 0 : index
    %166 = vector.load %arg19[%c2_98, %c1_99, %c0_100] : memref<4x4x64xf32, #tpu.memory_space<vmem>>, vector<2x2x64xf32>
    %c0_101 = arith.constant 0 : index
    %c7 = arith.constant 7 : index
    %c0_102 = arith.constant 0 : index
    %167 = vector.load %arg4[%c0_101, %c7, %c0_102] : memref<3x9x64xf32, #tpu.memory_space<vmem>>, vector<1x1x64xf32>
    %168 = vector.shape_cast %167 : vector<1x1x64xf32> to vector<1x64xf32>
    %169 = vector.shape_cast %168 : vector<1x64xf32> to vector<1x1x64xf32>
    %c1_103 = arith.constant 1 : index
    %c7_104 = arith.constant 7 : index
    %c0_105 = arith.constant 0 : index
    %170 = vector.load %arg4[%c1_103, %c7_104, %c0_105] : memref<3x9x64xf32, #tpu.memory_space<vmem>>, vector<1x1x64xf32>
    %171 = vector.shape_cast %170 : vector<1x1x64xf32> to vector<1x64xf32>
    %172 = vector.shape_cast %171 : vector<1x64xf32> to vector<1x1x64xf32>
    %c2_106 = arith.constant 2 : index
    %c7_107 = arith.constant 7 : index
    %c0_108 = arith.constant 0 : index
    %173 = vector.load %arg4[%c2_106, %c7_107, %c0_108] : memref<3x9x64xf32, #tpu.memory_space<vmem>>, vector<1x1x64xf32>
    %174 = vector.shape_cast %173 : vector<1x1x64xf32> to vector<1x64xf32>
    %175 = vector.shape_cast %174 : vector<1x64xf32> to vector<1x1x64xf32>
    %176 = vector.broadcast %169 : vector<1x1x64xf32> to vector<2x2x64xf32>
    %177 = arith.mulf %166, %176 : vector<2x2x64xf32>
    %178 = arith.addf %159, %177 : vector<2x2x64xf32>
    %179 = vector.broadcast %172 : vector<1x1x64xf32> to vector<2x2x64xf32>
    %180 = arith.mulf %166, %179 : vector<2x2x64xf32>
    %181 = arith.addf %162, %180 : vector<2x2x64xf32>
    %182 = vector.broadcast %175 : vector<1x1x64xf32> to vector<2x2x64xf32>
    %183 = arith.mulf %166, %182 : vector<2x2x64xf32>
    %184 = arith.addf %165, %183 : vector<2x2x64xf32>
    %c2_109 = arith.constant 2 : index
    %c2_110 = arith.constant 2 : index
    %c0_111 = arith.constant 0 : index
    %185 = vector.load %arg19[%c2_109, %c2_110, %c0_111] : memref<4x4x64xf32, #tpu.memory_space<vmem>>, vector<2x2x64xf32>
    %c0_112 = arith.constant 0 : index
    %c8 = arith.constant 8 : index
    %c0_113 = arith.constant 0 : index
    %186 = vector.load %arg4[%c0_112, %c8, %c0_113] : memref<3x9x64xf32, #tpu.memory_space<vmem>>, vector<1x1x64xf32>
    %187 = vector.shape_cast %186 : vector<1x1x64xf32> to vector<1x64xf32>
    %188 = vector.shape_cast %187 : vector<1x64xf32> to vector<1x1x64xf32>
    %c1_114 = arith.constant 1 : index
    %c8_115 = arith.constant 8 : index
    %c0_116 = arith.constant 0 : index
    %189 = vector.load %arg4[%c1_114, %c8_115, %c0_116] : memref<3x9x64xf32, #tpu.memory_space<vmem>>, vector<1x1x64xf32>
    %190 = vector.shape_cast %189 : vector<1x1x64xf32> to vector<1x64xf32>
    %191 = vector.shape_cast %190 : vector<1x64xf32> to vector<1x1x64xf32>
    %c2_117 = arith.constant 2 : index
    %c8_118 = arith.constant 8 : index
    %c0_119 = arith.constant 0 : index
    %192 = vector.load %arg4[%c2_117, %c8_118, %c0_119] : memref<3x9x64xf32, #tpu.memory_space<vmem>>, vector<1x1x64xf32>
    %193 = vector.shape_cast %192 : vector<1x1x64xf32> to vector<1x64xf32>
    %194 = vector.shape_cast %193 : vector<1x64xf32> to vector<1x1x64xf32>
    %195 = vector.broadcast %188 : vector<1x1x64xf32> to vector<2x2x64xf32>
    %196 = arith.mulf %185, %195 : vector<2x2x64xf32>
    %197 = arith.addf %178, %196 : vector<2x2x64xf32>
    %198 = vector.broadcast %191 : vector<1x1x64xf32> to vector<2x2x64xf32>
    %199 = arith.mulf %185, %198 : vector<2x2x64xf32>
    %200 = arith.addf %181, %199 : vector<2x2x64xf32>
    %201 = vector.broadcast %194 : vector<1x1x64xf32> to vector<2x2x64xf32>
    %202 = arith.mulf %185, %201 : vector<2x2x64xf32>
    %203 = arith.addf %184, %202 : vector<2x2x64xf32>
    %c0_120 = arith.constant 0 : index
    %c0_121 = arith.constant 0 : index
    %204 = vector.load %arg5[%c0_120, %c0_121] : memref<3x64xf32, #tpu.memory_space<vmem>>, vector<1x64xf32>
    %205 = vector.shape_cast %204 : vector<1x64xf32> to vector<1x1x64xf32>
    %206 = vector.broadcast %205 : vector<1x1x64xf32> to vector<2x2x64xf32>
    %207 = arith.mulf %197, %206 : vector<2x2x64xf32>
    %c0_122 = arith.constant 0 : index
    %c0_123 = arith.constant 0 : index
    %208 = vector.load %arg6[%c0_122, %c0_123] : memref<3x64xf32, #tpu.memory_space<vmem>>, vector<1x64xf32>
    %209 = vector.shape_cast %208 : vector<1x64xf32> to vector<1x1x64xf32>
    %210 = vector.broadcast %209 : vector<1x1x64xf32> to vector<2x2x64xf32>
    %211 = arith.addf %207, %210 : vector<2x2x64xf32>
    %c1_124 = arith.constant 1 : index
    %c0_125 = arith.constant 0 : index
    %212 = vector.load %arg5[%c1_124, %c0_125] : memref<3x64xf32, #tpu.memory_space<vmem>>, vector<1x64xf32>
    %213 = vector.shape_cast %212 : vector<1x64xf32> to vector<1x1x64xf32>
    %214 = vector.broadcast %213 : vector<1x1x64xf32> to vector<2x2x64xf32>
    %215 = arith.mulf %200, %214 : vector<2x2x64xf32>
    %c1_126 = arith.constant 1 : index
    %c0_127 = arith.constant 0 : index
    %216 = vector.load %arg6[%c1_126, %c0_127] : memref<3x64xf32, #tpu.memory_space<vmem>>, vector<1x64xf32>
    %217 = vector.shape_cast %216 : vector<1x64xf32> to vector<1x1x64xf32>
    %218 = vector.broadcast %217 : vector<1x1x64xf32> to vector<2x2x64xf32>
    %219 = arith.addf %215, %218 : vector<2x2x64xf32>
    %c2_128 = arith.constant 2 : index
    %c0_129 = arith.constant 0 : index
    %220 = vector.load %arg5[%c2_128, %c0_129] : memref<3x64xf32, #tpu.memory_space<vmem>>, vector<1x64xf32>
    %221 = vector.shape_cast %220 : vector<1x64xf32> to vector<1x1x64xf32>
    %222 = vector.broadcast %221 : vector<1x1x64xf32> to vector<2x2x64xf32>
    %223 = arith.mulf %203, %222 : vector<2x2x64xf32>
    %c2_130 = arith.constant 2 : index
    %c0_131 = arith.constant 0 : index
    %224 = vector.load %arg6[%c2_130, %c0_131] : memref<3x64xf32, #tpu.memory_space<vmem>>, vector<1x64xf32>
    %225 = vector.shape_cast %224 : vector<1x64xf32> to vector<1x1x64xf32>
    %226 = vector.broadcast %225 : vector<1x1x64xf32> to vector<2x2x64xf32>
    %227 = arith.addf %223, %226 : vector<2x2x64xf32>
    %228 = vector.extract_strided_slice %211 {offsets = [0, 0, 0], sizes = [1, 2, 64], strides = [1, 1, 1]} : vector<2x2x64xf32> to vector<1x2x64xf32>
    %229 = vector.shape_cast %228 : vector<1x2x64xf32> to vector<2x64xf32>
    %c1_132 = arith.constant 1 : index
    %c0_133 = arith.constant 0 : index
    %230 = vector.load %arg20[%c1_132, %c0_133] : memref<5x64xf32, #tpu.memory_space<vmem>>, vector<2x64xf32>
    tpu.vector_store %arg20[%c1_132, %c0_133], %229 {strides = array<i32>} : memref<5x64xf32, #tpu.memory_space<vmem>>, vector<2x64xf32>,
    %231 = vector.extract_strided_slice %219 {offsets = [0, 0, 0], sizes = [1, 2, 64], strides = [1, 1, 1]} : vector<2x2x64xf32> to vector<1x2x64xf32>
    %232 = vector.shape_cast %231 : vector<1x2x64xf32> to vector<2x64xf32>
    %c0_134 = arith.constant 0 : index
    %c0_135 = arith.constant 0 : index
    %233 = vector.load %arg23[%c0_134, %c0_135] : memref<4x64xf32, #tpu.memory_space<vmem>>, vector<2x64xf32>
    tpu.vector_store %arg23[%c0_134, %c0_135], %232 {strides = array<i32>} : memref<4x64xf32, #tpu.memory_space<vmem>>, vector<2x64xf32>,
    %234 = vector.extract_strided_slice %227 {offsets = [0, 0, 0], sizes = [1, 2, 64], strides = [1, 1, 1]} : vector<2x2x64xf32> to vector<1x2x64xf32>
    %235 = vector.shape_cast %234 : vector<1x2x64xf32> to vector<2x64xf32>
    %c0_136 = arith.constant 0 : index
    %c0_137 = arith.constant 0 : index
    %236 = vector.load %arg24[%c0_136, %c0_137] : memref<4x64xf32, #tpu.memory_space<vmem>>, vector<2x64xf32>
    tpu.vector_store %arg24[%c0_136, %c0_137], %235 {strides = array<i32>} : memref<4x64xf32, #tpu.memory_space<vmem>>, vector<2x64xf32>,
    %237 = vector.extract_strided_slice %211 {offsets = [1, 0, 0], sizes = [1, 2, 64], strides = [1, 1, 1]} : vector<2x2x64xf32> to vector<1x2x64xf32>
    %238 = vector.shape_cast %237 : vector<1x2x64xf32> to vector<2x64xf32>
    %c3_138 = arith.constant 3 : index
    %c0_139 = arith.constant 0 : index
    %239 = vector.load %arg20[%c3_138, %c0_139] : memref<5x64xf32, #tpu.memory_space<vmem>>, vector<2x64xf32>
    tpu.vector_store %arg20[%c3_138, %c0_139], %238 {strides = array<i32>} : memref<5x64xf32, #tpu.memory_space<vmem>>, vector<2x64xf32>,
    %240 = vector.extract_strided_slice %219 {offsets = [1, 0, 0], sizes = [1, 2, 64], strides = [1, 1, 1]} : vector<2x2x64xf32> to vector<1x2x64xf32>
    %241 = vector.shape_cast %240 : vector<1x2x64xf32> to vector<2x64xf32>
    %c2_140 = arith.constant 2 : index
    %c0_141 = arith.constant 0 : index
    %242 = vector.load %arg23[%c2_140, %c0_141] : memref<4x64xf32, #tpu.memory_space<vmem>>, vector<2x64xf32>
    tpu.vector_store %arg23[%c2_140, %c0_141], %241 {strides = array<i32>} : memref<4x64xf32, #tpu.memory_space<vmem>>, vector<2x64xf32>,
    %243 = vector.extract_strided_slice %227 {offsets = [1, 0, 0], sizes = [1, 2, 64], strides = [1, 1, 1]} : vector<2x2x64xf32> to vector<1x2x64xf32>
    %244 = vector.shape_cast %243 : vector<1x2x64xf32> to vector<2x64xf32>
    %c2_142 = arith.constant 2 : index
    %c0_143 = arith.constant 0 : index
    %245 = vector.load %arg24[%c2_142, %c0_143] : memref<4x64xf32, #tpu.memory_space<vmem>>, vector<2x64xf32>
    tpu.vector_store %arg24[%c2_142, %c0_143], %244 {strides = array<i32>} : memref<4x64xf32, #tpu.memory_space<vmem>>, vector<2x64xf32>,
    %c0_144 = arith.constant 0 : index
    %c0_145 = arith.constant 0 : index
    %246 = vector.load %arg7[%c0_144, %c0_145] : memref<1x4xbf16, #tpu.memory_space<vmem>>, vector<1x4xbf16>
    %c0_146 = arith.constant 0 : index
    %c0_147 = arith.constant 0 : index
    %247 = vector.load %arg23[%c0_146, %c0_147] : memref<4x64xf32, #tpu.memory_space<vmem>>, vector<4x64xf32>
    %248 = arith.truncf %247 : vector<4x64xf32> to vector<4x64xbf16>
    %cst_148 = arith.constant dense<0.000000e+00> : vector<1x64xf32>
    %249 = tpu.matmul %246, %248, %cst_148 {dimension_numbers = #tpu.dot_dimension_numbers<[1], [0], [0], [1], [0, 0, 1, 1], [], []>} : vector<1x4xbf16>, vector<4x64xbf16>, vector<1x64xf32> -> vector<1x64xf32>
    %c1_149 = arith.constant 1 : index
    %c0_150 = arith.constant 0 : index
    %250 = vector.load %arg21[%c1_149, %c0_150] : memref<2x64xf32, #tpu.memory_space<vmem>>, vector<1x64xf32>
    tpu.vector_store %arg21[%c1_149, %c0_150], %249 {strides = array<i32>} : memref<2x64xf32, #tpu.memory_space<vmem>>, vector<1x64xf32>,
    %c0_151 = arith.constant 0 : index
    %c0_152 = arith.constant 0 : index
    %251 = vector.load %arg24[%c0_151, %c0_152] : memref<4x64xf32, #tpu.memory_space<vmem>>, vector<4x64xf32>
    %252 = arith.truncf %251 : vector<4x64xf32> to vector<4x64xbf16>
    %cst_153 = arith.constant dense<0.000000e+00> : vector<1x64xf32>
    %253 = tpu.matmul %246, %252, %cst_153 {dimension_numbers = #tpu.dot_dimension_numbers<[1], [0], [0], [1], [0, 0, 1, 1], [], []>} : vector<1x4xbf16>, vector<4x64xbf16>, vector<1x64xf32> -> vector<1x64xf32>
    %c1_154 = arith.constant 1 : index
    %c0_155 = arith.constant 0 : index
    %254 = vector.load %arg22[%c1_154, %c0_155] : memref<2x64xf32, #tpu.memory_space<vmem>>, vector<1x64xf32>
    tpu.vector_store %arg22[%c1_154, %c0_155], %253 {strides = array<i32>} : memref<2x64xf32, #tpu.memory_space<vmem>>, vector<1x64xf32>,
    %255 = vector.extract_strided_slice %25 {offsets = [0, 0], sizes = [1, 64], strides = [1, 1]} : vector<5x64xf32> to vector<1x64xf32>
    %c0_156 = arith.constant 0 : index
    %c0_157 = arith.constant 0 : index
    %256 = vector.load %arg20[%c0_156, %c0_157] : memref<5x64xf32, #tpu.memory_space<vmem>>, vector<1x64xf32>
    tpu.vector_store %arg20[%c0_156, %c0_157], %255 {strides = array<i32>} : memref<5x64xf32, #tpu.memory_space<vmem>>, vector<1x64xf32>,
    %257 = vector.extract_strided_slice %25 {offsets = [0, 0], sizes = [1, 64], strides = [1, 1]} : vector<5x64xf32> to vector<1x64xf32>
    %c0_158 = arith.constant 0 : index
    %c0_159 = arith.constant 0 : index
    %258 = vector.load %arg21[%c0_158, %c0_159] : memref<2x64xf32, #tpu.memory_space<vmem>>, vector<1x64xf32>
    tpu.vector_store %arg21[%c0_158, %c0_159], %257 {strides = array<i32>} : memref<2x64xf32, #tpu.memory_space<vmem>>, vector<1x64xf32>,
    %259 = vector.extract_strided_slice %25 {offsets = [0, 0], sizes = [1, 64], strides = [1, 1]} : vector<5x64xf32> to vector<1x64xf32>
    %c0_160 = arith.constant 0 : index
    %c0_161 = arith.constant 0 : index
    %260 = vector.load %arg22[%c0_160, %c0_161] : memref<2x64xf32, #tpu.memory_space<vmem>>, vector<1x64xf32>
    tpu.vector_store %arg22[%c0_160, %c0_161], %259 {strides = array<i32>} : memref<2x64xf32, #tpu.memory_space<vmem>>, vector<1x64xf32>,
    %c0_162 = arith.constant 0 : index
    %c0_163 = arith.constant 0 : index
    %261 = vector.load %arg20[%c0_162, %c0_163] : memref<5x64xf32, #tpu.memory_space<vmem>>, vector<5x64xf32>
    %262 = arith.truncf %261 : vector<5x64xf32> to vector<5x64xbf16>
    %c0_164 = arith.constant 0 : index
    %c0_165 = arith.constant 0 : index
    %c0_166 = arith.constant 0 : index
    %263 = vector.load %arg8[%c0_164, %c0_165, %c0_166] : memref<3x64x64xbf16, #tpu.memory_space<vmem>>, vector<1x64x64xbf16>
    %264 = vector.shape_cast %263 : vector<1x64x64xbf16> to vector<64x64xbf16>
    %cst_167 = arith.constant dense<0.000000e+00> : vector<5x64xf32>
    %265 = tpu.matmul %262, %264, %cst_167 {dimension_numbers = #tpu.dot_dimension_numbers<[1], [0], [0], [1], [0, 0, 1, 1], [], []>} : vector<5x64xbf16>, vector<64x64xbf16>, vector<5x64xf32> -> vector<5x64xf32>
    %c0_168 = arith.constant 0 : index
    %c0_169 = arith.constant 0 : index
    %266 = vector.load %arg9[%c0_168, %c0_169] : memref<3x64xf32, #tpu.memory_space<vmem>>, vector<1x64xf32>
    %267 = vector.broadcast %266 : vector<1x64xf32> to vector<5x64xf32>
    %268 = arith.addf %265, %267 : vector<5x64xf32>
    %c0_170 = arith.constant 0 : index
    %c0_171 = arith.constant 0 : index
    %269 = vector.load %arg21[%c0_170, %c0_171] : memref<2x64xf32, #tpu.memory_space<vmem>>, vector<2x64xf32>
    %270 = arith.truncf %269 : vector<2x64xf32> to vector<2x64xbf16>
    %c1_172 = arith.constant 1 : index
    %c0_173 = arith.constant 0 : index
    %c0_174 = arith.constant 0 : index
    %271 = vector.load %arg8[%c1_172, %c0_173, %c0_174] : memref<3x64x64xbf16, #tpu.memory_space<vmem>>, vector<1x64x64xbf16>
    %272 = vector.shape_cast %271 : vector<1x64x64xbf16> to vector<64x64xbf16>
    %cst_175 = arith.constant dense<0.000000e+00> : vector<2x64xf32>
    %273 = tpu.matmul %270, %272, %cst_175 {dimension_numbers = #tpu.dot_dimension_numbers<[1], [0], [0], [1], [0, 0, 1, 1], [], []>} : vector<2x64xbf16>, vector<64x64xbf16>, vector<2x64xf32> -> vector<2x64xf32>
    %c1_176 = arith.constant 1 : index
    %c0_177 = arith.constant 0 : index
    %274 = vector.load %arg9[%c1_176, %c0_177] : memref<3x64xf32, #tpu.memory_space<vmem>>, vector<1x64xf32>
    %275 = vector.broadcast %274 : vector<1x64xf32> to vector<2x64xf32>
    %276 = arith.addf %273, %275 : vector<2x64xf32>
    %c0_178 = arith.constant 0 : index
    %c0_179 = arith.constant 0 : index
    %277 = vector.load %arg22[%c0_178, %c0_179] : memref<2x64xf32, #tpu.memory_space<vmem>>, vector<2x64xf32>
    %278 = arith.truncf %277 : vector<2x64xf32> to vector<2x64xbf16>
    %c2_180 = arith.constant 2 : index
    %c0_181 = arith.constant 0 : index
    %c0_182 = arith.constant 0 : index
    %279 = vector.load %arg8[%c2_180, %c0_181, %c0_182] : memref<3x64x64xbf16, #tpu.memory_space<vmem>>, vector<1x64x64xbf16>
    %280 = vector.shape_cast %279 : vector<1x64x64xbf16> to vector<64x64xbf16>
    %cst_183 = arith.constant dense<0.000000e+00> : vector<2x64xf32>
    %281 = tpu.matmul %278, %280, %cst_183 {dimension_numbers = #tpu.dot_dimension_numbers<[1], [0], [0], [1], [0, 0, 1, 1], [], []>} : vector<2x64xbf16>, vector<64x64xbf16>, vector<2x64xf32> -> vector<2x64xf32>
    %c2_184 = arith.constant 2 : index
    %c0_185 = arith.constant 0 : index
    %282 = vector.load %arg9[%c2_184, %c0_185] : memref<3x64xf32, #tpu.memory_space<vmem>>, vector<1x64xf32>
    %283 = vector.broadcast %282 : vector<1x64xf32> to vector<2x64xf32>
    %284 = arith.addf %281, %283 : vector<2x64xf32>
    %285 = vector.extract_strided_slice %268 {offsets = [0, 0], sizes = [5, 16], strides = [1, 1]} : vector<5x64xf32> to vector<5x16xf32>
    %286 = vector.extract_strided_slice %276 {offsets = [0, 0], sizes = [2, 16], strides = [1, 1]} : vector<2x64xf32> to vector<2x16xf32>
    %287 = vector.extract_strided_slice %284 {offsets = [0, 0], sizes = [2, 16], strides = [1, 1]} : vector<2x64xf32> to vector<2x16xf32>
    %288 = arith.truncf %285 : vector<5x16xf32> to vector<5x16xbf16>
    %289 = arith.truncf %286 : vector<2x16xf32> to vector<2x16xbf16>
    %cst_186 = arith.constant dense<0.000000e+00> : vector<5x2xf32>
    %290 = tpu.matmul %288, %289, %cst_186 {dimension_numbers = #tpu.dot_dimension_numbers<[1], [1], [0], [0], [0, 0, 1, 0], [], []>} : vector<5x16xbf16>, vector<2x16xbf16>, vector<5x2xf32> -> vector<5x2xf32>
    %cst_187 = arith.constant dense<0xFF800000> : vector<5xf32>
    %291 = vector.multi_reduction <maximumf>, %290, %cst_187 [1] : vector<5x2xf32> to vector<5xf32>
    %292 = vector.shape_cast %291 : vector<5xf32> to vector<5x1xf32>
    %293 = vector.broadcast %292 : vector<5x1xf32> to vector<5x2xf32>
    %294 = arith.subf %290, %293 : vector<5x2xf32>
    %295 = math.exp %294 : vector<5x2xf32>
    %cst_188 = arith.constant dense<0.000000e+00> : vector<5xf32>
    %296 = vector.multi_reduction <add>, %295, %cst_188 [1] : vector<5x2xf32> to vector<5xf32>
    %297 = vector.shape_cast %296 : vector<5xf32> to vector<5x1xf32>
    %298 = tpu.reciprocal %297 {approx = true} : vector<5x1xf32> -> vector<5x1xf32>
    %299 = vector.broadcast %298 : vector<5x1xf32> to vector<5x2xf32>
    %300 = arith.mulf %295, %299 : vector<5x2xf32>
    %301 = arith.truncf %300 : vector<5x2xf32> to vector<5x2xbf16>
    %302 = arith.truncf %287 : vector<2x16xf32> to vector<2x16xbf16>
    %cst_189 = arith.constant dense<0.000000e+00> : vector<5x16xf32>
    %303 = tpu.matmul %301, %302, %cst_189 {dimension_numbers = #tpu.dot_dimension_numbers<[1], [0], [0], [1], [0, 0, 1, 1], [], []>} : vector<5x2xbf16>, vector<2x16xbf16>, vector<5x16xf32> -> vector<5x16xf32>
    %304 = arith.truncf %303 : vector<5x16xf32> to vector<5x16xbf16>
    %c0_190 = arith.constant 0 : index
    %c0_191 = arith.constant 0 : index
    %305 = vector.load %arg10[%c0_190, %c0_191] : memref<64x64xbf16, #tpu.memory_space<vmem>>, vector<16x64xbf16>
    %cst_192 = arith.constant dense<0.000000e+00> : vector<5x64xf32>
    %306 = tpu.matmul %304, %305, %cst_192 {dimension_numbers = #tpu.dot_dimension_numbers<[1], [0], [0], [1], [0, 0, 1, 1], [], []>} : vector<5x16xbf16>, vector<16x64xbf16>, vector<5x64xf32> -> vector<5x64xf32>
    %307 = vector.extract_strided_slice %268 {offsets = [0, 16], sizes = [5, 16], strides = [1, 1]} : vector<5x64xf32> to vector<5x16xf32>
    %308 = vector.extract_strided_slice %276 {offsets = [0, 16], sizes = [2, 16], strides = [1, 1]} : vector<2x64xf32> to vector<2x16xf32>
    %309 = vector.extract_strided_slice %284 {offsets = [0, 16], sizes = [2, 16], strides = [1, 1]} : vector<2x64xf32> to vector<2x16xf32>
    %310 = arith.truncf %307 : vector<5x16xf32> to vector<5x16xbf16>
    %311 = arith.truncf %308 : vector<2x16xf32> to vector<2x16xbf16>
    %cst_193 = arith.constant dense<0.000000e+00> : vector<5x2xf32>
    %312 = tpu.matmul %310, %311, %cst_193 {dimension_numbers = #tpu.dot_dimension_numbers<[1], [1], [0], [0], [0, 0, 1, 0], [], []>} : vector<5x16xbf16>, vector<2x16xbf16>, vector<5x2xf32> -> vector<5x2xf32>
    %cst_194 = arith.constant dense<0xFF800000> : vector<5xf32>
    %313 = vector.multi_reduction <maximumf>, %312, %cst_194 [1] : vector<5x2xf32> to vector<5xf32>
    %314 = vector.shape_cast %313 : vector<5xf32> to vector<5x1xf32>
    %315 = vector.broadcast %314 : vector<5x1xf32> to vector<5x2xf32>
    %316 = arith.subf %312, %315 : vector<5x2xf32>
    %317 = math.exp %316 : vector<5x2xf32>
    %cst_195 = arith.constant dense<0.000000e+00> : vector<5xf32>
    %318 = vector.multi_reduction <add>, %317, %cst_195 [1] : vector<5x2xf32> to vector<5xf32>
    %319 = vector.shape_cast %318 : vector<5xf32> to vector<5x1xf32>
    %320 = tpu.reciprocal %319 {approx = true} : vector<5x1xf32> -> vector<5x1xf32>
    %321 = vector.broadcast %320 : vector<5x1xf32> to vector<5x2xf32>
    %322 = arith.mulf %317, %321 : vector<5x2xf32>
    %323 = arith.truncf %322 : vector<5x2xf32> to vector<5x2xbf16>
    %324 = arith.truncf %309 : vector<2x16xf32> to vector<2x16xbf16>
    %cst_196 = arith.constant dense<0.000000e+00> : vector<5x16xf32>
    %325 = tpu.matmul %323, %324, %cst_196 {dimension_numbers = #tpu.dot_dimension_numbers<[1], [0], [0], [1], [0, 0, 1, 1], [], []>} : vector<5x2xbf16>, vector<2x16xbf16>, vector<5x16xf32> -> vector<5x16xf32>
    %326 = arith.truncf %325 : vector<5x16xf32> to vector<5x16xbf16>
    %c16 = arith.constant 16 : index
    %c0_197 = arith.constant 0 : index
    %327 = vector.load %arg10[%c16, %c0_197] : memref<64x64xbf16, #tpu.memory_space<vmem>>, vector<16x64xbf16>
    %cst_198 = arith.constant dense<0.000000e+00> : vector<5x64xf32>
    %328 = tpu.matmul %326, %327, %cst_198 {dimension_numbers = #tpu.dot_dimension_numbers<[1], [0], [0], [1], [0, 0, 1, 1], [], []>} : vector<5x16xbf16>, vector<16x64xbf16>, vector<5x64xf32> -> vector<5x64xf32>
    %329 = arith.addf %306, %328 : vector<5x64xf32>
    %330 = vector.extract_strided_slice %268 {offsets = [0, 32], sizes = [5, 16], strides = [1, 1]} : vector<5x64xf32> to vector<5x16xf32>
    %331 = vector.extract_strided_slice %276 {offsets = [0, 32], sizes = [2, 16], strides = [1, 1]} : vector<2x64xf32> to vector<2x16xf32>
    %332 = vector.extract_strided_slice %284 {offsets = [0, 32], sizes = [2, 16], strides = [1, 1]} : vector<2x64xf32> to vector<2x16xf32>
    %333 = arith.truncf %330 : vector<5x16xf32> to vector<5x16xbf16>
    %334 = arith.truncf %331 : vector<2x16xf32> to vector<2x16xbf16>
    %cst_199 = arith.constant dense<0.000000e+00> : vector<5x2xf32>
    %335 = tpu.matmul %333, %334, %cst_199 {dimension_numbers = #tpu.dot_dimension_numbers<[1], [1], [0], [0], [0, 0, 1, 0], [], []>} : vector<5x16xbf16>, vector<2x16xbf16>, vector<5x2xf32> -> vector<5x2xf32>
    %cst_200 = arith.constant dense<0xFF800000> : vector<5xf32>
    %336 = vector.multi_reduction <maximumf>, %335, %cst_200 [1] : vector<5x2xf32> to vector<5xf32>
    %337 = vector.shape_cast %336 : vector<5xf32> to vector<5x1xf32>
    %338 = vector.broadcast %337 : vector<5x1xf32> to vector<5x2xf32>
    %339 = arith.subf %335, %338 : vector<5x2xf32>
    %340 = math.exp %339 : vector<5x2xf32>
    %cst_201 = arith.constant dense<0.000000e+00> : vector<5xf32>
    %341 = vector.multi_reduction <add>, %340, %cst_201 [1] : vector<5x2xf32> to vector<5xf32>
    %342 = vector.shape_cast %341 : vector<5xf32> to vector<5x1xf32>
    %343 = tpu.reciprocal %342 {approx = true} : vector<5x1xf32> -> vector<5x1xf32>
    %344 = vector.broadcast %343 : vector<5x1xf32> to vector<5x2xf32>
    %345 = arith.mulf %340, %344 : vector<5x2xf32>
    %346 = arith.truncf %345 : vector<5x2xf32> to vector<5x2xbf16>
    %347 = arith.truncf %332 : vector<2x16xf32> to vector<2x16xbf16>
    %cst_202 = arith.constant dense<0.000000e+00> : vector<5x16xf32>
    %348 = tpu.matmul %346, %347, %cst_202 {dimension_numbers = #tpu.dot_dimension_numbers<[1], [0], [0], [1], [0, 0, 1, 1], [], []>} : vector<5x2xbf16>, vector<2x16xbf16>, vector<5x16xf32> -> vector<5x16xf32>
    %349 = arith.truncf %348 : vector<5x16xf32> to vector<5x16xbf16>
    %c32 = arith.constant 32 : index
    %c0_203 = arith.constant 0 : index
    %350 = vector.load %arg10[%c32, %c0_203] : memref<64x64xbf16, #tpu.memory_space<vmem>>, vector<16x64xbf16>
    %cst_204 = arith.constant dense<0.000000e+00> : vector<5x64xf32>
    %351 = tpu.matmul %349, %350, %cst_204 {dimension_numbers = #tpu.dot_dimension_numbers<[1], [0], [0], [1], [0, 0, 1, 1], [], []>} : vector<5x16xbf16>, vector<16x64xbf16>, vector<5x64xf32> -> vector<5x64xf32>
    %352 = arith.addf %329, %351 : vector<5x64xf32>
    %353 = vector.extract_strided_slice %268 {offsets = [0, 48], sizes = [5, 16], strides = [1, 1]} : vector<5x64xf32> to vector<5x16xf32>
    %354 = vector.extract_strided_slice %276 {offsets = [0, 48], sizes = [2, 16], strides = [1, 1]} : vector<2x64xf32> to vector<2x16xf32>
    %355 = vector.extract_strided_slice %284 {offsets = [0, 48], sizes = [2, 16], strides = [1, 1]} : vector<2x64xf32> to vector<2x16xf32>
    %356 = arith.truncf %353 : vector<5x16xf32> to vector<5x16xbf16>
    %357 = arith.truncf %354 : vector<2x16xf32> to vector<2x16xbf16>
    %cst_205 = arith.constant dense<0.000000e+00> : vector<5x2xf32>
    %358 = tpu.matmul %356, %357, %cst_205 {dimension_numbers = #tpu.dot_dimension_numbers<[1], [1], [0], [0], [0, 0, 1, 0], [], []>} : vector<5x16xbf16>, vector<2x16xbf16>, vector<5x2xf32> -> vector<5x2xf32>
    %cst_206 = arith.constant dense<0xFF800000> : vector<5xf32>
    %359 = vector.multi_reduction <maximumf>, %358, %cst_206 [1] : vector<5x2xf32> to vector<5xf32>
    %360 = vector.shape_cast %359 : vector<5xf32> to vector<5x1xf32>
    %361 = vector.broadcast %360 : vector<5x1xf32> to vector<5x2xf32>
    %362 = arith.subf %358, %361 : vector<5x2xf32>
    %363 = math.exp %362 : vector<5x2xf32>
    %cst_207 = arith.constant dense<0.000000e+00> : vector<5xf32>
    %364 = vector.multi_reduction <add>, %363, %cst_207 [1] : vector<5x2xf32> to vector<5xf32>
    %365 = vector.shape_cast %364 : vector<5xf32> to vector<5x1xf32>
    %366 = tpu.reciprocal %365 {approx = true} : vector<5x1xf32> -> vector<5x1xf32>
    %367 = vector.broadcast %366 : vector<5x1xf32> to vector<5x2xf32>
    %368 = arith.mulf %363, %367 : vector<5x2xf32>
    %369 = arith.truncf %368 : vector<5x2xf32> to vector<5x2xbf16>
    %370 = arith.truncf %355 : vector<2x16xf32> to vector<2x16xbf16>
    %cst_208 = arith.constant dense<0.000000e+00> : vector<5x16xf32>
    %371 = tpu.matmul %369, %370, %cst_208 {dimension_numbers = #tpu.dot_dimension_numbers<[1], [0], [0], [1], [0, 0, 1, 1], [], []>} : vector<5x2xbf16>, vector<2x16xbf16>, vector<5x16xf32> -> vector<5x16xf32>
    %372 = arith.truncf %371 : vector<5x16xf32> to vector<5x16xbf16>
    %c48 = arith.constant 48 : index
    %c0_209 = arith.constant 0 : index
    %373 = vector.load %arg10[%c48, %c0_209] : memref<64x64xbf16, #tpu.memory_space<vmem>>, vector<16x64xbf16>
    %cst_210 = arith.constant dense<0.000000e+00> : vector<5x64xf32>
    %374 = tpu.matmul %372, %373, %cst_210 {dimension_numbers = #tpu.dot_dimension_numbers<[1], [0], [0], [1], [0, 0, 1, 1], [], []>} : vector<5x16xbf16>, vector<16x64xbf16>, vector<5x64xf32> -> vector<5x64xf32>
    %375 = arith.addf %352, %374 : vector<5x64xf32>
    %376 = arith.addf %1, %375 : vector<5x64xf32>
    %c0_211 = arith.constant 0 : index
    %c0_212 = arith.constant 0 : index
    %377 = vector.load %arg11[%c0_211, %c0_212] : memref<1x64xf32, #tpu.memory_space<vmem>>, vector<1x64xf32>
    %378 = vector.broadcast %377 : vector<1x64xf32> to vector<5x64xf32>
    %379 = arith.addf %376, %378 : vector<5x64xf32>
    %c0_213 = arith.constant 0 : index
    %c0_214 = arith.constant 0 : index
    %380 = vector.load %arg12[%c0_213, %c0_214] : memref<1x64xf32, #tpu.memory_space<vmem>>, vector<1x64xf32>
    %c0_215 = arith.constant 0 : index
    %c0_216 = arith.constant 0 : index
    %381 = vector.load %arg13[%c0_215, %c0_216] : memref<1x64xf32, #tpu.memory_space<vmem>>, vector<1x64xf32>
    %cst_217 = arith.constant dense<0.000000e+00> : vector<5xf32>
    %382 = vector.multi_reduction <add>, %379, %cst_217 [1] : vector<5x64xf32> to vector<5xf32>
    %383 = vector.shape_cast %382 : vector<5xf32> to vector<5x1xf32>
    %cst_218 = arith.constant 6.400000e+01 : f32
    %384 = vector.broadcast %cst_218 : f32 to vector<5x1xf32>
    %385 = arith.divf %383, %384 : vector<5x1xf32>
    %386 = vector.broadcast %385 : vector<5x1xf32> to vector<5x64xf32>
    %387 = arith.subf %379, %386 : vector<5x64xf32>
    %388 = arith.mulf %387, %387 : vector<5x64xf32>
    %cst_219 = arith.constant dense<0.000000e+00> : vector<5xf32>
    %389 = vector.multi_reduction <add>, %388, %cst_219 [1] : vector<5x64xf32> to vector<5xf32>
    %390 = vector.shape_cast %389 : vector<5xf32> to vector<5x1xf32>
    %cst_220 = arith.constant 6.400000e+01 : f32
    %391 = vector.broadcast %cst_220 : f32 to vector<5x1xf32>
    %392 = arith.divf %390, %391 : vector<5x1xf32>
    %393 = vector.broadcast %385 : vector<5x1xf32> to vector<5x64xf32>
    %394 = arith.subf %379, %393 : vector<5x64xf32>
    %cst_221 = arith.constant 9.99999974E-6 : f32
    %395 = vector.broadcast %cst_221 : f32 to vector<5x1xf32>
    %396 = arith.addf %392, %395 : vector<5x1xf32>
    %397 = math.rsqrt %396 : vector<5x1xf32>
    %398 = vector.broadcast %397 : vector<5x1xf32> to vector<5x64xf32>
    %399 = arith.mulf %394, %398 : vector<5x64xf32>
    %400 = vector.broadcast %380 : vector<1x64xf32> to vector<5x64xf32>
    %401 = arith.mulf %399, %400 : vector<5x64xf32>
    %402 = vector.broadcast %381 : vector<1x64xf32> to vector<5x64xf32>
    %403 = arith.addf %401, %402 : vector<5x64xf32>
    %404 = arith.truncf %403 : vector<5x64xf32> to vector<5x64xbf16>
    %c0_222 = arith.constant 0 : index
    %c0_223 = arith.constant 0 : index
    %405 = vector.load %arg14[%c0_222, %c0_223] : memref<64x256xbf16, #tpu.memory_space<vmem>>, vector<64x256xbf16>
    %cst_224 = arith.constant dense<0.000000e+00> : vector<5x256xf32>
    %406 = tpu.matmul %404, %405, %cst_224 {dimension_numbers = #tpu.dot_dimension_numbers<[1], [0], [0], [1], [0, 0, 1, 1], [], []>} : vector<5x64xbf16>, vector<64x256xbf16>, vector<5x256xf32> -> vector<5x256xf32>
    %c0_225 = arith.constant 0 : index
    %c0_226 = arith.constant 0 : index
    %407 = vector.load %arg15[%c0_225, %c0_226] : memref<1x256xf32, #tpu.memory_space<vmem>>, vector<1x256xf32>
    %408 = vector.broadcast %407 : vector<1x256xf32> to vector<5x256xf32>
    %409 = arith.addf %406, %408 : vector<5x256xf32>
    %cst_227 = arith.constant 5.000000e-01 : f32
    %410 = vector.broadcast %cst_227 : f32 to vector<5x256xf32>
    %411 = arith.mulf %410, %409 : vector<5x256xf32>
    %cst_228 = arith.constant 0.707106769 : f32
    %412 = vector.broadcast %cst_228 : f32 to vector<5x256xf32>
    %413 = arith.mulf %409, %412 : vector<5x256xf32>
    %414 = math.absf %413 : vector<5x256xf32>
    %cst_229 = arith.constant 0.327591091 : f32
    %415 = vector.broadcast %cst_229 : f32 to vector<5x256xf32>
    %416 = arith.mulf %415, %414 : vector<5x256xf32>
    %cst_230 = arith.constant 1.000000e+00 : f32
    %417 = vector.broadcast %cst_230 : f32 to vector<5x256xf32>
    %418 = arith.addf %417, %416 : vector<5x256xf32>
    %cst_231 = arith.constant 1.000000e+00 : f32
    %419 = vector.broadcast %cst_231 : f32 to vector<5x256xf32>
    %420 = arith.divf %419, %418 : vector<5x256xf32>
    %cst_232 = arith.constant 1.06140542 : f32
    %421 = vector.broadcast %cst_232 : f32 to vector<5x256xf32>
    %422 = arith.mulf %420, %421 : vector<5x256xf32>
    %cst_233 = arith.constant -1.45315206 : f32
    %423 = vector.broadcast %cst_233 : f32 to vector<5x256xf32>
    %424 = arith.addf %423, %422 : vector<5x256xf32>
    %425 = arith.mulf %420, %424 : vector<5x256xf32>
    %cst_234 = arith.constant 1.42141378 : f32
    %426 = vector.broadcast %cst_234 : f32 to vector<5x256xf32>
    %427 = arith.addf %426, %425 : vector<5x256xf32>
    %428 = arith.mulf %420, %427 : vector<5x256xf32>
    %cst_235 = arith.constant -0.284496725 : f32
    %429 = vector.broadcast %cst_235 : f32 to vector<5x256xf32>
    %430 = arith.addf %429, %428 : vector<5x256xf32>
    %431 = arith.mulf %420, %430 : vector<5x256xf32>
    %cst_236 = arith.constant 0.254829586 : f32
    %432 = vector.broadcast %cst_236 : f32 to vector<5x256xf32>
    %433 = arith.addf %432, %431 : vector<5x256xf32>
    %434 = arith.mulf %420, %433 : vector<5x256xf32>
    %cst_237 = arith.constant 0.000000e+00 : f32
    %435 = vector.broadcast %cst_237 : f32 to vector<5x256xf32>
    %436 = arith.subf %435, %414 : vector<5x256xf32>
    %437 = arith.mulf %436, %414 : vector<5x256xf32>
    %438 = math.exp %437 : vector<5x256xf32>
    %439 = arith.mulf %434, %438 : vector<5x256xf32>
    %cst_238 = arith.constant 1.000000e+00 : f32
    %440 = vector.broadcast %cst_238 : f32 to vector<5x256xf32>
    %441 = arith.subf %440, %439 : vector<5x256xf32>
    %cst_239 = arith.constant 0.000000e+00 : f32
    %442 = vector.broadcast %cst_239 : f32 to vector<5x256xf32>
    %443 = arith.cmpf olt, %413, %442 : vector<5x256xf32>
    %cst_240 = arith.constant 0.000000e+00 : f32
    %444 = vector.broadcast %cst_240 : f32 to vector<5x256xf32>
    %445 = arith.subf %444, %441 : vector<5x256xf32>
    %446 = arith.select %443, %445, %441 : vector<5x256xi1>, vector<5x256xf32>
    %cst_241 = arith.constant 1.000000e+00 : f32
    %447 = vector.broadcast %cst_241 : f32 to vector<5x256xf32>
    %448 = arith.addf %447, %446 : vector<5x256xf32>
    %449 = arith.mulf %411, %448 : vector<5x256xf32>
    %450 = arith.truncf %449 : vector<5x256xf32> to vector<5x256xbf16>
    %c0_242 = arith.constant 0 : index
    %c0_243 = arith.constant 0 : index
    %451 = vector.load %arg16[%c0_242, %c0_243] : memref<256x64xbf16, #tpu.memory_space<vmem>>, vector<256x64xbf16>
    %cst_244 = arith.constant dense<0.000000e+00> : vector<5x64xf32>
    %452 = tpu.matmul %450, %451, %cst_244 {dimension_numbers = #tpu.dot_dimension_numbers<[1], [0], [0], [1], [0, 0, 1, 1], [], []>} : vector<5x256xbf16>, vector<256x64xbf16>, vector<5x64xf32> -> vector<5x64xf32>
    %453 = arith.addf %379, %452 : vector<5x64xf32>
    %c0_245 = arith.constant 0 : index
    %c0_246 = arith.constant 0 : index
    %454 = vector.load %arg17[%c0_245, %c0_246] : memref<1x64xf32, #tpu.memory_space<vmem>>, vector<1x64xf32>
    %455 = vector.broadcast %454 : vector<1x64xf32> to vector<5x64xf32>
    %456 = arith.addf %453, %455 : vector<5x64xf32>
    %c0_247 = arith.constant 0 : index
    %c0_248 = arith.constant 0 : index
    %c0_249 = arith.constant 0 : index
    %457 = vector.load %arg18[%c0_247, %c0_248, %c0_249] : memref<1x5x64xf32, #tpu.memory_space<vmem>>, vector<1x5x64xf32>
    %458 = vector.shape_cast %457 : vector<1x5x64xf32> to vector<5x64xf32>
    %459 = vector.shape_cast %456 : vector<5x64xf32> to vector<1x5x64xf32>
    tpu.vector_store %arg18[%c0_247, %c0_248, %c0_249], %459 {strides = array<i32>} : memref<1x5x64xf32, #tpu.memory_space<vmem>>, vector<1x5x64xf32>,
    return
  }
  func.func @transform_0(%arg0: i32) -> (i32, i32, i32) {
    %c0_i32 = arith.constant 0 : i32
    %c0_i32_0 = arith.constant 0 : i32
    %c0_i32_1 = arith.constant 0 : i32
    return %arg0, %c0_i32, %c0_i32_0 : i32, i32, i32
  }
  func.func @transform_1(%arg0: i32) -> (i32, i32) {
    %c0_i32 = arith.constant 0 : i32
    %c0_i32_0 = arith.constant 0 : i32
    %c0_i32_1 = arith.constant 0 : i32
    return %c0_i32, %c0_i32_0 : i32, i32
  }
  func.func @transform_2(%arg0: i32) -> (i32, i32) {
    %c0_i32 = arith.constant 0 : i32
    %c0_i32_0 = arith.constant 0 : i32
    %c0_i32_1 = arith.constant 0 : i32
    return %c0_i32, %c0_i32_0 : i32, i32
  }
  func.func @transform_3(%arg0: i32) -> (i32, i32, i32) {
    %c0_i32 = arith.constant 0 : i32
    %c0_i32_0 = arith.constant 0 : i32
    %c0_i32_1 = arith.constant 0 : i32
    %c0_i32_2 = arith.constant 0 : i32
    return %c0_i32, %c0_i32_0, %c0_i32_1 : i32, i32, i32
  }
  func.func @transform_4(%arg0: i32) -> (i32, i32) {
    %c0_i32 = arith.constant 0 : i32
    %c0_i32_0 = arith.constant 0 : i32
    %c0_i32_1 = arith.constant 0 : i32
    return %c0_i32, %c0_i32_0 : i32, i32
  }
  func.func @transform_5(%arg0: i32) -> (i32, i32) {
    %c0_i32 = arith.constant 0 : i32
    %c0_i32_0 = arith.constant 0 : i32
    %c0_i32_1 = arith.constant 0 : i32
    return %c0_i32, %c0_i32_0 : i32, i32
  }
  func.func @transform_6(%arg0: i32) -> (i32, i32) {
    %c0_i32 = arith.constant 0 : i32
    %c0_i32_0 = arith.constant 0 : i32
    %c0_i32_1 = arith.constant 0 : i32
    return %c0_i32, %c0_i32_0 : i32, i32
  }
  func.func @transform_7(%arg0: i32) -> (i32, i32, i32) {
    %c0_i32 = arith.constant 0 : i32
    %c0_i32_0 = arith.constant 0 : i32
    %c0_i32_1 = arith.constant 0 : i32
    %c0_i32_2 = arith.constant 0 : i32
    return %c0_i32, %c0_i32_0, %c0_i32_1 : i32, i32, i32
  }
  func.func @transform_8(%arg0: i32) -> (i32, i32) {
    %c0_i32 = arith.constant 0 : i32
    %c0_i32_0 = arith.constant 0 : i32
    %c0_i32_1 = arith.constant 0 : i32
    return %c0_i32, %c0_i32_0 : i32, i32
  }
  func.func @transform_9(%arg0: i32) -> (i32, i32) {
    %c0_i32 = arith.constant 0 : i32
    %c0_i32_0 = arith.constant 0 : i32
    %c0_i32_1 = arith.constant 0 : i32
    return %c0_i32, %c0_i32_0 : i32, i32
  }
  func.func @transform_10(%arg0: i32) -> (i32, i32) {
    %c0_i32 = arith.constant 0 : i32
    %c0_i32_0 = arith.constant 0 : i32
    %c0_i32_1 = arith.constant 0 : i32
    return %c0_i32, %c0_i32_0 : i32, i32
  }
  func.func @transform_11(%arg0: i32) -> (i32, i32) {
    %c0_i32 = arith.constant 0 : i32
    %c0_i32_0 = arith.constant 0 : i32
    %c0_i32_1 = arith.constant 0 : i32
    return %c0_i32, %c0_i32_0 : i32, i32
  }
  func.func @transform_12(%arg0: i32) -> (i32, i32) {
    %c0_i32 = arith.constant 0 : i32
    %c0_i32_0 = arith.constant 0 : i32
    %c0_i32_1 = arith.constant 0 : i32
    return %c0_i32, %c0_i32_0 : i32, i32
  }
  func.func @transform_13(%arg0: i32) -> (i32, i32) {
    %c0_i32 = arith.constant 0 : i32
    %c0_i32_0 = arith.constant 0 : i32
    %c0_i32_1 = arith.constant 0 : i32
    return %c0_i32, %c0_i32_0 : i32, i32
  }
  func.func @transform_14(%arg0: i32) -> (i32, i32) {
    %c0_i32 = arith.constant 0 : i32
    %c0_i32_0 = arith.constant 0 : i32
    %c0_i32_1 = arith.constant 0 : i32
    return %c0_i32, %c0_i32_0 : i32, i32
  }
  func.func @transform_15(%arg0: i32) -> (i32, i32) {
    %c0_i32 = arith.constant 0 : i32
    %c0_i32_0 = arith.constant 0 : i32
    %c0_i32_1 = arith.constant 0 : i32
    return %c0_i32, %c0_i32_0 : i32, i32
  }
  func.func @transform_16(%arg0: i32) -> (i32, i32) {
    %c0_i32 = arith.constant 0 : i32
    %c0_i32_0 = arith.constant 0 : i32
    %c0_i32_1 = arith.constant 0 : i32
    return %c0_i32, %c0_i32_0 : i32, i32
  }
  func.func @transform_17(%arg0: i32) -> (i32, i32, i32) {
    %c0_i32 = arith.constant 0 : i32
    %c0_i32_0 = arith.constant 0 : i32
    %c0_i32_1 = arith.constant 0 : i32
    return %arg0, %c0_i32, %c0_i32_0 : i32, i32, i32
  }
}

module attributes {stable_mosaic.version = 11 : i64} {
  func.func @_head_kernel(%arg0: i32, %arg1: memref<2x64xf32, #tpu.memory_space<vmem>>, %arg2: memref<1x64xf32, #tpu.memory_space<vmem>>, %arg3: memref<1x64xf32, #tpu.memory_space<vmem>>, %arg4: memref<64x10xbf16, #tpu.memory_space<vmem>>, %arg5: memref<1x10xf32, #tpu.memory_space<vmem>>, %arg6: memref<2x10xf32, #tpu.memory_space<vmem>>) attributes {dimension_semantics = [#tpu.dimension_semantics<parallel>], iteration_bounds = array<i64: 1>, scalar_prefetch = 0 : i64, scratch_operands = 0 : i64, tpu.core_type = #tpu.core_type<tc>, window_params = [{pipeline_mode = #tpu.pipeline_mode<synchronous>, transform_indices = @transform_0, window_bounds = array<i64: 2, 64>}, {pipeline_mode = #tpu.pipeline_mode<synchronous>, transform_indices = @transform_1, window_bounds = array<i64: 1, 64>}, {pipeline_mode = #tpu.pipeline_mode<synchronous>, transform_indices = @transform_2, window_bounds = array<i64: 1, 64>}, {pipeline_mode = #tpu.pipeline_mode<synchronous>, transform_indices = @transform_3, window_bounds = array<i64: 64, 10>}, {pipeline_mode = #tpu.pipeline_mode<synchronous>, transform_indices = @transform_4, window_bounds = array<i64: 1, 10>}, {pipeline_mode = #tpu.pipeline_mode<synchronous>, transform_indices = @transform_5, window_bounds = array<i64: 2, 10>}]} {
    %c0 = arith.constant 0 : index
    %c0_0 = arith.constant 0 : index
    %0 = vector.load %arg1[%c0, %c0_0] : memref<2x64xf32, #tpu.memory_space<vmem>>, vector<2x64xf32>
    %c0_1 = arith.constant 0 : index
    %c0_2 = arith.constant 0 : index
    %1 = vector.load %arg2[%c0_1, %c0_2] : memref<1x64xf32, #tpu.memory_space<vmem>>, vector<1x64xf32>
    %c0_3 = arith.constant 0 : index
    %c0_4 = arith.constant 0 : index
    %2 = vector.load %arg3[%c0_3, %c0_4] : memref<1x64xf32, #tpu.memory_space<vmem>>, vector<1x64xf32>
    %cst = arith.constant dense<0.000000e+00> : vector<2xf32>
    %3 = vector.multi_reduction <add>, %0, %cst [1] : vector<2x64xf32> to vector<2xf32>
    %4 = vector.shape_cast %3 : vector<2xf32> to vector<2x1xf32>
    %cst_5 = arith.constant 6.400000e+01 : f32
    %5 = vector.broadcast %cst_5 : f32 to vector<2x1xf32>
    %6 = arith.divf %4, %5 : vector<2x1xf32>
    %7 = vector.broadcast %6 : vector<2x1xf32> to vector<2x64xf32>
    %8 = arith.subf %0, %7 : vector<2x64xf32>
    %9 = arith.mulf %8, %8 : vector<2x64xf32>
    %cst_6 = arith.constant dense<0.000000e+00> : vector<2xf32>
    %10 = vector.multi_reduction <add>, %9, %cst_6 [1] : vector<2x64xf32> to vector<2xf32>
    %11 = vector.shape_cast %10 : vector<2xf32> to vector<2x1xf32>
    %cst_7 = arith.constant 6.400000e+01 : f32
    %12 = vector.broadcast %cst_7 : f32 to vector<2x1xf32>
    %13 = arith.divf %11, %12 : vector<2x1xf32>
    %14 = vector.broadcast %6 : vector<2x1xf32> to vector<2x64xf32>
    %15 = arith.subf %0, %14 : vector<2x64xf32>
    %cst_8 = arith.constant 9.99999974E-6 : f32
    %16 = vector.broadcast %cst_8 : f32 to vector<2x1xf32>
    %17 = arith.addf %13, %16 : vector<2x1xf32>
    %18 = math.rsqrt %17 : vector<2x1xf32>
    %19 = vector.broadcast %18 : vector<2x1xf32> to vector<2x64xf32>
    %20 = arith.mulf %15, %19 : vector<2x64xf32>
    %21 = vector.broadcast %1 : vector<1x64xf32> to vector<2x64xf32>
    %22 = arith.mulf %20, %21 : vector<2x64xf32>
    %23 = vector.broadcast %2 : vector<1x64xf32> to vector<2x64xf32>
    %24 = arith.addf %22, %23 : vector<2x64xf32>
    %25 = arith.truncf %24 : vector<2x64xf32> to vector<2x64xbf16>
    %c0_9 = arith.constant 0 : index
    %c0_10 = arith.constant 0 : index
    %26 = vector.load %arg4[%c0_9, %c0_10] : memref<64x10xbf16, #tpu.memory_space<vmem>>, vector<64x10xbf16>
    %cst_11 = arith.constant dense<0.000000e+00> : vector<2x10xf32>
    %27 = tpu.matmul %25, %26, %cst_11 {dimension_numbers = #tpu.dot_dimension_numbers<[1], [0], [0], [1], [0, 0, 1, 1], [], []>} : vector<2x64xbf16>, vector<64x10xbf16>, vector<2x10xf32> -> vector<2x10xf32>
    %c0_12 = arith.constant 0 : index
    %c0_13 = arith.constant 0 : index
    %28 = vector.load %arg5[%c0_12, %c0_13] : memref<1x10xf32, #tpu.memory_space<vmem>>, vector<1x10xf32>
    %29 = vector.broadcast %28 : vector<1x10xf32> to vector<2x10xf32>
    %30 = arith.addf %27, %29 : vector<2x10xf32>
    %c0_14 = arith.constant 0 : index
    %c0_15 = arith.constant 0 : index
    %31 = vector.load %arg6[%c0_14, %c0_15] : memref<2x10xf32, #tpu.memory_space<vmem>>, vector<2x10xf32>
    tpu.vector_store %arg6[%c0_14, %c0_15], %30 {strides = array<i32>} : memref<2x10xf32, #tpu.memory_space<vmem>>, vector<2x10xf32>,
    return
  }
  func.func @transform_0(%arg0: i32) -> (i32, i32) {
    %c0_i32 = arith.constant 0 : i32
    %c0_i32_0 = arith.constant 0 : i32
    %c0_i32_1 = arith.constant 0 : i32
    return %c0_i32, %c0_i32_0 : i32, i32
  }
  func.func @transform_1(%arg0: i32) -> (i32, i32) {
    %c0_i32 = arith.constant 0 : i32
    %c0_i32_0 = arith.constant 0 : i32
    %c0_i32_1 = arith.constant 0 : i32
    return %c0_i32, %c0_i32_0 : i32, i32
  }
  func.func @transform_2(%arg0: i32) -> (i32, i32) {
    %c0_i32 = arith.constant 0 : i32
    %c0_i32_0 = arith.constant 0 : i32
    %c0_i32_1 = arith.constant 0 : i32
    return %c0_i32, %c0_i32_0 : i32, i32
  }
  func.func @transform_3(%arg0: i32) -> (i32, i32) {
    %c0_i32 = arith.constant 0 : i32
    %c0_i32_0 = arith.constant 0 : i32
    %c0_i32_1 = arith.constant 0 : i32
    return %c0_i32, %c0_i32_0 : i32, i32
  }
  func.func @transform_4(%arg0: i32) -> (i32, i32) {
    %c0_i32 = arith.constant 0 : i32
    %c0_i32_0 = arith.constant 0 : i32
    %c0_i32_1 = arith.constant 0 : i32
    return %c0_i32, %c0_i32_0 : i32, i32
  }
  func.func @transform_5(%arg0: i32) -> (i32, i32) {
    %c0_i32 = arith.constant 0 : i32
    %c0_i32_0 = arith.constant 0 : i32
    %c0_i32_1 = arith.constant 0 : i32
    return %c0_i32, %c0_i32_0 : i32, i32
  }
}

</mosaic_0001>

<bundles_post_ra>
// kernel: _lambda_.8
= control target key start
LH: loop header
LB: loop body
LE: loop exit
PB: predicated region body
PF: predicated region fallthrough
CT: control target
= control target key end

     0   :  { %s822_s18 = smov 0   ;;  %s1026_s0 = inlined_call_operand.vmem [shape: f32[2,64,147], index: 0, kind: input, shape index: {}]   ;;  %s1027_s1 = inlined_call_operand.vmem [shape: bf16[147,16], index: 1, kind: input, shape index: {}]   ;;  %s1028_s2 = inlined_call_operand.vmem [shape: f32[1,16], index: 2, kind: input, shape index: {}]   ;;  %s1029_s3 = inlined_call_operand.vmem [shape: f32[1,16], index: 3, kind: input, shape index: {}]   ;;  %s1030_s4 = inlined_call_operand.vmem [shape: f32[1,16], index: 4, kind: input, shape index: {}]   ;;  %s1031_s5 = inlined_call_operand.vmem [shape: f32[2,64,16], index: 5, kind: output, shape index: {}]  }
   0x1 LB: > { %s679_s19 = sadd.s32 4294967295, %s788_s18   ;;  %p683_p0 = scmp.ge.s32.totalorder %s788_s18, 1  ;;  %s788_s18 = sphi %s822_s18, %s15_s18  }
   0x2   : > { %p187_p1 = scmp.lt.s32.totalorder %s788_s18, 3 }
   0x4   : > { %p188_p2 = pnand %p683_p0, %p187_p1 }
   0x5   : > { %p215_p3 = scmp.lt.s32.totalorder (!%p188_p2), %s679_s19, 1 }
   0x6   : > { %191 = sbr.rel (%p188_p2) target bundleno = 475 (0x1db), region = 40 }
   0xb   : > { %v739_v0 = vld [vmem:[%s1027_s1 + $0x38] sm:$0xff]  ;;  %v268_v1 = vld [vmem:[%s1027_s1 + $0x48] sm:$0x3]  ;;  %vm343_vm0 = vcmask 1040384   ;;  %vm344_vm1 = vcmask 1041408   ;;  %v738_v3 = vld [vmem:[%s1027_s1 + $0x30] sm:$0xff] }
   0xc   : > { %v310_v2 = vunpack.c.l.b16 %v268_v1  ;;  %350 = vmatpush.bf16.msra.mxu0 %v739_v0  ;;  %741 = vmatpush.bf16.msra.mxu2 %v739_v0  ;;  %v790_v4 = vmov 65535   ;;  %s1033_s19 = smov (!%p215_p3, %s679_s19), 1  ;;  %v737_v9 = vld [vmem:[%s1027_s1 + $0x28] sm:$0xff]  ;;  %v740_v10 = vld [vmem:[%s1027_s1 + $0x40] sm:$0xff]  ;;  %vm330_vm2 = vcmask 154624   ;;  %v735_v18 = vld [vmem:[%s1027_s1 + $0x18] sm:$0xff] }
   0xd   : > { %v345_v5 = vsel %vm343_vm0, 4294967295, %v790_v4  ;;  %s730_s26 = sshll.u32 %s1033_s19, 7  ;;  %v736_v15 = vld [vmem:[%s1027_s1 + $0x20] sm:$0xff]  ;;  %v734_v19 = vld [vmem:[%s1027_s1 + $0x10] sm:$0xff]  ;;  %v733_v20 = vld [vmem:[%s1027_s1 + $0x8] sm:$0xff]  ;;  %vm410_vm3 = vcmask 130048  }
   0xe   : > { %v320_v6 = vpack.c.b16 %v310_v2, %v310_v2  ;;  %v346_v7 = vsel %vm344_vm1, %v345_v5, 0  ;;  %s848_s6 = scalar_lea.vmem %s1026_s0, %s730_s26  ;;  %v732_v24 = vld [vmem:[%s1027_s1] sm:$0xff]  ;;  %s731_s25 = sshll.u32 %s1033_s19, 6 }
   0xf   : > { %v231_v11 = vld [vmem:[%s848_s6 + $0x28] sm:$0xff]  ;;  %v233_v12 = vld [vmem:[%s848_s6 + $0x38] sm:$0xff]  ;;  %v226_v25 = vld [vmem:[%s848_s6] sm:$0xff]  ;;  %s971_s29 = scalar_lea.vmem %s1031_s5, %s731_s25 }
  0x10   : > { %v348_v8 = vand.u32 %v346_v7, %v320_v6  ;;  %351 = vmatpush.bf16.msra.mxu0 %v738_v3  ;;  %742 = vmatpush.bf16.msra.mxu2 %v738_v3  ;;  %v227_v13 = vld [vmem:[%s848_s6 + $0x8] sm:$0xff]  ;;  %v245_v14 = vpack.c.bf16 %v233_v12, %v231_v11  ;;  %v229_v16 = vld [vmem:[%s848_s6 + $0x18] sm:$0xff]  ;;  %v228_v26 = vld [vmem:[%s848_s6 + $0x10] sm:$0xff] }
  0x11   : > { %v243_v17 = vpack.c.bf16 %v229_v16, %v227_v13  ;;  %v235_v21 = vld [vmem:[%s848_s6 + $0x48] sm:$0xff]  ;;  %v237_v22 = vld [vmem:[%s848_s6 + $0x58] sm:$0xff]  ;;  %v234_v27 = vld [vmem:[%s848_s6 + $0x40] sm:$0xff]  ;;  %v242_v29 = vpack.c.bf16 %v228_v26, %v226_v25 }
  0x12   : > { %749 = vmatpush.bf16.msra.mxu3 %v348_v8  ;;  %385 = vmatpush.bf16.msra.mxu1 %v348_v8  ;;  %v247_v23 = vpack.c.bf16 %v237_v22, %v235_v21  ;;  %v236_v28 = vld [vmem:[%s848_s6 + $0x50] sm:$0xff]  ;;  %v239_v31 = vld [vmem:[%s848_s6 + $0x68] sm:$0xff]  ;;  %v241_v32 = vld [vmem:[%s848_s6 + $0x78] sm:$0xff] }
  0x13   : > { %v246_v30 = vpack.c.bf16 %v236_v28, %v234_v27  ;;  %v249_v33 = vpack.c.bf16 %v241_v32, %v239_v31  ;;  %v230_v34 = vld [vmem:[%s848_s6 + $0x20] sm:$0xff]  ;;  %v232_v35 = vld [vmem:[%s848_s6 + $0x30] sm:$0xff] }
  0x14   : > { %352 = vmatpush.bf16.msra.mxu0 %v737_v9  ;;  %743 = vmatpush.bf16.msra.mxu2 %v737_v9  ;;  %v238_v36 = vld [vmem:[%s848_s6 + $0x60] sm:$0xff]  ;;  %v240_v37 = vld [vmem:[%s848_s6 + $0x70] sm:$0xff]  ;;  %v244_v38 = vpack.c.bf16 %v232_v35, %v230_v34 }
  0x15   : > { %v248_v39 = vpack.c.bf16 %v240_v37, %v238_v36  ;;  %v761_v42 = vld [vmem:[%s1028_s2] ss:$0 sm:$0xff] }
  0x16   : > { %750 = vmatpush.bf16.msra.mxu3 %v740_v10  ;;  %386 = vmatpush.bf16.msra.mxu1 %v740_v10 }
  0x18   : > { %353 = vmatpush.bf16.msra.mxu0 %v736_v15  ;;  %744 = vmatpush.bf16.msra.mxu2 %v736_v15 }
  0x19   : > { %725 = vmatmul.msk.bf16.vlgmr.msra.gmra.mxu3 %vm330_vm2, %v245_v14  ;;  %724 = vmatmul.msk.bf16.vlgmr.msra.gmra.mxu1 %vm330_vm2, %v243_v17  ;;  %v791_v17 = vmov 16.0  }
  0x1a   : > { %764 = vrcp.f32 %v791_v17 }
  0x1c   : > { %354 = vmatpush.bf16.msra.mxu0 %v735_v18  ;;  %745 = vmatpush.bf16.msra.mxu2 %v735_v18 }
  0x20   : > { %355 = vmatpush.bf16.msra.mxu0 %v734_v19  ;;  %746 = vmatpush.bf16.msra.mxu2 %v734_v19  ;;  %v765_v18 = vpop.eup %764 }
  0x21   : > { %v436_v19 = vmul.f32 16.0, %v765_v18  ;;  %vm440_vm4 = vweird.f32 %v765_v18 }
  0x24   : > { %356 = vmatpush.bf16.msra.mxu0 %v733_v20  ;;  %747 = vmatpush.bf16.msra.mxu2 %v733_v20  ;;  %v437_v20 = vsub.f32 1.0, %v436_v19 }
  0x26   : > { %v438_v21 = vmul.f32 %v765_v18, %v437_v20  ;;  %v956_v20 = vld [vmem:[%s1029_s3] ss:$0 sm:$0xff] }
  0x28   : > { %357 = vmatpush.bf16.msra.mxu0 %v732_v24  ;;  %748 = vmatpush.bf16.msra.mxu2 %v732_v24  ;;  %v439_v22 = vadd.f32 %v765_v18, %v438_v21 }
  0x29   : > { %726 = vmatmul.msk.bf16.gmra.mxu3 %vm330_vm2, %v247_v23 }
  0x2a   : > { %v899_v23 = vsel %vm440_vm4, %v765_v18, %v439_v22 }
  0x2b   : > { %358 = vmatmul.bf16.vlgmr.msra.gmra.mxu0 %v242_v29  ;;  %368 = vmatmul.bf16.vlgmr.msra.gmra.mxu2 %v246_v30 }
  0x39   : > { %727 = vmatmul.msk.bf16.gmra.mxu3 %vm330_vm2, %v249_v33 }
  0x3b   : > { %363 = vmatmul.bf16.gmra.mxu0 %v244_v38  ;;  %373 = vmatmul.bf16.gmra.mxu2 %v248_v39 }
  0x96   : > { %v388_v43 = vpop.f32.mrf.mxu1 }
  0x9c   : > { %v393_v40 = vpop.f32.mrf.mxu3 }
  0x9e   : > { %v390_v52 = vpop.f32.mrf.mxu1 }
  0xa4   : > { %v395_v41 = vpop.f32.mrf.mxu3 }
  0xa8   : > { %v359_v44 = vpop.f32.mrf.mxu0 }
  0xa9   : > { %v360_v45 = vadd.f32 %v761_v42, %v359_v44 }
  0xab   : > { %v389_v46 = vadd.f32 %v388_v43, %v360_v45 }
  0xac   : > { %v398_v47 = vpop.f32.mrf.mxu3 }
  0xad   : > { %v411_v48 = vsel %vm410_vm3, %v389_v46, 0.0 }
  0xae   : > { %412 = vadd.xlane.f32.xlu0 %v411_v48  ;;  %v369_v49 = vpop.f32.mrf.mxu2 }
  0xaf   : > { %v370_v50 = vadd.f32 %v761_v42, %v369_v49 }
  0xb0   : > { %v361_v51 = vpop.f32.mrf.mxu0 }
  0xb1   : > { %v362_v53 = vadd.f32 %v761_v42, %v361_v51  ;;  %v399_v54 = vadd.f32 %v398_v47, %v370_v50 }
  0xb3   : > { %v391_v55 = vadd.f32 %v390_v52, %v362_v53  ;;  %v423_v56 = vsel %vm410_vm3, %v399_v54, 0.0 }
  0xb4   : > { %v400_v57 = vpop.f32.mrf.mxu3  ;;  %424 = vadd.xlane.f32.xlu2 %v423_v56 }
  0xb5   : > { %v414_v58 = vsel %vm410_vm3, %v391_v55, 0.0 }
  0xb6   : > { %415 = vadd.xlane.f32.xlu0 %v414_v58  ;;  %v371_v59 = vpop.f32.mrf.mxu2 }
  0xb7   : > { %v372_v60 = vadd.f32 %v761_v42, %v371_v59 }
  0xb8   : > { %v364_v61 = vpop.f32.mrf.mxu0 }
  0xb9   : > { %v365_v62 = vadd.f32 %v761_v42, %v364_v61  ;;  %v401_v63 = vadd.f32 %v400_v57, %v372_v60 }
  0xbb   : > { %v394_v0 = vadd.f32 %v393_v40, %v365_v62  ;;  %v426_v1 = vsel %vm410_vm3, %v401_v63, 0.0 }
  0xbc   : > { %427 = vadd.xlane.f32.xlu2 %v426_v1  ;;  %v403_v3 = vpop.f32.mrf.mxu3 }
  0xbd   : > { %v417_v2 = vsel %vm410_vm3, %v394_v0, 0.0 }
  0xbe   : > { %418 = vadd.xlane.f32.xlu1 %v417_v2  ;;  %v374_v4 = vpop.f32.mrf.mxu2 }
  0xbf   : > { %v375_v5 = vadd.f32 %v761_v42, %v374_v4 }
  0xc0   : > { %v366_v6 = vpop.f32.mrf.mxu0 }
  0xc1   : > { %v367_v7 = vadd.f32 %v761_v42, %v366_v6  ;;  %v404_v8 = vadd.f32 %v403_v3, %v375_v5 }
  0xc3   : > { %v396_v9 = vadd.f32 %v395_v41, %v367_v7  ;;  %v429_v10 = vsel %vm410_vm3, %v404_v8, 0.0 }
  0xc4   : > { %430 = vadd.xlane.f32.xlu0 %v429_v10  ;;  %v405_v14 = vpop.f32.mrf.mxu3 }
  0xc5   : > { %v420_v11 = vsel %vm410_vm3, %v396_v9, 0.0 }
  0xc6   : > { %421 = vadd.xlane.f32.xlu1 %v420_v11  ;;  %v376_v12 = vpop.f32.mrf.mxu2 }
  0xc7   : > { %v377_v13 = vadd.f32 %v761_v42, %v376_v12 }
  0xc9   : > { %v406_v15 = vadd.f32 %v405_v14, %v377_v13 }
  0xcb   : > { %v432_v16 = vsel %vm410_vm3, %v406_v15, 0.0 }
  0xce   : > { %433 = vadd.xlane.f32.xlu1 %v432_v16 }
 0x121   : > { %v413_v24 = vpop.xlane.xlu0 %412 }
 0x122   : > { %v442_v25 = vmul.f32 %v899_v23, %v413_v24  ;;  %v962_v24 = vld [vmem:[%s1030_s4] ss:$0 sm:$0xff] }
 0x124   : > { %v902_v26 = vsub.f32 %v389_v46, %v442_v25 }
 0x126   : > { %v458_v27 = vmul.f32 %v902_v26, %v902_v26 }
 0x127   : > { %v425_v28 = vpop.xlane.xlu2 %424 }
 0x128   : > { %v466_v29 = vsel %vm410_vm3, %v458_v27, 0.0  ;;  %v446_v30 = vmul.f32 %v899_v23, %v425_v28 }
 0x129   : > { %467 = vadd.xlane.f32.xlu2 %v466_v29  ;;  %v416_v31 = vpop.xlane.xlu0 %415 }
 0x12a   : > { %v908_v32 = vsub.f32 %v399_v54, %v446_v30  ;;  %v443_v33 = vmul.f32 %v899_v23, %v416_v31 }
 0x12c   : > { %v462_v34 = vmul.f32 %v908_v32, %v908_v32  ;;  %v913_v35 = vsub.f32 %v391_v55, %v443_v33 }
 0x12e   : > { %v478_v36 = vsel %vm410_vm3, %v462_v34, 0.0  ;;  %v459_v40 = vmul.f32 %v913_v35, %v913_v35 }
 0x12f   : > { %479 = vadd.xlane.f32.xlu0 %v478_v36  ;;  %v428_v37 = vpop.xlane.xlu2 %427 }
 0x130   : > { %v447_v41 = vmul.f32 %v899_v23, %v428_v37  ;;  %v469_v44 = vsel %vm410_vm3, %v459_v40, 0.0 }
 0x131   : > { %v419_v38 = vpop.xlane.xlu1 %418 }
 0x132   : > { %v444_v39 = vmul.f32 %v899_v23, %v419_v38  ;;  %v925_v45 = vsub.f32 %v401_v63, %v447_v41 }
 0x134   : > { %v920_v42 = vsub.f32 %v394_v0, %v444_v39  ;;  %v463_v52 = vmul.f32 %v925_v45, %v925_v45 }
 0x136   : > { %v460_v43 = vmul.f32 %v920_v42, %v920_v42  ;;  %v481_v55 = vsel %vm410_vm3, %v463_v52, 0.0 }
 0x137   : > { %470 = vadd.xlane.f32.xlu0 %v469_v44  ;;  %v431_v47 = vpop.xlane.xlu0 %430 }
 0x138   : > { %v472_v46 = vsel %vm410_vm3, %v460_v43, 0.0  ;;  %v448_v50 = vmul.f32 %v899_v23, %v431_v47 }
 0x139   : > { %473 = vadd.xlane.f32.xlu1 %v472_v46  ;;  %v422_v48 = vpop.xlane.xlu1 %421 }
 0x13a   : > { %v445_v49 = vmul.f32 %v899_v23, %v422_v48  ;;  %v936_v54 = vsub.f32 %v404_v8, %v448_v50 }
 0x13c   : > { %v930_v51 = vsub.f32 %v396_v9, %v445_v49  ;;  %v464_v60 = vmul.f32 %v936_v54, %v936_v54 }
 0x13e   : > { %v461_v53 = vmul.f32 %v930_v51, %v930_v51  ;;  %v484_v63 = vsel %vm410_vm3, %v464_v60, 0.0 }
 0x140   : > { %v475_v56 = vsel %vm410_vm3, %v461_v53, 0.0 }
 0x141   : > { %482 = vadd.xlane.f32.xlu1 %v481_v55  ;;  %v434_v57 = vpop.xlane.xlu1 %433  ;;  %476 = vadd.xlane.f32.xlu2 %v475_v56 }
 0x142   : > { %v449_v58 = vmul.f32 %v899_v23, %v434_v57 }
 0x144   : > { %v941_v59 = vsub.f32 %v406_v15, %v449_v58 }
 0x146   : > { %v465_v61 = vmul.f32 %v941_v59, %v941_v59 }
 0x148   : > { %v487_v62 = vsel %vm410_vm3, %v465_v61, 0.0 }
 0x149   : > { %488 = vadd.xlane.f32.xlu0 %v487_v62  ;;  %485 = vadd.xlane.f32.xlu2 %v484_v63 }
 0x19c   : > { %v468_v0 = vpop.xlane.xlu2 %467 }
 0x19d   : > { %v490_v1 = vmul.f32 %v468_v0, %v899_v23 }
 0x19f   : > { %v498_v2 = vadd.f32 1e-05, %v490_v1 }
 0x1a1   : > { %766 = vrsqrt.f32 %v498_v2  ;;  %vm512_vm6 = vweird.f32 %v498_v2 }
 0x1a2   : > { %v480_v3 = vpop.xlane.xlu0 %479 }
 0x1a3   : > { %v494_v4 = vmul.f32 %v480_v3, %v899_v23 }
 0x1a5   : > { %v502_v5 = vadd.f32 1e-05, %v494_v4 }
 0x1a7   : > { %v767_v6 = vpop.eup %766  ;;  %768 = vrsqrt.f32 %v502_v5  ;;  %vm552_vm9 = vweird.f32 %v502_v5 }
 0x1a8   : > { %v507_v7 = vmul.f32 %v767_v6, %v498_v2  ;;  %vm513_vm5 = vweird.f32 %v767_v6 }
 0x1a9   : > { %vm514_vm7 = vmor %vm512_vm6, %vm513_vm5 }
 0x1aa   : > { %v508_v8 = vmul.f32 %v767_v6, %v507_v7  ;;  %v471_v9 = vpop.xlane.xlu0 %470 }
 0x1ab   : > { %v491_v11 = vmul.f32 %v471_v9, %v899_v23 }
 0x1ac   : > { %v509_v10 = vmul.f32 0.5, %v508_v8  ;;  %v474_v12 = vpop.xlane.xlu1 %473 }
 0x1ad   : > { %v492_v13 = vmul.f32 %v474_v12, %v899_v23  ;;  %v769_v14 = vpop.eup %768  ;;  %v499_v16 = vadd.f32 1e-05, %v491_v11 }
 0x1ae   : > { %v510_v15 = vsub.f32 1.5, %v509_v10  ;;  %v547_v17 = vmul.f32 %v769_v14, %v502_v5  ;;  %vm553_vm8 = vweird.f32 %v769_v14 }
 0x1af   : > { %v500_v18 = vadd.f32 1e-05, %v492_v13  ;;  %770 = vrsqrt.f32 %v499_v16  ;;  %vm554_vm10 = vmor %vm552_vm9, %vm553_vm8  ;;  %vm522_vm13 = vweird.f32 %v499_v16 }
 0x1b0   : > { %v511_v19 = vmul.f32 %v767_v6, %v510_v15  ;;  %v548_v21 = vmul.f32 %v769_v14, %v547_v17 }
 0x1b1   : > { %772 = vrsqrt.f32 %v500_v18  ;;  %vm532_vm15 = vweird.f32 %v500_v18 }
 0x1b2   : > { %v515_v22 = vsel %vm514_vm7, %v767_v6, %v511_v19  ;;  %v549_v27 = vmul.f32 0.5, %v548_v21 }
 0x1b3   : > { %v586_v25 = vmul.f32 %v515_v22, %v902_v26 }
 0x1b4   : > { %v483_v28 = vpop.xlane.xlu1 %482  ;;  %v477_v29 = vpop.xlane.xlu2 %476  ;;  %v550_v31 = vsub.f32 1.5, %v549_v27 }
 0x1b5   : > { %v597_v30 = vmul.f32 %v956_v20, %v586_v25  ;;  %v495_v33 = vmul.f32 %v483_v28, %v899_v23  ;;  %v493_v34 = vmul.f32 %v477_v29, %v899_v23  ;;  %v771_v36 = vpop.eup %770 }
 0x1b6   : > { %v551_v38 = vmul.f32 %v769_v14, %v550_v31  ;;  %v517_v39 = vmul.f32 %v771_v36, %v499_v16  ;;  %vm523_vm11 = vweird.f32 %v771_v36 }
 0x1b7   : > { %v773_v37 = vpop.eup %772  ;;  %v608_v26 = vadd.f32 %v962_v24, %v597_v30  ;;  %v503_v41 = vadd.f32 1e-05, %v495_v33  ;;  %v974_v43 = vadd.f32 1e-05, %v493_v34  ;;  %vm524_vm14 = vmor %vm522_vm13, %vm523_vm11 }
 0x1b8   : > { %v527_v40 = vmul.f32 %v773_v37, %v500_v18  ;;  %v555_v44 = vsel %vm554_vm10, %v769_v14, %v551_v38  ;;  %v518_v46 = vmul.f32 %v771_v36, %v517_v39  ;;  %vm533_vm12 = vweird.f32 %v773_v37 }
 0x1b9   : > { %616 = vst.msk [vmem:[%s971_s29] sm:$0xff] %vm410_vm3, %v608_v26  ;;  %v590_v47 = vmul.f32 %v555_v44, %v908_v32  ;;  %774 = vrsqrt.f32 %v503_v41  ;;  %vm534_vm0 = vmor %vm532_vm15, %vm533_vm12  ;;  %vm562_vm4 = vweird.f32 %v503_v41  ;;  %vm542_vm6 = vweird.f32 %v974_v43 }
 0x1ba   : > { %v528_v48 = vmul.f32 %v773_v37, %v527_v40  ;;  %v519_v49 = vmul.f32 0.5, %v518_v46  ;;  %776 = vrsqrt.f32 %v974_v43 }
 0x1bb   : > { %v601_v50 = vmul.f32 %v956_v20, %v590_v47 }
 0x1bc   : > { %v529_v52 = vmul.f32 0.5, %v528_v48  ;;  %v486_v53 = vpop.xlane.xlu2 %485  ;;  %v489_v55 = vpop.xlane.xlu0 %488  ;;  %v520_v56 = vsub.f32 1.5, %v519_v49 }
 0x1bd   : > { %v496_v57 = vmul.f32 %v486_v53, %v899_v23  ;;  %v497_v58 = vmul.f32 %v489_v55, %v899_v23  ;;  %v612_v60 = vadd.f32 %v962_v24, %v601_v50 }
 0x1be   : > { %v530_v32 = vsub.f32 1.5, %v529_v52  ;;  %v521_v61 = vmul.f32 %v771_v36, %v520_v56 }
 0x1bf   : > { %v504_v62 = vadd.f32 1e-05, %v496_v57  ;;  %v984_v63 = vadd.f32 1e-05, %v497_v58  ;;  %v775_v0 = vpop.eup %774  ;;  %620 = vst.msk [vmem:[%s971_s29 + $0x20] sm:$0xff] %vm410_vm3, %v612_v60 }
 0x1c0   : > { %v531_v1 = vmul.f32 %v773_v37, %v530_v32  ;;  %v777_v2 = vpop.eup %776  ;;  %v525_v3 = vsel %vm524_vm14, %v771_v36, %v521_v61  ;;  %v557_v4 = vmul.f32 %v775_v0, %v503_v41  ;;  %vm563_vm1 = vweird.f32 %v775_v0 }
 0x1c1   : > { %778 = vrsqrt.f32 %v504_v62  ;;  %v587_v23 = vmul.f32 %v525_v3, %v913_v35  ;;  %v537_v6 = vmul.f32 %v777_v2, %v974_v43  ;;  %vm543_vm2 = vweird.f32 %v777_v2  ;;  %vm564_vm5 = vmor %vm562_vm4, %vm563_vm1 }
 0x1c2   : > { %v535_v5 = vsel %vm534_vm0, %v773_v37, %v531_v1  ;;  %v558_v8 = vmul.f32 %v775_v0, %v557_v4  ;;  %780 = vrsqrt.f32 %v984_v63  ;;  %vm544_vm7 = vmor %vm542_vm6, %vm543_vm2  ;;  %vm572_vm9 = vweird.f32 %v504_v62 }
 0x1c3   : > { %v588_v7 = vmul.f32 %v535_v5, %v920_v42  ;;  %v598_v9 = vmul.f32 %v956_v20, %v587_v23  ;;  %v538_v10 = vmul.f32 %v777_v2, %v537_v6  ;;  %vm582_vm12 = vweird.f32 %v984_v63 }
 0x1c4   : > { %v559_v12 = vmul.f32 0.5, %v558_v8 }
 0x1c5   : > { %v599_v11 = vmul.f32 %v956_v20, %v588_v7  ;;  %v609_v13 = vadd.f32 %v962_v24, %v598_v9  ;;  %v539_v14 = vmul.f32 0.5, %v538_v10 }
 0x1c6   : > { %v560_v16 = vsub.f32 1.5, %v559_v12 }
 0x1c7   : > { %v779_v35 = vpop.eup %778  ;;  %v610_v15 = vadd.f32 %v962_v24, %v599_v11  ;;  %617 = vst.msk [vmem:[%s971_s29 + $0x8] sm:$0xff] %vm410_vm3, %v609_v13  ;;  %v540_v42 = vsub.f32 1.5, %v539_v14 }
 0x1c8   : > { %v567_v17 = vmul.f32 %v779_v35, %v504_v62  ;;  %v781_v18 = vpop.eup %780  ;;  %v561_v19 = vmul.f32 %v775_v0, %v560_v16  ;;  %vm573_vm8 = vweird.f32 %v779_v35 }
 0x1c9   : > { %618 = vst.msk [vmem:[%s971_s29 + $0x10] sm:$0xff] %vm410_vm3, %v610_v15  ;;  %v541_v21 = vmul.f32 %v777_v2, %v540_v42  ;;  %v577_v25 = vmul.f32 %v781_v18, %v984_v63  ;;  %vm583_vm10 = vweird.f32 %v781_v18  ;;  %vm574_vm11 = vmor %vm572_vm9, %vm573_vm8 }
 0x1ca   : > { %v568_v22 = vmul.f32 %v779_v35, %v567_v17  ;;  %v565_v27 = vsel %vm564_vm5, %v775_v0, %v561_v19  ;;  %vm584_vm13 = vmor %vm582_vm12, %vm583_vm10 }
 0x1cb   : > { %v591_v28 = vmul.f32 %v565_v27, %v925_v45  ;;  %v545_v29 = vsel %vm544_vm7, %v777_v2, %v541_v21  ;;  %v578_v31 = vmul.f32 %v781_v18, %v577_v25 }
 0x1cc   : > { %v569_v30 = vmul.f32 0.5, %v568_v22  ;;  %v589_v33 = vmul.f32 %v545_v29, %v930_v51 }
 0x1cd   : > { %v602_v34 = vmul.f32 %v956_v20, %v591_v28  ;;  %v579_v37 = vmul.f32 0.5, %v578_v31 }
 0x1ce   : > { %v570_v36 = vsub.f32 1.5, %v569_v30  ;;  %v600_v26 = vmul.f32 %v956_v20, %v589_v33 }
 0x1cf   : > { %v613_v38 = vadd.f32 %v962_v24, %v602_v34  ;;  %v580_v40 = vsub.f32 1.5, %v579_v37 }
 0x1d0   : > { %v571_v39 = vmul.f32 %v779_v35, %v570_v36  ;;  %v611_v45 = vadd.f32 %v962_v24, %v600_v26 }
 0x1d1   : > { %621 = vst.msk [vmem:[%s971_s29 + $0x28] sm:$0xff] %vm410_vm3, %v613_v38  ;;  %v581_v41 = vmul.f32 %v781_v18, %v580_v40 }
 0x1d2   : > { %v575_v51 = vsel %vm574_vm11, %v779_v35, %v571_v39  ;;  %619 = vst.msk [vmem:[%s971_s29 + $0x18] sm:$0xff] %vm410_vm3, %v611_v45 }
 0x1d3   : > { %v592_v43 = vmul.f32 %v575_v51, %v936_v54  ;;  %v585_v44 = vsel %vm584_vm13, %v781_v18, %v581_v41 }
 0x1d4   : > { %v593_v47 = vmul.f32 %v585_v44, %v941_v59 }
 0x1d5   : > { %v603_v46 = vmul.f32 %v956_v20, %v592_v43 }
 0x1d6   : > { %v604_v49 = vmul.f32 %v956_v20, %v593_v47 }
 0x1d7   : > { %v614_v48 = vadd.f32 %v962_v24, %v603_v46 }
 0x1d8   : > { %v615_v50 = vadd.f32 %v962_v24, %v604_v49 }
 0x1d9   : > { %622 = vst.msk [vmem:[%s971_s29 + $0x30] sm:$0xff] %vm410_vm3, %v614_v48 }
 0x1da   : > { %623 = vst.msk [vmem:[%s971_s29 + $0x38] sm:$0xff] %vm410_vm3, %v615_v50 }
 0x1db PF: > { %s15_s18 = sadd.s32 1, %s788_s18  }
 0x1dc   : > { %p12_p4 = scmp.ge.s32.totalorder %s15_s18, 4  }
 0x1de   :  { %14 = sbr.rel (!%p12_p4) target bundleno = 1 (0x1), region = 70 }

// kernel: _lambda_.10
= control target key start
LH: loop header
LB: loop body
LE: loop exit
PB: predicated region body
PF: predicated region fallthrough
CT: control target
= control target key end

     0   :  { %s577_s18 = smov 0   ;;  %s640_s0 = inlined_call_operand.vmem [shape: f32[2,16,144], index: 0, kind: input, shape index: {}]   ;;  %s641_s1 = inlined_call_operand.vmem [shape: bf16[144,32], index: 1, kind: input, shape index: {}]   ;;  %s642_s2 = inlined_call_operand.vmem [shape: f32[1,32], index: 2, kind: input, shape index: {}]   ;;  %s643_s3 = inlined_call_operand.vmem [shape: f32[1,32], index: 3, kind: input, shape index: {}]   ;;  %s644_s4 = inlined_call_operand.vmem [shape: f32[1,32], index: 4, kind: input, shape index: {}]   ;;  %s645_s5 = inlined_call_operand.vmem [shape: f32[2,16,32], index: 5, kind: output, shape index: {}]  }
   0x1 LB: > { %s461_s19 = sadd.s32 4294967295, %s544_s18   ;;  %p465_p0 = scmp.ge.s32.totalorder %s544_s18, 1  ;;  %s544_s18 = sphi %s577_s18, %s15_s18  }
   0x2   : > { %p187_p1 = scmp.lt.s32.totalorder %s544_s18, 3 }
   0x4   : > { %p188_p2 = pnand %p465_p0, %p187_p1 }
   0x5   : > { %p215_p3 = scmp.lt.s32.totalorder (!%p188_p2), %s461_s19, 1 }
   0x6   : > { %191 = sbr.rel (%p188_p2) target bundleno = 450 (0x1c2), region = 40 }
   0xb   : > { %v518_v0 = vld [vmem:[%s641_s1 + $0x38] sm:$0xff]  ;;  %v517_v1 = vld [vmem:[%s641_s1 + $0x30] sm:$0xff]  ;;  %v519_v2 = vld [vmem:[%s641_s1 + $0x40] sm:$0xff]  ;;  %s647_s19 = smov (!%p215_p3, %s461_s19), 1  ;;  %vm308_vm0 = vcmask 130048   ;;  %vm342_vm1 = vcmask 261120  }
   0xc   : > { %312 = vmatpush.bf16.msra.mxu0 %v518_v0  ;;  %333 = vmatpush.bf16.msra.mxu1 %v519_v2  ;;  %s509_s26 = sshll.u32 %s647_s19, 5  ;;  %v516_v3 = vld [vmem:[%s641_s1 + $0x28] sm:$0xff]  ;;  %v515_v7 = vld [vmem:[%s641_s1 + $0x20] sm:$0xff]  ;;  %v514_v8 = vld [vmem:[%s641_s1 + $0x18] sm:$0xff]  ;;  %v546_v26 = vmov 32.0   ;;  %s510_s23 = sshll.u32 %s647_s19, 4 }
   0xd   : > { %s219_s29 = scalar_lea.vmem %s640_s0, %s509_s26  ;;  %v513_v9 = vld [vmem:[%s641_s1 + $0x10] sm:$0xff]  ;;  %v512_v10 = vld [vmem:[%s641_s1 + $0x8] sm:$0xff]  ;;  %v511_v11 = vld [vmem:[%s641_s1] sm:$0xff]  ;;  %532 = vrcp.f32 %v546_v26  ;;  %s224_s28 = scalar_lea.vmem %s645_s5, %s510_s23 }
   0xe   : > { %v227_v4 = vld [vmem:[%s219_s29 + $0x8] sm:$0xff]  ;;  %v229_v5 = vld [vmem:[%s219_s29 + $0x18] sm:$0xff]  ;;  %v226_v12 = vld [vmem:[%s219_s29] sm:$0xff] }
   0xf   : > { %v231_v6 = vpack.c.bf16 %v229_v5, %v227_v4  ;;  %v228_v13 = vld [vmem:[%s219_s29 + $0x10] sm:$0xff]  ;;  %v529_v15 = vld [vmem:[%s642_s2] ss:$0 sm:$0xff] }
  0x10   : > { %313 = vmatpush.bf16.msra.mxu0 %v517_v1  ;;  %v230_v14 = vpack.c.bf16 %v228_v13, %v226_v12  ;;  %v530_v57 = vld [vmem:[%s643_s3] ss:$0 sm:$0xff] }
  0x11   : > { %506 = vmatmul.msk.bf16.vlgmr.msra.gmra.mxu1 %vm308_vm0, %v231_v6  ;;  %v531_v60 = vld [vmem:[%s644_s4] ss:$0 sm:$0xff] }
  0x13   : > { %v533_v27 = vpop.eup %532 }
  0x14   : > { %314 = vmatpush.bf16.msra.mxu0 %v516_v3  ;;  %v350_v28 = vmul.f32 32.0, %v533_v27  ;;  %vm354_vm2 = vweird.f32 %v533_v27 }
  0x16   : > { %v351_v29 = vsub.f32 1.0, %v350_v28 }
  0x18   : > { %315 = vmatpush.bf16.msra.mxu0 %v515_v7  ;;  %v352_v30 = vmul.f32 %v533_v27, %v351_v29 }
  0x1a   : > { %v353_v31 = vadd.f32 %v533_v27, %v352_v30 }
  0x1c   : > { %316 = vmatpush.bf16.msra.mxu0 %v514_v8  ;;  %v355_v32 = vsel %vm354_vm2, %v533_v27, %v353_v31 }
  0x20   : > { %317 = vmatpush.bf16.msra.mxu0 %v513_v9 }
  0x24   : > { %318 = vmatpush.bf16.msra.mxu0 %v512_v10 }
  0x28   : > { %319 = vmatpush.bf16.msra.mxu0 %v511_v11 }
  0x2b   : > { %320 = vmatmul.bf16.vlgmr.msra.gmra.mxu0 %v230_v14 }
  0x8e   : > { %v335_v16 = vpop.f32.mrf.mxu1 }
  0x96   : > { %v337_v23 = vpop.f32.mrf.mxu1 }
  0xa8   : > { %v321_v17 = vpop.f32.mrf.mxu0 }
  0xa9   : > { %v322_v18 = vadd.f32 %v529_v15, %v321_v17 }
  0xab   : > { %v336_v19 = vadd.f32 %v335_v16, %v322_v18 }
  0xad   : > { %v343_v20 = vsel %vm342_vm1, %v336_v19, 0.0 }
  0xae   : > { %344 = vadd.xlane.f32.xlu0 %v343_v20 }
  0xb0   : > { %v323_v21 = vpop.f32.mrf.mxu0 }
  0xb1   : > { %v324_v22 = vadd.f32 %v529_v15, %v323_v21 }
  0xb3   : > { %v338_v24 = vadd.f32 %v337_v23, %v324_v22 }
  0xb5   : > { %v346_v25 = vsel %vm342_vm1, %v338_v24, 0.0 }
  0xb6   : > { %347 = vadd.xlane.f32.xlu0 %v346_v25 }
 0x121   : > { %v345_v33 = vpop.xlane.xlu0 %344 }
 0x122   : > { %v356_v34 = vmul.f32 %v355_v32, %v345_v33 }
 0x124   : > { %v358_v35 = vsub.f32 %v336_v19, %v356_v34 }
 0x126   : > { %v360_v36 = vmul.f32 %v358_v35, %v358_v35 }
 0x128   : > { %v362_v37 = vsel %vm342_vm1, %v360_v36, 0.0 }
 0x129   : > { %363 = vadd.xlane.f32.xlu1 %v362_v37  ;;  %v348_v38 = vpop.xlane.xlu0 %347 }
 0x12a   : > { %v357_v39 = vmul.f32 %v355_v32, %v348_v38 }
 0x12c   : > { %v359_v40 = vsub.f32 %v338_v24, %v357_v39 }
 0x12e   : > { %v361_v41 = vmul.f32 %v359_v40, %v359_v40 }
 0x130   : > { %v365_v42 = vsel %vm342_vm1, %v361_v41, 0.0 }
 0x131   : > { %366 = vadd.xlane.f32.xlu1 %v365_v42 }
 0x19c   : > { %v364_v43 = vpop.xlane.xlu1 %363 }
 0x19d   : > { %v368_v44 = vmul.f32 %v364_v43, %v355_v32 }
 0x19f   : > { %v370_v45 = vadd.f32 1e-05, %v368_v44 }
 0x1a1   : > { %534 = vrsqrt.f32 %v370_v45  ;;  %vm378_vm4 = vweird.f32 %v370_v45 }
 0x1a4   : > { %v367_v46 = vpop.xlane.xlu1 %366 }
 0x1a5   : > { %v369_v47 = vmul.f32 %v367_v46, %v355_v32 }
 0x1a7   : > { %v535_v48 = vpop.eup %534  ;;  %v371_v49 = vadd.f32 1e-05, %v369_v47 }
 0x1a8   : > { %v373_v50 = vmul.f32 %v535_v48, %v370_v45  ;;  %vm379_vm3 = vweird.f32 %v535_v48 }
 0x1a9   : > { %536 = vrsqrt.f32 %v371_v49  ;;  %vm380_vm5 = vmor %vm378_vm4, %vm379_vm3  ;;  %vm388_vm7 = vweird.f32 %v371_v49 }
 0x1aa   : > { %v374_v51 = vmul.f32 %v535_v48, %v373_v50 }
 0x1ac   : > { %v375_v52 = vmul.f32 0.5, %v374_v51 }
 0x1ae   : > { %v376_v53 = vsub.f32 1.5, %v375_v52 }
 0x1af   : > { %v537_v54 = vpop.eup %536 }
 0x1b0   : > { %v377_v55 = vmul.f32 %v535_v48, %v376_v53  ;;  %v383_v56 = vmul.f32 %v537_v54, %v371_v49  ;;  %vm389_vm6 = vweird.f32 %v537_v54 }
 0x1b1   : > { %vm390_vm8 = vmor %vm388_vm7, %vm389_vm6 }
 0x1b2   : > { %v381_v58 = vsel %vm380_vm5, %v535_v48, %v377_v55  ;;  %v384_v59 = vmul.f32 %v537_v54, %v383_v56 }
 0x1b3   : > { %v392_v61 = vmul.f32 %v381_v58, %v358_v35 }
 0x1b4   : > { %v385_v62 = vmul.f32 0.5, %v384_v59 }
 0x1b5   : > { %v397_v63 = vmul.f32 %v530_v57, %v392_v61 }
 0x1b6   : > { %v386_v0 = vsub.f32 1.5, %v385_v62 }
 0x1b7   : > { %v402_v1 = vadd.f32 %v531_v60, %v397_v63 }
 0x1b8   : > { %v387_v2 = vmul.f32 %v537_v54, %v386_v0 }
 0x1b9   : > { %404 = vst.msk [vmem:[%s224_s28] sm:$0xff] %vm342_vm1, %v402_v1 }
 0x1ba   : > { %v391_v3 = vsel %vm390_vm8, %v537_v54, %v387_v2 }
 0x1bb   : > { %v393_v4 = vmul.f32 %v391_v3, %v359_v40 }
 0x1bd   : > { %v398_v5 = vmul.f32 %v530_v57, %v393_v4 }
 0x1bf   : > { %v403_v6 = vadd.f32 %v531_v60, %v398_v5 }
 0x1c1   : > { %405 = vst.msk [vmem:[%s224_s28 + $0x8] sm:$0xff] %vm342_vm1, %v403_v6 }
 0x1c2 PF: > { %s15_s18 = sadd.s32 1, %s544_s18  }
 0x1c3   : > { %p12_p4 = scmp.ge.s32.totalorder %s15_s18, 4  }
 0x1c5   :  { %14 = sbr.rel (!%p12_p4) target bundleno = 1 (0x1), region = 70 }

// kernel: _lambda_.9
= control target key start
LH: loop header
LB: loop body
LE: loop exit
PB: predicated region body
PF: predicated region fallthrough
CT: control target
= control target key end

     0   :  { %s2989_s24 = smov 0   ;;  %s4473_s0 = inlined_call_operand.vmem [shape: f32[2,64,16], index: 0, kind: input, shape index: {}]   ;;  %s4474_s1 = inlined_call_operand.vmem [shape: f32[1,16], index: 1, kind: input, shape index: {}]   ;;  %s4475_s2 = inlined_call_operand.vmem [shape: f32[1,16], index: 2, kind: input, shape index: {}]   ;;  %s4476_s3 = inlined_call_operand.vmem [shape: f32[3,9,16], index: 3, kind: input, shape index: {}]   ;;  %s4477_s4 = inlined_call_operand.vmem [shape: f32[3,16], index: 4, kind: input, shape index: {}]   ;;  %s4478_s5 = inlined_call_operand.vmem [shape: f32[3,16], index: 5, kind: input, shape index: {}]   ;;  %s4479_s6 = inlined_call_operand.vmem [shape: bf16[16,64], index: 6, kind: input, shape index: {}]   ;;  %s4480_s7 = inlined_call_operand.vmem [shape: bf16[3,16,16], index: 7, kind: input, shape index: {}]   ;;  %s4481_s8 = inlined_call_operand.vmem [shape: f32[3,16], index: 8, kind: input, shape index: {}]   ;;  %s4482_s9 = inlined_call_operand.vmem [shape: bf16[16,16], index: 9, kind: input, shape index: {}]   ;;  %s4483_s10 = inlined_call_operand.vmem [shape: f32[1,16], index: 10, kind: input, shape index: {}]   ;;  %s4484_s11 = inlined_call_operand.vmem [shape: f32[1,16], index: 11, kind: input, shape index: {}]   ;;  %s4485_s12 = inlined_call_operand.vmem [shape: f32[1,16], index: 12, kind: input, shape index: {}]   ;;  %s4486_s13 = inlined_call_operand.vmem [shape: bf16[16,64], index: 13, kind: input, shape index: {}]   ;;  %s4487_s14 = inlined_call_operand.vmem [shape: f32[1,64], index: 14, kind: input, shape index: {}]   ;;  %s4488_s15 = inlined_call_operand.vmem [shape: bf16[64,16], index: 15, kind: input, shape index: {}]   ;;  %s4489_s16 = inlined_call_operand.vmem [shape: f32[1,16], index: 16, kind: input, shape index: {}]   ;;  %s4490_s17 = inlined_call_operand.vmem [shape: f32[2,64,16], index: 17, kind: output, shape index: {}]  }
   0x1   :  { %4519 = sst [smem:[#allocation54_spill]] %s4473_s0 }
   0x2   :  { %4520 = sst [smem:[#allocation55_spill]] %s4474_s1 }
   0x3 LB: > { %s2608_s25 = sadd.s32 4294967295, %s2895_s24   ;;  %p2612_p0 = scmp.ge.s32.totalorder %s2895_s24, 1  ;;  %s2895_s24 = sphi %s2989_s24, %s27_s24  }
   0x4   : > { %p487_p1 = scmp.lt.s32.totalorder %s2895_s24, 3 }
   0x6   : > { %p488_p2 = pnand %p2612_p0, %p487_p1 }
   0x8   : > { %491 = sbr.rel (%p488_p2) target bundleno = 2108 (0x83c), region = 88 }
   0xd   : > { %p539_p3 = scmp.lt.s32.totalorder %s2608_s25, 1  ;;  %vm560_vm0 = vcmask 130048   ;;  %s4521_s29 = sld [smem:[#allocation54_spill]]  ;;  %v2897_v16 = vmov 16.0   ;;  %vm767_vm2 = vcmask 123904   ;;  %v2898_v27 = vmov 0.0  }
   0xe   : > { %2775 = vrcp.f32 %v2897_v16  ;;  %768 = vst.msk [vmem:[#allocation2 + $0x8] sm:$0x3] %vm767_vm2, %v2898_v27  ;;  %s4523_s19 = sld [smem:[#allocation55_spill]] }
   0xf   : > { %s4618_s25 = smov (!%p539_p3, %s2608_s25), 1  ;;  %779 = vst.msk [vmem:[#allocation2 + $0x60] sm:$0xff] %vm560_vm0, %v2898_v27 }
  0x10   : > { %s2709_s26 = sshll.u32 %s4618_s25, 6  ;;  %780 = vst.msk [vmem:[#allocation2 + $0x68] sm:$0x3] %vm767_vm2, %v2898_v27 }
  0x11   : > { %766 = vst.msk [vmem:[#allocation2] sm:$0xff] %vm560_vm0, %v2898_v27 }
  0x12   : > { %769 = vst.msk [vmem:[#allocation2 + $0x10] sm:$0xff] %vm560_vm0, %v2898_v27 }
  0x13   : > { %s3005_s0 = scalar_lea.vmem %s4521_s29, %s2709_s26  ;;  %770 = vst.msk [vmem:[#allocation2 + $0x18] sm:$0x3] %vm767_vm2, %v2898_v27  ;;  %s548_s29 = scalar_lea.vmem %s4490_s17, %s2709_s26 }
  0x14   : > { %v3008_v0 = vld [vmem:[%s3005_s0 + $0x38] sm:$0xff]  ;;  %v555_v1 = vld [vmem:[%s3005_s0 + $0x28] sm:$0xff]  ;;  %v556_v6 = vld [vmem:[%s3005_s0 + $0x30] sm:$0xff]  ;;  %v2776_v17 = vpop.eup %2775  ;;  %771 = vst.msk [vmem:[#allocation2 + $0x20] sm:$0xff] %vm560_vm0, %v2898_v27 }
  0x15   : > { %v553_v2 = vld [vmem:[%s3005_s0 + $0x18] sm:$0xff]  ;;  %v582_v3 = vsel %vm560_vm0, %v3008_v0, 0.0  ;;  %v576_v4 = vsel %vm560_vm0, %v555_v1, 0.0  ;;  %v554_v7 = vld [vmem:[%s3005_s0 + $0x20] sm:$0xff]  ;;  %v551_v8 = vld [vmem:[%s3005_s0 + $0x8] sm:$0xff]  ;;  %v579_v9 = vsel %vm560_vm0, %v556_v6, 0.0  ;;  %vm590_vm1 = vweird.f32 %v2776_v17 }
  0x16   : > { %v570_v5 = vsel %vm560_vm0, %v553_v2, 0.0  ;;  %583 = vadd.xlane.f32.xlu2 %v582_v3  ;;  %577 = vadd.xlane.f32.xlu0 %v576_v4  ;;  %v573_v10 = vsel %vm560_vm0, %v554_v7, 0.0  ;;  %v564_v11 = vsel %vm560_vm0, %v551_v8, 0.0  ;;  %v3023_v12 = vld [vmem:[%s3005_s0 + $0x10] sm:$0xff]  ;;  %v3026_v13 = vld [vmem:[%s3005_s0] sm:$0xff]  ;;  %v586_v18 = vmul.f32 16.0, %v2776_v17 }
  0x17   : > { %571 = vadd.xlane.f32.xlu1 %v570_v5  ;;  %v567_v14 = vsel %vm560_vm0, %v3023_v12, 0.0  ;;  %v561_v15 = vsel %vm560_vm0, %v3026_v13, 0.0  ;;  %772 = vst.msk [vmem:[#allocation2 + $0x28] sm:$0x3] %vm767_vm2, %v2898_v27 }
  0x18   : > { %v587_v19 = vsub.f32 1.0, %v586_v18  ;;  %773 = vst.msk [vmem:[#allocation2 + $0x30] sm:$0xff] %vm560_vm0, %v2898_v27 }
  0x19   : > { %774 = vst.msk [vmem:[#allocation2 + $0x38] sm:$0x3] %vm767_vm2, %v2898_v27 }
  0x1a   : > { %v588_v20 = vmul.f32 %v2776_v17, %v587_v19  ;;  %775 = vst.msk [vmem:[#allocation2 + $0x40] sm:$0xff] %vm560_vm0, %v2898_v27 }
  0x1b   : > { %776 = vst.msk [vmem:[#allocation2 + $0x48] sm:$0x3] %vm767_vm2, %v2898_v27 }
  0x1c   : > { %v589_v21 = vadd.f32 %v2776_v17, %v588_v20  ;;  %777 = vst.msk [vmem:[#allocation2 + $0x50] sm:$0xff] %vm560_vm0, %v2898_v27 }
  0x1d   : > { %778 = vst.msk [vmem:[#allocation2 + $0x58] sm:$0x3] %vm767_vm2, %v2898_v27 }
  0x1e   : > { %580 = vadd.xlane.f32.xlu0 %v579_v9  ;;  %565 = vadd.xlane.f32.xlu2 %v564_v11  ;;  %v3032_v22 = vsel %vm590_vm1, %v2776_v17, %v589_v21  ;;  %781 = vst.msk [vmem:[#allocation2 + $0x70] sm:$0xff] %vm560_vm0, %v2898_v27 }
  0x1f   : > { %574 = vadd.xlane.f32.xlu1 %v573_v10  ;;  %4522 = vst [vmem:[#allocation8_spill] sm:$0xff] %v3032_v22 }
  0x20   : > { %782 = vst.msk [vmem:[#allocation2 + $0x78] sm:$0x3] %vm767_vm2, %v2898_v27 }
  0x21   : > { %783 = vst.msk [vmem:[#allocation2 + $0x80] sm:$0xff] %vm560_vm0, %v2898_v27 }
  0x22   : > { %784 = vst.msk [vmem:[#allocation2 + $0x88] sm:$0x3] %vm767_vm2, %v2898_v27 }
  0x23   : > { %785 = vst.msk [vmem:[#allocation2 + $0x90] sm:$0xff] %vm560_vm0, %v2898_v27 }
  0x24   : > { %786 = vst.msk [vmem:[#allocation2 + $0x98] sm:$0x3] %vm767_vm2, %v2898_v27 }
  0x26   : > { %568 = vadd.xlane.f32.xlu0 %v567_v14 }
  0x27   : > { %562 = vadd.xlane.f32.xlu1 %v561_v15 }
  0x89   : > { %v584_v23 = vpop.xlane.xlu2 %583  ;;  %v578_v24 = vpop.xlane.xlu0 %577 }
  0x8a   : > { %v597_v25 = vmul.f32 %v3032_v22, %v578_v24  ;;  %v572_v26 = vpop.xlane.xlu1 %571  ;;  %v599_v41 = vmul.f32 %v3032_v22, %v584_v23 }
  0x8b   : > { %v595_v28 = vmul.f32 %v3032_v22, %v572_v26 }
  0x8c   : > { %v3038_v29 = vsub.f32 %v555_v1, %v597_v25  ;;  %v3077_v48 = vsub.f32 %v3008_v0, %v599_v41 }
  0x8d   : > { %v3041_v30 = vsub.f32 %v553_v2, %v595_v28 }
  0x8e   : > { %v613_v31 = vmul.f32 %v3038_v29, %v3038_v29  ;;  %v615_v57 = vmul.f32 %v3077_v48, %v3077_v48 }
  0x8f   : > { %v611_v32 = vmul.f32 %v3041_v30, %v3041_v30 }
  0x90   : > { %v631_v33 = vsel %vm560_vm0, %v613_v31, 0.0  ;;  %v637_v60 = vsel %vm560_vm0, %v615_v57, 0.0 }
  0x91   : > { %v581_v34 = vpop.xlane.xlu0 %580  ;;  %632 = vadd.xlane.f32.xlu2 %v631_v33  ;;  %v566_v35 = vpop.xlane.xlu2 %565  ;;  %v625_v36 = vsel %vm560_vm0, %v611_v32, 0.0 }
  0x92   : > { %v598_v37 = vmul.f32 %v3032_v22, %v581_v34  ;;  %v575_v38 = vpop.xlane.xlu1 %574  ;;  %v593_v39 = vmul.f32 %v3032_v22, %v566_v35  ;;  %626 = vadd.xlane.f32.xlu1 %v625_v36 }
  0x93   : > { %v596_v40 = vmul.f32 %v3032_v22, %v575_v38  ;;  %v3127_v38 = vld [vmem:[%s4523_s19] ss:$0 sm:$0xff] }
  0x94   : > { %v3060_v42 = vsub.f32 %v556_v6, %v598_v37  ;;  %v3062_v43 = vsub.f32 %v551_v8, %v593_v39 }
  0x95   : > { %v3065_v44 = vsub.f32 %v554_v7, %v596_v40 }
  0x96   : > { %v614_v45 = vmul.f32 %v3060_v42, %v3060_v42  ;;  %v609_v46 = vmul.f32 %v3062_v43, %v3062_v43 }
  0x97   : > { %v612_v47 = vmul.f32 %v3065_v44, %v3065_v44 }
  0x98   : > { %v634_v49 = vsel %vm560_vm0, %v614_v45, 0.0  ;;  %v619_v50 = vsel %vm560_vm0, %v609_v46, 0.0 }
  0x99   : > { %635 = vadd.xlane.f32.xlu0 %v634_v49  ;;  %v569_v51 = vpop.xlane.xlu0 %568  ;;  %v628_v52 = vsel %vm560_vm0, %v612_v47, 0.0  ;;  %v3135_v47 = vld [vmem:[%s4475_s2] ss:$0 sm:$0xff] }
  0x9a   : > { %v594_v53 = vmul.f32 %v3032_v22, %v569_v51  ;;  %629 = vadd.xlane.f32.xlu2 %v628_v52  ;;  %620 = vadd.xlane.f32.xlu1 %v619_v50  ;;  %v563_v54 = vpop.xlane.xlu1 %562 }
  0x9b   : > { %v592_v55 = vmul.f32 %v3032_v22, %v563_v54 }
  0x9c   : > { %v3089_v56 = vsub.f32 %v3023_v12, %v594_v53 }
  0x9d   : > { %v3098_v59 = vsub.f32 %v3026_v13, %v592_v55 }
  0x9e   : > { %v610_v58 = vmul.f32 %v3089_v56, %v3089_v56 }
  0x9f   : > { %v608_v62 = vmul.f32 %v3098_v59, %v3098_v59 }
  0xa0   : > { %v622_v61 = vsel %vm560_vm0, %v610_v58, 0.0 }
  0xa1   : > { %638 = vadd.xlane.f32.xlu0 %v637_v60  ;;  %v616_v63 = vsel %vm560_vm0, %v608_v62, 0.0 }
  0xa2   : > { %623 = vadd.xlane.f32.xlu2 %v622_v61 }
  0xa9   : > { %617 = vadd.xlane.f32.xlu0 %v616_v63 }
 0x104   : > { %v633_v0 = vpop.xlane.xlu2 %632 }
 0x105   : > { %v645_v1 = vmul.f32 %v633_v0, %v3032_v22  ;;  %v627_v2 = vpop.xlane.xlu1 %626 }
 0x106   : > { %v643_v3 = vmul.f32 %v627_v2, %v3032_v22 }
 0x107   : > { %v653_v4 = vadd.f32 1e-05, %v645_v1 }
 0x108   : > { %v651_v5 = vadd.f32 1e-05, %v643_v3 }
 0x109   : > { %2777 = vrsqrt.f32 %v653_v4  ;;  %vm712_vm4 = vweird.f32 %v653_v4 }
 0x10a   : > { %2779 = vrsqrt.f32 %v651_v5  ;;  %vm692_vm7 = vweird.f32 %v651_v5 }
 0x10c   : > { %v636_v6 = vpop.xlane.xlu0 %635 }
 0x10d   : > { %v646_v7 = vmul.f32 %v636_v6, %v3032_v22  ;;  %v630_v8 = vpop.xlane.xlu2 %629  ;;  %v621_v9 = vpop.xlane.xlu1 %620 }
 0x10e   : > { %v644_v10 = vmul.f32 %v630_v8, %v3032_v22  ;;  %v641_v11 = vmul.f32 %v621_v9, %v3032_v22 }
 0x10f   : > { %v2778_v12 = vpop.eup %2777  ;;  %v3110_v13 = vadd.f32 1e-05, %v646_v7 }
 0x110   : > { %v707_v14 = vmul.f32 %v2778_v12, %v653_v4  ;;  %v3112_v15 = vadd.f32 1e-05, %v644_v10  ;;  %v3114_v16 = vadd.f32 1e-05, %v641_v11  ;;  %v2780_v17 = vpop.eup %2779  ;;  %vm713_vm3 = vweird.f32 %v2778_v12 }
 0x111   : > { %2781 = vrsqrt.f32 %v3110_v13  ;;  %v687_v19 = vmul.f32 %v2780_v17, %v651_v5  ;;  %vm693_vm5 = vweird.f32 %v2780_v17  ;;  %vm714_vm6 = vmor %vm712_vm4, %vm713_vm3  ;;  %vm722_vm9 = vweird.f32 %v3110_v13 }
 0x112   : > { %v708_v18 = vmul.f32 %v2778_v12, %v707_v14  ;;  %2783 = vrsqrt.f32 %v3112_v15  ;;  %vm694_vm8 = vmor %vm692_vm7, %vm693_vm5  ;;  %vm672_vm10 = vweird.f32 %v3114_v16  ;;  %vm702_vm15 = vweird.f32 %v3112_v15 }
 0x113   : > { %2785 = vrsqrt.f32 %v3114_v16  ;;  %v688_v21 = vmul.f32 %v2780_v17, %v687_v19  ;;  %v3174_v19 = vld [vmem:[%s4476_s3] ss:$0 sm:$0xff] }
 0x114   : > { %v709_v20 = vmul.f32 0.5, %v708_v18  ;;  %v639_v23 = vpop.xlane.xlu0 %638  ;;  %4524 = vst [vmem:[#allocation9_spill] sm:$0xff] %v3174_v19 }
 0x115   : > { %v647_v24 = vmul.f32 %v639_v23, %v3032_v22  ;;  %v624_v25 = vpop.xlane.xlu2 %623  ;;  %v689_v27 = vmul.f32 0.5, %v688_v21  ;;  %v3191_v21 = vld [vmem:[%s4476_s3 + $0x10] ss:$0 sm:$0xff] }
 0x116   : > { %v710_v26 = vsub.f32 1.5, %v709_v20  ;;  %v642_v32 = vmul.f32 %v624_v25, %v3032_v22 }
 0x117   : > { %v2782_v28 = vpop.eup %2781  ;;  %v3120_v31 = vadd.f32 1e-05, %v647_v24  ;;  %v690_v35 = vsub.f32 1.5, %v689_v27 }
 0x118   : > { %v2784_v33 = vpop.eup %2783  ;;  %v711_v34 = vmul.f32 %v2778_v12, %v710_v26  ;;  %v717_v36 = vmul.f32 %v2782_v28, %v3110_v13  ;;  %v3139_v51 = vadd.f32 1e-05, %v642_v32  ;;  %vm723_vm11 = vweird.f32 %v2782_v28  ;;  %v3208_v32 = vld [vmem:[%s4476_s3 + $0x16] ss:$0 sm:$0xff] }
 0x119   : > { %v2786_v37 = vpop.eup %2785  ;;  %v697_v39 = vmul.f32 %v2784_v33, %v3112_v15  ;;  %2787 = vrsqrt.f32 %v3120_v31  ;;  %v691_v41 = vmul.f32 %v2780_v17, %v690_v35  ;;  %vm703_vm12 = vweird.f32 %v2784_v33  ;;  %vm724_vm14 = vmor %vm722_vm9, %vm723_vm11 }
 0x11a   : > { %v715_v40 = vsel %vm714_vm6, %v2778_v12, %v711_v34  ;;  %v718_v45 = vmul.f32 %v2782_v28, %v717_v36  ;;  %v667_v46 = vmul.f32 %v2786_v37, %v3114_v16  ;;  %2789 = vrsqrt.f32 %v3139_v51  ;;  %vm704_vm1 = vmor %vm702_vm15, %vm703_vm12 }
 0x11b   : > { %v741_v49 = vmul.f32 %v715_v40, %v3038_v29  ;;  %v698_v50 = vmul.f32 %v2784_v33, %v697_v39  ;;  %v695_v52 = vsel %vm694_vm8, %v2780_v17, %v691_v41  ;;  %vm673_vm13 = vweird.f32 %v2786_v37  ;;  %v3224_v41 = vld [vmem:[%s4476_s3 + $0x11] ss:$0 sm:$0xff] }
 0x11c   : > { %v719_v53 = vmul.f32 0.5, %v718_v45  ;;  %v668_v54 = vmul.f32 %v2786_v37, %v667_v46  ;;  %v618_v55 = vpop.xlane.xlu0 %617  ;;  %v739_v58 = vmul.f32 %v695_v52, %v3041_v30  ;;  %vm674_vm2 = vmor %vm672_vm10, %vm673_vm13  ;;  %vm732_vm4 = vweird.f32 %v3120_v31 }
 0x11d   : > { %v752_v57 = vmul.f32 %v3127_v38, %v741_v49  ;;  %v699_v60 = vmul.f32 0.5, %v698_v50  ;;  %v640_v62 = vmul.f32 %v618_v55, %v3032_v22  ;;  %vm682_vm6 = vweird.f32 %v3139_v51  ;;  %v3247_v50 = vld [vmem:[%s4476_s3 + $0x21] ss:$0 sm:$0xff] }
 0x11e   : > { %v720_v29 = vsub.f32 1.5, %v719_v53  ;;  %v669_v61 = vmul.f32 0.5, %v668_v54  ;;  %v750_v1 = vmul.f32 %v3127_v38, %v739_v58  ;;  %4530 = vst [vmem:[#allocation13_spill] sm:$0xff] %v3247_v50  ;;  %vm1442_vm12 = vcmask 523264  }
 0x11f   : > { %v3146_v63 = vpop.eup %2787  ;;  %v763_v0 = vadd.f32 %v3135_v47, %v752_v57  ;;  %v700_v2 = vsub.f32 1.5, %v699_v60  ;;  %v3157_v7 = vadd.f32 1e-05, %v640_v62  ;;  %v3278_v62 = vld [vmem:[%s4476_s3 + $0x12] ss:$0 sm:$0xff] }
 0x120   : > { %v721_v3 = vmul.f32 %v2782_v28, %v720_v29  ;;  %v670_v4 = vsub.f32 1.5, %v669_v61  ;;  %v727_v30 = vmul.f32 %v3146_v63, %v3120_v31  ;;  %v761_v5 = vadd.f32 %v3135_v47, %v750_v1  ;;  %v3160_v11 = vpop.eup %2789 }
 0x121   : > { %798 = vst.msk [vmem:[#allocation2 + $0x61] sm:$0xff] %vm560_vm0, %v763_v0  ;;  %v701_v6 = vmul.f32 %v2784_v33, %v700_v2  ;;  %2791 = vrsqrt.f32 %v3157_v7  ;;  %v677_v18 = vmul.f32 %v3160_v11, %v3139_v51  ;;  %vm733_vm3 = vweird.f32 %v3146_v63 }
 0x122   : > { %v725_v8 = vsel %vm724_vm14, %v2782_v28, %v721_v3  ;;  %v671_v9 = vmul.f32 %v2786_v37, %v670_v4  ;;  %v728_v10 = vmul.f32 %v3146_v63, %v727_v30  ;;  %794 = vst.msk [vmem:[#allocation2 + $0x41] sm:$0xff] %vm560_vm0, %v761_v5  ;;  %v3203_v28 = vld [vmem:[#allocation2 + $0x90] sm:$0xff]  ;;  %vm3230_vm5 = vmor %vm732_vm4, %vm733_vm3  ;;  %vm683_vm7 = vweird.f32 %v3160_v11 }
 0x123   : > { %v742_v12 = vmul.f32 %v725_v8, %v3060_v42  ;;  %v705_v14 = vsel %vm704_vm1, %v2784_v33, %v701_v6  ;;  %v3179_v42 = vld [vmem:[%s4476_s3 + $0x1] ss:$0 sm:$0xff]  ;;  %v678_v25 = vmul.f32 %v3160_v11, %v677_v18  ;;  %v3238_v31 = vmul.f32 %v3208_v32, %v3203_v28  ;;  %v3293_v3 = vld [vmem:[#allocation2 + $0x91] sm:$0xff]  ;;  %vm684_vm10 = vmor %vm682_vm6, %vm683_vm7 }
 0x124   : > { %v740_v13 = vmul.f32 %v705_v14, %v3065_v44  ;;  %v675_v15 = vsel %vm674_vm2, %v2786_v37, %v671_v9  ;;  %v729_v17 = vmul.f32 0.5, %v728_v10  ;;  %4525 = vst [vmem:[#allocation10_spill] sm:$0xff] %v3179_v42  ;;  %v3186_v44 = vld [vmem:[%s4476_s3 + $0x2] ss:$0 sm:$0xff]  ;;  %vm662_vm9 = vweird.f32 %v3157_v7  ;;  %v3305_v8 = vld [vmem:[%s4476_s3 + $0x17] ss:$0 sm:$0xff] }
 0x125   : > { %v753_v16 = vmul.f32 %v3127_v38, %v742_v12  ;;  %v737_v20 = vmul.f32 %v675_v15, %v3062_v43  ;;  %4526 = vst [vmem:[#allocation11_spill] sm:$0xff] %v3186_v44  ;;  %v3199_v43 = vld [vmem:[%s4476_s3 + $0x20] ss:$0 sm:$0xff]  ;;  %v679_v39 = vmul.f32 0.5, %v678_v25  ;;  %v3312_v9 = vld [vmem:[%s4476_s3 + $0x22] ss:$0 sm:$0xff] }
 0x126   : > { %v751_v23 = vmul.f32 %v3127_v38, %v740_v13  ;;  %v730_v24 = vsub.f32 1.5, %v729_v17  ;;  %4537 = vst [vmem:[#allocation20_spill] sm:$0xff] %v3312_v9  ;;  %v3334_v15 = vld [vmem:[%s4476_s3 + $0x18] ss:$0 sm:$0xff] }
 0x127   : > { %v764_v26 = vadd.f32 %v3135_v47, %v753_v16  ;;  %v748_v27 = vmul.f32 %v3127_v38, %v737_v20  ;;  %v3219_v40 = vpop.eup %2791  ;;  %v680_v55 = vsub.f32 1.5, %v679_v39  ;;  %v3341_v20 = vmul.f32 %v3305_v8, %v3293_v3 }
 0x128   : > { %v3210_v33 = vld [vmem:[#allocation2 + $0x60] sm:$0xff]  ;;  %v762_v36 = vadd.f32 %v3135_v47, %v751_v23  ;;  %v731_v37 = vmul.f32 %v3146_v63, %v730_v24  ;;  %v657_v57 = vmul.f32 %v3219_v40, %v3157_v7  ;;  %vm663_vm8 = vweird.f32 %v3219_v40 }
 0x129   : > { %v3212_v34 = vld [vmem:[#allocation2 + $0x61] sm:$0xff]  ;;  %800 = vst.msk [vmem:[#allocation2 + $0x71] sm:$0xff] %vm560_vm0, %v764_v26  ;;  %v759_v45 = vadd.f32 %v3135_v47, %v748_v27  ;;  %v3242_v49 = vmul.f32 %v3174_v19, %v3210_v33  ;;  %v681_v4 = vmul.f32 %v3160_v11, %v680_v55  ;;  %v832_v5 = vmul.f32 %v3191_v21, %v3210_v33  ;;  %vm664_vm11 = vmor %vm662_vm9, %vm663_vm8 }
 0x12a   : > { %v3214_v35 = vld [vmem:[#allocation2 + $0x62] sm:$0xff]  ;;  %796 = vst.msk [vmem:[#allocation2 + $0x51] sm:$0xff] %vm560_vm0, %v762_v36  ;;  %v735_v54 = vsel %vm3230_vm5, %v3146_v63, %v731_v37  ;;  %v3261_v58 = vmul.f32 %v3179_v42, %v3212_v34  ;;  %v658_v30 = vmul.f32 %v3219_v40, %v657_v57  ;;  %v878_v6 = vmul.f32 %v3224_v41, %v3212_v34 }
 0x12b   : > { %4529 = vst [vmem:[#allocation12_spill] sm:$0xff] %v3242_v49  ;;  %v3249_v52 = vld [vmem:[#allocation2 + $0x40] sm:$0xff]  ;;  %v3265_v60 = vmul.f32 %v3186_v44, %v3214_v35  ;;  %v743_v2 = vmul.f32 %v735_v54, %v3077_v48  ;;  %v3307_v48 = vld [vmem:[#allocation2 + $0x92] sm:$0xff]  ;;  %v685_v17 = vsel %vm684_vm10, %v3160_v11, %v681_v4  ;;  %v940_v16 = vmul.f32 %v3278_v62, %v3214_v35 }
 0x12c   : > { %4531 = vst [vmem:[#allocation14_spill] sm:$0xff] %v3249_v52  ;;  %v3251_v53 = vld [vmem:[#allocation2 + $0x41] sm:$0xff]  ;;  %v3269_v29 = vmul.f32 %v3174_v19, %v3249_v52  ;;  %v3282_v63 = vmul.f32 %v3191_v21, %v3249_v52  ;;  %v3286_v0 = vmul.f32 %v3199_v43, %v3249_v52  ;;  %v659_v18 = vmul.f32 0.5, %v658_v30 }
 0x12d   : > { %4532 = vst [vmem:[#allocation15_spill] sm:$0xff] %v3251_v53  ;;  %v3271_v61 = vld [vmem:[#allocation2 + $0x42] sm:$0xff]  ;;  %v3290_v1 = vmul.f32 %v3179_v42, %v3251_v53  ;;  %v3316_v10 = vmul.f32 %v3224_v41, %v3251_v53  ;;  %v3320_v12 = vmul.f32 %v3247_v50, %v3251_v53  ;;  %v754_v13 = vmul.f32 %v3127_v38, %v743_v2 }
 0x12e   : > { %4533 = vst [vmem:[#allocation16_spill] sm:$0xff] %v3261_v58  ;;  %v3324_v14 = vmul.f32 %v3186_v44, %v3271_v61  ;;  %v886_v25 = vadd.f32 %v878_v6, %v832_v5  ;;  %v3350_v26 = vmul.f32 %v3334_v15, %v3307_v48  ;;  %v841_v11 = vmul.f32 %v3199_v43, %v3210_v33 }
 0x12f   : > { %4534 = vst [vmem:[#allocation17_spill] sm:$0xff] %v3265_v60  ;;  %v765_v51 = vadd.f32 %v3135_v47, %v754_v13  ;;  %v738_v39 = vmul.f32 %v685_v17, %v3089_v56  ;;  %v895_v46 = vmul.f32 %v3247_v50, %v3212_v34  ;;  %v957_v54 = vmul.f32 %v3312_v9, %v3214_v35 }
 0x130   : > { %4535 = vst [vmem:[#allocation18_spill] sm:$0xff] %v3269_v29  ;;  %v3343_v23 = vld [vmem:[#allocation2 + $0x70] sm:$0xff] }
 0x131   : > { %790 = vst.msk [vmem:[#allocation2 + $0x21] sm:$0xff] %vm560_vm0, %v759_v45  ;;  %v3345_v24 = vld [vmem:[#allocation2 + $0x71] sm:$0xff]  ;;  %v660_v45 = vsub.f32 1.5, %v659_v18  ;;  %v3367_v55 = vmul.f32 %v3174_v19, %v3343_v23 }
 0x132   : > { %4536 = vst [vmem:[#allocation19_spill] sm:$0xff] %v3290_v1  ;;  %v3354_v27 = vld [vmem:[#allocation2 + $0x50] sm:$0xff]  ;;  %v3371_v57 = vmul.f32 %v3179_v42, %v3345_v24 }
 0x133   : > { %4538 = vst [vmem:[#allocation21_spill] sm:$0xff] %v3324_v14  ;;  %v3356_v36 = vld [vmem:[#allocation2 + $0x51] sm:$0xff]  ;;  %v3375_v2 = vmul.f32 %v3174_v19, %v3354_v27  ;;  %v3379_v56 = vmul.f32 %v3191_v21, %v3354_v27  ;;  %v3388_v5 = vmul.f32 %v3199_v43, %v3354_v27  ;;  %v661_v14 = vmul.f32 %v3219_v40, %v660_v45 }
 0x134   : > { %v3358_v37 = vld [vmem:[#allocation2 + $0x52] sm:$0xff]  ;;  %4539 = vst [vmem:[#allocation22_spill] sm:$0xff] %v3367_v55  ;;  %v3392_v6 = vmul.f32 %v3179_v42, %v3356_v36  ;;  %v3396_v13 = vmul.f32 %v3224_v41, %v3356_v36  ;;  %v3400_v17 = vmul.f32 %v3247_v50, %v3356_v36  ;;  %v879_v45 = vmul.f32 %v3224_v41, %v3345_v24 }
 0x135   : > { %4540 = vst [vmem:[#allocation23_spill] sm:$0xff] %v3371_v57  ;;  %v3420_v55 = vld [vmem:[#allocation2 + $0x72] sm:$0xff] }
 0x136   : > { %4541 = vst [vmem:[#allocation24_spill] sm:$0xff] %v3375_v2 }
 0x137   : > { %802 = vst.msk [vmem:[#allocation2 + $0x81] sm:$0xff] %vm560_vm0, %v765_v51  ;;  %v3406_v51 = vmul.f32 %v3186_v44, %v3358_v37 }
 0x138   : > { %v3381_v4 = vld [vmem:[#allocation2 + $0x20] sm:$0xff]  ;;  %4544 = vst [vmem:[#allocation27_spill] sm:$0xff] %v3392_v6  ;;  %v3435_v6 = vld [vmem:[%s4476_s3 + $0x13] ss:$0 sm:$0xff] }
 0x139   : > { %4542 = vst [vmem:[#allocation25_spill] sm:$0xff] %v3381_v4  ;;  %v3383_v30 = vld [vmem:[#allocation2 + $0x21] sm:$0xff]  ;;  %v3410_v22 = vmul.f32 %v3174_v19, %v3381_v4  ;;  %v3414_v60 = vmul.f32 %v3191_v21, %v3381_v4  ;;  %v3418_v57 = vmul.f32 %v3199_v43, %v3381_v4 }
 0x13a   : > { %4543 = vst [vmem:[#allocation26_spill] sm:$0xff] %v3383_v30  ;;  %v3402_v18 = vld [vmem:[#allocation2 + $0x22] sm:$0xff]  ;;  %v3424_v58 = vmul.f32 %v3179_v42, %v3383_v30  ;;  %v3428_v49 = vmul.f32 %v3224_v41, %v3383_v30  ;;  %v3439_v2 = vmul.f32 %v3247_v50, %v3383_v30  ;;  %v1002_v30 = vmul.f32 %v3435_v6, %v3343_v23 }
 0x13b   : > { %4545 = vst [vmem:[#allocation28_spill] sm:$0xff] %v3402_v18  ;;  %v3443_v1 = vmul.f32 %v3186_v44, %v3402_v18 }
 0x13c   : > { %4546 = vst [vmem:[#allocation29_spill] sm:$0xff] %v3406_v51  ;;  %v749_v51 = vmul.f32 %v3127_v38, %v738_v39  ;;  %v833_v39 = vmul.f32 %v3191_v21, %v3343_v23 }
 0x13d   : > { %4547 = vst [vmem:[#allocation30_spill] sm:$0xff] %v3410_v22  ;;  %v948_v22 = vadd.f32 %v940_v16, %v886_v25 }
 0x13e   : > { %4548 = vst [vmem:[#allocation31_spill] sm:$0xff] %v3414_v60  ;;  %v760_v29 = vadd.f32 %v3135_v47, %v749_v51  ;;  %v887_v4 = vadd.f32 %v879_v45, %v833_v39  ;;  %v3468_v51 = vld [vmem:[%s4476_s3 + $0x15] ss:$0 sm:$0xff]  ;;  %v3475_v25 = vld [vmem:[#allocation2 + $0x81] sm:$0xff]  ;;  %v896_v39 = vmul.f32 %v3247_v50, %v3345_v24  ;;  %v903_v45 = vadd.f32 %v895_v46, %v841_v11 }
 0x13f   : > { %4549 = vst [vmem:[#allocation32_spill] sm:$0xff] %v3418_v57  ;;  %v1010_v16 = vadd.f32 %v1002_v30, %v948_v22  ;;  %v1126_v22 = vmul.f32 %v3468_v51, %v3420_v55 }
 0x140   : > { %4550 = vst [vmem:[#allocation33_spill] sm:$0xff] %v3424_v58  ;;  %v665_v58 = vsel %vm664_vm11, %v3219_v40, %v661_v14  ;;  %v842_v40 = vmul.f32 %v3199_v43, %v3343_v23  ;;  %v3473_v14 = vld [vmem:[#allocation2 + $0x80] sm:$0xff] }
 0x141   : > { %4551 = vst [vmem:[#allocation34_spill] sm:$0xff] %v3428_v49  ;;  %v736_v7 = vmul.f32 %v665_v58, %v3098_v59  ;;  %v3479_v58 = vld [vmem:[#allocation2 + $0x82] sm:$0xff]  ;;  %v1188_v18 = vmul.f32 %v3208_v32, %v3473_v14  ;;  %v958_v49 = vmul.f32 %v3312_v9, %v3420_v55 }
 0x142   : > { %4552 = vst [vmem:[#allocation35_spill] sm:$0xff] %v3439_v2  ;;  %v941_v2 = vmul.f32 %v3278_v62, %v3420_v55  ;;  %v3509_v9 = vld [vmem:[%s4476_s3 + $0x24] ss:$0 sm:$0xff] }
 0x143   : > { %4553 = vst [vmem:[#allocation36_spill] sm:$0xff] %v3443_v1  ;;  %v3460_v1 = vld [vmem:[%s4476_s3 + $0x14] ss:$0 sm:$0xff]  ;;  %v747_v57 = vmul.f32 %v3127_v38, %v736_v7  ;;  %v3497_v38 = vld [vmem:[%s4476_s3 + $0x23] ss:$0 sm:$0xff] }
 0x144   : > { %792 = vst.msk [vmem:[#allocation2 + $0x31] sm:$0xff] %vm560_vm0, %v760_v29  ;;  %v1064_v59 = vmul.f32 %v3460_v1, %v3345_v24  ;;  %v949_v53 = vadd.f32 %v941_v2, %v887_v4  ;;  %v1003_v29 = vmul.f32 %v3435_v6, %v3473_v14  ;;  %v1065_v30 = vmul.f32 %v3460_v1, %v3475_v25 }
 0x145   : > { %4554 = vst [vmem:[#allocation37_spill] sm:$0xff] %v3473_v14  ;;  %v758_v11 = vadd.f32 %v3135_v47, %v747_v57  ;;  %v1127_v2 = vmul.f32 %v3468_v51, %v3479_v58  ;;  %v904_v4 = vadd.f32 %v896_v39, %v842_v40  ;;  %v1020_v60 = vmul.f32 %v3497_v38, %v3473_v14  ;;  %v3519_v57 = vld [vmem:[%s4476_s3 + $0x25] ss:$0 sm:$0xff] }
 0x146   : > { %4555 = vst [vmem:[#allocation38_spill] sm:$0xff] %v3475_v25  ;;  %v1072_v52 = vadd.f32 %v1064_v59, %v1010_v16  ;;  %v1011_v46 = vadd.f32 %v1003_v29, %v949_v53  ;;  %v965_v16 = vadd.f32 %v957_v54, %v903_v45  ;;  %v1019_v59 = vmul.f32 %v3497_v38, %v3343_v23 }
 0x147   : > { %4556 = vst [vmem:[#allocation39_spill] sm:$0xff] %v3479_v58  ;;  %v1250_v53 = vmul.f32 %v3305_v8, %v3475_v25  ;;  %v966_v54 = vadd.f32 %v958_v49, %v904_v4  ;;  %v1081_v45 = vmul.f32 %v3509_v9, %v3345_v24  ;;  %v1082_v29 = vmul.f32 %v3509_v9, %v3475_v25 }
 0x148   : > { %v1134_v7 = vadd.f32 %v1126_v22, %v1072_v52  ;;  %788 = vst.msk [vmem:[#allocation2 + $0x11] sm:$0xff] %vm560_vm0, %v758_v11  ;;  %v1073_v47 = vadd.f32 %v1065_v30, %v1011_v46  ;;  %v1312_v52 = vmul.f32 %v3334_v15, %v3479_v58  ;;  %v1027_v39 = vadd.f32 %v1019_v59, %v965_v16  ;;  %v3528_v22 = vld [vmem:[%s4476_s3 + $0x26] ss:$0 sm:$0xff] }
 0x149   : > { %4557 = vst [vmem:[#allocation40_spill] sm:$0xff] %v3528_v22  ;;  %v1028_v46 = vadd.f32 %v1020_v60, %v966_v54  ;;  %v1144_v4 = vmul.f32 %v3519_v57, %v3479_v58  ;;  %v1206_v60 = vmul.f32 %v3528_v22, %v3203_v28 }
 0x14a   : > { %v1196_v40 = vadd.f32 %v1188_v18, %v1134_v7  ;;  %v1135_v11 = vadd.f32 %v1127_v2, %v1073_v47  ;;  %v1143_v18 = vmul.f32 %v3519_v57, %v3420_v55  ;;  %v1205_v2 = vmul.f32 %v3528_v22, %v3473_v14  ;;  %v3568_v14 = vld [vmem:[%s4476_s3 + $0x27] ss:$0 sm:$0xff] }
 0x14b   : > { %v3530_v30 = vld [vmem:[#allocation2 + $0x30] sm:$0xff]  ;;  %v1090_v22 = vadd.f32 %v1082_v29, %v1028_v46 }
 0x14c   : > { %4558 = vst [vmem:[#allocation41_spill] sm:$0xff] %v3530_v30  ;;  %v3532_v49 = vld [vmem:[#allocation2 + $0x31] sm:$0xff]  ;;  %v3540_v7 = vmul.f32 %v3174_v19, %v3530_v30  ;;  %v3544_v16 = vmul.f32 %v3191_v21, %v3530_v30  ;;  %v3554_v47 = vmul.f32 %v3199_v43, %v3530_v30  ;;  %v1089_v30 = vadd.f32 %v1081_v45, %v1027_v39 }
 0x14d   : > { %v3546_v59 = vld [vmem:[#allocation2 + $0x32] sm:$0xff]  ;;  %v3558_v54 = vmul.f32 %v3179_v42, %v3532_v49  ;;  %v3572_v28 = vmul.f32 %v3247_v50, %v3532_v49  ;;  %v1152_v45 = vadd.f32 %v1144_v4, %v1090_v22  ;;  %v884_v22 = vadd.f32 %v3316_v10, %v3282_v63  ;;  %v3628_v63 = vld [vmem:[%s4478_s5 + $0x1] ss:$0 sm:$0xff] }
 0x14e   : > { %4559 = vst [vmem:[#allocation42_spill] sm:$0xff] %v3540_v7  ;;  %v3562_v7 = vmul.f32 %v3224_v41, %v3532_v49 }
 0x14f   : > { %4560 = vst [vmem:[#allocation43_spill] sm:$0xff] %v3544_v16  ;;  %v1197_v16 = vadd.f32 %v3238_v31, %v1135_v11  ;;  %v3581_v31 = vmul.f32 %v3186_v44, %v3546_v59 }
 0x150   : > { %4561 = vst [vmem:[#allocation44_spill] sm:$0xff] %v3554_v47  ;;  %v1258_v47 = vadd.f32 %v1250_v53, %v1196_v40  ;;  %v3588_v53 = vld [vmem:[#allocation2 + $0x10] sm:$0xff] }
 0x151   : > { %4562 = vst [vmem:[#allocation45_spill] sm:$0xff] %v3558_v54  ;;  %v3577_v54 = vld [vmem:[%s4476_s3 + $0x28] ss:$0 sm:$0xff]  ;;  %v1259_v11 = vadd.f32 %v3341_v20, %v1197_v16  ;;  %v3590_v40 = vld [vmem:[#allocation2 + $0x11] sm:$0xff]  ;;  %v3598_v20 = vmul.f32 %v3174_v19, %v3588_v53  ;;  %v3602_v16 = vmul.f32 %v3191_v21, %v3588_v53 }
 0x152   : > { %4563 = vst [vmem:[#allocation46_spill] sm:$0xff] %v3562_v7  ;;  %v1267_v7 = vmul.f32 %v3568_v14, %v3475_v25  ;;  %v1320_v39 = vadd.f32 %v1312_v52, %v1258_v47  ;;  %v1329_v29 = vmul.f32 %v3577_v54, %v3479_v58  ;;  %v1330_v46 = vmul.f32 %v3577_v54, %v3307_v48 }
 0x153   : > { %4564 = vst [vmem:[#allocation47_spill] sm:$0xff] %v3572_v28  ;;  %v1268_v28 = vmul.f32 %v3568_v14, %v3293_v3  ;;  %v3607_v3 = vld [vmem:[%s4477_s4 + $0x1] ss:$0 sm:$0xff]  ;;  %v1151_v52 = vadd.f32 %v1143_v18, %v1089_v30  ;;  %v3613_v48 = vmul.f32 %v3199_v43, %v3588_v53  ;;  %v3617_v4 = vmul.f32 %v3179_v42, %v3590_v40 }
 0x154   : > { %4565 = vst [vmem:[#allocation48_spill] sm:$0xff] %v3581_v31  ;;  %v3621_v47 = vmul.f32 %v3224_v41, %v3590_v40  ;;  %v1321_v58 = vadd.f32 %v3350_v26, %v1259_v11  ;;  %v1367_v25 = vmul.f32 %v3607_v3, %v1320_v39  ;;  %v1214_v30 = vadd.f32 %v1206_v60, %v1152_v45  ;;  %v3632_v31 = vld [vmem:[#allocation2 + $0x12] sm:$0xff] }
 0x155   : > { %4566 = vst [vmem:[#allocation49_spill] sm:$0xff] %v3598_v20  ;;  %v1213_v10 = vadd.f32 %v1205_v2, %v1151_v52  ;;  %v885_v18 = vadd.f32 %v3396_v13, %v3379_v56  ;;  %v938_v20 = vmul.f32 %v3278_v62, %v3271_v61  ;;  %v939_v26 = vmul.f32 %v3278_v62, %v3358_v37 }
 0x156   : > { %4567 = vst [vmem:[#allocation50_spill] sm:$0xff] %v3613_v48  ;;  %v1000_v11 = vmul.f32 %v3435_v6, %v3354_v27  ;;  %v3643_v2 = vmul.f32 %v3247_v50, %v3590_v40  ;;  %v1377_v60 = vadd.f32 %v3628_v63, %v1367_v25  ;;  %v1276_v13 = vadd.f32 %v1268_v28, %v1214_v30  ;;  %v3657_v25 = vld [vmem:[%s4477_s4 + $0x2] ss:$0 sm:$0xff] }
 0x157   : > { %4568 = vst [vmem:[#allocation51_spill] sm:$0xff] %v3617_v4  ;;  %v1368_v4 = vmul.f32 %v3607_v3, %v1321_v58  ;;  %v1275_v56 = vadd.f32 %v1267_v7, %v1213_v10  ;;  %v946_v58 = vadd.f32 %v938_v20, %v884_v22  ;;  %v947_v45 = vadd.f32 %v939_v26, %v885_v18  ;;  %v3671_v10 = vld [vmem:[%s4478_s5 + $0x2] ss:$0 sm:$0xff] }
 0x158   : > { %4569 = vst [vmem:[#allocation52_spill] sm:$0xff] %v3643_v2  ;;  %v1001_v52 = vmul.f32 %v3435_v6, %v3210_v33  ;;  %v3651_v42 = vmul.f32 %v3186_v44, %v3632_v31  ;;  %v1338_v48 = vadd.f32 %v1330_v46, %v1276_v13  ;;  %v1062_v7 = vmul.f32 %v3460_v1, %v3356_v36 }
 0x159   : > { %v1378_v39 = vadd.f32 %v3628_v63, %v1368_v4  ;;  %1418 = vst.msk [vmem:[#allocation6 + $0x30] sm:$0xff] %vm560_vm0, %v1377_v60  ;;  %v1337_v19 = vadd.f32 %v1329_v29, %v1275_v56  ;;  %v1008_v28 = vadd.f32 %v1000_v11, %v946_v58  ;;  %v1063_v22 = vmul.f32 %v3460_v1, %v3212_v34 }
 0x15a   : > { %4570 = vst [vmem:[#allocation53_spill] sm:$0xff] %v3651_v42  ;;  %v1009_v20 = vadd.f32 %v1001_v52, %v947_v45  ;;  %v1124_v4 = vmul.f32 %v3468_v51, %v3358_v37  ;;  %v1388_v46 = vmul.f32 %v3657_v25, %v1338_v48  ;;  %v1125_v30 = vmul.f32 %v3468_v51, %v3214_v35 }
 0x15b   : > { %1421 = vst.msk [vmem:[#allocation6 + $0x38] sm:$0xff] %vm560_vm0, %v1378_v39  ;;  %v1387_v29 = vmul.f32 %v3657_v25, %v1337_v19  ;;  %v1186_v18 = vmul.f32 %v3208_v32, %v3210_v33  ;;  %v1070_v26 = vadd.f32 %v1062_v7, %v1008_v28  ;;  %v1187_v60 = vmul.f32 %v3208_v32, %v3343_v23  ;;  %v4571_v7 = vld [vmem:[#allocation20_spill] sm:$0xff] }
 0x15c   : > { %v1071_v11 = vadd.f32 %v1063_v22, %v1009_v20  ;;  %v1248_v19 = vmul.f32 %v3305_v8, %v3212_v34  ;;  %v1398_v56 = vadd.f32 %v3671_v10, %v1388_v46  ;;  %v1249_v13 = vmul.f32 %v3305_v8, %v3345_v24 }
 0x15d   : > { %v1397_v48 = vadd.f32 %v3671_v10, %v1387_v29  ;;  %v901_v39 = vadd.f32 %v3320_v12, %v3286_v0  ;;  %v1132_v58 = vadd.f32 %v1124_v4, %v1070_v26  ;;  %v902_v52 = vadd.f32 %v3400_v17, %v3388_v5 }
 0x15e   : > { %v1133_v45 = vadd.f32 %v1125_v30, %v1071_v11  ;;  %v955_v28 = vmul.f32 %v4571_v7, %v3271_v61  ;;  %v1310_v20 = vmul.f32 %v3334_v15, %v3214_v35  ;;  %v1311_v22 = vmul.f32 %v3334_v15, %v3420_v55  ;;  %1422 = vst.msk [vmem:[#allocation7 + $0x38] sm:$0xff] %vm560_vm0, %v1398_v56 }
 0x15f   : > { %1419 = vst.msk [vmem:[#allocation7 + $0x30] sm:$0xff] %vm560_vm0, %v1397_v48  ;;  %v956_v29 = vmul.f32 %v4571_v7, %v3358_v37  ;;  %v1017_v0 = vmul.f32 %v3497_v38, %v3354_v27  ;;  %v1194_v12 = vadd.f32 %v1186_v18, %v1132_v58  ;;  %v1018_v4 = vmul.f32 %v3497_v38, %v3210_v33 }
 0x160   : > { %v1195_v5 = vadd.f32 %v1187_v60, %v1133_v45  ;;  %v963_v17 = vadd.f32 %v955_v28, %v901_v39  ;;  %v1431_v46 = vld [vmem:[#allocation6 + $0x30] sm:$0xff]  ;;  %v1079_v11 = vmul.f32 %v3509_v9, %v3356_v36  ;;  %v1080_v48 = vmul.f32 %v3509_v9, %v3212_v34  ;;  %v4572_v45 = vld [vmem:[#allocation40_spill] sm:$0xff] }
 0x161   : > { %v964_v26 = vadd.f32 %v956_v29, %v902_v52  ;;  %v1141_v42 = vmul.f32 %v3519_v57, %v3358_v37  ;;  %v1256_v56 = vadd.f32 %v1248_v19, %v1194_v12  ;;  %v1142_v58 = vmul.f32 %v3519_v57, %v3214_v35  ;;  %v4574_v12 = vld [vmem:[#allocation34_spill] sm:$0xff] }
 0x162   : > { %v1432_v30 = vld [vmem:[#allocation6 + $0x38] sm:$0xff]  ;;  %v1257_v18 = vadd.f32 %v1249_v13, %v1195_v5  ;;  %v1025_v60 = vadd.f32 %v1017_v0, %v963_v17  ;;  %v1203_v52 = vmul.f32 %v4572_v45, %v3210_v33  ;;  %v1204_v28 = vmul.f32 %v4572_v45, %v3343_v23 }
 0x163   : > { %v1436_v44 = vpack.c.bf16 %v1432_v30, %v1431_v46  ;;  %v1026_v39 = vadd.f32 %v1018_v4, %v964_v26  ;;  %v1318_v29 = vadd.f32 %v1310_v20, %v1256_v56  ;;  %v1265_v46 = vmul.f32 %v3568_v14, %v3212_v34  ;;  %v4573_v0 = vld [vmem:[#allocation31_spill] sm:$0xff]  ;;  %v4576_v4 = vld [vmem:[#allocation46_spill] sm:$0xff] }
 0x164   : > { %v1319_v2 = vadd.f32 %v1311_v22, %v1257_v18  ;;  %v1087_v50 = vadd.f32 %v1079_v11, %v1025_v60  ;;  %v1266_v13 = vmul.f32 %v3568_v14, %v3345_v24  ;;  %v882_v5 = vadd.f32 %v4574_v12, %v4573_v0  ;;  %v4575_v17 = vld [vmem:[#allocation43_spill] sm:$0xff]  ;;  %v4578_v60 = vld [vmem:[#allocation41_spill] sm:$0xff] }
 0x165   : > { %1450 = vmatpush.bf16.msra.mxu0 %v1436_v44  ;;  %v1088_v19 = vadd.f32 %v1080_v48, %v1026_v39  ;;  %v883_v33 = vadd.f32 %v4576_v4, %v4575_v17  ;;  %v1365_v30 = vmul.f32 %v3607_v3, %v1318_v29  ;;  %v1327_v22 = vmul.f32 %v3577_v54, %v3214_v35  ;;  %v1469_v34 = vld [vmem:[#allocation7 + $0x38] sm:$0xff]  ;;  %v4577_v48 = vld [vmem:[#allocation28_spill] sm:$0xff]  ;;  %v4579_v17 = vld [vmem:[#allocation14_spill] sm:$0xff] }
 0x166   : > { %v1366_v44 = vmul.f32 %v3607_v3, %v1319_v2  ;;  %v1149_v20 = vadd.f32 %v1141_v42, %v1087_v50  ;;  %v1468_v26 = vld [vmem:[#allocation7 + $0x30] sm:$0xff]  ;;  %v936_v56 = vmul.f32 %v3278_v62, %v4577_v48  ;;  %v937_v18 = vmul.f32 %v3278_v62, %v3546_v59 }
 0x167   : > { %v1150_v11 = vadd.f32 %v1142_v58, %v1088_v19  ;;  %v998_v39 = vmul.f32 %v3435_v6, %v4578_v60  ;;  %v1473_v0 = vpack.c.bf16 %v1469_v34, %v1468_v26  ;;  %v1375_v29 = vadd.f32 %v3628_v63, %v1365_v30 }
 0x168   : > { %v1376_v42 = vadd.f32 %v3628_v63, %v1366_v44  ;;  %v1211_v50 = vadd.f32 %v1203_v52, %v1149_v20  ;;  %v944_v35 = vadd.f32 %v936_v56, %v882_v5  ;;  %v945_v12 = vadd.f32 %v937_v18, %v883_v33  ;;  %v4580_v5 = vld [vmem:[#allocation15_spill] sm:$0xff] }
 0x169   : > { %v1212_v2 = vadd.f32 %v1204_v28, %v1150_v11  ;;  %v999_v58 = vmul.f32 %v3435_v6, %v4579_v17  ;;  %1478 = vmatpush.bf16.msra.mxu1 %v1473_v0  ;;  %1412 = vst.msk [vmem:[#allocation6 + $0x20] sm:$0xff] %vm560_vm0, %v1375_v29  ;;  %v1328_v4 = vmul.f32 %v3577_v54, %v3420_v55  ;;  %v4581_v29 = vld [vmem:[#allocation32_spill] sm:$0xff] }
 0x16a   : > { %v1273_v19 = vadd.f32 %v1265_v46, %v1211_v50  ;;  %v1060_v26 = vmul.f32 %v3460_v1, %v3532_v49  ;;  %1415 = vst.msk [vmem:[#allocation6 + $0x28] sm:$0xff] %vm560_vm0, %v1376_v42  ;;  %v1006_v52 = vadd.f32 %v998_v39, %v944_v35  ;;  %v1061_v33 = vmul.f32 %v3460_v1, %v4580_v5  ;;  %v4582_v42 = vld [vmem:[#allocation35_spill] sm:$0xff] }
 0x16b   : > { %v1274_v30 = vadd.f32 %v1266_v13, %v1212_v2  ;;  %v1007_v28 = vadd.f32 %v999_v58, %v945_v12  ;;  %v1122_v20 = vmul.f32 %v3468_v51, %v3546_v59  ;;  %v1123_v46 = vmul.f32 %v3468_v51, %v3271_v61  ;;  %v4583_v58 = vld [vmem:[#allocation44_spill] sm:$0xff] }
 0x16c   : > { %v1335_v44 = vadd.f32 %v1327_v22, %v1273_v19  ;;  %v1184_v34 = vmul.f32 %v3208_v32, %v4579_v17  ;;  %v1068_v56 = vadd.f32 %v1060_v26, %v1006_v52  ;;  %v1185_v13 = vmul.f32 %v3208_v32, %v3354_v27  ;;  %v4584_v19 = vld [vmem:[#allocation47_spill] sm:$0xff]  ;;  %v2712_v26 = vld [vmem:[%s4480_s7] sm:$0xff] }
 0x16d   : > { %v1336_v11 = vadd.f32 %v1328_v4, %v1274_v30  ;;  %v1069_v18 = vadd.f32 %v1061_v33, %v1007_v28  ;;  %v1246_v22 = vmul.f32 %v3305_v8, %v4580_v5  ;;  %v1247_v0 = vmul.f32 %v3305_v8, %v3356_v36  ;;  %1531 = vmatpush.bf16.msra.mxu2 %v2712_v26 }
 0x16e   : > { %v1385_v39 = vmul.f32 %v3657_v25, %v1335_v44  ;;  %v899_v50 = vadd.f32 %v4582_v42, %v4581_v29  ;;  %v1130_v35 = vadd.f32 %v1122_v20, %v1068_v56  ;;  %v900_v4 = vadd.f32 %v4584_v19, %v4583_v58 }
 0x16f   : > { %v1386_v2 = vmul.f32 %v3657_v25, %v1336_v11  ;;  %v1131_v12 = vadd.f32 %v1123_v46, %v1069_v18  ;;  %v953_v52 = vmul.f32 %v4571_v7, %v4577_v48  ;;  %v954_v28 = vmul.f32 %v4571_v7, %v3546_v59 }
 0x170   : > { %v1395_v30 = vadd.f32 %v3671_v10, %v1385_v39  ;;  %v1015_v33 = vmul.f32 %v3497_v38, %v4578_v60  ;;  %v1192_v20 = vadd.f32 %v1184_v34, %v1130_v35  ;;  %v1308_v11 = vmul.f32 %v3334_v15, %v3271_v61  ;;  %v1429_v56 = vld [vmem:[#allocation6 + $0x20] sm:$0xff] }
 0x171   : > { %v1396_v44 = vadd.f32 %v3671_v10, %v1386_v2  ;;  %v1193_v46 = vadd.f32 %v1185_v13, %v1131_v12  ;;  %v1430_v18 = vld [vmem:[#allocation6 + $0x28] sm:$0xff]  ;;  %v1309_v39 = vmul.f32 %v3334_v15, %v3358_v37  ;;  %v961_v29 = vadd.f32 %v953_v52, %v899_v50 }
 0x172   : > { %1413 = vst.msk [vmem:[#allocation7 + $0x20] sm:$0xff] %vm560_vm0, %v1395_v30  ;;  %v962_v42 = vadd.f32 %v954_v28, %v900_v4  ;;  %v1016_v58 = vmul.f32 %v3497_v38, %v4579_v17  ;;  %v1435_v19 = vpack.c.bf16 %v1430_v18, %v1429_v56  ;;  %v1254_v34 = vadd.f32 %v1246_v22, %v1192_v20  ;;  %v3788_v4 = vld [vmem:[#allocation2] sm:$0xff] }
 0x173   : > { %1416 = vst.msk [vmem:[#allocation7 + $0x28] sm:$0xff] %vm560_vm0, %v1396_v44  ;;  %v1255_v13 = vadd.f32 %v1247_v0, %v1193_v46  ;;  %v1077_v2 = vmul.f32 %v3509_v9, %v3532_v49  ;;  %v1023_v35 = vadd.f32 %v1015_v33, %v961_v29  ;;  %v1078_v26 = vmul.f32 %v3509_v9, %v4580_v5  ;;  %v3794_v28 = vld [vmem:[#allocation2 + $0x1] sm:$0xff] }
 0x174   : > { %v1024_v12 = vadd.f32 %v1016_v58, %v962_v42  ;;  %v1139_v50 = vmul.f32 %v3519_v57, %v3546_v59  ;;  %1451 = vmatpush.bf16.msra.mxu0 %v1435_v19  ;;  %v1316_v30 = vadd.f32 %v1308_v11, %v1254_v34  ;;  %v1140_v22 = vmul.f32 %v3519_v57, %v3271_v61  ;;  %v3800_v56 = vld [vmem:[#allocation2 + $0x2] sm:$0xff] }
 0x175   : > { %v1317_v52 = vadd.f32 %v1309_v39, %v1255_v13  ;;  %v1201_v0 = vmul.f32 %v4572_v45, %v4579_v17  ;;  %v1085_v33 = vadd.f32 %v1077_v2, %v1023_v35  ;;  %v1202_v20 = vmul.f32 %v4572_v45, %v3354_v27 }
 0x176   : > { %v1086_v44 = vadd.f32 %v1078_v26, %v1024_v12  ;;  %v1263_v46 = vmul.f32 %v3568_v14, %v4580_v5  ;;  %v1363_v11 = vmul.f32 %v3607_v3, %v1316_v30  ;;  %v1264_v39 = vmul.f32 %v3568_v14, %v3356_v36 }
 0x177   : > { %v1364_v18 = vmul.f32 %v3607_v3, %v1317_v52  ;;  %v826_v29 = vmul.f32 %v3191_v21, %v3788_v4  ;;  %v1147_v42 = vadd.f32 %v1139_v50, %v1085_v33  ;;  %v872_v19 = vmul.f32 %v3224_v41, %v3794_v28  ;;  %v4585_v33 = vld [vmem:[#allocation25_spill] sm:$0xff] }
 0x178   : > { %v1148_v58 = vadd.f32 %v1140_v22, %v1086_v44  ;;  %v881_v34 = vadd.f32 %v3621_v47, %v3602_v16  ;;  %v1373_v13 = vadd.f32 %v3628_v63, %v1363_v11  ;;  %v934_v35 = vmul.f32 %v3278_v62, %v3800_v56 }
 0x179   : > { %v1374_v2 = vadd.f32 %v3628_v63, %v1364_v18  ;;  %v935_v12 = vmul.f32 %v3278_v62, %v3632_v31  ;;  %v1466_v26 = vld [vmem:[#allocation7 + $0x20] sm:$0xff]  ;;  %v1209_v50 = vadd.f32 %v1201_v0, %v1147_v42  ;;  %v880_v52 = vadd.f32 %v872_v19, %v826_v29  ;;  %v4586_v42 = vld [vmem:[#allocation26_spill] sm:$0xff] }
 0x17a   : > { %v1467_v21 = vld [vmem:[#allocation7 + $0x28] sm:$0xff]  ;;  %v1210_v30 = vadd.f32 %v1202_v20, %v1148_v58  ;;  %v996_v41 = vmul.f32 %v3435_v6, %v3588_v53  ;;  %1406 = vst.msk [vmem:[#allocation6 + $0x10] sm:$0xff] %vm560_vm0, %v1373_v13  ;;  %v1325_v16 = vmul.f32 %v3577_v54, %v3271_v61  ;;  %v997_v44 = vmul.f32 %v3435_v6, %v4585_v33 }
 0x17b   : > { %v1472_v22 = vpack.c.bf16 %v1467_v21, %v1466_v26  ;;  %v943_v47 = vadd.f32 %v935_v12, %v881_v34  ;;  %1409 = vst.msk [vmem:[#allocation6 + $0x18] sm:$0xff] %vm560_vm0, %v1374_v2  ;;  %v1271_v62 = vadd.f32 %v1263_v46, %v1209_v50  ;;  %v1326_v0 = vmul.f32 %v3577_v54, %v3358_v37 }
 0x17c   : > { %v1272_v11 = vadd.f32 %v1264_v39, %v1210_v30  ;;  %v942_v20 = vadd.f32 %v934_v35, %v880_v52  ;;  %v1058_v29 = vmul.f32 %v3460_v1, %v3590_v40  ;;  %v1059_v58 = vmul.f32 %v3460_v1, %v4586_v42  ;;  %v4587_v52 = vld [vmem:[#allocation13_spill] sm:$0xff] }
 0x17d   : > { %1479 = vmatpush.bf16.msra.mxu1 %v1472_v22  ;;  %v1005_v18 = vadd.f32 %v997_v44, %v943_v47  ;;  %v1120_v19 = vmul.f32 %v3468_v51, %v3632_v31  ;;  %v1333_v6 = vadd.f32 %v1325_v16, %v1271_v62  ;;  %v1121_v46 = vmul.f32 %v3468_v51, %v4577_v48  ;;  %v4588_v22 = vld [vmem:[#allocation50_spill] sm:$0xff] }
 0x17e   : > { %v1334_v34 = vadd.f32 %v1326_v0, %v1272_v11  ;;  %v1004_v13 = vadd.f32 %v996_v41, %v942_v20  ;;  %v1182_v2 = vmul.f32 %v3208_v32, %v4585_v33  ;;  %v1183_v35 = vmul.f32 %v3208_v32, %v4578_v60  ;;  %v4589_v32 = vld [vmem:[#allocation52_spill] sm:$0xff] }
 0x17f   : > { %v1067_v39 = vadd.f32 %v1059_v58, %v1005_v18  ;;  %v1244_v12 = vmul.f32 %v3305_v8, %v4586_v42  ;;  %v1383_v1 = vmul.f32 %v3657_v25, %v1333_v6  ;;  %v1245_v50 = vmul.f32 %v3305_v8, %v3532_v49 }
 0x180   : > { %v1384_v26 = vmul.f32 %v3657_v25, %v1334_v34  ;;  %v1066_v21 = vadd.f32 %v1058_v29, %v1004_v13  ;;  %v835_v51 = vmul.f32 %v3199_v43, %v3788_v4  ;;  %v889_v41 = vmul.f32 %v4587_v52, %v3794_v28 }
 0x181   : > { %v1129_v30 = vadd.f32 %v1121_v46, %v1067_v39  ;;  %v898_v16 = vadd.f32 %v4589_v32, %v4588_v22  ;;  %v1393_v47 = vadd.f32 %v3671_v10, %v1383_v1  ;;  %v951_v11 = vmul.f32 %v4571_v7, %v3800_v56  ;;  %v1427_v0 = vld [vmem:[#allocation6 + $0x10] sm:$0xff] }
 0x182   : > { %v1394_v44 = vadd.f32 %v3671_v10, %v1384_v26  ;;  %v1128_v62 = vadd.f32 %v1120_v19, %v1066_v21  ;;  %v1428_v8 = vld [vmem:[#allocation6 + $0x18] sm:$0xff]  ;;  %v897_v18 = vadd.f32 %v889_v41, %v835_v51  ;;  %v952_v43 = vmul.f32 %v4571_v7, %v3632_v31 }
 0x183   : > { %v1191_v20 = vadd.f32 %v1183_v35, %v1129_v30  ;;  %v1013_v29 = vmul.f32 %v3497_v38, %v3588_v53  ;;  %v1434_v58 = vpack.c.bf16 %v1428_v8, %v1427_v0  ;;  %1407 = vst.msk [vmem:[#allocation7 + $0x10] sm:$0xff] %vm560_vm0, %v1393_v47  ;;  %v1306_v19 = vmul.f32 %v3334_v15, %v4577_v48  ;;  %v3895_v8 = vld [vmem:[%s4476_s3 + $0x3] ss:$0 sm:$0xff] }
 0x184   : > { %v1190_v6 = vadd.f32 %v1182_v2, %v1128_v62  ;;  %v1307_v34 = vmul.f32 %v3334_v15, %v3546_v59  ;;  %1410 = vst.msk [vmem:[#allocation7 + $0x18] sm:$0xff] %vm560_vm0, %v1394_v44  ;;  %v959_v46 = vadd.f32 %v951_v11, %v897_v18  ;;  %v960_v39 = vadd.f32 %v952_v43, %v898_v16  ;;  %v4591_v44 = vld [vmem:[#allocation10_spill] sm:$0xff]  ;;  %v4592_v11 = vld [vmem:[#allocation49_spill] sm:$0xff] }
 0x185   : > { %v1253_v13 = vadd.f32 %v1245_v50, %v1191_v20  ;;  %v1014_v7 = vmul.f32 %v3497_v38, %v4585_v33  ;;  %1452 = vmatpush.bf16.msra.mxu0 %v1434_v58  ;;  %v1075_v1 = vmul.f32 %v3509_v9, %v3590_v40  ;;  %v1076_v2 = vmul.f32 %v3509_v9, %v4586_v42 }
 0x186   : > { %v1252_v35 = vadd.f32 %v1244_v12, %v1190_v6  ;;  %v1137_v26 = vmul.f32 %v3519_v57, %v3632_v31  ;;  %v1021_v21 = vadd.f32 %v1013_v29, %v959_v46  ;;  %v1138_v50 = vmul.f32 %v3519_v57, %v4577_v48  ;;  %v4590_v57 = vld [vmem:[#allocation9_spill] sm:$0xff] }
 0x187   : > { %v1315_v15 = vadd.f32 %v1307_v34, %v1253_v13  ;;  %v1022_v30 = vadd.f32 %v1014_v7, %v960_v39  ;;  %v1199_v38 = vmul.f32 %v4572_v45, %v4585_v33  ;;  %v1200_v12 = vmul.f32 %v4572_v45, %v4578_v60  ;;  %v4593_v45 = vld [vmem:[#allocation51_spill] sm:$0xff]  ;;  %v4595_v6 = vld [vmem:[#allocation53_spill] sm:$0xff]  ;;  %v3907_v13 = vld [vmem:[%s4476_s3 + $0x4] ss:$0 sm:$0xff] }
 0x188   : > { %v1314_v51 = vadd.f32 %v1306_v19, %v1252_v35  ;;  %v1261_v52 = vmul.f32 %v3568_v14, %v4586_v42  ;;  %v1083_v41 = vadd.f32 %v1075_v1, %v1021_v21  ;;  %v1262_v32 = vmul.f32 %v3568_v14, %v3532_v49 }
 0x189   : > { %v1362_v9 = vmul.f32 %v3607_v3, %v1315_v15  ;;  %v1084_v22 = vadd.f32 %v1076_v2, %v1022_v30  ;;  %v817_v47 = vmul.f32 %v4590_v57, %v3788_v4  ;;  %v855_v62 = vmul.f32 %v4591_v44, %v3794_v28  ;;  %v3922_v2 = vld [vmem:[%s4476_s3 + $0x5] ss:$0 sm:$0xff] }
 0x18a   : > { %v1361_v16 = vmul.f32 %v3607_v3, %v1314_v51  ;;  %v864_v0 = vadd.f32 %v4593_v45, %v4592_v11  ;;  %v1145_v18 = vadd.f32 %v1137_v26, %v1083_v41  ;;  %v4594_v3 = vld [vmem:[#allocation11_spill] sm:$0xff]  ;;  %v1464_v29 = vld [vmem:[#allocation7 + $0x10] sm:$0xff]  ;;  %v979_v34 = vmul.f32 %v3895_v8, %v3588_v53  ;;  %v3927_v26 = vld [vmem:[%s4476_s3 + $0x6] ss:$0 sm:$0xff] }
 0x18b   : > { %v1372_v20 = vadd.f32 %v3628_v63, %v1362_v9  ;;  %v1146_v14 = vadd.f32 %v1138_v50, %v1084_v22  ;;  %v917_v43 = vmul.f32 %v4594_v3, %v3800_v56  ;;  %v1465_v4 = vld [vmem:[#allocation7 + $0x18] sm:$0xff]  ;;  %v863_v28 = vadd.f32 %v855_v62, %v817_v47  ;;  %v4596_v11 = vld [vmem:[#allocation30_spill] sm:$0xff]  ;;  %v4597_v45 = vld [vmem:[#allocation33_spill] sm:$0xff] }
 0x18c   : > { %v1371_v58 = vadd.f32 %v3628_v63, %v1361_v16  ;;  %v926_v19 = vadd.f32 %v4595_v6, %v864_v0  ;;  %v1471_v46 = vpack.c.bf16 %v1465_v4, %v1464_v29  ;;  %v1207_v39 = vadd.f32 %v1199_v38, %v1145_v18  ;;  %v4599_v3 = vld [vmem:[#allocation45_spill] sm:$0xff] }
 0x18d   : > { %1403 = vst.msk [vmem:[#allocation6 + $0x8] sm:$0xff] %vm560_vm0, %v1372_v20  ;;  %v1208_v56 = vadd.f32 %v1200_v12, %v1146_v14  ;;  %v980_v7 = vmul.f32 %v3895_v8, %v4585_v33  ;;  %v1323_v63 = vmul.f32 %v3577_v54, %v4577_v48  ;;  %v1324_v53 = vmul.f32 %v3577_v54, %v3546_v59  ;;  %v3940_v12 = vld [vmem:[%s4476_s3 + $0x7] ss:$0 sm:$0xff] }
 0x18e   : > { %1400 = vst.msk [vmem:[#allocation6] sm:$0xff] %vm560_vm0, %v1371_v58  ;;  %v925_v35 = vadd.f32 %v917_v43, %v863_v28  ;;  %v1041_v1 = vmul.f32 %v3907_v13, %v3590_v40  ;;  %1480 = vmatpush.bf16.msra.mxu1 %v1471_v46  ;;  %v1269_v15 = vadd.f32 %v1261_v52, %v1207_v39  ;;  %v3945_v52 = vld [vmem:[%s4476_s3 + $0x8] ss:$0 sm:$0xff]  ;;  %v4600_v28 = vld [vmem:[#allocation36_spill] sm:$0xff] }
 0x18f   : > { %v1270_v21 = vadd.f32 %v1262_v32, %v1208_v56  ;;  %v988_v30 = vadd.f32 %v980_v7, %v926_v19  ;;  %v1042_v54 = vmul.f32 %v3907_v13, %v4586_v42  ;;  %v1103_v40 = vmul.f32 %v3922_v2, %v3632_v31  ;;  %v4601_v46 = vld [vmem:[#allocation48_spill] sm:$0xff] }
 0x190   : > { %v987_v50 = vadd.f32 %v979_v34, %v925_v35  ;;  %v1104_v51 = vmul.f32 %v3922_v2, %v4577_v48  ;;  %v1165_v38 = vmul.f32 %v3927_v26, %v4585_v33  ;;  %v1331_v9 = vadd.f32 %v1323_v63, %v1269_v15 }
 0x191   : > { %v1332_v41 = vadd.f32 %v1324_v53, %v1270_v21  ;;  %v1050_v22 = vadd.f32 %v1042_v54, %v988_v30  ;;  %v1166_v31 = vmul.f32 %v3927_v26, %v4578_v60  ;;  %v1227_v33 = vmul.f32 %v3940_v12, %v4586_v42  ;;  %v4598_v42 = vld [vmem:[#allocation42_spill] sm:$0xff]  ;;  %v3987_v30 = vld [vmem:[%s4477_s4] ss:$0 sm:$0xff] }
 0x192   : > { %v1049_v32 = vadd.f32 %v1041_v1, %v987_v50  ;;  %v1228_v16 = vmul.f32 %v3940_v12, %v3532_v49  ;;  %v1289_v57 = vmul.f32 %v3945_v52, %v4577_v48  ;;  %v1381_v47 = vmul.f32 %v3657_v25, %v1331_v9 }
 0x193   : > { %v1382_v44 = vmul.f32 %v3657_v25, %v1332_v41  ;;  %v1112_v62 = vadd.f32 %v1104_v51, %v1050_v22  ;;  %v865_v0 = vadd.f32 %v4597_v45, %v4596_v11  ;;  %v1290_v14 = vmul.f32 %v3945_v52, %v3546_v59  ;;  %v4001_v41 = vld [vmem:[%s4478_s5] ss:$0 sm:$0xff] }
 0x194   : > { %v1426_v20 = vld [vmem:[#allocation6 + $0x8] sm:$0xff]  ;;  %v1111_v18 = vadd.f32 %v1103_v40, %v1049_v32  ;;  %v866_v43 = vadd.f32 %v4599_v3, %v4598_v42  ;;  %v981_v29 = vmul.f32 %v3895_v8, %v4578_v60  ;;  %v1391_v4 = vadd.f32 %v3671_v10, %v1381_v47  ;;  %v3975_v60 = vld [vmem:[%s4479_s6] sm:$0xff] }
 0x195   : > { %v1425_v48 = vld [vmem:[#allocation6] sm:$0xff]  ;;  %v1392_v25 = vadd.f32 %v3671_v10, %v1382_v44  ;;  %v1174_v58 = vadd.f32 %v1166_v31, %v1112_v62  ;;  %v927_v6 = vadd.f32 %v4600_v28, %v865_v0  ;;  %v982_v56 = vmul.f32 %v3895_v8, %v4579_v17  ;;  %v4605_v44 = vld [vmem:[#allocation27_spill] sm:$0xff]  ;;  %v4606_v42 = vld [vmem:[#allocation21_spill] sm:$0xff] }
 0x196   : > { %v1433_v19 = vpack.c.bf16 %v1426_v20, %v1425_v48  ;;  %v1173_v34 = vadd.f32 %v1165_v38, %v1111_v18  ;;  %v928_v39 = vadd.f32 %v4601_v46, %v866_v43  ;;  %1401 = vst.msk [vmem:[#allocation7] sm:$0xff] %vm560_vm0, %v1391_v4  ;;  %v1043_v10 = vmul.f32 %v3907_v13, %v3532_v49  ;;  %v4604_v47 = vld [vmem:[#allocation24_spill] sm:$0xff]  ;;  %v4607_v43 = vld [vmem:[#allocation29_spill] sm:$0xff] }
 0x197   : > { %v1236_v7 = vadd.f32 %v1228_v16, %v1174_v58  ;;  %v989_v63 = vadd.f32 %v981_v29, %v927_v6  ;;  %v1044_v53 = vmul.f32 %v3907_v13, %v4580_v5  ;;  %1404 = vst.msk [vmem:[#allocation7 + $0x8] sm:$0xff] %vm560_vm0, %v1392_v25  ;;  %v1105_v15 = vmul.f32 %v3922_v2, %v3546_v59  ;;  %v4603_v16 = vld [vmem:[#allocation19_spill] sm:$0xff]  ;;  %v2873_v20 = vld [vmem:[#allocation2 + $0x60] sm:$0xff] }
 0x198   : > { %1453 = vmatpush.bf16.msra.mxu0 %v1433_v19  ;;  %v1235_v35 = vadd.f32 %v1227_v33, %v1173_v34  ;;  %v990_v1 = vadd.f32 %v982_v56, %v928_v39  ;;  %v1106_v49 = vmul.f32 %v3922_v2, %v3271_v61  ;;  %v1167_v50 = vmul.f32 %v3927_v26, %v4579_v17  ;;  %v4602_v33 = vld [vmem:[#allocation18_spill] sm:$0xff]  ;;  %v2874_v28 = vld [vmem:[#allocation2 + $0x61] sm:$0xff] }
 0x199   : > { %v1298_v21 = vadd.f32 %v1290_v14, %v1236_v7  ;;  %v1051_v54 = vadd.f32 %v1043_v10, %v989_v63  ;;  %v1168_v38 = vmul.f32 %v3927_v26, %v3354_v27  ;;  %v1229_v59 = vmul.f32 %v3940_v12, %v4580_v5  ;;  %v2875_v56 = vld [vmem:[%s4476_s3 + $0x2] ss:$0 sm:$0xff] }
 0x19a   : > { %v1297_v40 = vadd.f32 %v1289_v57, %v1235_v35  ;;  %v1052_v51 = vadd.f32 %v1044_v53, %v990_v1  ;;  %v1230_v17 = vmul.f32 %v3940_v12, %v3356_v36  ;;  %v1291_v31 = vmul.f32 %v3945_v52, %v3271_v61 }
 0x19b   : > { %v1342_v9 = vmul.f32 %v3987_v30, %v1298_v21  ;;  %2639 = vmatmul.msk.bf16.vlgmr.msra.gmra.mxu0 %vm1442_vm12, %v3975_v60  ;;  %v1113_v22 = vadd.f32 %v1105_v15, %v1051_v54  ;;  %v867_v57 = vadd.f32 %v4603_v16, %v4602_v33  ;;  %v868_v62 = vadd.f32 %v4605_v44, %v4604_v47  ;;  %v4612_v16 = vld [vmem:[#allocation37_spill] sm:$0xff] }
 0x19c   : > { %v1341_v32 = vmul.f32 %v3987_v30, %v1297_v40  ;;  %v1114_v5 = vadd.f32 %v1106_v49, %v1052_v51  ;;  %v983_v0 = vmul.f32 %v3895_v8, %v3354_v27  ;;  %v984_v18 = vmul.f32 %v2873_v20, %v3895_v8 }
 0x19d   : > { %v1352_v11 = vadd.f32 %v4001_v41, %v1342_v9  ;;  %v1175_v45 = vadd.f32 %v1167_v50, %v1113_v22  ;;  %v929_v3 = vadd.f32 %v4606_v42, %v867_v57  ;;  %v930_v29 = vadd.f32 %v4607_v43, %v868_v62  ;;  %v1462_v48 = vld [vmem:[#allocation7] sm:$0xff] }
 0x19e   : > { %v1351_v61 = vadd.f32 %v4001_v41, %v1341_v32  ;;  %v1176_v14 = vadd.f32 %v1168_v38, %v1114_v5  ;;  %v1463_v4 = vld [vmem:[#allocation7 + $0x8] sm:$0xff]  ;;  %v1292_v58 = vmul.f32 %v3945_v52, %v3358_v37  ;;  %v1045_v27 = vmul.f32 %v3907_v13, %v3356_v36  ;;  %v4609_v9 = vld [vmem:[#allocation16_spill] sm:$0xff]  ;;  %v4611_v32 = vld [vmem:[#allocation23_spill] sm:$0xff] }
 0x19f   : > { %1402 = vst.msk [vmem:[#allocation3 + $0x8] sm:$0xff] %vm560_vm0, %v1352_v11  ;;  %v1237_v25 = vadd.f32 %v1229_v59, %v1175_v45  ;;  %v1046_v6 = vmul.f32 %v2874_v28, %v3907_v13  ;;  %v1470_v19 = vpack.c.bf16 %v1463_v4, %v1462_v48  ;;  %v991_v46 = vadd.f32 %v983_v0, %v929_v3  ;;  %v2876_v36 = vld [vmem:[#allocation2 + $0x62] sm:$0xff] }
 0x1a0   : > { %1399 = vst.msk [vmem:[#allocation3] sm:$0xff] %vm560_vm0, %v1351_v61  ;;  %v1238_v34 = vadd.f32 %v1230_v17, %v1176_v14  ;;  %v992_v39 = vadd.f32 %v984_v18, %v930_v29  ;;  %v924_v7 = vmul.f32 %v2875_v56, %v3420_v55  ;;  %v1107_v10 = vmul.f32 %v3922_v2, %v3358_v37  ;;  %v4608_v59 = vld [vmem:[#allocation12_spill] sm:$0xff]  ;;  %v4613_v11 = vld [vmem:[#allocation17_spill] sm:$0xff]  ;;  %v4614_v29 = vld [vmem:[#allocation38_spill] sm:$0xff] }
 0x1a1   : > { %v1299_v63 = vadd.f32 %v1291_v31, %v1237_v25  ;;  %v1108_v53 = vmul.f32 %v2876_v36, %v3922_v2  ;;  %1481 = vmatpush.bf16.msra.mxu1 %v1470_v19  ;;  %v1053_v1 = vadd.f32 %v1045_v27, %v991_v46  ;;  %v1169_v21 = vmul.f32 %v2873_v20, %v3927_v26  ;;  %v4610_v31 = vld [vmem:[#allocation22_spill] sm:$0xff]  ;;  %v4615_v19 = vld [vmem:[#allocation39_spill] sm:$0xff] }
 0x1a2   : > { %v1300_v35 = vadd.f32 %v1292_v58, %v1238_v34  ;;  %v1054_v15 = vadd.f32 %v1046_v6, %v992_v39  ;;  %v1170_v49 = vmul.f32 %v3927_v26, %v3343_v23  ;;  %v1231_v50 = vmul.f32 %v2874_v28, %v3940_v12  ;;  %v2878_v46 = vld [vmem:[#allocation2 + $0x90] sm:$0xff] }
 0x1a3   : > { %v1343_v54 = vmul.f32 %v3987_v30, %v1299_v63  ;;  %v1232_v40 = vmul.f32 %v3940_v12, %v3345_v24  ;;  %v1115_v51 = vadd.f32 %v1107_v10, %v1053_v1  ;;  %v869_v22 = vadd.f32 %v4609_v9, %v4608_v59  ;;  %v2879_v63 = vld [vmem:[#allocation2 + $0x91] sm:$0xff] }
 0x1a4   : > { %v1344_v37 = vmul.f32 %v3987_v30, %v1300_v35  ;;  %v1116_v38 = vadd.f32 %v1108_v53, %v1054_v15  ;;  %v870_v5 = vadd.f32 %v4611_v32, %v4610_v31  ;;  %v985_v33 = vmul.f32 %v3895_v8, %v3343_v23  ;;  %2640 = vmatmul.msk.bf16.vlgmr.msra.gmra.mxu1 %vm1442_vm12, %v3975_v60  ;;  %v2880_v15 = vld [vmem:[#allocation2 + $0x92] sm:$0xff] }
 0x1a5   : > { %v1353_v17 = vadd.f32 %v4001_v41, %v1343_v54  ;;  %v986_v57 = vmul.f32 %v3895_v8, %v4612_v16  ;;  %v1177_v44 = vadd.f32 %v1169_v21, %v1115_v51  ;;  %v931_v45 = vadd.f32 %v4613_v11, %v869_v22  ;;  %v2877_v8 = vld [vmem:[#allocation2 + $0x71] sm:$0xff] }
 0x1a6   : > { %v1491_v24 = vld [vmem:[#allocation3 + $0x8] sm:$0xff]  ;;  %v1354_v47 = vadd.f32 %v4001_v41, %v1344_v37  ;;  %v1178_v62 = vadd.f32 %v1170_v49, %v1116_v38  ;;  %v1293_v20 = vmul.f32 %v2876_v36, %v3945_v52  ;;  %v1294_v23 = vmul.f32 %v3945_v52, %v3420_v55 }
 0x1a7   : > { %v1490_v0 = vld [vmem:[#allocation3] sm:$0xff]  ;;  %1405 = vst.msk [vmem:[#allocation3 + $0x10] sm:$0xff] %vm560_vm0, %v1353_v17  ;;  %v932_v18 = vadd.f32 %v924_v7, %v870_v5  ;;  %v1047_v61 = vmul.f32 %v2877_v8, %v3907_v13  ;;  %v1239_v14 = vadd.f32 %v1231_v50, %v1177_v44  ;;  %v993_v3 = vadd.f32 %v985_v33, %v931_v45 }
 0x1a8   : > { %v1498_v60 = vpack.c.bf16 %v1491_v24, %v1490_v0  ;;  %1408 = vst.msk [vmem:[#allocation3 + $0x18] sm:$0xff] %vm560_vm0, %v1354_v47  ;;  %v1240_v42 = vadd.f32 %v1232_v40, %v1178_v62  ;;  %v1048_v48 = vmul.f32 %v3907_v13, %v4614_v29  ;;  %v1109_v4 = vmul.f32 %v3922_v2, %v3420_v55 }
 0x1a9   : > { %v994_v43 = vadd.f32 %v986_v57, %v932_v18  ;;  %v1301_v25 = vadd.f32 %v1293_v20, %v1239_v14  ;;  %v1055_v27 = vadd.f32 %v1047_v61, %v993_v3  ;;  %v1171_v28 = vmul.f32 %v3927_v26, %v4612_v16  ;;  %v2767_v3 = vld [vmem:[%s4481_s8] ss:$0 sm:$0xff] }
 0x1aa   : > { %2645 = vmatmul.msk.bf16.vlgmr.msra.gmra.mxu2 %vm560_vm0, %v1498_v60  ;;  %v1302_v58 = vadd.f32 %v1294_v23, %v1240_v42  ;;  %v1110_v34 = vmul.f32 %v3922_v2, %v4615_v19  ;;  %v1172_v39 = vmul.f32 %v2878_v46, %v3927_v26  ;;  %v1234_v10 = vmul.f32 %v2879_v63, %v3940_v12  ;;  %v2768_v23 = vld [vmem:[%s4481_s8 + $0x1] ss:$0 sm:$0xff] }
 0x1ab   : > { %v1056_v6 = vadd.f32 %v1048_v48, %v994_v43  ;;  %v1345_v13 = vmul.f32 %v3987_v30, %v1301_v25  ;;  %v1117_v55 = vadd.f32 %v1109_v4, %v1055_v27  ;;  %v1233_v2 = vmul.f32 %v3940_v12, %v4614_v29 }
 0x1ac   : > { %v1346_v56 = vmul.f32 %v3987_v30, %v1302_v58  ;;  %v1296_v26 = vmul.f32 %v2880_v15, %v3945_v52  ;;  %v1295_v54 = vmul.f32 %v3945_v52, %v4615_v19 }
 0x1ad   : > { %v1118_v7 = vadd.f32 %v1110_v34, %v1056_v6  ;;  %v1355_v36 = vadd.f32 %v4001_v41, %v1345_v13  ;;  %v1179_v35 = vadd.f32 %v1171_v28, %v1117_v55 }
 0x1ae   : > { %v1356_v53 = vadd.f32 %v4001_v41, %v1346_v56  ;;  %v1492_v59 = vld [vmem:[#allocation3 + $0x10] sm:$0xff] }
 0x1af   : > { %v1180_v1 = vadd.f32 %v1172_v39, %v1118_v7  ;;  %1411 = vst.msk [vmem:[#allocation3 + $0x20] sm:$0xff] %vm560_vm0, %v1355_v36  ;;  %v1241_v21 = vadd.f32 %v1233_v2, %v1179_v35  ;;  %v1493_v51 = vld [vmem:[#allocation3 + $0x18] sm:$0xff]  ;;  %v2714_v36 = vld [vmem:[%s4480_s7 + $0x10] sm:$0xff] }
 0x1b0   : > { %1414 = vst.msk [vmem:[#allocation3 + $0x28] sm:$0xff] %vm560_vm0, %v1356_v53  ;;  %v1499_v22 = vpack.c.bf16 %v1493_v51, %v1492_v59 }
 0x1b1   : > { %v1242_v49 = vadd.f32 %v1234_v10, %v1180_v1  ;;  %v1303_v50 = vadd.f32 %v1295_v54, %v1241_v21 }
 0x1b3   : > { %v1304_v40 = vadd.f32 %v1296_v26, %v1242_v49  ;;  %v1347_v37 = vmul.f32 %v3987_v30, %v1303_v50 }
 0x1b5   : > { %v1348_v12 = vmul.f32 %v3987_v30, %v1304_v40  ;;  %v1357_v38 = vadd.f32 %v4001_v41, %v1347_v37 }
 0x1b6   : > { %v1494_v17 = vld [vmem:[#allocation3 + $0x20] sm:$0xff] }
 0x1b7   : > { %v1358_v9 = vadd.f32 %v4001_v41, %v1348_v12  ;;  %1417 = vst.msk [vmem:[#allocation3 + $0x30] sm:$0xff] %vm560_vm0, %v1357_v38  ;;  %v1495_v52 = vld [vmem:[#allocation3 + $0x28] sm:$0xff] }
 0x1b8   : > { %v1500_v31 = vpack.c.bf16 %v1495_v52, %v1494_v17  ;;  %v2713_v41 = vld [vmem:[%s4480_s7 + $0x8] sm:$0xff] }
 0x1b9   : > { %1420 = vst.msk [vmem:[#allocation3 + $0x38] sm:$0xff] %vm560_vm0, %v1358_v9  ;;  %1577 = vmatpush.bf16.msra.mxu3 %v2713_v41 }
 0x1ba   : > { %2646 = vmatmul.msk.bf16.gmra.mxu2 %vm560_vm0, %v1499_v22 }
 0x1bd   : > { %1608 = vmatpush.bf16.msrb.mxu3 %v2714_v36 }
 0x1be   : > { %v1496_v5 = vld [vmem:[#allocation3 + $0x30] sm:$0xff] }
 0x1c0   : > { %v1497_v32 = vld [vmem:[#allocation3 + $0x38] sm:$0xff] }
 0x1c1   : > { %v1501_v30 = vpack.c.bf16 %v1497_v32, %v1496_v5 }
 0x1ca   : > { %2647 = vmatmul.msk.bf16.gmra.mxu2 %vm560_vm0, %v1500_v31 }
 0x1da   : > { %2648 = vmatmul.msk.bf16.gmra.mxu2 %vm560_vm0, %v1501_v30 }
 0x218   : > { %v1455_v33 = vpop.f32.mrf.mxu0 }
 0x219   : > { %1460 = vst.msk [vmem:[#allocation4] sm:$0xff] %vm560_vm0, %v1455_v33 }
 0x220   : > { %v1457_v16 = vpop.f32.mrf.mxu0  ;;  %v1553_v57 = vld [vmem:[#allocation4] sm:$0xff] }
 0x221   : > { %1461 = vst.msk [vmem:[#allocation4 + $0x8] sm:$0xff] %vm560_vm0, %v1457_v16  ;;  %v1483_v18 = vpop.f32.mrf.mxu1 }
 0x222   : > { %1488 = vst.msk [vmem:[#allocation5] sm:$0xff] %vm560_vm0, %v1483_v18 }
 0x228   : > { %v1554_v24 = vld [vmem:[#allocation4 + $0x8] sm:$0xff] }
 0x229   : > { %v1555_v47 = vpack.c.bf16 %v1554_v24, %v1553_v57  ;;  %v1485_v29 = vpop.f32.mrf.mxu1  ;;  %v1584_v53 = vld [vmem:[#allocation5] sm:$0xff] }
 0x22a   : > { %1489 = vst.msk [vmem:[#allocation5 + $0x8] sm:$0xff] %vm560_vm0, %v1485_v29 }
 0x22b   : > { %2655 = vmatmul.msk.bf16.vlgmr.msra.gmra.mxu3 %vm560_vm0, %v1555_v47 }
 0x22d   : > { %v1533_v44 = vpop.f32.mrf.mxu2 }
 0x22e   : > { %v1534_v25 = vadd.f32 %v2767_v3, %v1533_v44 }
 0x231   : > { %v1585_v35 = vld [vmem:[#allocation5 + $0x8] sm:$0xff] }
 0x232   : > { %v1586_v2 = vpack.c.bf16 %v1585_v35, %v1584_v53 }
 0x235   : > { %v1535_v62 = vpop.f32.mrf.mxu2 }
 0x236   : > { %v1536_v48 = vadd.f32 %v2767_v3, %v1535_v62 }
 0x238   : > { %v1615_v28 = vpack.c.bf16 %v1536_v48, %v1534_v25 }
 0x23b   : > { %2662 = vmatmul.msk.bf16.vlgmr.msrb.gmra.mxu3 %vm560_vm0, %v1586_v2 }
 0x23d   : > { %v1538_v11 = vpop.f32.mrf.mxu2 }
 0x23e   : > { %v1539_v39 = vadd.f32 %v2767_v3, %v1538_v11 }
 0x245   : > { %v1540_v45 = vpop.f32.mrf.mxu2 }
 0x246   : > { %v1541_v34 = vadd.f32 %v2767_v3, %v1540_v45 }
 0x248   : > { %v1616_v56 = vpack.c.bf16 %v1541_v34, %v1539_v39 }
 0x24d   : > { %v1543_v0 = vpop.f32.mrf.mxu2 }
 0x24e   : > { %v1544_v58 = vadd.f32 %v2767_v3, %v1543_v0 }
 0x255   : > { %v1545_v8 = vpop.f32.mrf.mxu2 }
 0x256   : > { %v1546_v4 = vadd.f32 %v2767_v3, %v1545_v8  ;;  %v2769_v8 = vld [vmem:[%s4481_s8 + $0x2] ss:$0 sm:$0xff] }
 0x258   : > { %v1617_v6 = vpack.c.bf16 %v1546_v4, %v1544_v58 }
 0x25d   : > { %v1548_v27 = vpop.f32.mrf.mxu2 }
 0x25e   : > { %v1549_v13 = vadd.f32 %v2767_v3, %v1548_v27 }
 0x265   : > { %v1550_v19 = vpop.f32.mrf.mxu2 }
 0x266   : > { %v1551_v46 = vadd.f32 %v2767_v3, %v1550_v19 }
 0x268   : > { %v1618_v55 = vpack.c.bf16 %v1551_v46, %v1549_v13 }
 0x2ae   : > { %v1579_v20 = vpop.f32.mrf.mxu3 }
 0x2af   : > { %v1580_v60 = vadd.f32 %v2768_v23, %v1579_v20 }
 0x2b6   : > { %v1581_v61 = vpop.f32.mrf.mxu3 }
 0x2b7   : > { %v1582_v14 = vadd.f32 %v2768_v23, %v1581_v61 }
 0x2b9   : > { %v1619_v42 = vpack.c.bf16 %v1582_v14, %v1580_v60 }
 0x2bb   : > { %v1633_v43 = vsel %vm560_vm0, %v1619_v42, 0 }
 0x2bc   : > { %1642 = vmatpush.bf16.xpose.msrb.mxu0 %v1633_v43  ;;  %2721 = vmatpush.bf16.xpose.msrb.mxu1 %v1633_v43 }
 0x2be   : > { %v1610_v11 = vpop.f32.mrf.mxu3 }
 0x2bf   : > { %v1611_v4 = vadd.f32 %v2769_v8, %v1610_v11 }
 0x2c3   : > { %2663 = vmatmul.msk.bf16.vlgmr.msrb.gmra.mxu0 %vm560_vm0, %v1615_v28  ;;  %2665 = vmatmul.msk.bf16.vlgmr.msrb.gmra.mxu1 %vm560_vm0, %v1617_v6 }
 0x2c6   : > { %v1612_v25 = vpop.f32.mrf.mxu3 }
 0x2c7   : > { %v1613_v58 = vadd.f32 %v2769_v8, %v1612_v25 }
 0x2c9   : > { %v1756_v28 = vpack.c.bf16 %v1613_v58, %v1611_v4 }
 0x2cb   : > { %1776 = vmatpush.bf16.msra.mxu1 %v1756_v28  ;;  %v2883_v28 = vld [vmem:[%s3005_s0 + $0x10] sm:$0xff] }
 0x2d3   : > { %2664 = vmatmul.msk.bf16.gmra.mxu0 %vm560_vm0, %v1616_v56  ;;  %2666 = vmatmul.msk.bf16.gmra.mxu1 %vm560_vm0, %v1618_v55 }
 0x340   : > { %v1644_v7 = vpop.f32.mrf.mxu0  ;;  %v1654_v63 = vpop.f32.mrf.mxu1 }
 0x341   : > { %v1664_v10 = vsel %vm560_vm0, %v1644_v7, -inf  ;;  %v1676_v49 = vsel %vm560_vm0, %v1654_v63, -inf }
 0x342   : > { %1665 = vmax.xlane.f32.xlu1 %v1664_v10 }
 0x348   : > { %v1646_v1 = vpop.f32.mrf.mxu0  ;;  %v1656_v15 = vpop.f32.mrf.mxu1 }
 0x349   : > { %v1667_v26 = vsel %vm560_vm0, %v1646_v1, -inf  ;;  %v1679_v12 = vsel %vm560_vm0, %v1656_v15, -inf }
 0x34a   : > { %1668 = vmax.xlane.f32.xlu2 %v1667_v26 }
 0x350   : > { %v1649_v21 = vpop.f32.mrf.mxu0  ;;  %v4118_v54 = vpop.f32.mrf.mxu1 }
 0x351   : > { %v1670_v50 = vsel %vm560_vm0, %v1649_v21, -inf  ;;  %v1682_v59 = vsel %vm560_vm0, %v4118_v54, -inf }
 0x352   : > { %1677 = vmax.xlane.f32.xlu2 %v1676_v49  ;;  %1671 = vmax.xlane.f32.xlu0 %v1670_v50 }
 0x358   : > { %v1651_v40 = vpop.f32.mrf.mxu0  ;;  %v1661_v37 = vpop.f32.mrf.mxu1 }
 0x359   : > { %v1685_v51 = vsel %vm560_vm0, %v1661_v37, -inf  ;;  %v1673_v38 = vsel %vm560_vm0, %v1651_v40, -inf }
 0x35a   : > { %1686 = vmax.xlane.f32.xlu2 %v1685_v51  ;;  %1680 = vmax.xlane.f32.xlu0 %v1679_v12 }
 0x35b   : > { %1674 = vmax.xlane.f32.xlu1 %v1673_v38 }
 0x363   : > { %1683 = vmax.xlane.f32.xlu1 %v1682_v59 }
 0x3b5   : > { %v1666_v9 = vpop.xlane.xlu1 %1665 }
 0x3b6   : > { %v1688_v22 = vsub.f32 %v1644_v7, %v1666_v9 }
 0x3b8   : > { %v1696_v52 = vmul.f32 1.442695, %v1688_v22 }
 0x3ba   : > { %2793 = vpow2.f32 %v1696_v52 }
 0x3bd   : > { %v1669_v17 = vpop.xlane.xlu2 %1668 }
 0x3be   : > { %v1689_v31 = vsub.f32 %v1646_v1, %v1669_v17 }
 0x3c0   : > { %v4127_v32 = vpop.eup %2793  ;;  %v1698_v5 = vmul.f32 1.442695, %v1689_v31 }
 0x3c1   : > { %v1712_v30 = vsel %vm560_vm0, %v4127_v32, 0.0 }
 0x3c2   : > { %2795 = vpow2.f32 %v1698_v5  ;;  %1713 = vadd.xlane.f32.xlu0 %v1712_v30 }
 0x3c5   : > { %v1678_v33 = vpop.xlane.xlu2 %1677  ;;  %v1672_v41 = vpop.xlane.xlu0 %1671 }
 0x3c6   : > { %v1692_v16 = vsub.f32 %v1654_v63, %v1678_v33  ;;  %v1690_v57 = vsub.f32 %v1649_v21, %v1672_v41 }
 0x3c8   : > { %v2796_v24 = vpop.eup %2795  ;;  %v1704_v47 = vmul.f32 1.442695, %v1692_v16  ;;  %v1700_v44 = vmul.f32 1.442695, %v1690_v57  ;;  %v2715_v16 = vld [vmem:[%s4482_s9] sm:$0xff] }
 0x3c9   : > { %v1715_v62 = vsel %vm560_vm0, %v2796_v24, 0.0  ;;  %1829 = vmatpush.bf16.msra.mxu3 %v2715_v16 }
 0x3ca   : > { %2797 = vpow2.f32 %v1704_v47  ;;  %1716 = vadd.xlane.f32.xlu1 %v1715_v62 }
 0x3cb   : > { %2799 = vpow2.f32 %v1700_v44 }
 0x3cd   : > { %v1687_v45 = vpop.xlane.xlu2 %1686  ;;  %v1681_v0 = vpop.xlane.xlu0 %1680 }
 0x3ce   : > { %v1695_v20 = vsub.f32 %v1661_v37, %v1687_v45  ;;  %v1693_v23 = vsub.f32 %v1656_v15, %v1681_v0  ;;  %v1675_v18 = vpop.xlane.xlu1 %1674 }
 0x3cf   : > { %v1691_v61 = vsub.f32 %v1651_v40, %v1675_v18 }
 0x3d0   : > { %v2798_v60 = vpop.eup %2797  ;;  %v1710_v14 = vmul.f32 1.442695, %v1695_v20  ;;  %v1706_v42 = vmul.f32 1.442695, %v1693_v23 }
 0x3d1   : > { %v2800_v3 = vpop.eup %2799  ;;  %v1702_v43 = vmul.f32 1.442695, %v1691_v61  ;;  %v1724_v29 = vsel %vm560_vm0, %v2798_v60, 0.0  ;;  %v2770_v61 = vld [vmem:[%s4483_s10] ss:$0 sm:$0xff] }
 0x3d2   : > { %2801 = vpow2.f32 %v1710_v14  ;;  %v1718_v48 = vsel %vm560_vm0, %v2800_v3, 0.0  ;;  %1725 = vadd.xlane.f32.xlu1 %v1724_v29  ;;  %v2881_v14 = vld [vmem:[%s3005_s0] sm:$0xff] }
 0x3d3   : > { %2803 = vpow2.f32 %v1706_v42  ;;  %1719 = vadd.xlane.f32.xlu2 %v1718_v48  ;;  %v2882_v48 = vld [vmem:[%s3005_s0 + $0x8] sm:$0xff] }
 0x3d4   : > { %2805 = vpow2.f32 %v1702_v43 }
 0x3d6   : > { %v1684_v27 = vpop.xlane.xlu1 %1683 }
 0x3d7   : > { %v1694_v6 = vsub.f32 %v4118_v54, %v1684_v27 }
 0x3d8   : > { %v2802_v19 = vpop.eup %2801 }
 0x3d9   : > { %v2804_v34 = vpop.eup %2803  ;;  %v1708_v46 = vmul.f32 1.442695, %v1694_v6  ;;  %v1733_v39 = vsel %vm560_vm0, %v2802_v19, 0.0 }
 0x3da   : > { %v2806_v13 = vpop.eup %2805  ;;  %v1727_v56 = vsel %vm560_vm0, %v2804_v34, 0.0  ;;  %1734 = vadd.xlane.f32.xlu1 %v1733_v39  ;;  %v2884_v39 = vld [vmem:[%s3005_s0 + $0x18] sm:$0xff] }
 0x3db   : > { %2807 = vpow2.f32 %v1708_v46  ;;  %1728 = vadd.xlane.f32.xlu2 %v1727_v56  ;;  %v1721_v55 = vsel %vm560_vm0, %v2806_v13, 0.0 }
 0x3dc   : > { %1722 = vadd.xlane.f32.xlu0 %v1721_v55 }
 0x3e1   : > { %v2808_v7 = vpop.eup %2807 }
 0x3e2   : > { %v1730_v63 = vsel %vm560_vm0, %v2808_v7, 0.0 }
 0x3e4   : > { %1731 = vadd.xlane.f32.xlu0 %v1730_v63  ;;  %v2885_v63 = vld [vmem:[%s3005_s0 + $0x20] sm:$0xff] }
 0x435   : > { %v1714_v10 = vpop.xlane.xlu0 %1713 }
 0x436   : > { %2809 = vrcp.f32 %v1714_v10 }
 0x43c   : > { %v2810_v53 = vpop.eup %2809 }
 0x43d   : > { %v1717_v36 = vpop.xlane.xlu1 %1716  ;;  %v1744_v2 = vmul.f32 %v2810_v53, %v4127_v32 }
 0x43e   : > { %2811 = vrcp.f32 %v1717_v36 }
 0x444   : > { %v2812_v35 = vpop.eup %2811 }
 0x445   : > { %v1745_v1 = vmul.f32 %v2812_v35, %v2796_v24  ;;  %v1726_v12 = vpop.xlane.xlu1 %1725 }
 0x446   : > { %v1720_v26 = vpop.xlane.xlu2 %1719 }
 0x447   : > { %v1752_v15 = vpack.c.bf16 %v1745_v1, %v1744_v2  ;;  %2813 = vrcp.f32 %v1720_v26  ;;  %v2886_v2 = vld [vmem:[%s3005_s0 + $0x28] sm:$0xff] }
 0x449   : > { %2667 = vmatmul.msk.bf16.vlgmr.msra.gmra.mxu1 %vm560_vm0, %v1752_v15 }
 0x44d   : > { %v2814_v54 = vpop.eup %2813  ;;  %v1735_v31 = vpop.xlane.xlu1 %1734 }
 0x44e   : > { %v1746_v50 = vmul.f32 %v2814_v54, %v2800_v3  ;;  %v1729_v37 = vpop.xlane.xlu2 %1728  ;;  %v2887_v54 = vld [vmem:[%s3005_s0 + $0x30] sm:$0xff] }
 0x44f   : > { %v1723_v21 = vpop.xlane.xlu0 %1722 }
 0x450   : > { %2815 = vrcp.f32 %v1723_v21 }
 0x451   : > { %2817 = vrcp.f32 %v1729_v37 }
 0x452   : > { %2819 = vrcp.f32 %v1726_v12 }
 0x456   : > { %v2816_v49 = vpop.eup %2815 }
 0x457   : > { %v1747_v40 = vmul.f32 %v2816_v49, %v2806_v13  ;;  %v2818_v38 = vpop.eup %2817  ;;  %v1732_v52 = vpop.xlane.xlu0 %1731 }
 0x458   : > { %v2820_v59 = vpop.eup %2819  ;;  %v1749_v9 = vmul.f32 %v2818_v38, %v2804_v34  ;;  %2821 = vrcp.f32 %v1732_v52 }
 0x459   : > { %v1753_v51 = vpack.c.bf16 %v1747_v40, %v1746_v50  ;;  %v1748_v22 = vmul.f32 %v2820_v59, %v2798_v60  ;;  %2823 = vrcp.f32 %v1735_v31 }
 0x45b   : > { %2668 = vmatmul.msk.bf16.gmra.mxu1 %vm560_vm0, %v1753_v51  ;;  %v1754_v17 = vpack.c.bf16 %v1749_v9, %v1748_v22  ;;  %v4616_v51 = vld [vmem:[#allocation8_spill] sm:$0xff]  ;;  %v2888_v22 = vld [vmem:[%s3005_s0 + $0x38] sm:$0xff] }
 0x45e   : > { %v2822_v32 = vpop.eup %2821 }
 0x45f   : > { %v2824_v5 = vpop.eup %2823  ;;  %v1750_v30 = vmul.f32 %v2822_v32, %v2808_v7 }
 0x460   : > { %v1751_v33 = vmul.f32 %v2824_v5, %v2802_v19 }
 0x462   : > { %v1755_v41 = vpack.c.bf16 %v1751_v33, %v1750_v30 }
 0x46b   : > { %2669 = vmatmul.msk.bf16.gmra.mxu1 %vm560_vm0, %v1754_v17 }
 0x47b   : > { %2670 = vmatmul.msk.bf16.gmra.mxu1 %vm560_vm0, %v1755_v41 }
 0x4c6   : > { %v1778_v57 = vpop.f32.mrf.mxu1 }
 0x4ce   : > { %v1780_v24 = vpop.f32.mrf.mxu1 }
 0x4cf   : > { %v1798_v47 = vpack.c.bf16 %v1780_v24, %v1778_v57 }
 0x4d1   : > { %2675 = vmatmul.msk.bf16.vlgmr.msra.gmra.mxu3 %vm560_vm0, %v1798_v47 }
 0x4d8   : > { %v1783_v44 = vpop.f32.mrf.mxu1 }
 0x4e0   : > { %v1785_v62 = vpop.f32.mrf.mxu1 }
 0x4e1   : > { %v1799_v11 = vpack.c.bf16 %v1785_v62, %v1783_v44 }
 0x4e3   : > { %2676 = vmatmul.msk.bf16.gmra.mxu3 %vm560_vm0, %v1799_v11 }
 0x4e8   : > { %v1788_v45 = vpop.f32.mrf.mxu1 }
 0x4f0   : > { %v1790_v0 = vpop.f32.mrf.mxu1 }
 0x4f1   : > { %v1800_v20 = vpack.c.bf16 %v1790_v0, %v1788_v45 }
 0x4f3   : > { %2677 = vmatmul.msk.bf16.gmra.mxu3 %vm560_vm0, %v1800_v20 }
 0x4f8   : > { %v1793_v23 = vpop.f32.mrf.mxu1 }
 0x500   : > { %v1795_v18 = vpop.f32.mrf.mxu1 }
 0x501   : > { %v1801_v8 = vpack.c.bf16 %v1795_v18, %v1793_v23 }
 0x503   : > { %2678 = vmatmul.msk.bf16.gmra.mxu3 %vm560_vm0, %v1801_v8 }
 0x554   : > { %v1831_v60 = vpop.f32.mrf.mxu3 }
 0x555   : > { %v1851_v42 = vadd.f32 %v2881_v14, %v1831_v60 }
 0x557   : > { %v4158_v3 = vadd.f32 %v2770_v61, %v1851_v42 }
 0x559   : > { %v1873_v43 = vsel %vm560_vm0, %v4158_v3, 0.0 }
 0x55a   : > { %1874 = vadd.xlane.f32.xlu2 %v1873_v43 }
 0x55c   : > { %v1833_v29 = vpop.f32.mrf.mxu3 }
 0x55d   : > { %v1852_v4 = vadd.f32 %v2882_v48, %v1833_v29 }
 0x55f   : > { %v4163_v25 = vadd.f32 %v2770_v61, %v1852_v4 }
 0x561   : > { %v1876_v58 = vsel %vm560_vm0, %v4163_v25, 0.0 }
 0x562   : > { %1877 = vadd.xlane.f32.xlu0 %v1876_v58 }
 0x566   : > { %v1836_v27 = vpop.f32.mrf.mxu3 }
 0x567   : > { %v1853_v6 = vadd.f32 %v2883_v28, %v1836_v27 }
 0x569   : > { %v4168_v19 = vadd.f32 %v2770_v61, %v1853_v6 }
 0x56b   : > { %v1879_v34 = vsel %vm560_vm0, %v4168_v19, 0.0 }
 0x56c   : > { %1880 = vadd.xlane.f32.xlu1 %v1879_v34 }
 0x56e   : > { %v1838_v46 = vpop.f32.mrf.mxu3 }
 0x56f   : > { %v1854_v13 = vadd.f32 %v2884_v39, %v1838_v46 }
 0x571   : > { %v4173_v56 = vadd.f32 %v2770_v61, %v1854_v13 }
 0x573   : > { %v1882_v55 = vsel %vm560_vm0, %v4173_v56, 0.0 }
 0x574   : > { %1883 = vadd.xlane.f32.xlu2 %v1882_v55 }
 0x576   : > { %v1841_v7 = vpop.f32.mrf.mxu3 }
 0x577   : > { %v1855_v10 = vadd.f32 %v2885_v63, %v1841_v7 }
 0x579   : > { %v4178_v36 = vadd.f32 %v2770_v61, %v1855_v10 }
 0x57b   : > { %v1885_v53 = vsel %vm560_vm0, %v4178_v36, 0.0 }
 0x57c   : > { %1886 = vadd.xlane.f32.xlu0 %v1885_v53 }
 0x57e   : > { %v1843_v35 = vpop.f32.mrf.mxu3 }
 0x57f   : > { %v1856_v1 = vadd.f32 %v2886_v2, %v1843_v35 }
 0x581   : > { %v4183_v15 = vadd.f32 %v2770_v61, %v1856_v1 }
 0x583   : > { %v1888_v26 = vsel %vm560_vm0, %v4183_v15, 0.0 }
 0x584   : > { %1889 = vadd.xlane.f32.xlu1 %v1888_v26 }
 0x586   : > { %v1846_v21 = vpop.f32.mrf.mxu3 }
 0x587   : > { %v1857_v49 = vadd.f32 %v2887_v54, %v1846_v21 }
 0x589   : > { %v4188_v50 = vadd.f32 %v2770_v61, %v1857_v49 }
 0x58b   : > { %v1891_v40 = vsel %vm560_vm0, %v4188_v50, 0.0 }
 0x58c   : > { %1892 = vadd.xlane.f32.xlu1 %v1891_v40 }
 0x58e   : > { %v1848_v59 = vpop.f32.mrf.mxu3 }
 0x58f   : > { %v1858_v52 = vadd.f32 %v2888_v22, %v1848_v59 }
 0x591   : > { %v4201_v5 = vadd.f32 %v2770_v61, %v1858_v52 }
 0x593   : > { %v1894_v16 = vsel %vm560_vm0, %v4201_v5, 0.0 }
 0x5cd   : > { %v1875_v37 = vpop.xlane.xlu2 %1874 }
 0x5ce   : > { %v1897_v12 = vmul.f32 %v1875_v37, %v4616_v51 }
 0x5d0   : > { %v4194_v38 = vsub.f32 %v4158_v3, %v1897_v12 }
 0x5d2   : > { %v1913_v9 = vmul.f32 %v4194_v38, %v4194_v38 }
 0x5d4   : > { %v1921_v17 = vsel %vm560_vm0, %v1913_v9, 0.0 }
 0x5d5   : > { %v1878_v31 = vpop.xlane.xlu0 %1877  ;;  %1922 = vadd.xlane.f32.xlu2 %v1921_v17 }
 0x5d6   : > { %v1898_v32 = vmul.f32 %v1878_v31, %v4616_v51 }
 0x5d8   : > { %v4204_v30 = vsub.f32 %v4163_v25, %v1898_v32 }
 0x5da   : > { %v1914_v33 = vmul.f32 %v4204_v30, %v4204_v30 }
 0x5dc   : > { %v1924_v41 = vsel %vm560_vm0, %v1914_v33, 0.0  ;;  %v2716_v33 = vld [vmem:[%s4486_s13] sm:$0xff] }
 0x5dd   : > { %1925 = vadd.xlane.f32.xlu0 %v1924_v41  ;;  %1895 = vadd.xlane.f32.xlu2 %v1894_v16 }
 0x5de   : > { %2106 = vmatpush.bf16.msrb.mxu2 %v2716_v33 }
 0x5df   : > { %v1881_v57 = vpop.xlane.xlu1 %1880 }
 0x5e0   : > { %v1899_v24 = vmul.f32 %v1881_v57, %v4616_v51 }
 0x5e2   : > { %v4213_v47 = vsub.f32 %v4168_v19, %v1899_v24 }
 0x5e4   : > { %v1915_v44 = vmul.f32 %v4213_v47, %v4213_v47 }
 0x5e6   : > { %v1927_v62 = vsel %vm560_vm0, %v1915_v44, 0.0  ;;  %v4264_v44 = vld [vmem:[%s4484_s11] ss:$0 sm:$0xff] }
 0x5e7   : > { %v1884_v11 = vpop.xlane.xlu2 %1883  ;;  %1928 = vadd.xlane.f32.xlu0 %v1927_v62 }
 0x5e8   : > { %v1900_v45 = vmul.f32 %v1884_v11, %v4616_v51 }
 0x5ea   : > { %v4220_v0 = vsub.f32 %v4173_v56, %v1900_v45 }
 0x5ec   : > { %v1916_v20 = vmul.f32 %v4220_v0, %v4220_v0 }
 0x5ee   : > { %v1930_v23 = vsel %vm560_vm0, %v1916_v20, 0.0 }
 0x5ef   : > { %v1887_v18 = vpop.xlane.xlu0 %1886  ;;  %1931 = vadd.xlane.f32.xlu1 %v1930_v23 }
 0x5f0   : > { %v1901_v8 = vmul.f32 %v1887_v18, %v4616_v51 }
 0x5f2   : > { %v4227_v61 = vsub.f32 %v4178_v36, %v1901_v8  ;;  %v4271_v8 = vld [vmem:[%s4485_s12] ss:$0 sm:$0xff] }
 0x5f4   : > { %v1917_v60 = vmul.f32 %v4227_v61, %v4227_v61 }
 0x5f6   : > { %v1933_v14 = vsel %vm560_vm0, %v1917_v60, 0.0 }
 0x5f7   : > { %1934 = vadd.xlane.f32.xlu2 %v1933_v14  ;;  %v1890_v42 = vpop.xlane.xlu1 %1889 }
 0x5f8   : > { %v1902_v43 = vmul.f32 %v1890_v42, %v4616_v51 }
 0x5fa   : > { %v4234_v29 = vsub.f32 %v4183_v15, %v1902_v43 }
 0x5fc   : > { %v1918_v48 = vmul.f32 %v4234_v29, %v4234_v29 }
 0x5fe   : > { %v1936_v4 = vsel %vm560_vm0, %v1918_v48, 0.0 }
 0x5ff   : > { %1937 = vadd.xlane.f32.xlu0 %v1936_v4  ;;  %v1893_v58 = vpop.xlane.xlu1 %1892 }
 0x600   : > { %v1903_v27 = vmul.f32 %v1893_v58, %v4616_v51 }
 0x602   : > { %v4241_v28 = vsub.f32 %v4188_v50, %v1903_v27 }
 0x604   : > { %v1919_v6 = vmul.f32 %v4241_v28, %v4241_v28 }
 0x606   : > { %v1939_v34 = vsel %vm560_vm0, %v1919_v6, 0.0 }
 0x607   : > { %1940 = vadd.xlane.f32.xlu1 %v1939_v34 }
 0x648   : > { %v1923_v46 = vpop.xlane.xlu2 %1922 }
 0x649   : > { %v1945_v39 = vmul.f32 %v1923_v46, %v4616_v51 }
 0x64b   : > { %v1953_v13 = vadd.f32 1e-05, %v1945_v39 }
 0x64d   : > { %2825 = vrsqrt.f32 %v1953_v13  ;;  %vm1967_vm14 = vweird.f32 %v1953_v13 }
 0x650   : > { %v1926_v55 = vpop.xlane.xlu0 %1925  ;;  %v1896_v7 = vpop.xlane.xlu2 %1895 }
 0x651   : > { %v1946_v63 = vmul.f32 %v1926_v55, %v4616_v51  ;;  %v1904_v10 = vmul.f32 %v1896_v7, %v4616_v51 }
 0x653   : > { %v2826_v53 = vpop.eup %2825  ;;  %v1954_v35 = vadd.f32 1e-05, %v1946_v63  ;;  %v4250_v2 = vsub.f32 %v4201_v5, %v1904_v10 }
 0x654   : > { %v1962_v1 = vmul.f32 %v2826_v53, %v1953_v13  ;;  %vm1968_vm13 = vweird.f32 %v2826_v53 }
 0x655   : > { %2827 = vrsqrt.f32 %v1954_v35  ;;  %v1920_v26 = vmul.f32 %v4250_v2, %v4250_v2  ;;  %vm1969_vm15 = vmor %vm1967_vm14, %vm1968_vm13  ;;  %vm1977_vm2 = vweird.f32 %v1954_v35 }
 0x656   : > { %v1963_v21 = vmul.f32 %v2826_v53, %v1962_v1 }
 0x657   : > { %v1942_v54 = vsel %vm560_vm0, %v1920_v26, 0.0 }
 0x658   : > { %v1964_v49 = vmul.f32 0.5, %v1963_v21  ;;  %1943 = vadd.xlane.f32.xlu2 %v1942_v54 }
 0x65a   : > { %v1965_v40 = vsub.f32 1.5, %v1964_v49  ;;  %v1929_v37 = vpop.xlane.xlu0 %1928 }
 0x65b   : > { %v2828_v12 = vpop.eup %2827  ;;  %v1947_v59 = vmul.f32 %v1929_v37, %v4616_v51 }
 0x65c   : > { %v1966_v9 = vmul.f32 %v2826_v53, %v1965_v40  ;;  %v1972_v22 = vmul.f32 %v2828_v12, %v1954_v35  ;;  %vm1978_vm1 = vweird.f32 %v2828_v12 }
 0x65d   : > { %v1955_v52 = vadd.f32 1e-05, %v1947_v59  ;;  %vm1979_vm3 = vmor %vm1977_vm2, %vm1978_vm1 }
 0x65e   : > { %v1973_v17 = vmul.f32 %v2828_v12, %v1972_v22  ;;  %v1970_v31 = vsel %vm1969_vm15, %v2826_v53, %v1966_v9 }
 0x65f   : > { %2829 = vrsqrt.f32 %v1955_v52  ;;  %v2041_v57 = vmul.f32 %v1970_v31, %v4194_v38  ;;  %vm1987_vm5 = vweird.f32 %v1955_v52 }
 0x660   : > { %v1974_v32 = vmul.f32 0.5, %v1973_v17 }
 0x661   : > { %v2052_v38 = vmul.f32 %v4264_v44, %v2041_v57 }
 0x662   : > { %v1975_v41 = vsub.f32 1.5, %v1974_v32  ;;  %v1932_v16 = vpop.xlane.xlu1 %1931 }
 0x663   : > { %v1948_v24 = vmul.f32 %v1932_v16, %v4616_v51  ;;  %v2063_v4 = vadd.f32 %v4271_v8, %v2052_v38 }
 0x664   : > { %v1976_v62 = vmul.f32 %v2828_v12, %v1975_v41 }
 0x665   : > { %v2830_v11 = vpop.eup %2829  ;;  %v1956_v45 = vadd.f32 1e-05, %v1948_v24 }
 0x666   : > { %v1980_v20 = vsel %vm1979_vm3, %v2828_v12, %v1976_v62  ;;  %v1982_v23 = vmul.f32 %v2830_v11, %v1955_v52  ;;  %vm1988_vm4 = vweird.f32 %v2830_v11 }
 0x667   : > { %v2042_v18 = vmul.f32 %v1980_v20, %v4204_v30  ;;  %2831 = vrsqrt.f32 %v1956_v45  ;;  %vm1989_vm6 = vmor %vm1987_vm5, %vm1988_vm4  ;;  %vm1997_vm8 = vweird.f32 %v1956_v45 }
 0x668   : > { %v1983_v60 = vmul.f32 %v2830_v11, %v1982_v23 }
 0x669   : > { %v2053_v14 = vmul.f32 %v4264_v44, %v2042_v18 }
 0x66a   : > { %v1984_v42 = vmul.f32 0.5, %v1983_v60  ;;  %v1935_v43 = vpop.xlane.xlu2 %1934 }
 0x66b   : > { %v1949_v48 = vmul.f32 %v1935_v43, %v4616_v51  ;;  %v2064_v58 = vadd.f32 %v4271_v8, %v2053_v14 }
 0x66c   : > { %v1985_v30 = vsub.f32 1.5, %v1984_v42 }
 0x66d   : > { %v2832_v27 = vpop.eup %2831  ;;  %v1957_v6 = vadd.f32 1e-05, %v1949_v48  ;;  %v2071_v34 = vpack.c.bf16 %v2064_v58, %v2063_v4 }
 0x66e   : > { %v1986_v46 = vmul.f32 %v2830_v11, %v1985_v30  ;;  %v1992_v39 = vmul.f32 %v2832_v27, %v1956_v45  ;;  %vm1998_vm7 = vweird.f32 %v2832_v27 }
 0x66f   : > { %2833 = vrsqrt.f32 %v1957_v6  ;;  %2683 = vmatmul.msk.bf16.vlgmr.msrb.gmra.mxu2 %vm560_vm0, %v2071_v34  ;;  %vm1999_vm9 = vmor %vm1997_vm8, %vm1998_vm7  ;;  %vm2007_vm11 = vweird.f32 %v1957_v6 }
 0x670   : > { %v1993_v13 = vmul.f32 %v2832_v27, %v1992_v39  ;;  %v1990_v55 = vsel %vm1989_vm6, %v2830_v11, %v1986_v46 }
 0x671   : > { %v2043_v1 = vmul.f32 %v1990_v55, %v4213_v47 }
 0x672   : > { %v1994_v7 = vmul.f32 0.5, %v1993_v13  ;;  %v1938_v63 = vpop.xlane.xlu0 %1937 }
 0x673   : > { %v1950_v10 = vmul.f32 %v1938_v63, %v4616_v51  ;;  %v2054_v12 = vmul.f32 %v4264_v44, %v2043_v1 }
 0x674   : > { %v1995_v53 = vsub.f32 1.5, %v1994_v7 }
 0x675   : > { %v2834_v35 = vpop.eup %2833  ;;  %v1958_v26 = vadd.f32 1e-05, %v1950_v10  ;;  %v2065_v17 = vadd.f32 %v4271_v8, %v2054_v12 }
 0x676   : > { %v1996_v21 = vmul.f32 %v2832_v27, %v1995_v53  ;;  %v2002_v54 = vmul.f32 %v2834_v35, %v1957_v6  ;;  %vm2008_vm10 = vweird.f32 %v2834_v35 }
 0x677   : > { %2835 = vrsqrt.f32 %v1958_v26  ;;  %vm2009_vm13 = vmor %vm2007_vm11, %vm2008_vm10  ;;  %vm2017_vm15 = vweird.f32 %v1958_v26 }
 0x678   : > { %v2000_v49 = vsel %vm1999_vm9, %v2832_v27, %v1996_v21  ;;  %v2003_v40 = vmul.f32 %v2834_v35, %v2002_v54 }
 0x679   : > { %v2044_v37 = vmul.f32 %v2000_v49, %v4220_v0 }
 0x67a   : > { %v2004_v59 = vmul.f32 0.5, %v2003_v40  ;;  %v1941_v14 = vpop.xlane.xlu1 %1940 }
 0x67b   : > { %v2055_v9 = vmul.f32 %v4264_v44, %v2044_v37 }
 0x67c   : > { %v2005_v22 = vsub.f32 1.5, %v2004_v59 }
 0x67d   : > { %v2836_v52 = vpop.eup %2835  ;;  %v2066_v47 = vadd.f32 %v4271_v8, %v2055_v9 }
 0x67e   : > { %v2006_v31 = vmul.f32 %v2834_v35, %v2005_v22  ;;  %v2012_v32 = vmul.f32 %v2836_v52, %v1958_v26  ;;  %vm2018_vm14 = vweird.f32 %v2836_v52 }
 0x67f   : > { %v2072_v33 = vpack.c.bf16 %v2066_v47, %v2065_v17  ;;  %vm2019_vm1 = vmor %vm2017_vm15, %vm2018_vm14 }
 0x680   : > { %v2013_v41 = vmul.f32 %v2836_v52, %v2012_v32  ;;  %v2010_v0 = vsel %vm2009_vm13, %v2834_v35, %v2006_v31 }
 0x681   : > { %2684 = vmatmul.msk.bf16.gmra.mxu2 %vm560_vm0, %v2072_v33  ;;  %v2045_v24 = vmul.f32 %v2010_v0, %v4227_v61  ;;  %v1951_v61 = vmul.f32 %v1941_v14, %v4616_v51 }
 0x682   : > { %v2014_v16 = vmul.f32 0.5, %v2013_v41 }
 0x683   : > { %v2056_v20 = vmul.f32 %v4264_v44, %v2045_v24  ;;  %v1959_v42 = vadd.f32 1e-05, %v1951_v61 }
 0x684   : > { %v2015_v57 = vsub.f32 1.5, %v2014_v16 }
 0x685   : > { %v2067_v18 = vadd.f32 %v4271_v8, %v2056_v20  ;;  %2837 = vrsqrt.f32 %v1959_v42  ;;  %vm2027_vm3 = vweird.f32 %v1959_v42 }
 0x686   : > { %v2016_v62 = vmul.f32 %v2836_v52, %v2015_v57 }
 0x688   : > { %v2020_v11 = vsel %vm2019_vm1, %v2836_v52, %v2016_v62 }
 0x689   : > { %v2046_v45 = vmul.f32 %v2020_v11, %v4234_v29 }
 0x68b   : > { %v2057_v23 = vmul.f32 %v4264_v44, %v2046_v45  ;;  %v2838_v43 = vpop.eup %2837 }
 0x68c   : > { %v2022_v48 = vmul.f32 %v2838_v43, %v1959_v42  ;;  %vm2028_vm2 = vweird.f32 %v2838_v43 }
 0x68d   : > { %v2068_v38 = vadd.f32 %v4271_v8, %v2057_v23  ;;  %vm2029_vm4 = vmor %vm2027_vm3, %vm2028_vm2 }
 0x68e   : > { %v2023_v4 = vmul.f32 %v2838_v43, %v2022_v48 }
 0x68f   : > { %v2073_v60 = vpack.c.bf16 %v2068_v38, %v2067_v18 }
 0x690   : > { %v2024_v27 = vmul.f32 0.5, %v2023_v4 }
 0x691   : > { %2685 = vmatmul.msk.bf16.gmra.mxu2 %vm560_vm0, %v2073_v60 }
 0x692   : > { %v2025_v6 = vsub.f32 1.5, %v2024_v27 }
 0x694   : > { %v2026_v46 = vmul.f32 %v2838_v43, %v2025_v6 }
 0x696   : > { %v2030_v55 = vsel %vm2029_vm4, %v2838_v43, %v2026_v46 }
 0x697   : > { %v2047_v10 = vmul.f32 %v2030_v55, %v4241_v28  ;;  %v4305_v28 = vld [vmem:[%s4487_s14] ss:$0 sm:$0xff] }
 0x699   : > { %v2058_v1 = vmul.f32 %v4264_v44, %v2047_v10 }
 0x69b   : > { %v2069_v21 = vadd.f32 %v4271_v8, %v2058_v1 }
 0x6cb   : > { %v1944_v29 = vpop.xlane.xlu2 %1943 }
 0x6cc   : > { %v1952_v58 = vmul.f32 %v1944_v29, %v4616_v51 }
 0x6ce   : > { %v1960_v30 = vadd.f32 1e-05, %v1952_v58 }
 0x6d0   : > { %2839 = vrsqrt.f32 %v1960_v30  ;;  %vm2037_vm6 = vweird.f32 %v1960_v30 }
 0x6d6   : > { %v2840_v34 = vpop.eup %2839 }
 0x6d7   : > { %v2032_v39 = vmul.f32 %v2840_v34, %v1960_v30  ;;  %vm2038_vm5 = vweird.f32 %v2840_v34 }
 0x6d8   : > { %vm2039_vm7 = vmor %vm2037_vm6, %vm2038_vm5 }
 0x6d9   : > { %v2033_v13 = vmul.f32 %v2840_v34, %v2032_v39 }
 0x6db   : > { %v2034_v7 = vmul.f32 0.5, %v2033_v13 }
 0x6dd   : > { %v2035_v63 = vsub.f32 1.5, %v2034_v7 }
 0x6df   : > { %v2036_v53 = vmul.f32 %v2840_v34, %v2035_v63 }
 0x6e1   : > { %v2040_v51 = vsel %vm2039_vm7, %v2840_v34, %v2036_v53 }
 0x6e2   : > { %v2048_v35 = vmul.f32 %v2040_v51, %v4250_v2 }
 0x6e4   : > { %v2059_v26 = vmul.f32 %v4264_v44, %v2048_v35 }
 0x6e6   : > { %v2070_v54 = vadd.f32 %v4271_v8, %v2059_v26 }
 0x6e8   : > { %v2074_v49 = vpack.c.bf16 %v2070_v54, %v2069_v21 }
 0x6ea   : > { %2686 = vmatmul.msk.bf16.gmra.mxu2 %vm560_vm0, %v2074_v49 }
 0x6f2   : > { %v2108_v40 = vpop.f32.mrf.mxu2 }
 0x6f3   : > { %v4308_v37 = vadd.f32 %v4305_v28, %v2108_v40 }
 0x6f5   : > { %v4311_v2 = vmul.f32 0.70710677, %v4308_v37 }
 0x6f7   : > { %v2144_v44 = vand.u32 2147483647, %v4311_v2 }
 0x6f9   : > { %v2152_v12 = vmul.f32 0.3275911, %v2144_v44  ;;  %v2360_v10 = vsub.f32 0.0, %v2144_v44 }
 0x6fa   : > { %v2110_v52 = vpop.f32.mrf.mxu2 }
 0x6fb   : > { %v2160_v59 = vadd.f32 1.0, %v2152_v12  ;;  %v4315_v17 = vadd.f32 %v4305_v28, %v2110_v52  ;;  %v2368_v49 = vmul.f32 %v2360_v10, %v2144_v44 }
 0x6fd   : > { %2841 = vrcp.f32 %v2160_v59  ;;  %v4318_v31 = vmul.f32 0.70710677, %v4315_v17  ;;  %v2179_v0 = vand.u32 2147483648, %v2160_v59  ;;  %vm2173_vm9 = vweird.f32 %v2160_v59 }
 0x6fe   : > { %v2177_v16 = vand.u32 2147483647, %v2160_v59 }
 0x6ff   : > { %v2145_v32 = vand.u32 2147483647, %v4318_v31  ;;  %v2180_v62 = vor.u32 1.1754944e-38, %v2179_v0 }
 0x700   : > { %vm2178_vm11 = vcmp.eq.f32.partialorder %v2177_v16, 8.507059e+37 }
 0x701   : > { %v2153_v41 = vmul.f32 0.3275911, %v2145_v32  ;;  %v2361_v55 = vsub.f32 0.0, %v2145_v32 }
 0x703   : > { %v2842_v8 = vpop.eup %2841  ;;  %v2161_v57 = vadd.f32 1.0, %v2153_v41  ;;  %v2369_v1 = vmul.f32 %v2361_v55, %v2145_v32 }
 0x704   : > { %v2169_v9 = vmul.f32 %v2842_v8, %v2160_v59  ;;  %vm2174_vm8 = vweird.f32 %v2842_v8  ;;  %v2113_v4 = vpop.f32.mrf.mxu2 }
 0x705   : > { %vm2175_vm10 = vmor %vm2173_vm9, %vm2174_vm8  ;;  %2843 = vrcp.f32 %v2161_v57  ;;  %v2194_v60 = vand.u32 2147483648, %v2161_v57  ;;  %v2192_v61 = vand.u32 2147483647, %v2161_v57  ;;  %vm2188_vm14 = vweird.f32 %v2161_v57 }
 0x706   : > { %v2170_v22 = vsub.f32 1.0, %v2169_v9  ;;  %v4326_v58 = vadd.f32 %v4305_v28, %v2113_v4  ;;  %vm2409_vm9 = vcmp.lt.f32.partialorder %v4318_v31, 0.0 }
 0x707   : > { %v2195_v48 = vor.u32 1.1754944e-38, %v2194_v60  ;;  %vm2193_vm1 = vcmp.eq.f32.partialorder %v2192_v61, 8.507059e+37 }
 0x708   : > { %v2171_v47 = vmul.f32 %v2842_v8, %v2170_v22  ;;  %v4329_v6 = vmul.f32 0.70710677, %v4326_v58 }
 0x70a   : > { %v2172_v33 = vadd.f32 %v2842_v8, %v2171_v47  ;;  %v4332_v39 = vand.u32 2147483647, %v4329_v6  ;;  %v2376_v47 = vmul.f32 1.442695, %v2368_v49 }
 0x70b   : > { %v2844_v45 = vpop.eup %2843 }
 0x70c   : > { %v2176_v24 = vsel %vm2175_vm10, %v2842_v8, %v2172_v33  ;;  %v2184_v23 = vmul.f32 %v2844_v45, %v2161_v57  ;;  %vm2189_vm13 = vweird.f32 %v2844_v45  ;;  %v2154_v7 = vmul.f32 0.3275911, %v4332_v39  ;;  %v2115_v26 = vpop.f32.mrf.mxu2 }
 0x70d   : > { %v4321_v11 = vsel %vm2178_vm11, %v2180_v62, %v2176_v24  ;;  %vm2190_vm15 = vmor %vm2188_vm14, %vm2189_vm13  ;;  %v4337_v54 = vadd.f32 %v4305_v28, %v2115_v26  ;;  %v2378_v8 = vmul.f32 1.442695, %v2369_v1  ;;  %vm2408_vm11 = vcmp.lt.f32.partialorder %v4311_v2, 0.0 }
 0x70e   : > { %v2288_v20 = vmul.f32 1.0614054, %v4321_v11  ;;  %v2185_v18 = vsub.f32 1.0, %v2184_v23  ;;  %v2162_v51 = vadd.f32 1.0, %v2154_v7 }
 0x70f   : > { %v4340_v12 = vmul.f32 0.70710677, %v4337_v54 }
 0x710   : > { %v2296_v38 = vadd.f32 -1.4531521, %v2288_v20  ;;  %v2186_v14 = vmul.f32 %v2844_v45, %v2185_v18  ;;  %2845 = vrcp.f32 %v2162_v51  ;;  %v2207_v62 = vand.u32 2147483647, %v2162_v51 }
 0x711   : > { %v4344_v22 = vand.u32 2147483647, %v4340_v12  ;;  %2847 = vpow2.f32 %v2378_v8  ;;  %vm2203_vm3 = vweird.f32 %v2162_v51 }
 0x712   : > { %v2187_v42 = vadd.f32 %v2844_v45, %v2186_v14  ;;  %v2304_v43 = vmul.f32 %v2296_v38, %v4321_v11  ;;  %2849 = vpow2.f32 %v2376_v47  ;;  %vm2208_vm5 = vcmp.eq.f32.partialorder %v2207_v62, 8.507059e+37  ;;  %v2720_v62 = vld [vmem:[%s4488_s15 + $0x18] sm:$0xff] }
 0x713   : > { %v2155_v41 = vmul.f32 0.3275911, %v4344_v22  ;;  %2500 = vmatpush.bf16.msra.mxu0 %v2720_v62 }
 0x714   : > { %v2191_v29 = vsel %vm2190_vm15, %v2844_v45, %v2187_v42  ;;  %v2312_v34 = vadd.f32 1.4214138, %v2304_v43  ;;  %v2118_v0 = vpop.f32.mrf.mxu2  ;;  %v2209_v45 = vand.u32 2147483648, %v2162_v51 }
 0x715   : > { %v2196_v30 = vsel %vm2193_vm1, %v2195_v48, %v2191_v29  ;;  %v2163_v57 = vadd.f32 1.0, %v2155_v41  ;;  %v4348_v24 = vadd.f32 %v4305_v28, %v2118_v0 }
 0x716   : > { %v2289_v27 = vmul.f32 1.0614054, %v2196_v30  ;;  %v2320_v63 = vmul.f32 %v2312_v34, %v4321_v11  ;;  %v2846_v52 = vpop.eup %2845  ;;  %v2210_v61 = vor.u32 1.1754944e-38, %v2209_v45 }
 0x717   : > { %v2199_v33 = vmul.f32 %v2846_v52, %v2162_v51  ;;  %vm2204_vm2 = vweird.f32 %v2846_v52  ;;  %2851 = vrcp.f32 %v2163_v57  ;;  %v4352_v60 = vmul.f32 0.70710677, %v4348_v24  ;;  %v2848_v14 = vpop.eup %2847 }
 0x718   : > { %v2297_v46 = vadd.f32 -1.4531521, %v2289_v27  ;;  %v2328_v21 = vadd.f32 -0.28449672, %v2320_v63  ;;  %vm2205_vm4 = vmor %vm2203_vm3, %vm2204_vm2  ;;  %v2850_v4 = vpop.eup %2849  ;;  %v2224_v49 = vand.u32 2147483648, %v2163_v57  ;;  %vm2218_vm7 = vweird.f32 %v2163_v57 }
 0x719   : > { %v2200_v16 = vsub.f32 1.0, %v2199_v33  ;;  %v4355_v48 = vand.u32 2147483647, %v4352_v60 }
 0x71a   : > { %v2305_v13 = vmul.f32 %v2297_v46, %v2196_v30  ;;  %v2336_v9 = vmul.f32 %v2328_v21, %v4321_v11  ;;  %v2225_v41 = vor.u32 1.1754944e-38, %v2224_v49 }
 0x71b   : > { %v2201_v23 = vmul.f32 %v2846_v52, %v2200_v16  ;;  %v2363_v16 = vsub.f32 0.0, %v4344_v22 }
 0x71c   : > { %v2313_v53 = vadd.f32 1.4214138, %v2305_v13  ;;  %v2344_v44 = vadd.f32 0.2548296, %v2336_v9  ;;  %v2156_v13 = vmul.f32 0.3275911, %v4355_v48 }
 0x71d   : > { %v2202_v38 = vadd.f32 %v2846_v52, %v2201_v23  ;;  %v2852_v27 = vpop.eup %2851 }
 0x71e   : > { %v2321_v35 = vmul.f32 %v2313_v53, %v2196_v30  ;;  %v2352_v18 = vmul.f32 %v2344_v44, %v4321_v11  ;;  %v2120_v11 = vpop.f32.mrf.mxu2  ;;  %v2214_v55 = vmul.f32 %v2852_v27, %v2163_v57  ;;  %v4365_v53 = vadd.f32 1.0, %v2156_v13 }
 0x71f   : > { %v2206_v43 = vsel %vm2205_vm4, %v2846_v52, %v2202_v38  ;;  %v4363_v7 = vadd.f32 %v4305_v28, %v2120_v11  ;;  %vm2219_vm6 = vweird.f32 %v2852_v27 }
 0x720   : > { %v2329_v40 = vadd.f32 -0.28449672, %v2321_v35  ;;  %v4357_v29 = vsel %vm2208_vm5, %v2210_v61, %v2206_v43  ;;  %v2392_v34 = vmul.f32 %v2850_v4, %v2352_v18  ;;  %v2215_v35 = vsub.f32 1.0, %v2214_v55  ;;  %vm2220_vm8 = vmor %vm2218_vm7, %vm2219_vm6 }
 0x721   : > { %v2290_v46 = vmul.f32 1.0614054, %v4357_v29  ;;  %v4369_v1 = vmul.f32 0.70710677, %v4363_v7  ;;  %2853 = vrcp.f32 %v4365_v53  ;;  %v2371_v4 = vmul.f32 %v2363_v16, %v4344_v22 }
 0x722   : > { %v2337_v59 = vmul.f32 %v2329_v40, %v2196_v30  ;;  %v2400_v26 = vsub.f32 1.0, %v2392_v34  ;;  %v2216_v40 = vmul.f32 %v2852_v27, %v2215_v35  ;;  %v2239_v2 = vand.u32 2147483648, %v4365_v53  ;;  %v2719_v34 = vld [vmem:[%s4488_s15 + $0x10] sm:$0xff] }
 0x723   : > { %v2298_v10 = vadd.f32 -1.4531521, %v2290_v46  ;;  %v4374_v52 = vand.u32 2147483647, %v4369_v1  ;;  %2501 = vmatpush.bf16.msra.mxu0 %v2719_v34  ;;  %v2382_v35 = vmul.f32 1.442695, %v2371_v4  ;;  %vm2233_vm14 = vweird.f32 %v4365_v53 }
 0x724   : > { %v2345_v32 = vadd.f32 0.2548296, %v2337_v59  ;;  %v2222_v59 = vand.u32 2147483647, %v2163_v57  ;;  %vm2410_vm6 = vcmp.lt.f32.partialorder %v4329_v6, 0.0  ;;  %vm2411_vm7 = vcmp.lt.f32.partialorder %v4340_v12, 0.0 }
 0x725   : > { %v2306_v21 = vmul.f32 %v2298_v10, %v4357_v29  ;;  %v2157_v0 = vmul.f32 0.3275911, %v4374_v52  ;;  %v2131_v6 = vmul.f32 0.5, %v4337_v54 }
 0x726   : > { %v2353_v20 = vmul.f32 %v2345_v32, %v2196_v30  ;;  %v2362_v30 = vsub.f32 0.0, %v4332_v39  ;;  %v2416_v32 = vsub.f32 0.0, %v2400_v26  ;;  %vm2223_vm10 = vcmp.eq.f32.partialorder %v2222_v59, 8.507059e+37 }
 0x727   : > { %v2314_v9 = vadd.f32 1.4214138, %v2306_v21  ;;  %v2854_v45 = vpop.eup %2853  ;;  %v4385_v18 = vadd.f32 1.0, %v2157_v0  ;;  %v2718_v21 = vld [vmem:[%s4488_s15 + $0x8] sm:$0xff] }
 0x728   : > { %v2393_v42 = vmul.f32 %v2848_v14, %v2353_v20  ;;  %v2370_v51 = vmul.f32 %v2362_v30, %v4332_v39  ;;  %v2217_v39 = vadd.f32 %v2852_v27, %v2216_v40  ;;  %v2229_v38 = vmul.f32 %v2854_v45, %v4365_v53  ;;  %2502 = vmatpush.bf16.msra.mxu0 %v2718_v21 }
 0x729   : > { %v2322_v33 = vmul.f32 %v2314_v9, %v4357_v29  ;;  %v2424_v14 = vsel %vm2408_vm11, %v2416_v32, %v2400_v26  ;;  %vm2234_vm13 = vweird.f32 %v2854_v45  ;;  %v2128_v40 = vmul.f32 0.5, %v4308_v37  ;;  %v2717_v37 = vld [vmem:[%s4488_s15] sm:$0xff] }
 0x72a   : > { %v2401_v63 = vsub.f32 1.0, %v2393_v42  ;;  %v2380_v47 = vmul.f32 1.442695, %v2370_v51  ;;  %v2221_v44 = vsel %vm2220_vm8, %v2852_v27, %v2217_v39  ;;  %v2230_v30 = vsub.f32 1.0, %v2229_v38  ;;  %vm2235_vm15 = vmor %vm2233_vm14, %vm2234_vm13 }
 0x72b   : > { %v2330_v57 = vadd.f32 -0.28449672, %v2322_v33  ;;  %v4383_v23 = vsel %vm2223_vm10, %v2225_v41, %v2221_v44  ;;  %v2237_v27 = vand.u32 2147483647, %v4365_v53  ;;  %v2432_v55 = vadd.f32 1.0, %v2424_v14 }
 0x72c   : > { %v2417_v8 = vsub.f32 0.0, %v2401_v63  ;;  %2855 = vpow2.f32 %v2380_v47  ;;  %v2291_v31 = vmul.f32 1.0614054, %v4383_v23  ;;  %v2231_v13 = vmul.f32 %v2854_v45, %v2230_v30  ;;  %2503 = vmatpush.bf16.msra.mxu0 %v2717_v37 }
 0x72d   : > { %v2338_v61 = vmul.f32 %v2330_v57, %v4357_v29  ;;  %2857 = vrcp.f32 %v4385_v18  ;;  %vm2238_vm1 = vcmp.eq.f32.partialorder %v2237_v27, 8.507059e+37  ;;  %v2440_v39 = vmul.f32 %v2432_v55, %v2128_v40 }
 0x72e   : > { %v2425_v20 = vsel %vm2409_vm9, %v2417_v8, %v2401_v63  ;;  %v2299_v43 = vadd.f32 -1.4531521, %v2291_v31  ;;  %v2129_v63 = vmul.f32 0.5, %v4315_v17  ;;  %v2232_v26 = vadd.f32 %v2854_v45, %v2231_v13 }
 0x72f   : > { %v2433_v42 = vadd.f32 1.0, %v2425_v20  ;;  %v2346_v11 = vadd.f32 0.2548296, %v2338_v61  ;;  %v2240_v17 = vor.u32 1.1754944e-38, %v2239_v2  ;;  %v2364_v53 = vsub.f32 0.0, %v4355_v48 }
 0x730   : > { %v2307_v46 = vmul.f32 %v2299_v43, %v4383_v23  ;;  %v2236_v9 = vsel %vm2235_vm15, %v2854_v45, %v2232_v26  ;;  %2859 = vpow2.f32 %v2382_v35  ;;  %v2252_v16 = vand.u32 2147483647, %v4385_v18 }
 0x731   : > { %v2354_v10 = vmul.f32 %v2346_v11, %v4357_v29  ;;  %v2441_v59 = vmul.f32 %v2433_v42, %v2129_v63  ;;  %v2241_v32 = vsel %vm2238_vm1, %v2240_v17, %v2236_v9  ;;  %v2254_v62 = vand.u32 2147483648, %v4385_v18 }
 0x732   : > { %v2856_v22 = vpop.eup %2855  ;;  %v2315_v51 = vadd.f32 1.4214138, %v2307_v46  ;;  %v2292_v41 = vmul.f32 1.0614054, %v2241_v32  ;;  %v2372_v38 = vmul.f32 %v2364_v53, %v4355_v48  ;;  %vm2248_vm3 = vweird.f32 %v4385_v18 }
 0x733   : > { %v2858_v49 = vpop.eup %2857  ;;  %v2394_v8 = vmul.f32 %v2856_v22, %v2354_v10  ;;  %v2448_v44 = vpack.c.bf16 %v2441_v59, %v2440_v39  ;;  %vm2253_vm5 = vcmp.eq.f32.partialorder %v2252_v16, 8.507059e+37  ;;  %v2255_v43 = vor.u32 1.1754944e-38, %v2254_v62 }
 0x734   : > { %v2323_v29 = vmul.f32 %v2315_v51, %v4383_v23  ;;  %v2244_v47 = vmul.f32 %v2858_v49, %v4385_v18  ;;  %vm2249_vm2 = vweird.f32 %v2858_v49  ;;  %v2300_v57 = vadd.f32 -1.4531521, %v2292_v41 }
 0x735   : > { %v2402_v45 = vsub.f32 1.0, %v2394_v8  ;;  %vm2250_vm4 = vmor %vm2248_vm3, %vm2249_vm2  ;;  %2703 = vmatmul.msk.bf16.vlgmr.msra.gmra.mxu0 %vm1442_vm12, %v2448_v44  ;;  %v2384_v34 = vmul.f32 1.442695, %v2372_v38  ;;  %v2365_v48 = vsub.f32 0.0, %v4374_v52  ;;  %v2130_v8 = vmul.f32 0.5, %v4326_v58 }
 0x736   : > { %v2331_v33 = vadd.f32 -0.28449672, %v2323_v29  ;;  %v2245_v0 = vsub.f32 1.0, %v2244_v47  ;;  %v2308_v61 = vmul.f32 %v2300_v57, %v2241_v32  ;;  %v2860_v4 = vpop.eup %2859  ;;  %vm2412_vm8 = vcmp.lt.f32.partialorder %v4352_v60, 0.0 }
 0x737   : > { %v2418_v30 = vsub.f32 0.0, %v2402_v45  ;;  %2861 = vpow2.f32 %v2384_v34  ;;  %vm2413_vm9 = vcmp.lt.f32.partialorder %v4369_v1, 0.0 }
 0x738   : > { %v2339_v20 = vmul.f32 %v2331_v33, %v4383_v23  ;;  %v2246_v31 = vmul.f32 %v2858_v49, %v2245_v0  ;;  %v2316_v27 = vadd.f32 1.4214138, %v2308_v61 }
 0x739   : > { %v2426_v18 = vsel %vm2410_vm6, %v2418_v30, %v2402_v45  ;;  %v2133_v30 = vmul.f32 0.5, %v4363_v7 }
 0x73a   : > { %v2347_v14 = vadd.f32 0.2548296, %v2339_v20  ;;  %v2247_v42 = vadd.f32 %v2858_v49, %v2246_v31  ;;  %v2324_v55 = vmul.f32 %v2316_v27, %v2241_v32 }
 0x73c   : > { %v2355_v11 = vmul.f32 %v2347_v14, %v4383_v23  ;;  %v2251_v2 = vsel %vm2250_vm4, %v2858_v49, %v2247_v42  ;;  %v2332_v22 = vadd.f32 -0.28449672, %v2324_v55  ;;  %v2373_v23 = vmul.f32 %v2365_v48, %v4374_v52 }
 0x73d   : > { %v2256_v46 = vsel %vm2253_vm5, %v2255_v43, %v2251_v2  ;;  %v2434_v49 = vadd.f32 1.0, %v2426_v18  ;;  %v2862_v53 = vpop.eup %2861 }
 0x73e   : > { %v2395_v13 = vmul.f32 %v2860_v4, %v2355_v11  ;;  %v2293_v63 = vmul.f32 1.0614054, %v2256_v46  ;;  %v2340_v26 = vmul.f32 %v2332_v22, %v2241_v32  ;;  %v2386_v9 = vmul.f32 1.442695, %v2373_v23 }
 0x73f   : > { %v2442_v33 = vmul.f32 %v2434_v49, %v2130_v8  ;;  %v2132_v4 = vmul.f32 0.5, %v4348_v24 }
 0x740   : > { %v2403_v10 = vsub.f32 1.0, %v2395_v13  ;;  %v2301_v51 = vadd.f32 -1.4531521, %v2293_v63  ;;  %v2348_v59 = vadd.f32 0.2548296, %v2340_v26  ;;  %2863 = vpow2.f32 %v2386_v9 }
 0x742   : > { %v2419_v35 = vsub.f32 0.0, %v2403_v10  ;;  %v2309_v21 = vmul.f32 %v2301_v51, %v2256_v46  ;;  %v2356_v47 = vmul.f32 %v2348_v59, %v2241_v32 }
 0x744   : > { %v2427_v40 = vsel %vm2411_vm7, %v2419_v35, %v2403_v10  ;;  %v2317_v17 = vadd.f32 1.4214138, %v2309_v21  ;;  %v2396_v41 = vmul.f32 %v2862_v53, %v2356_v47 }
 0x745   : > { %v2435_v29 = vadd.f32 1.0, %v2427_v40 }
 0x746   : > { %v2325_v39 = vmul.f32 %v2317_v17, %v2256_v46  ;;  %v2404_v44 = vsub.f32 1.0, %v2396_v41  ;;  %v2864_v45 = vpop.eup %2863 }
 0x747   : > { %v2443_v52 = vmul.f32 %v2435_v29, %v2131_v6 }
 0x748   : > { %v2333_v0 = vadd.f32 -0.28449672, %v2325_v39  ;;  %v2420_v62 = vsub.f32 0.0, %v2404_v44 }
 0x749   : > { %v2449_v37 = vpack.c.bf16 %v2443_v52, %v2442_v33 }
 0x74a   : > { %v2341_v12 = vmul.f32 %v2333_v0, %v2256_v46  ;;  %v2428_v57 = vsel %vm2412_vm8, %v2420_v62, %v2404_v44 }
 0x74b   : > { %2704 = vmatmul.msk.bf16.gmra.mxu0 %vm1442_vm12, %v2449_v37  ;;  %v2436_v61 = vadd.f32 1.0, %v2428_v57 }
 0x74c   : > { %v2349_v16 = vadd.f32 0.2548296, %v2341_v12 }
 0x74d   : > { %v2444_v27 = vmul.f32 %v2436_v61, %v2132_v4 }
 0x74e   : > { %v2357_v58 = vmul.f32 %v2349_v16, %v2256_v46 }
 0x750   : > { %v2397_v54 = vmul.f32 %v2864_v45, %v2357_v58 }
 0x752   : > { %v2405_v31 = vsub.f32 1.0, %v2397_v54 }
 0x754   : > { %v2421_v14 = vsub.f32 0.0, %v2405_v31 }
 0x756   : > { %v2429_v43 = vsel %vm2413_vm9, %v2421_v14, %v2405_v31 }
 0x757   : > { %v2437_v60 = vadd.f32 1.0, %v2429_v43 }
 0x759   : > { %v2445_v2 = vmul.f32 %v2437_v60, %v2133_v30 }
 0x75b   : > { %v2450_v46 = vpack.c.bf16 %v2445_v2, %v2444_v27 }
 0x75d   : > { %2705 = vmatmul.msk.bf16.gmra.mxu0 %vm1442_vm12, %v2450_v46 }
 0x76d   : > { %v2123_v20 = vpop.f32.mrf.mxu2 }
 0x76e   : > { %v4428_v32 = vadd.f32 %v4305_v28, %v2123_v20 }
 0x770   : > { %v4431_v38 = vmul.f32 0.70710677, %v4428_v32 }
 0x772   : > { %v2150_v42 = vand.u32 2147483647, %v4431_v38  ;;  %vm2414_vm4 = vcmp.lt.f32.partialorder %v4431_v38, 0.0  ;;  %v2774_v38 = vld [vmem:[%s4489_s16] ss:$0 sm:$0xff] }
 0x774   : > { %v2158_v11 = vmul.f32 0.3275911, %v2150_v42  ;;  %v2366_v9 = vsub.f32 0.0, %v2150_v42 }
 0x775   : > { %v2125_v10 = vpop.f32.mrf.mxu2 }
 0x776   : > { %v2166_v34 = vadd.f32 1.0, %v2158_v11  ;;  %v4439_v7 = vadd.f32 %v4305_v28, %v2125_v10  ;;  %v2374_v53 = vmul.f32 %v2366_v9, %v2150_v42 }
 0x778   : > { %2865 = vrcp.f32 %v2166_v34  ;;  %v2269_v1 = vand.u32 2147483648, %v2166_v34  ;;  %v2267_v18 = vand.u32 2147483647, %v2166_v34  ;;  %vm2263_vm11 = vweird.f32 %v2166_v34 }
 0x779   : > { %v2143_v23 = vmul.f32 0.70710677, %v4439_v7  ;;  %v2388_v44 = vmul.f32 1.442695, %v2374_v53 }
 0x77a   : > { %v2270_v22 = vor.u32 1.1754944e-38, %v2269_v1  ;;  %vm2268_vm14 = vcmp.eq.f32.partialorder %v2267_v18, 8.507059e+37 }
 0x77b   : > { %v2151_v21 = vand.u32 2147483647, %v2143_v23  ;;  %vm2415_vm5 = vcmp.lt.f32.partialorder %v2143_v23, 0.0 }
 0x77d   : > { %v2159_v40 = vmul.f32 0.3275911, %v2151_v21  ;;  %v2367_v58 = vsub.f32 0.0, %v2151_v21 }
 0x77e   : > { %v2866_v48 = vpop.eup %2865 }
 0x77f   : > { %v2259_v13 = vmul.f32 %v2866_v48, %v2166_v34  ;;  %vm2264_vm10 = vweird.f32 %v2866_v48  ;;  %v2167_v17 = vadd.f32 1.0, %v2159_v40  ;;  %v2375_v57 = vmul.f32 %v2367_v58, %v2151_v21 }
 0x780   : > { %vm2265_vm13 = vmor %vm2263_vm11, %vm2264_vm10 }
 0x781   : > { %v2260_v55 = vsub.f32 1.0, %v2259_v13  ;;  %2867 = vrcp.f32 %v2167_v17  ;;  %v2284_v33 = vand.u32 2147483648, %v2167_v17  ;;  %v2282_v41 = vand.u32 2147483647, %v2167_v17 }
 0x782   : > { %vm2278_vm1 = vweird.f32 %v2167_v17  ;;  %2869 = vpow2.f32 %v2388_v44  ;;  %v2390_v43 = vmul.f32 1.442695, %v2375_v57 }
 0x783   : > { %v2261_v63 = vmul.f32 %v2866_v48, %v2260_v55  ;;  %v2285_v12 = vor.u32 1.1754944e-38, %v2284_v33  ;;  %vm2283_vm3 = vcmp.eq.f32.partialorder %v2282_v41, 8.507059e+37 }
 0x784   : > { %2871 = vpow2.f32 %v2390_v43 }
 0x785   : > { %v2262_v24 = vadd.f32 %v2866_v48, %v2261_v63 }
 0x787   : > { %v2266_v51 = vsel %vm2265_vm13, %v2866_v48, %v2262_v24  ;;  %v2868_v29 = vpop.eup %2867  ;;  %v2134_v24 = vmul.f32 0.5, %v4428_v32 }
 0x788   : > { %v2271_v35 = vsel %vm2268_vm14, %v2270_v22, %v2266_v51  ;;  %v2274_v28 = vmul.f32 %v2868_v29, %v2167_v17  ;;  %vm2279_vm15 = vweird.f32 %v2868_v29  ;;  %v2870_v42 = vpop.eup %2869  ;;  %v2135_v22 = vmul.f32 0.5, %v4439_v7 }
 0x789   : > { %v2294_v26 = vmul.f32 1.0614054, %v2271_v35  ;;  %vm2280_vm2 = vmor %vm2278_vm1, %vm2279_vm15 }
 0x78a   : > { %v2275_v39 = vsub.f32 1.0, %v2274_v28  ;;  %v2872_v48 = vpop.eup %2871 }
 0x78b   : > { %v2302_v49 = vadd.f32 -1.4531521, %v2294_v26 }
 0x78c   : > { %v2276_v52 = vmul.f32 %v2868_v29, %v2275_v39 }
 0x78d   : > { %v2310_v59 = vmul.f32 %v2302_v49, %v2271_v35 }
 0x78e   : > { %v2277_v37 = vadd.f32 %v2868_v29, %v2276_v52 }
 0x78f   : > { %v2318_v8 = vadd.f32 1.4214138, %v2310_v59 }
 0x790   : > { %v2281_v16 = vsel %vm2280_vm2, %v2868_v29, %v2277_v37 }
 0x791   : > { %v2326_v6 = vmul.f32 %v2318_v8, %v2271_v35  ;;  %v2286_v62 = vsel %vm2283_vm3, %v2285_v12, %v2281_v16 }
 0x792   : > { %v2295_v54 = vmul.f32 1.0614054, %v2286_v62 }
 0x793   : > { %v2334_v47 = vadd.f32 -0.28449672, %v2326_v6 }
 0x794   : > { %v2303_v20 = vadd.f32 -1.4531521, %v2295_v54 }
 0x795   : > { %v2342_v0 = vmul.f32 %v2334_v47, %v2271_v35 }
 0x796   : > { %v2311_v14 = vmul.f32 %v2303_v20, %v2286_v62 }
 0x797   : > { %v2350_v45 = vadd.f32 0.2548296, %v2342_v0 }
 0x798   : > { %v2319_v61 = vadd.f32 1.4214138, %v2311_v14 }
 0x799   : > { %v2358_v31 = vmul.f32 %v2350_v45, %v2271_v35 }
 0x79a   : > { %v2327_v30 = vmul.f32 %v2319_v61, %v2286_v62 }
 0x79b   : > { %v2398_v4 = vmul.f32 %v2870_v42, %v2358_v31 }
 0x79c   : > { %v2335_v60 = vadd.f32 -0.28449672, %v2327_v30 }
 0x79d   : > { %v2406_v11 = vsub.f32 1.0, %v2398_v4 }
 0x79e   : > { %v2343_v27 = vmul.f32 %v2335_v60, %v2286_v62 }
 0x79f   : > { %v2422_v34 = vsub.f32 0.0, %v2406_v11 }
 0x7a0   : > { %v2351_v2 = vadd.f32 0.2548296, %v2343_v27 }
 0x7a1   : > { %v2430_v55 = vsel %vm2414_vm4, %v2422_v34, %v2406_v11 }
 0x7a2   : > { %v2359_v46 = vmul.f32 %v2351_v2, %v2286_v62  ;;  %v2438_v18 = vadd.f32 1.0, %v2430_v55 }
 0x7a4   : > { %v2399_v13 = vmul.f32 %v2872_v48, %v2359_v46  ;;  %v2446_v35 = vmul.f32 %v2438_v18, %v2134_v24 }
 0x7a6   : > { %v2407_v1 = vsub.f32 1.0, %v2399_v13 }
 0x7a8   : > { %v2423_v63 = vsub.f32 0.0, %v2407_v1 }
 0x7aa   : > { %v2431_v10 = vsel %vm2415_vm5, %v2423_v63, %v2407_v1 }
 0x7ab   : > { %v2439_v51 = vadd.f32 1.0, %v2431_v10 }
 0x7ad   : > { %v2447_v26 = vmul.f32 %v2439_v51, %v2135_v22 }
 0x7af   : > { %v2451_v21 = vpack.c.bf16 %v2447_v26, %v2446_v35 }
 0x7b1   : > { %2706 = vmatmul.msk.bf16.gmra.mxu0 %vm1442_vm12, %v2451_v21 }
 0x7b2   : > { %v2505_v49 = vpop.f32.mrf.mxu0 }
 0x7b3   : > { %v2525_v40 = vadd.f32 %v2505_v49, %v4158_v3 }
 0x7b5   : > { %v2537_v32 = vadd.f32 %v2774_v38, %v2525_v40 }
 0x7b7   : > { %2545 = vst.msk [vmem:[%s548_s29] sm:$0xff] %vm560_vm0, %v2537_v32 }
 0x7ba   : > { %v2507_v7 = vpop.f32.mrf.mxu0 }
 0x7bb   : > { %v2526_v23 = vadd.f32 %v2507_v7, %v4163_v25 }
 0x7bd   : > { %v2538_v59 = vadd.f32 %v2774_v38, %v2526_v23 }
 0x7bf   : > { %2546 = vst.msk [vmem:[%s548_s29 + $0x8] sm:$0xff] %vm560_vm0, %v2538_v59 }
 0x7c8   : > { %v2510_v17 = vpop.f32.mrf.mxu0 }
 0x7c9   : > { %v2527_v8 = vadd.f32 %v2510_v17, %v4168_v19 }
 0x7cb   : > { %v2539_v6 = vadd.f32 %v2774_v38, %v2527_v8 }
 0x7cd   : > { %2547 = vst.msk [vmem:[%s548_s29 + $0x10] sm:$0xff] %vm560_vm0, %v2539_v6 }
 0x7d0   : > { %v2512_v3 = vpop.f32.mrf.mxu0 }
 0x7d1   : > { %v2528_v29 = vadd.f32 %v2512_v3, %v4173_v56 }
 0x7d3   : > { %v2540_v9 = vadd.f32 %v2774_v38, %v2528_v29 }
 0x7d5   : > { %2548 = vst.msk [vmem:[%s548_s29 + $0x18] sm:$0xff] %vm560_vm0, %v2540_v9 }
 0x7da   : > { %v2515_v28 = vpop.f32.mrf.mxu0 }
 0x7db   : > { %v2529_v47 = vadd.f32 %v2515_v28, %v4178_v36 }
 0x7dd   : > { %v2541_v39 = vadd.f32 %v2774_v38, %v2529_v47 }
 0x7df   : > { %2549 = vst.msk [vmem:[%s548_s29 + $0x20] sm:$0xff] %vm560_vm0, %v2541_v39 }
 0x7e2   : > { %v2517_v25 = vpop.f32.mrf.mxu0 }
 0x7e3   : > { %v2530_v53 = vadd.f32 %v2517_v25, %v4183_v15 }
 0x7e5   : > { %v2542_v33 = vadd.f32 %v2774_v38, %v2530_v53 }
 0x7e7   : > { %2550 = vst.msk [vmem:[%s548_s29 + $0x28] sm:$0xff] %vm560_vm0, %v2542_v33 }
 0x82e   : > { %v2520_v19 = vpop.f32.mrf.mxu0 }
 0x82f   : > { %v2531_v52 = vadd.f32 %v2520_v19, %v4188_v50 }
 0x831   : > { %v2543_v41 = vadd.f32 %v2774_v38, %v2531_v52 }
 0x833   : > { %2551 = vst.msk [vmem:[%s548_s29 + $0x30] sm:$0xff] %vm560_vm0, %v2543_v41 }
 0x836   : > { %v2522_v56 = vpop.f32.mrf.mxu0 }
 0x837   : > { %v2532_v0 = vadd.f32 %v2522_v56, %v4201_v5 }
 0x839   : > { %v2544_v37 = vadd.f32 %v2774_v38, %v2532_v0 }
 0x83b   : > { %2552 = vst.msk [vmem:[%s548_s29 + $0x38] sm:$0xff] %vm560_vm0, %v2544_v37 }
 0x83c PF: > { %s27_s24 = sadd.s32 1, %s2895_s24  }
 0x83d   : > { %p24_p4 = scmp.ge.s32.totalorder %s27_s24, 4  }
 0x83f   :  { %26 = sbr.rel (!%p24_p4) target bundleno = 3 (0x3), region = 130 }

// kernel: _lambda_.11
= control target key start
LH: loop header
LB: loop body
LE: loop exit
PB: predicated region body
PF: predicated region fallthrough
CT: control target
= control target key end

     0   :  { %s1978_s24 = smov 0   ;;  %s2587_s0 = inlined_call_operand.vmem [shape: f32[2,16,32], index: 0, kind: input, shape index: {}]   ;;  %s2588_s1 = inlined_call_operand.vmem [shape: f32[1,32], index: 1, kind: input, shape index: {}]   ;;  %s2589_s2 = inlined_call_operand.vmem [shape: f32[1,32], index: 2, kind: input, shape index: {}]   ;;  %s2590_s3 = inlined_call_operand.vmem [shape: f32[3,9,32], index: 3, kind: input, shape index: {}]   ;;  %s2591_s4 = inlined_call_operand.vmem [shape: f32[3,32], index: 4, kind: input, shape index: {}]   ;;  %s2592_s5 = inlined_call_operand.vmem [shape: f32[3,32], index: 5, kind: input, shape index: {}]   ;;  %s2593_s6 = inlined_call_operand.vmem [shape: bf16[4,16], index: 6, kind: input, shape index: {}]   ;;  %s2594_s7 = inlined_call_operand.vmem [shape: bf16[3,32,32], index: 7, kind: input, shape index: {}]   ;;  %s2595_s8 = inlined_call_operand.vmem [shape: f32[3,32], index: 8, kind: input, shape index: {}]   ;;  %s2596_s9 = inlined_call_operand.vmem [shape: bf16[32,32], index: 9, kind: input, shape index: {}]   ;;  %s2597_s10 = inlined_call_operand.vmem [shape: f32[1,32], index: 10, kind: input, shape index: {}]   ;;  %s2598_s11 = inlined_call_operand.vmem [shape: f32[1,32], index: 11, kind: input, shape index: {}]   ;;  %s2599_s12 = inlined_call_operand.vmem [shape: f32[1,32], index: 12, kind: input, shape index: {}]   ;;  %s2600_s13 = inlined_call_operand.vmem [shape: bf16[32,128], index: 13, kind: input, shape index: {}]   ;;  %s2601_s14 = inlined_call_operand.vmem [shape: f32[1,128], index: 14, kind: input, shape index: {}]   ;;  %s2602_s15 = inlined_call_operand.vmem [shape: bf16[128,32], index: 15, kind: input, shape index: {}]   ;;  %s2603_s16 = inlined_call_operand.vmem [shape: f32[1,32], index: 16, kind: input, shape index: {}]   ;;  %s2604_s17 = inlined_call_operand.vmem [shape: f32[2,16,32], index: 17, kind: output, shape index: {}]  }
   0x1   :  { %2611 = sst [smem:[#allocation25_spill]] %s2587_s0 }
   0x2   :  { %2612 = sst [smem:[#allocation26_spill]] %s2588_s1 }
   0x3 LB: > { %s1646_s25 = sadd.s32 4294967295, %s1883_s24   ;;  %p1650_p0 = scmp.ge.s32.totalorder %s1883_s24, 1  ;;  %s1883_s24 = sphi %s1978_s24, %s27_s24  }
   0x4   : > { %p487_p1 = scmp.lt.s32.totalorder %s1883_s24, 3 }
   0x6   : > { %p488_p2 = pnand %p1650_p0, %p487_p1 }
   0x8   : > { %491 = sbr.rel (%p488_p2) target bundleno = 2004 (0x7d4), region = 88 }
   0xd   : > { %p539_p3 = scmp.lt.s32.totalorder %s1646_s25, 1  ;;  %vm554_vm0 = vcmask 261120   ;;  %s2613_s29 = sld [smem:[#allocation25_spill]]  ;;  %v1885_v4 = vmov 32.0   ;;  %vm616_vm1 = vcmask 259072   ;;  %v1886_v7 = vmov 0.0  }
   0xe   : > { %1841 = vrcp.f32 %v1885_v4  ;;  %617 = vst.msk [vmem:[#allocation2] sm:$0x3f] %vm616_vm1, %v1886_v7  ;;  %v1770_v34 = vld [vmem:[%s2594_s7 + $0x8] sm:$0xff]  ;;  %s2615_s20 = sld [smem:[#allocation26_spill]]  ;;  %v1799_v38 = vld [vmem:[%s2589_s2] ss:$0 sm:$0xff] }
   0xf   : > { %s2650_s25 = smov (!%p539_p3, %s1646_s25), 1  ;;  %618 = vst.msk [vmem:[#allocation2 + $0x8] sm:$0x3f] %vm616_vm1, %v1886_v7  ;;  %1046 = vmatpush.bf16.msra.mxu2 %v1770_v34  ;;  %v1769_v39 = vld [vmem:[%s2594_s7] sm:$0xff]  ;;  %v2023_v40 = vld [vmem:[%s2590_s3 + $0x10] ss:$0 sm:$0xff] }
  0x10   : > { %s1767_s26 = sshll.u32 %s2650_s25, 4  ;;  %619 = vst.msk [vmem:[#allocation2 + $0x10] sm:$0x3f] %vm616_vm1, %v1886_v7  ;;  %v2028_v41 = vld [vmem:[%s2590_s3 + $0x20] ss:$0 sm:$0xff]  ;;  %vm624_vm6 = vcmask 257024  }
  0x11   : > { %622 = vst.msk [vmem:[#allocation2 + $0x28] sm:$0x3f] %vm616_vm1, %v1886_v7  ;;  %v2033_v42 = vld [vmem:[%s2590_s3 + $0x11] ss:$0 sm:$0xff]  ;;  %v2038_v45 = vld [vmem:[%s2590_s3 + $0x21] ss:$0 sm:$0xff] }
  0x12   : > { %620 = vst.msk [vmem:[#allocation2 + $0x18] sm:$0x3f] %vm616_vm1, %v1886_v7  ;;  %vm627_vm8 = vcmask 261124   ;;  %v2045_v54 = vld [vmem:[%s2590_s3 + $0x12] ss:$0 sm:$0xff]  ;;  %vm981_vm11 = vcmask 130048  }
  0x13   : > { %s1994_s0 = scalar_lea.vmem %s2613_s29, %s1767_s26  ;;  %621 = vst.msk [vmem:[#allocation2 + $0x20] sm:$0x3f] %vm616_vm1, %v1886_v7  ;;  %1047 = vmatpush.bf16.msra.mxu2 %v1769_v39  ;;  %v2050_v55 = vld [vmem:[%s2590_s3 + $0x22] ss:$0 sm:$0xff]  ;;  %v2070_v4 = vld [vmem:[%s2590_s3 + $0x1] ss:$0 sm:$0xff] }
  0x14   : > { %v550_v0 = vld [vmem:[%s1994_s0] sm:$0xff]  ;;  %v551_v2 = vld [vmem:[%s1994_s0 + $0x8] sm:$0xff]  ;;  %v1842_v5 = vpop.eup %1841  ;;  %v2077_v7 = vld [vmem:[%s2590_s3 + $0x16] ss:$0 sm:$0xff]  ;;  %s1887_s18 = smov 112   ;;  %vm1178_vm12 = vcmask 1041408  }
  0x15   : > { %v555_v1 = vsel %vm554_vm0, %v550_v0, 0.0  ;;  %v558_v3 = vsel %vm554_vm0, %v551_v2, 0.0  ;;  %v562_v6 = vmul.f32 32.0, %v1842_v5  ;;  %vm566_vm2 = vweird.f32 %v1842_v5  ;;  %v1798_v35 = vld [vmem:[%s2615_s20] ss:$0 sm:$0xff]  ;;  %s548_s20 = scalar_lea.vmem %s2604_s17, %s1767_s26 }
  0x16   : > { %556 = vadd.xlane.f32.xlu0 %v555_v1  ;;  %v633_v47 = vld [vmem:[#allocation2] sm:$0xf]  ;;  %v2150_v39 = vld [vmem:[%s2590_s3 + $0x14] ss:$0 sm:$0xff]  ;;  %vm1150_vm13 = vcmask 31744  }
  0x17   : > { %v563_v8 = vsub.f32 1.0, %v562_v6  ;;  %v657_v48 = vld [vmem:[#allocation2 + $0x1] sm:$0xf]  ;;  %v648_v52 = vmul.f32 %v2023_v40, %v633_v47  ;;  %v653_v57 = vmul.f32 %v2028_v41, %v633_v47 }
  0x18   : > { %v674_v53 = vmul.f32 %v2033_v42, %v657_v48  ;;  %v683_v58 = vmul.f32 %v2038_v45, %v657_v48  ;;  %v2054_v60 = vld [vmem:[#allocation2 + $0x2] sm:$0xf] }
  0x19   : > { %v564_v9 = vmul.f32 %v1842_v5, %v563_v8  ;;  %2616 = vst [vmem:[#allocation9_spill] sm:$0xff] %v2054_v60  ;;  %v2079_v8 = vld [vmem:[#allocation2 + $0x29] sm:$0xf] }
  0x1a   : > { %v678_v62 = vadd.f32 %v674_v53, %v648_v52  ;;  %v687_v1 = vadd.f32 %v683_v58, %v653_v57 }
  0x1b   : > { %v565_v10 = vadd.f32 %v1842_v5, %v564_v9  ;;  %v2081_v9 = vld [vmem:[#allocation2 + $0x2a] sm:$0xf] }
  0x1c   : > { %2617 = vst [vmem:[#allocation10_spill] sm:$0xff] %v2081_v9 }
  0x1d   : > { %v2000_v11 = vsel %vm566_vm2, %v1842_v5, %v565_v10  ;;  %v2072_v5 = vld [vmem:[#allocation2 + $0x28] sm:$0xf]  ;;  %v2086_v10 = vld [vmem:[%s2590_s3 + $0x17] ss:$0 sm:$0xff] }
  0x1e   : > { %559 = vadd.xlane.f32.xlu0 %v558_v3  ;;  %2614 = vst [vmem:[#allocation8_spill] sm:$0xff] %v2000_v11  ;;  %v2065_v3 = vld [vmem:[%s2590_s3] ss:$0 sm:$0xff] }
  0x89   : > { %v557_v12 = vpop.xlane.xlu0 %556 }
  0x8a   : > { %v568_v13 = vmul.f32 %v2000_v11, %v557_v12  ;;  %v2091_v12 = vld [vmem:[%s2590_s3 + $0x18] ss:$0 sm:$0xff] }
  0x8c   : > { %v570_v14 = vsub.f32 %v550_v0, %v568_v13  ;;  %v708_v0 = vmul.f32 %v2045_v54, %v2054_v60 }
  0x8e   : > { %v572_v15 = vmul.f32 %v570_v14, %v570_v14 }
  0x90   : > { %v574_v16 = vsel %vm554_vm0, %v572_v15, 0.0  ;;  %v2097_v15 = vmul.f32 %v2077_v7, %v2072_v5 }
  0x91   : > { %575 = vadd.xlane.f32.xlu1 %v574_v16  ;;  %v560_v17 = vpop.xlane.xlu0 %559 }
  0x92   : > { %v569_v18 = vmul.f32 %v2000_v11, %v560_v17  ;;  %v2104_v17 = vld [vmem:[%s2590_s3 + $0x2] ss:$0 sm:$0xff] }
  0x93   : > { %2618 = vst [vmem:[#allocation11_spill] sm:$0xff] %v2104_v17 }
  0x94   : > { %v571_v19 = vsub.f32 %v551_v2, %v569_v18  ;;  %v717_v2 = vmul.f32 %v2050_v55, %v2054_v60  ;;  %v2109_v18 = vld [vmem:[%s2590_s3 + $0x3] ss:$0 sm:$0xff] }
  0x96   : > { %v573_v20 = vmul.f32 %v571_v19, %v571_v19  ;;  %v2099_v16 = vadd.f32 %v717_v2, %v687_v1 }
  0x98   : > { %v577_v21 = vsel %vm554_vm0, %v573_v20, 0.0 }
  0x99   : > { %578 = vadd.xlane.f32.xlu1 %v577_v21 }
 0x104   : > { %v576_v22 = vpop.xlane.xlu1 %575 }
 0x105   : > { %v580_v23 = vmul.f32 %v576_v22, %v2000_v11  ;;  %v2113_v22 = vmul.f32 %v2086_v10, %v2079_v8 }
 0x107   : > { %v582_v24 = vadd.f32 1e-05, %v580_v23  ;;  %v2117_v23 = vmul.f32 %v2091_v12, %v2081_v9 }
 0x109   : > { %1843 = vrsqrt.f32 %v582_v24  ;;  %vm590_vm4 = vweird.f32 %v582_v24 }
 0x10c   : > { %v579_v25 = vpop.xlane.xlu1 %578 }
 0x10d   : > { %v581_v26 = vmul.f32 %v579_v25, %v2000_v11  ;;  %v2123_v25 = vmul.f32 %v2070_v4, %v657_v48 }
 0x10f   : > { %v1844_v27 = vpop.eup %1843  ;;  %v583_v28 = vadd.f32 1e-05, %v581_v26  ;;  %2620 = vst [vmem:[#allocation13_spill] sm:$0xff] %v2123_v25 }
 0x110   : > { %v585_v29 = vmul.f32 %v1844_v27, %v582_v24  ;;  %vm591_vm3 = vweird.f32 %v1844_v27  ;;  %v2120_v24 = vmul.f32 %v2065_v3, %v633_v47 }
 0x111   : > { %1845 = vrsqrt.f32 %v583_v28  ;;  %vm592_vm5 = vmor %vm590_vm4, %vm591_vm3  ;;  %vm600_vm9 = vweird.f32 %v583_v28 }
 0x112   : > { %v586_v30 = vmul.f32 %v1844_v27, %v585_v29  ;;  %2619 = vst [vmem:[#allocation12_spill] sm:$0xff] %v2120_v24 }
 0x114   : > { %v587_v31 = vmul.f32 0.5, %v586_v30 }
 0x116   : > { %v588_v32 = vsub.f32 1.5, %v587_v31 }
 0x117   : > { %v1846_v33 = vpop.eup %1845 }
 0x118   : > { %v589_v36 = vmul.f32 %v1844_v27, %v588_v32  ;;  %v595_v37 = vmul.f32 %v1846_v33, %v583_v28  ;;  %vm601_vm7 = vweird.f32 %v1846_v33 }
 0x119   : > { %vm602_vm10 = vmor %vm600_vm9, %vm601_vm7 }
 0x11a   : > { %v593_v43 = vsel %vm592_vm5, %v1844_v27, %v589_v36  ;;  %v596_v44 = vmul.f32 %v1846_v33, %v595_v37 }
 0x11b   : > { %v604_v46 = vmul.f32 %v593_v43, %v570_v14  ;;  %v2093_v14 = vadd.f32 %v708_v0, %v678_v62 }
 0x11c   : > { %v597_v49 = vmul.f32 0.5, %v596_v44 }
 0x11d   : > { %v609_v50 = vmul.f32 %v1798_v35, %v604_v46 }
 0x11e   : > { %v598_v51 = vsub.f32 1.5, %v597_v49 }
 0x11f   : > { %v614_v56 = vadd.f32 %v1799_v38, %v609_v50 }
 0x120   : > { %v599_v59 = vmul.f32 %v1846_v33, %v598_v51 }
 0x121   : > { %625 = vst.msk [vmem:[#allocation2 + $0x9] sm:$0xf] %vm624_vm6, %v614_v56 }
 0x122   : > { %628 = vst.msk [vmem:[#allocation2 + $0xd] sm:$0xf0] %vm627_vm8, %v614_v56  ;;  %v603_v61 = vsel %vm602_vm10, %v1846_v33, %v599_v59  ;;  %v2134_v33 = vld [vmem:[%s2590_s3 + $0x4] ss:$0 sm:$0xff] }
 0x123   : > { %v605_v63 = vmul.f32 %v603_v61, %v571_v19 }
 0x125   : > { %v610_v6 = vmul.f32 %v1798_v35, %v605_v63  ;;  %v2183_v63 = vld [vmem:[%s2590_s3 + $0x15] ss:$0 sm:$0xff] }
 0x127   : > { %v615_v13 = vadd.f32 %v1799_v38, %v610_v6  ;;  %v2145_v38 = vld [vmem:[%s2590_s3 + $0x13] ss:$0 sm:$0xff] }
 0x128   : > { %v634_v19 = vld [vmem:[#allocation2 + $0x8] sm:$0xf] }
 0x129   : > { %v658_v20 = vld [vmem:[#allocation2 + $0x9] sm:$0xf]  ;;  %v635_v26 = vld [vmem:[#allocation2 + $0x10] sm:$0xf]  ;;  %v644_v27 = vmul.f32 %v2065_v3, %v634_v19  ;;  %v649_v28 = vmul.f32 %v2023_v40, %v634_v19  ;;  %v2128_v29 = vmul.f32 %v2028_v41, %v634_v19  ;;  %630 = vst.msk [vmem:[#allocation2 + $0x19] sm:$0xf] %vm624_vm6, %v615_v13 }
 0x12a   : > { %v692_v21 = vld [vmem:[#allocation2 + $0xa] sm:$0xf]  ;;  %v659_v30 = vld [vmem:[#allocation2 + $0x11] sm:$0xf]  ;;  %v666_v31 = vmul.f32 %v2070_v4, %v658_v20  ;;  %v645_v34 = vmul.f32 %v2065_v3, %v635_v26  ;;  %v650_v35 = vmul.f32 %v2023_v40, %v635_v26  ;;  %v2139_v36 = vmul.f32 %v2028_v41, %v635_v26  ;;  %632 = vst.msk [vmem:[#allocation2 + $0x1d] sm:$0xf0] %vm627_vm8, %v615_v13 }
 0x12b   : > { %v693_v32 = vld [vmem:[#allocation2 + $0x12] sm:$0xf]  ;;  %v667_v37 = vmul.f32 %v2070_v4, %v659_v30  ;;  %v675_v44 = vmul.f32 %v2033_v42, %v658_v20  ;;  %v676_v46 = vmul.f32 %v2033_v42, %v659_v30  ;;  %v2155_v47 = vmul.f32 %v2038_v45, %v658_v20  ;;  %v2157_v48 = vld [vmem:[#allocation2 + $0x8] sm:$0xf] }
 0x12c   : > { %v670_v43 = vadd.f32 %v666_v31, %v644_v27  ;;  %v2159_v49 = vld [vmem:[#allocation2 + $0x10] sm:$0xf]  ;;  %v2163_v51 = vmul.f32 %v2038_v45, %v659_v30  ;;  %v700_v52 = vmul.f32 %v2104_v17, %v692_v21  ;;  %v701_v53 = vmul.f32 %v2104_v17, %v693_v32  ;;  %v2167_v56 = vld [vmem:[#allocation2 + $0x9] sm:$0xf] }
 0x12d   : > { %v671_v50 = vadd.f32 %v667_v37, %v645_v34  ;;  %v2169_v57 = vld [vmem:[#allocation2 + $0x11] sm:$0xf]  ;;  %v709_v58 = vmul.f32 %v2045_v54, %v692_v21  ;;  %v710_v59 = vmul.f32 %v2045_v54, %v693_v32  ;;  %v2175_v61 = vmul.f32 %v2050_v55, %v692_v21  ;;  %v2197_v13 = vld [vmem:[#allocation2 + $0xa] sm:$0xf] }
 0x12e   : > { %v2178_v62 = vmul.f32 %v2050_v55, %v693_v32  ;;  %v2185_v0 = vadd.f32 %v700_v52, %v670_v43  ;;  %v2191_v2 = vmul.f32 %v2109_v18, %v2157_v48  ;;  %v2195_v6 = vmul.f32 %v2109_v18, %v2159_v49  ;;  %v2199_v19 = vld [vmem:[#allocation2 + $0x12] sm:$0xf] }
 0x12f   : > { %v2187_v1 = vadd.f32 %v701_v53, %v671_v50  ;;  %v2203_v20 = vmul.f32 %v2134_v33, %v2167_v56  ;;  %v2207_v21 = vmul.f32 %v2134_v33, %v2169_v57  ;;  %v679_v26 = vadd.f32 %v675_v44, %v649_v28  ;;  %v2209_v30 = vld [vmem:[#allocation2 + $0x10] sm:$0xf] }
 0x130   : > { %2621 = vst [vmem:[#allocation14_spill] sm:$0xff] %v2185_v0  ;;  %v680_v27 = vadd.f32 %v676_v46, %v650_v35  ;;  %v2211_v31 = vld [vmem:[#allocation2 + $0x11] sm:$0xf]  ;;  %v742_v34 = vmul.f32 %v2145_v38, %v2157_v48  ;;  %v743_v37 = vmul.f32 %v2145_v38, %v2159_v49  ;;  %v776_v43 = vmul.f32 %v2150_v39, %v2167_v56  ;;  %v636_v52 = vld [vmem:[#allocation2 + $0x18] sm:$0xf] }
 0x131   : > { %2622 = vst [vmem:[#allocation15_spill] sm:$0xff] %v2187_v1  ;;  %v2213_v32 = vld [vmem:[#allocation2 + $0x12] sm:$0xf]  ;;  %v777_v50 = vmul.f32 %v2150_v39, %v2169_v57  ;;  %v713_v28 = vadd.f32 %v709_v58, %v679_v26  ;;  %v810_v44 = vmul.f32 %v2183_v63, %v2197_v13  ;;  %v811_v46 = vmul.f32 %v2183_v63, %v2199_v19  ;;  %v660_v53 = vld [vmem:[#allocation2 + $0x19] sm:$0xf] }
 0x132   : > { %2623 = vst [vmem:[#allocation16_spill] sm:$0xff] %v2191_v2  ;;  %v714_v35 = vadd.f32 %v710_v59, %v680_v27  ;;  %v694_v11 = vld [vmem:[#allocation2 + $0x1a] sm:$0xf]  ;;  %v844_v2 = vmul.f32 %v2077_v7, %v2209_v30  ;;  %v2234_v58 = vmul.f32 %v2091_v12, %v2213_v32  ;;  %v646_v59 = vmul.f32 %v2065_v3, %v636_v52  ;;  %v2250_v24 = vld [vmem:[#allocation2 + $0x21] sm:$0xf] }
 0x133   : > { %2624 = vst [vmem:[#allocation17_spill] sm:$0xff] %v2195_v6  ;;  %v651_v26 = vmul.f32 %v2023_v40, %v636_v52  ;;  %v656_v27 = vmul.f32 %v2028_v41, %v636_v52  ;;  %v668_v1 = vmul.f32 %v2070_v4, %v660_v53  ;;  %v2240_v6 = vld [vmem:[#allocation2 + $0x18] sm:$0xf]  ;;  %v677_v0 = vmul.f32 %v2033_v42, %v660_v53  ;;  %v2289_v9 = vld [vmem:[#allocation2 + $0x21] sm:$0xf] }
 0x134   : > { %2625 = vst [vmem:[#allocation18_spill] sm:$0xff] %v2203_v20  ;;  %v746_v20 = vadd.f32 %v742_v34, %v2093_v14  ;;  %v2242_v14 = vld [vmem:[#allocation2 + $0x20] sm:$0xf]  ;;  %v2244_v34 = vld [vmem:[#allocation2 + $0x19] sm:$0xf]  ;;  %v686_v60 = vmul.f32 %v2038_v45, %v660_v53  ;;  %v702_v25 = vmul.f32 %v2104_v17, %v694_v11  ;;  %v711_v3 = vmul.f32 %v2045_v54, %v694_v11 }
 0x135   : > { %2626 = vst [vmem:[#allocation19_spill] sm:$0xff] %v2207_v21  ;;  %v878_v21 = vmul.f32 %v2086_v10, %v2211_v31  ;;  %v672_v40 = vadd.f32 %v668_v1, %v646_v59  ;;  %v720_v41 = vmul.f32 %v2050_v55, %v694_v11  ;;  %v2255_v4 = vmul.f32 %v2109_v18, %v2240_v6  ;;  %v2271_v55 = vld [vmem:[#allocation2 + $0x1a] sm:$0xf]  ;;  %v2273_v1 = vld [vmem:[#allocation2 + $0x22] sm:$0xf] }
 0x136   : > { %v2259_v52 = vmul.f32 %v2109_v18, %v2242_v14  ;;  %v2263_v42 = vmul.f32 %v2134_v33, %v2244_v34  ;;  %v2267_v45 = vmul.f32 %v2134_v33, %v2250_v24  ;;  %v681_v54 = vadd.f32 %v677_v0, %v651_v26  ;;  %v2275_v53 = vld [vmem:[#allocation2 + $0x18] sm:$0xf] }
 0x137   : > { %2627 = vst [vmem:[#allocation20_spill] sm:$0xff] %v2255_v4  ;;  %v744_v11 = vmul.f32 %v2145_v38, %v2240_v6  ;;  %v2277_v18 = vadd.f32 %v702_v25, %v672_v40  ;;  %v745_v59 = vmul.f32 %v2145_v38, %v2242_v14  ;;  %v778_v33 = vmul.f32 %v2150_v39, %v2244_v34  ;;  %v2287_v17 = vld [vmem:[#allocation2 + $0x19] sm:$0xf] }
 0x138   : > { %2628 = vst [vmem:[#allocation21_spill] sm:$0xff] %v2259_v52  ;;  %v715_v0 = vadd.f32 %v711_v3, %v681_v54  ;;  %v779_v52 = vmul.f32 %v2150_v39, %v2250_v24  ;;  %v780_v4 = vadd.f32 %v776_v43, %v746_v20  ;;  %v2291_v25 = vld [vmem:[#allocation2 + $0x1a] sm:$0xf]  ;;  %v812_v38 = vmul.f32 %v2183_v63, %v2271_v55 }
 0x139   : > { %2629 = vst [vmem:[#allocation22_spill] sm:$0xff] %v2263_v42  ;;  %v747_v42 = vadd.f32 %v743_v37, %v713_v28  ;;  %v748_v26 = vadd.f32 %v744_v11, %v714_v35  ;;  %v813_v37 = vmul.f32 %v2183_v63, %v2273_v1  ;;  %v845_v28 = vmul.f32 %v2077_v7, %v2275_v53  ;;  %v2299_v35 = vld [vmem:[#allocation2 + $0x22] sm:$0xf] }
 0x13a   : > { %2630 = vst [vmem:[#allocation23_spill] sm:$0xff] %v2267_v45  ;;  %v2283_v45 = vld [vmem:[#allocation2 + $0x20] sm:$0xf]  ;;  %v749_v39 = vadd.f32 %v745_v59, %v715_v0  ;;  %v814_v43 = vadd.f32 %v810_v44, %v780_v4  ;;  %v879_v54 = vmul.f32 %v2086_v10, %v2287_v17  ;;  %v880_v63 = vmul.f32 %v2086_v10, %v2289_v9 }
 0x13b   : > { %2631 = vst [vmem:[#allocation24_spill] sm:$0xff] %v2277_v18  ;;  %v781_v40 = vadd.f32 %v777_v50, %v747_v42  ;;  %v782_v20 = vadd.f32 %v778_v33, %v748_v26  ;;  %v846_v3 = vmul.f32 %v2077_v7, %v2283_v45  ;;  %v1819_v50 = vld [vmem:[%s2590_s3 + $0x23] ss:$0 sm:$0xff]  ;;  %v913_v11 = vmul.f32 %v2091_v12, %v2291_v25 }
 0x13c   : > { %v783_v59 = vadd.f32 %v779_v52, %v749_v39  ;;  %v848_v44 = vadd.f32 %v844_v2, %v814_v43  ;;  %v914_v7 = vmul.f32 %v2091_v12, %v2299_v35  ;;  %v688_v0 = vadd.f32 %v2155_v47, %v2128_v29  ;;  %v1817_v52 = vld [vmem:[%s2591_s4 + $0x1] ss:$0 sm:$0xff]  ;;  %v1820_v29 = vld [vmem:[%s2590_s3 + $0x24] ss:$0 sm:$0xff] }
 0x13d   : > { %v815_v42 = vadd.f32 %v811_v46, %v781_v40  ;;  %v816_v33 = vadd.f32 %v812_v38, %v782_v20  ;;  %v689_v46 = vadd.f32 %v2163_v51, %v2139_v36  ;;  %v690_v26 = vadd.f32 %v686_v60, %v656_v27  ;;  %v1818_v51 = vld [vmem:[%s2592_s5 + $0x1] ss:$0 sm:$0xff] }
 0x13e   : > { %v817_v40 = vadd.f32 %v813_v37, %v783_v59  ;;  %v882_v10 = vadd.f32 %v878_v21, %v848_v44  ;;  %v751_v2 = vmul.f32 %v1819_v50, %v2157_v48  ;;  %v722_v12 = vadd.f32 %v2175_v61, %v688_v0 }
 0x13f   : > { %v849_v4 = vadd.f32 %v845_v28, %v815_v42  ;;  %v850_v18 = vadd.f32 %v846_v3, %v816_v33  ;;  %v723_v28 = vadd.f32 %v2178_v62, %v689_v46  ;;  %v724_v39 = vadd.f32 %v720_v41, %v690_v26 }
 0x140   : > { %v851_v60 = vadd.f32 %v2097_v15, %v817_v40  ;;  %v916_v47 = vadd.f32 %v2234_v58, %v882_v10  ;;  %v752_v48 = vmul.f32 %v1819_v50, %v2159_v49  ;;  %v753_v61 = vmul.f32 %v1819_v50, %v2240_v6  ;;  %v1821_v58 = vld [vmem:[%s2590_s3 + $0x25] ss:$0 sm:$0xff]  ;;  %v1824_v40 = vld [vmem:[%s2590_s3 + $0x28] ss:$0 sm:$0xff] }
 0x141   : > { %v883_v38 = vadd.f32 %v879_v54, %v849_v4  ;;  %v884_v36 = vadd.f32 %v880_v63, %v850_v18  ;;  %v754_v62 = vmul.f32 %v1819_v50, %v2242_v14  ;;  %v755_v27 = vadd.f32 %v751_v2, %v2099_v16 }
 0x142   : > { %v885_v41 = vadd.f32 %v2113_v22, %v851_v60  ;;  %v943_v15 = vmul.f32 %v1817_v52, %v916_v47  ;;  %v756_v18 = vadd.f32 %v752_v48, %v722_v12  ;;  %v757_v43 = vadd.f32 %v753_v61, %v723_v28  ;;  %v1822_v22 = vld [vmem:[%s2590_s3 + $0x26] ss:$0 sm:$0xff] }
 0x143   : > { %v917_v21 = vadd.f32 %v913_v11, %v883_v38  ;;  %v918_v37 = vadd.f32 %v914_v7, %v884_v36  ;;  %v758_v3 = vadd.f32 %v754_v62, %v724_v39  ;;  %v785_v49 = vmul.f32 %v1820_v29, %v2167_v56 }
 0x144   : > { %v919_v6 = vadd.f32 %v2117_v23, %v885_v41  ;;  %v949_v14 = vadd.f32 %v1818_v51, %v943_v15  ;;  %v786_v16 = vmul.f32 %v1820_v29, %v2169_v57  ;;  %v787_v54 = vmul.f32 %v1820_v29, %v2244_v34  ;;  %v1823_v57 = vld [vmem:[%s2590_s3 + $0x27] ss:$0 sm:$0xff] }
 0x145   : > { %v944_v20 = vmul.f32 %v1817_v52, %v917_v21  ;;  %v945_v42 = vmul.f32 %v1817_v52, %v918_v37  ;;  %v788_v63 = vmul.f32 %v1820_v29, %v2250_v24  ;;  %v789_v11 = vadd.f32 %v785_v49, %v755_v27  ;;  %v1825_v27 = vld [vmem:[%s2591_s4 + $0x2] ss:$0 sm:$0xff] }
 0x146   : > { %v946_v59 = vmul.f32 %v1817_v52, %v919_v6  ;;  %966 = vst.msk [vmem:[#allocation6] sm:$0xf] %vm624_vm6, %v949_v14  ;;  %v790_v56 = vadd.f32 %v786_v16, %v756_v18  ;;  %v819_v23 = vmul.f32 %v1821_v58, %v2197_v13  ;;  %v791_v44 = vadd.f32 %v787_v54, %v757_v43  ;;  %v1826_v49 = vld [vmem:[%s2592_s5 + $0x2] ss:$0 sm:$0xff]  ;;  %v2633_v6 = vld [vmem:[#allocation12_spill] sm:$0xff] }
 0x147   : > { %v950_v50 = vadd.f32 %v1818_v51, %v944_v20  ;;  %v951_v33 = vadd.f32 %v1818_v51, %v945_v42  ;;  %v792_v7 = vadd.f32 %v788_v63, %v758_v3  ;;  %v820_v34 = vmul.f32 %v1821_v58, %v2199_v19  ;;  %v2632_v20 = vld [vmem:[#allocation10_spill] sm:$0xff]  ;;  %v2634_v42 = vld [vmem:[#allocation13_spill] sm:$0xff]  ;;  %v2636_v54 = vld [vmem:[#allocation11_spill] sm:$0xff] }
 0x148   : > { %v821_v24 = vmul.f32 %v1821_v58, %v2271_v55  ;;  %v952_v4 = vadd.f32 %v1818_v51, %v946_v59  ;;  %v822_v0 = vmul.f32 %v1821_v58, %v2273_v1  ;;  %v823_v46 = vadd.f32 %v819_v23, %v789_v11  ;;  %v2637_v11 = vld [vmem:[#allocation14_spill] sm:$0xff]  ;;  %v2638_v59 = vld [vmem:[#allocation17_spill] sm:$0xff] }
 0x149   : > { %969 = vst.msk [vmem:[#allocation6 + $0x4] sm:$0xf] %vm624_vm6, %v950_v50  ;;  %v853_v26 = vmul.f32 %v1822_v22, %v2209_v30  ;;  %v824_v10 = vadd.f32 %v820_v34, %v790_v56  ;;  %v854_v2 = vmul.f32 %v1822_v22, %v2275_v53  ;;  %v855_v38 = vmul.f32 %v1822_v22, %v2283_v45  ;;  %v2635_v50 = vld [vmem:[#allocation9_spill] sm:$0xff]  ;;  %v2641_v34 = vld [vmem:[#allocation24_spill] sm:$0xff] }
 0x14a   : > { %972 = vst.msk [vmem:[#allocation6 + $0x8] sm:$0xf] %vm624_vm6, %v951_v33  ;;  %v825_v52 = vadd.f32 %v821_v24, %v791_v44  ;;  %v826_v12 = vadd.f32 %v822_v0, %v792_v7  ;;  %v856_v28 = vmul.f32 %v1822_v22, %v2072_v5  ;;  %v887_v29 = vmul.f32 %v1823_v57, %v2211_v31  ;;  %v2640_v44 = vld [vmem:[#allocation20_spill] sm:$0xff]  ;;  %v2642_v24 = vld [vmem:[#allocation21_spill] sm:$0xff]  ;;  %v1827_v0 = vld [vmem:[%s2590_s3 + $0x5] ss:$0 sm:$0xff] }
 0x14b   : > { %975 = vst.msk [vmem:[#allocation6 + $0xc] sm:$0xf] %vm624_vm6, %v952_v4  ;;  %v857_v39 = vadd.f32 %v853_v26, %v823_v46  ;;  %v858_v60 = vadd.f32 %v854_v2, %v824_v10  ;;  %v888_v47 = vmul.f32 %v1823_v57, %v2287_v17  ;;  %v889_v51 = vmul.f32 %v1823_v57, %v2289_v9  ;;  %v2643_v2 = vld [vmem:[#allocation19_spill] sm:$0xff] }
 0x14c   : > { %v859_v36 = vadd.f32 %v855_v38, %v825_v52  ;;  %v860_v48 = vadd.f32 %v856_v28, %v826_v12  ;;  %v890_v21 = vmul.f32 %v1823_v57, %v2079_v8  ;;  %v921_v62 = vmul.f32 %v1824_v40, %v2213_v32  ;;  %v2639_v57 = vld [vmem:[#allocation15_spill] sm:$0xff] }
 0x14d   : > { %v891_v61 = vadd.f32 %v887_v29, %v857_v39  ;;  %v892_v41 = vadd.f32 %v888_v47, %v858_v60  ;;  %v922_v15 = vmul.f32 %v1824_v40, %v2291_v25  ;;  %v923_v18 = vmul.f32 %v1824_v40, %v2299_v35  ;;  %v2644_v29 = vld [vmem:[#allocation22_spill] sm:$0xff] }
 0x14e   : > { %v893_v37 = vadd.f32 %v889_v51, %v859_v36  ;;  %v894_v58 = vadd.f32 %v890_v21, %v860_v48  ;;  %v924_v43 = vmul.f32 %v1824_v40, %v2632_v20  ;;  %v669_v14 = vadd.f32 %v2634_v42, %v2633_v6  ;;  %v1828_v36 = vld [vmem:[%s2590_s3 + $0x6] ss:$0 sm:$0xff]  ;;  %v2645_v48 = vld [vmem:[#allocation16_spill] sm:$0xff] }
 0x14f   : > { %v925_v3 = vadd.f32 %v921_v62, %v891_v61  ;;  %v926_v16 = vadd.f32 %v922_v15, %v892_v41  ;;  %v699_v63 = vmul.f32 %v2636_v54, %v2635_v50  ;;  %v738_v33 = vadd.f32 %v2638_v59, %v2637_v11  ;;  %v2646_v61 = vld [vmem:[#allocation23_spill] sm:$0xff] }
 0x150   : > { %v927_v22 = vadd.f32 %v923_v18, %v893_v37  ;;  %v928_v56 = vadd.f32 %v924_v43, %v894_v58  ;;  %v739_v7 = vadd.f32 %v2640_v44, %v2639_v57  ;;  %v740_v4 = vadd.f32 %v2642_v24, %v2641_v34  ;;  %v978_v46 = vld [vmem:[#allocation6] sm:$0xff]  ;;  %v1829_v15 = vld [vmem:[%s2590_s3 + $0x7] ss:$0 sm:$0xff]  ;;  %v2647_v18 = vld [vmem:[#allocation18_spill] sm:$0xff] }
 0x151   : > { %v955_v23 = vmul.f32 %v1825_v27, %v925_v3  ;;  %v956_v40 = vmul.f32 %v1825_v27, %v926_v16  ;;  %v703_v52 = vadd.f32 %v699_v63, %v669_v14  ;;  %v772_v38 = vadd.f32 %v2643_v2, %v738_v33 }
 0x152   : > { %v979_v26 = vld [vmem:[#allocation6 + $0x8] sm:$0xff]  ;;  %v957_v10 = vmul.f32 %v1825_v27, %v927_v22  ;;  %v958_v28 = vmul.f32 %v1825_v27, %v928_v56  ;;  %v773_v60 = vadd.f32 %v2644_v29, %v739_v7  ;;  %v774_v62 = vadd.f32 %v2646_v61, %v740_v4 }
 0x153   : > { %v980_v12 = vpack.c.bf16 %v979_v26, %v978_v46  ;;  %v961_v39 = vadd.f32 %v1826_v49, %v955_v23  ;;  %v962_v47 = vadd.f32 %v1826_v49, %v956_v40  ;;  %v737_v21 = vadd.f32 %v2645_v48, %v703_v52 }
 0x154   : > { %v963_v51 = vadd.f32 %v1826_v49, %v957_v10  ;;  %v964_v41 = vadd.f32 %v1826_v49, %v958_v28  ;;  %v801_v37 = vmul.f32 %v1827_v0, %v2197_v13  ;;  %v802_v27 = vmul.f32 %v1827_v0, %v2199_v19  ;;  %v977_v49 = vld [vmem:[%s2593_s6] sm:$0x3] }
 0x155   : > { %992 = vmatpush.bf16.msra.mxu0 %v980_v12  ;;  %967 = vst.msk [vmem:[#allocation7] sm:$0xf] %vm624_vm6, %v961_v39  ;;  %v771_v58 = vadd.f32 %v2647_v18, %v737_v21  ;;  %v803_v43 = vmul.f32 %v1827_v0, %v2271_v55  ;;  %v804_v3 = vmul.f32 %v1827_v0, %v2273_v1  ;;  %v1830_v55 = vld [vmem:[%s2590_s3 + $0x8] ss:$0 sm:$0xff]  ;;  %v1772_v39 = vld [vmem:[%s2594_s7 + $0x18] sm:$0xff]  ;;  %v1773_v21 = vld [vmem:[%s2594_s7 + $0x20] sm:$0xff] }
 0x156   : > { %970 = vst.msk [vmem:[#allocation7 + $0x4] sm:$0xf] %vm624_vm6, %v962_v47  ;;  %v806_v13 = vadd.f32 %v802_v27, %v772_v38  ;;  %v835_v19 = vmul.f32 %v1828_v36, %v2209_v30  ;;  %v836_v6 = vmul.f32 %v1828_v36, %v2275_v53  ;;  %v838_v42 = vmul.f32 %v1828_v36, %v2072_v5 }
 0x157   : > { %973 = vst.msk [vmem:[#allocation7 + $0x8] sm:$0xf] %vm624_vm6, %v963_v51  ;;  %v805_v1 = vadd.f32 %v801_v37, %v771_v58  ;;  %v807_v14 = vadd.f32 %v803_v43, %v773_v60  ;;  %v808_v16 = vadd.f32 %v804_v3, %v774_v62  ;;  %v837_v22 = vmul.f32 %v1828_v36, %v2283_v45  ;;  %v1771_v60 = vld [vmem:[%s2594_s7 + $0x10] sm:$0xff]  ;;  %v1774_v51 = vld [vmem:[%s2594_s7 + $0x28] sm:$0xff] }
 0x158   : > { %976 = vst.msk [vmem:[#allocation7 + $0xc] sm:$0xf] %vm624_vm6, %v964_v41  ;;  %v840_v50 = vadd.f32 %v836_v6, %v806_v13  ;;  %v869_v54 = vmul.f32 %v1829_v15, %v2211_v31  ;;  %v870_v30 = vmul.f32 %v1829_v15, %v2287_v17  ;;  %v872_v53 = vmul.f32 %v1829_v15, %v2079_v8  ;;  %v1831_v8 = vld [vmem:[%s2591_s4] ss:$0 sm:$0xff] }
 0x159   : > { %1673 = vmatmul.msk.bf16.vlgmr.msra.gmra.mxu0 %vm981_vm11, %v977_v49  ;;  %v839_v5 = vadd.f32 %v835_v19, %v805_v1  ;;  %v841_v63 = vadd.f32 %v837_v22, %v807_v14  ;;  %v842_v11 = vadd.f32 %v838_v42, %v808_v16  ;;  %v871_v59 = vmul.f32 %v1829_v15, %v2289_v9  ;;  %v1834_v15 = vld [vmem:[%s2595_s8 + $0x1] ss:$0 sm:$0xff] }
 0x15a   : > { %v874_v33 = vadd.f32 %v870_v30, %v840_v50  ;;  %v903_v56 = vmul.f32 %v1830_v55, %v2213_v32  ;;  %v904_v23 = vmul.f32 %v1830_v55, %v2291_v25  ;;  %v906_v45 = vmul.f32 %v1830_v55, %v2632_v20  ;;  %v1832_v32 = vld [vmem:[%s2592_s5] ss:$0 sm:$0xff]  ;;  %1084 = vmatpush.bf16.msra.mxu3 %v1772_v39 }
 0x15b   : > { %v873_v57 = vadd.f32 %v869_v54, %v839_v5  ;;  %v875_v31 = vadd.f32 %v871_v59, %v841_v63  ;;  %v876_v44 = vadd.f32 %v872_v53, %v842_v11  ;;  %v905_v17 = vmul.f32 %v1830_v55, %v2299_v35  ;;  %v1835_v54 = vld [vmem:[%s2595_s8 + $0x2] ss:$0 sm:$0xff] }
 0x15c   : > { %v908_v7 = vadd.f32 %v904_v23, %v874_v33 }
 0x15d   : > { %v907_v34 = vadd.f32 %v903_v56, %v873_v57  ;;  %v909_v24 = vadd.f32 %v905_v17, %v875_v31  ;;  %v910_v9 = vadd.f32 %v906_v45, %v876_v44  ;;  %v999_v25 = vld [vmem:[#allocation7] sm:$0xff] }
 0x15e   : > { %v932_v20 = vmul.f32 %v1831_v8, %v908_v7  ;;  %1085 = vmatpush.bf16.msra.mxu3 %v1771_v60 }
 0x15f   : > { %v1000_v4 = vld [vmem:[#allocation7 + $0x8] sm:$0xff]  ;;  %v931_v46 = vmul.f32 %v1831_v8, %v907_v34  ;;  %v933_v26 = vmul.f32 %v1831_v8, %v909_v24  ;;  %v934_v40 = vmul.f32 %v1831_v8, %v910_v9 }
 0x160   : > { %v1001_v0 = vpack.c.bf16 %v1000_v4, %v999_v25  ;;  %v938_v35 = vadd.f32 %v1832_v32, %v932_v20 }
 0x161   : > { %v937_v10 = vadd.f32 %v1832_v32, %v931_v46  ;;  %v939_v52 = vadd.f32 %v1832_v32, %v933_v26  ;;  %v940_v2 = vadd.f32 %v1832_v32, %v934_v40 }
 0x162   : > { %1009 = vmatpush.bf16.msra.mxu1 %v1001_v0  ;;  %968 = vst.msk [vmem:[#allocation3 + $0x4] sm:$0xf] %vm624_vm6, %v938_v35 }
 0x163   : > { %965 = vst.msk [vmem:[#allocation3] sm:$0xf] %vm624_vm6, %v937_v10 }
 0x164   : > { %971 = vst.msk [vmem:[#allocation3 + $0x8] sm:$0xf] %vm624_vm6, %v939_v52 }
 0x165   : > { %1674 = vmatmul.msk.bf16.vlgmr.msra.gmra.mxu1 %vm981_vm11, %v977_v49  ;;  %974 = vst.msk [vmem:[#allocation3 + $0xc] sm:$0xf] %vm624_vm6, %v940_v2  ;;  %v1833_v49 = vld [vmem:[%s2595_s8] ss:$0 sm:$0xff] }
 0x166   : > { %1121 = vmatpush.bf16.msrb.mxu1 %v1774_v51 }
 0x16a   : > { %v1016_v38 = vld [vmem:[#allocation3] sm:$0xff]  ;;  %1122 = vmatpush.bf16.msrb.mxu1 %v1773_v21 }
 0x16c   : > { %v1017_v12 = vld [vmem:[#allocation3 + $0x8] sm:$0xff] }
 0x16d   : > { %v1018_v28 = vpack.c.bf16 %v1017_v12, %v1016_v38 }
 0x16f   : > { %1683 = vmatmul.msk.bf16.vlgmr.msra.gmra.mxu2 %vm554_vm0, %v1018_v28 }
 0x1d6   : > { %v994_v29 = vpop.f32.mrf.mxu0 }
 0x1d7   : > { %998 = vst.msk [vmem:[#allocation4] sm:$0xf] %vm624_vm6, %v994_v29 }
 0x1de   : > { %v996_v36 = vpop.f32.mrf.mxu0  ;;  %v1054_v47 = vld [vmem:[#allocation4] sm:$0xf] }
 0x1df   : > { %v1055_v48 = vpack.c.bf16 %v1054_v47, %v1054_v47 }
 0x1e1   : > { %1696 = vmatmul.msk.bf16.vlgmr.msra.gmra.mxu3 %vm554_vm0, %v1055_v48 }
 0x1e2   : > { %v1011_v61 = vpop.f32.mrf.mxu1 }
 0x1e3   : > { %1015 = vst.msk [vmem:[#allocation5] sm:$0xf] %vm624_vm6, %v1011_v61 }
 0x1ea   : > { %v1091_v62 = vld [vmem:[#allocation5] sm:$0xf]  ;;  %v1013_v41 = vpop.f32.mrf.mxu1 }
 0x1eb   : > { %v1092_v37 = vpack.c.bf16 %v1091_v62, %v1091_v62 }
 0x1ed   : > { %1709 = vmatmul.msk.bf16.vlgmr.msrb.gmra.mxu1 %vm554_vm0, %v1092_v37 }
 0x1f2   : > { %v1049_v27 = vpop.f32.mrf.mxu2 }
 0x1f3   : > { %v1050_v42 = vadd.f32 %v1833_v49, %v1049_v27 }
 0x1fa   : > { %v1051_v3 = vpop.f32.mrf.mxu2 }
 0x1fb   : > { %v1052_v19 = vadd.f32 %v1833_v49, %v1051_v3  ;;  %v1776_v3 = vld [vmem:[%s2596_s9 + $0x8] sm:$0xff] }
 0x1fd   : > { %v1128_v55 = vpack.c.bf16 %v1052_v19, %v1050_v42 }
 0x264   : > { %v1087_v18 = vpop.f32.mrf.mxu3 }
 0x265   : > { %v1088_v58 = vadd.f32 %v1834_v15, %v1087_v18  ;;  %v1775_v15 = vld [vmem:[%s2596_s9] sm:$0xff] }
 0x267   : > { %v1129_v43 = vpack.c.bf16 %v1088_v58, %v1088_v58 }
 0x269   : > { %v1134_v13 = vsel %vm981_vm11, %v1129_v43, 0  ;;  %1203 = vrot.lane.b32.xlu2 %v1129_v43, %s1887_s18 }
 0x26a   : > { %1143 = vmatpush.bf16.xpose.msra.mxu1 %v1134_v13  ;;  %v1124_v1 = vpop.f32.mrf.mxu1 }
 0x26b   : > { %v1125_v30 = vadd.f32 %v1835_v54, %v1124_v1  ;;  %v1836_v1 = vld [vmem:[%s2597_s10] ss:$0 sm:$0xff] }
 0x26c   : > { %v1089_v6 = vpop.f32.mrf.mxu3 }
 0x26d   : > { %v1174_v53 = vpack.c.bf16 %v1125_v30, %v1125_v30 }
 0x26f   : > { %v1180_v5 = vsel %vm1178_vm12, %v1174_v53, 0 }
 0x270   : > { %1189 = vmatpush.bf16.msrb.mxu2 %v1180_v5  ;;  %v1876_v5 = vld [vmem:[%s1994_s0 + $0x8] sm:$0xff] }
 0x271   : > { %1200 = vrot.lane.b32.xlu2 %v1128_v55, %s1887_s18  ;;  %1710 = vmatmul.msk.bf16.vlgmr.msra.gmra.mxu1 %vm981_vm11, %v1128_v55 }
 0x272   : > { %v1126_v14 = vpop.f32.mrf.mxu1  ;;  %1290 = vmatpush.bf16.msrb.mxu1 %v1776_v3 }
 0x273   : > { %v1875_v14 = vld [vmem:[%s1994_s0] sm:$0xff] }
 0x274   : > { %1313 = vmatpush.bf16.msra.mxu2 %v1775_v15 }
 0x2c3   : > { %v1204_v16 = vpop.permute.xlu2 %1203 }
 0x2c4   : > { %v1209_v22 = vsel %vm981_vm11, %v1204_v16, 0 }
 0x2c5   : > { %1218 = vmatpush.bf16.xpose.msrb.mxu3 %v1209_v22 }
 0x2cb   : > { %v1201_v50 = vpop.permute.xlu2 %1200 }
 0x2cc   : > { %1712 = vmatmul.msk.bf16.vlgmr.msrb.gmra.mxu3 %vm981_vm11, %v1201_v50 }
 0x2ee   : > { %v1145_v63 = vpop.f32.mrf.mxu1 }
 0x2ef   : > { %v1151_v11 = vsel %vm1150_vm13, %v1145_v63, -inf }
 0x2f0   : > { %1152 = vmax.xlane.f32.xlu0 %v1151_v11 }
 0x2f6   : > { %v1147_v59 = vpop.f32.mrf.mxu1 }
 0x2f7   : > { %v1154_v33 = vsel %vm1150_vm13, %v1147_v59, -inf }
 0x2f8   : > { %1155 = vmax.xlane.f32.xlu1 %v1154_v33 }
 0x34f   : > { %v1220_v56 = vpop.f32.mrf.mxu3 }
 0x350   : > { %v1225_v23 = vsel %vm1150_vm13, %v1220_v56, -inf }
 0x351   : > { %1226 = vmax.xlane.f32.xlu2 %v1225_v23 }
 0x357   : > { %v1222_v45 = vpop.f32.mrf.mxu3 }
 0x358   : > { %v1228_v57 = vsel %vm1150_vm13, %v1222_v45, -inf }
 0x359   : > { %1229 = vmax.xlane.f32.xlu0 %v1228_v57 }
 0x363   : > { %v1153_v31 = vpop.xlane.xlu0 %1152 }
 0x364   : > { %v1157_v44 = vsub.f32 %v1145_v63, %v1153_v31 }
 0x366   : > { %v1159_v17 = vmul.f32 1.442695, %v1157_v44 }
 0x368   : > { %1847 = vpow2.f32 %v1159_v17 }
 0x36b   : > { %v1156_v8 = vpop.xlane.xlu1 %1155 }
 0x36c   : > { %v1158_v7 = vsub.f32 %v1147_v59, %v1156_v8 }
 0x36e   : > { %v1848_v34 = vpop.eup %1847  ;;  %v1161_v24 = vmul.f32 1.442695, %v1158_v7 }
 0x36f   : > { %v1163_v9 = vsel %vm1150_vm13, %v1848_v34, 0.0 }
 0x370   : > { %1849 = vpow2.f32 %v1161_v24  ;;  %1164 = vadd.xlane.f32.xlu1 %v1163_v9 }
 0x376   : > { %v1850_v32 = vpop.eup %1849 }
 0x377   : > { %v1166_v25 = vsel %vm1150_vm13, %v1850_v32, 0.0 }
 0x378   : > { %1167 = vadd.xlane.f32.xlu0 %v1166_v25  ;;  %v1778_v25 = vld [vmem:[%s2600_s13 + $0x8] sm:$0xff] }
 0x379   : > { %1414 = vmatpush.bf16.msra.mxu3 %v1778_v25 }
 0x3c4   : > { %v1227_v4 = vpop.xlane.xlu2 %1226 }
 0x3c5   : > { %v1231_v20 = vsub.f32 %v1220_v56, %v1227_v4  ;;  %v2648_v56 = vld [vmem:[#allocation8_spill] sm:$0xff]  ;;  %v1777_v4 = vld [vmem:[%s2600_s13] sm:$0xff] }
 0x3c6   : > { %1415 = vmatpush.bf16.msra.mxu3 %v1777_v4 }
 0x3c7   : > { %v1233_v0 = vmul.f32 1.442695, %v1231_v20 }
 0x3c9   : > { %1851 = vpow2.f32 %v1233_v0 }
 0x3cc   : > { %v1230_v46 = vpop.xlane.xlu0 %1229 }
 0x3cd   : > { %v1232_v26 = vsub.f32 %v1222_v45, %v1230_v46 }
 0x3cf   : > { %v1852_v40 = vpop.eup %1851  ;;  %v1235_v35 = vmul.f32 1.442695, %v1232_v26 }
 0x3d0   : > { %v1237_v10 = vsel %vm1150_vm13, %v1852_v40, 0.0 }
 0x3d1   : > { %1853 = vpow2.f32 %v1235_v35  ;;  %1238 = vadd.xlane.f32.xlu1 %v1237_v10 }
 0x3d7   : > { %v1854_v52 = vpop.eup %1853 }
 0x3d8   : > { %v1240_v2 = vsel %vm1150_vm13, %v1854_v52, 0.0 }
 0x3d9   : > { %1241 = vadd.xlane.f32.xlu0 %v1240_v2 }
 0x3e3   : > { %v1165_v38 = vpop.xlane.xlu1 %1164 }
 0x3e4   : > { %1855 = vrcp.f32 %v1165_v38 }
 0x3ea   : > { %1249 = vrot.lane.b32.xlu1 %v1174_v53, %s1887_s18  ;;  %v1856_v28 = vpop.eup %1855 }
 0x3eb   : > { %v1168_v12 = vpop.xlane.xlu0 %1167  ;;  %v1171_v29 = vmul.f32 %v1856_v28, %v1848_v34 }
 0x3ec   : > { %1857 = vrcp.f32 %v1168_v12 }
 0x3f2   : > { %v1858_v39 = vpop.eup %1857 }
 0x3f3   : > { %v1172_v60 = vmul.f32 %v1858_v39, %v1850_v32 }
 0x3f5   : > { %v1173_v36 = vpack.c.bf16 %v1172_v60, %v1171_v29 }
 0x3f7   : > { %1711 = vmatmul.msk.bf16.vlgmr.msrb.gmra.mxu2 %vm1150_vm13, %v1173_v36  ;;  %v1837_v36 = vld [vmem:[%s2598_s11] ss:$0 sm:$0xff] }
 0x444   : > { %v1239_v51 = vpop.xlane.xlu1 %1238 }
 0x44c   : > { %v1242_v47 = vpop.xlane.xlu0 %1241 }
 0x44d   : > { %1859 = vrcp.f32 %v1242_v47 }
 0x44e   : > { %1861 = vrcp.f32 %v1239_v51 }
 0x453   : > { %v1860_v48 = vpop.eup %1859 }
 0x454   : > { %v1862_v21 = vpop.eup %1861  ;;  %v1246_v61 = vmul.f32 %v1860_v48, %v1854_v52 }
 0x455   : > { %v1245_v41 = vmul.f32 %v1862_v21, %v1852_v40  ;;  %v1838_v21 = vld [vmem:[%s2599_s12] ss:$0 sm:$0xff] }
 0x457   : > { %v1247_v27 = vpack.c.bf16 %v1246_v61, %v1245_v41 }
 0x45c   : > { %v1250_v62 = vpop.permute.xlu1 %1249 }
 0x45d   : > { %v1255_v37 = vsel %vm1178_vm12, %v1250_v62, 0 }
 0x45e   : > { %1264 = vmatpush.bf16.msrb.mxu0 %v1255_v37 }
 0x461   : > { %1713 = vmatmul.msk.bf16.vlgmr.msrb.gmra.mxu0 %vm1150_vm13, %v1247_v27 }
 0x47a   : > { %v1191_v18 = vpop.f32.mrf.mxu2 }
 0x482   : > { %v1193_v58 = vpop.f32.mrf.mxu2 }
 0x483   : > { %v1196_v43 = vpack.c.bf16 %v1193_v58, %v1191_v18  ;;  %v1839_v18 = vld [vmem:[%s2601_s14] ss:$0 sm:$0xff] }
 0x485   : > { %1723 = vmatmul.msk.bf16.vlgmr.msra.gmra.mxu2 %vm981_vm11, %v1196_v43 }
 0x4de   : > { %v1266_v49 = vpop.f32.mrf.mxu0 }
 0x4e6   : > { %v1268_v13 = vpop.f32.mrf.mxu0 }
 0x4e7   : > { %v1271_v19 = vpack.c.bf16 %v1268_v13, %v1266_v49 }
 0x4e9   : > { %1718 = vmatmul.msk.bf16.vlgmr.msrb.gmra.mxu1 %vm981_vm11, %v1271_v19 }
 0x508   : > { %v1315_v6 = vpop.f32.mrf.mxu2 }
 0x510   : > { %v1317_v54 = vpop.f32.mrf.mxu2 }
 0x566   : > { %v1292_v42 = vpop.f32.mrf.mxu1 }
 0x567   : > { %v1316_v55 = vadd.f32 %v1315_v6, %v1292_v42 }
 0x569   : > { %v1320_v16 = vadd.f32 %v1875_v14, %v1316_v55 }
 0x56b   : > { %v2499_v22 = vadd.f32 %v1836_v1, %v1320_v16 }
 0x56d   : > { %v1330_v50 = vsel %vm554_vm0, %v2499_v22, 0.0 }
 0x56e   : > { %1331 = vadd.xlane.f32.xlu0 %v1330_v50  ;;  %v1294_v30 = vpop.f32.mrf.mxu1 }
 0x56f   : > { %v1318_v53 = vadd.f32 %v1317_v54, %v1294_v30 }
 0x571   : > { %v1321_v63 = vadd.f32 %v1876_v5, %v1318_v53 }
 0x573   : > { %v2504_v11 = vadd.f32 %v1836_v1, %v1321_v63 }
 0x575   : > { %v1333_v59 = vsel %vm554_vm0, %v2504_v11, 0.0 }
 0x576   : > { %1334 = vadd.xlane.f32.xlu0 %v1333_v59 }
 0x5e1   : > { %v1332_v33 = vpop.xlane.xlu0 %1331 }
 0x5e2   : > { %v1336_v23 = vmul.f32 %v1332_v33, %v2648_v56 }
 0x5e4   : > { %v1338_v45 = vsub.f32 %v2499_v22, %v1336_v23 }
 0x5e6   : > { %v1340_v57 = vmul.f32 %v1338_v45, %v1338_v45 }
 0x5e8   : > { %v1342_v31 = vsel %vm554_vm0, %v1340_v57, 0.0 }
 0x5e9   : > { %1343 = vadd.xlane.f32.xlu2 %v1342_v31  ;;  %v1335_v44 = vpop.xlane.xlu0 %1334 }
 0x5ea   : > { %v1337_v17 = vmul.f32 %v1335_v44, %v2648_v56 }
 0x5ec   : > { %v1339_v8 = vsub.f32 %v2504_v11, %v1337_v17 }
 0x5ee   : > { %v1341_v7 = vmul.f32 %v1339_v8, %v1339_v8 }
 0x5f0   : > { %v1345_v34 = vsel %vm554_vm0, %v1341_v7, 0.0 }
 0x5f1   : > { %1346 = vadd.xlane.f32.xlu0 %v1345_v34 }
 0x65c   : > { %v1344_v24 = vpop.xlane.xlu2 %1343 }
 0x65d   : > { %v1348_v9 = vmul.f32 %v1344_v24, %v2648_v56 }
 0x65f   : > { %v1350_v32 = vadd.f32 1e-05, %v1348_v9 }
 0x661   : > { %1863 = vrsqrt.f32 %v1350_v32  ;;  %vm1358_vm15 = vweird.f32 %v1350_v32 }
 0x664   : > { %v1347_v20 = vpop.xlane.xlu0 %1346 }
 0x665   : > { %v1349_v0 = vmul.f32 %v1347_v20, %v2648_v56 }
 0x667   : > { %v1864_v46 = vpop.eup %1863  ;;  %v1351_v26 = vadd.f32 1e-05, %v1349_v0 }
 0x668   : > { %v1353_v40 = vmul.f32 %v1864_v46, %v1350_v32  ;;  %vm1359_vm14 = vweird.f32 %v1864_v46 }
 0x669   : > { %1865 = vrsqrt.f32 %v1351_v26  ;;  %vm1360_vm1 = vmor %vm1358_vm15, %vm1359_vm14  ;;  %vm1368_vm3 = vweird.f32 %v1351_v26 }
 0x66a   : > { %v1354_v35 = vmul.f32 %v1864_v46, %v1353_v40 }
 0x66c   : > { %v1355_v10 = vmul.f32 0.5, %v1354_v35  ;;  %v1786_v35 = vld [vmem:[%s2602_s15 + $0x38] sm:$0xff] }
 0x66d   : > { %1567 = vmatpush.bf16.msra.mxu0 %v1786_v35 }
 0x66e   : > { %v1356_v52 = vsub.f32 1.5, %v1355_v10 }
 0x66f   : > { %v1866_v2 = vpop.eup %1865 }
 0x670   : > { %v1357_v38 = vmul.f32 %v1864_v46, %v1356_v52  ;;  %v1363_v12 = vmul.f32 %v1866_v2, %v1351_v26  ;;  %vm1369_vm2 = vweird.f32 %v1866_v2 }
 0x671   : > { %vm1370_vm4 = vmor %vm1368_vm3, %vm1369_vm2 }
 0x672   : > { %v1364_v28 = vmul.f32 %v1866_v2, %v1363_v12  ;;  %v1361_v39 = vsel %vm1360_vm1, %v1864_v46, %v1357_v38  ;;  %v1785_v38 = vld [vmem:[%s2602_s15 + $0x30] sm:$0xff] }
 0x673   : > { %v1372_v47 = vmul.f32 %v1361_v39, %v1338_v45  ;;  %1568 = vmatpush.bf16.msra.mxu0 %v1785_v38 }
 0x674   : > { %v1365_v29 = vmul.f32 0.5, %v1364_v28 }
 0x675   : > { %v1377_v61 = vmul.f32 %v1837_v36, %v1372_v47 }
 0x676   : > { %v1366_v60 = vsub.f32 1.5, %v1365_v29 }
 0x677   : > { %v1382_v37 = vadd.f32 %v1838_v21, %v1377_v61  ;;  %v1783_v61 = vld [vmem:[%s2602_s15 + $0x20] sm:$0xff] }
 0x678   : > { %v1367_v51 = vmul.f32 %v1866_v2, %v1366_v60  ;;  %v1784_v60 = vld [vmem:[%s2602_s15 + $0x28] sm:$0xff] }
 0x679   : > { %1569 = vmatpush.bf16.msra.mxu0 %v1784_v60 }
 0x67a   : > { %v1371_v48 = vsel %vm1370_vm4, %v1866_v2, %v1367_v51 }
 0x67b   : > { %v1373_v62 = vmul.f32 %v1371_v48, %v1339_v8 }
 0x67d   : > { %v1378_v41 = vmul.f32 %v1837_v36, %v1373_v62  ;;  %1570 = vmatpush.bf16.msra.mxu0 %v1783_v61 }
 0x67f   : > { %v1383_v27 = vadd.f32 %v1838_v21, %v1378_v41 }
 0x681   : > { %v1384_v15 = vpack.c.bf16 %v1383_v27, %v1382_v37  ;;  %v1782_v27 = vld [vmem:[%s2602_s15 + $0x18] sm:$0xff] }
 0x682   : > { %1571 = vmatpush.bf16.msra.mxu0 %v1782_v27 }
 0x683   : > { %1732 = vmatmul.msk.bf16.vlgmr.msra.gmra.mxu3 %vm554_vm0, %v1384_v15 }
 0x706   : > { %v1417_v58 = vpop.f32.mrf.mxu3 }
 0x707   : > { %v2532_v43 = vadd.f32 %v1839_v18, %v1417_v58 }
 0x709   : > { %v2535_v3 = vmul.f32 0.70710677, %v2532_v43 }
 0x70b   : > { %v1426_v49 = vand.u32 2147483647, %v2535_v3  ;;  %vm1492_vm13 = vcmp.lt.f32.partialorder %v2535_v3, 0.0  ;;  %v1422_v3 = vmul.f32 0.5, %v2532_v43 }
 0x70d   : > { %v1428_v13 = vmul.f32 0.3275911, %v1426_v49  ;;  %v1480_v7 = vsub.f32 0.0, %v1426_v49 }
 0x70e   : > { %v1419_v1 = vpop.f32.mrf.mxu3 }
 0x70f   : > { %v1430_v19 = vadd.f32 1.0, %v1428_v13  ;;  %v2538_v16 = vadd.f32 %v1839_v18, %v1419_v1  ;;  %v1482_v32 = vmul.f32 %v1480_v7, %v1426_v49  ;;  %v1781_v49 = vld [vmem:[%s2602_s15 + $0x10] sm:$0xff] }
 0x710   : > { %1572 = vmatpush.bf16.msra.mxu0 %v1781_v49 }
 0x711   : > { %1867 = vrcp.f32 %v1430_v19  ;;  %v1443_v14 = vand.u32 2147483648, %v1430_v19  ;;  %v1441_v54 = vand.u32 2147483647, %v1430_v19  ;;  %v2541_v30 = vmul.f32 0.70710677, %v2538_v16 }
 0x712   : > { %vm1437_vm6 = vweird.f32 %v1430_v19  ;;  %v1484_v26 = vmul.f32 1.442695, %v1482_v32 }
 0x713   : > { %v1444_v5 = vor.u32 1.1754944e-38, %v1443_v14  ;;  %v1427_v63 = vand.u32 2147483647, %v2541_v30  ;;  %vm1442_vm8 = vcmp.eq.f32.partialorder %v1441_v54, 8.507059e+37  ;;  %vm1493_vm14 = vcmp.lt.f32.partialorder %v2541_v30, 0.0 }
 0x714   : > { %v1840_v30 = vld [vmem:[%s2603_s16] ss:$0 sm:$0xff] }
 0x715   : > { %v1429_v56 = vmul.f32 0.3275911, %v1427_v63  ;;  %v1481_v2 = vsub.f32 0.0, %v1427_v63 }
 0x717   : > { %v1868_v6 = vpop.eup %1867  ;;  %v1431_v45 = vadd.f32 1.0, %v1429_v56  ;;  %v1483_v29 = vmul.f32 %v1481_v2, %v1427_v63  ;;  %v1423_v63 = vmul.f32 0.5, %v2538_v16 }
 0x718   : > { %v1433_v42 = vmul.f32 %v1868_v6, %v1430_v19  ;;  %vm1438_vm5 = vweird.f32 %v1868_v6 }
 0x719   : > { %vm1439_vm7 = vmor %vm1437_vm6, %vm1438_vm5  ;;  %1869 = vrcp.f32 %v1431_v45  ;;  %v1458_v25 = vand.u32 2147483648, %v1431_v45  ;;  %v1456_v20 = vand.u32 2147483647, %v1431_v45  ;;  %vm1452_vm10 = vweird.f32 %v1431_v45 }
 0x71a   : > { %v1434_v55 = vsub.f32 1.0, %v1433_v42  ;;  %1871 = vpow2.f32 %v1484_v26  ;;  %v1486_v21 = vmul.f32 1.442695, %v1483_v29 }
 0x71b   : > { %v1459_v40 = vor.u32 1.1754944e-38, %v1458_v25  ;;  %vm1457_vm12 = vcmp.eq.f32.partialorder %v1456_v20, 8.507059e+37 }
 0x71c   : > { %v1435_v50 = vmul.f32 %v1868_v6, %v1434_v55  ;;  %1873 = vpow2.f32 %v1486_v21  ;;  %v1780_v55 = vld [vmem:[%s2602_s15 + $0x8] sm:$0xff] }
 0x71d   : > { %1573 = vmatpush.bf16.msra.mxu0 %v1780_v55 }
 0x71e   : > { %v1436_v53 = vadd.f32 %v1868_v6, %v1435_v50 }
 0x71f   : > { %v1870_v8 = vpop.eup %1869 }
 0x720   : > { %v1440_v59 = vsel %vm1439_vm7, %v1868_v6, %v1436_v53  ;;  %v1448_v34 = vmul.f32 %v1870_v8, %v1431_v45  ;;  %vm1453_vm9 = vweird.f32 %v1870_v8  ;;  %v1872_v48 = vpop.eup %1871  ;;  %v1779_v53 = vld [vmem:[%s2602_s15] sm:$0xff] }
 0x721   : > { %v1445_v33 = vsel %vm1442_vm8, %v1444_v5, %v1440_v59  ;;  %vm1454_vm11 = vmor %vm1452_vm10, %vm1453_vm9  ;;  %1574 = vmatpush.bf16.msra.mxu0 %v1779_v53 }
 0x722   : > { %v1462_v23 = vmul.f32 1.0614054, %v1445_v33  ;;  %v1449_v9 = vsub.f32 1.0, %v1448_v34  ;;  %v1874_v6 = vpop.eup %1873 }
 0x724   : > { %v1464_v57 = vadd.f32 -1.4531521, %v1462_v23  ;;  %v1450_v4 = vmul.f32 %v1870_v8, %v1449_v9 }
 0x726   : > { %v1466_v31 = vmul.f32 %v1464_v57, %v1445_v33  ;;  %v1451_v46 = vadd.f32 %v1870_v8, %v1450_v4 }
 0x728   : > { %v1468_v44 = vadd.f32 1.4214138, %v1466_v31  ;;  %v1455_v10 = vsel %vm1454_vm11, %v1870_v8, %v1451_v46 }
 0x729   : > { %v1460_v52 = vsel %vm1457_vm12, %v1459_v40, %v1455_v10 }
 0x72a   : > { %v1470_v17 = vmul.f32 %v1468_v44, %v1445_v33  ;;  %v1463_v28 = vmul.f32 1.0614054, %v1460_v52 }
 0x72c   : > { %v1472_v24 = vadd.f32 -0.28449672, %v1470_v17  ;;  %v1465_v39 = vadd.f32 -1.4531521, %v1463_v28 }
 0x72e   : > { %v1474_v0 = vmul.f32 %v1472_v24, %v1445_v33  ;;  %v1467_v47 = vmul.f32 %v1465_v39, %v1460_v52 }
 0x730   : > { %v1476_v12 = vadd.f32 0.2548296, %v1474_v0  ;;  %v1469_v51 = vadd.f32 1.4214138, %v1467_v47 }
 0x732   : > { %v1478_v36 = vmul.f32 %v1476_v12, %v1445_v33  ;;  %v1471_v41 = vmul.f32 %v1469_v51, %v1460_v52 }
 0x734   : > { %v1488_v62 = vmul.f32 %v1872_v48, %v1478_v36  ;;  %v1473_v37 = vadd.f32 -0.28449672, %v1471_v41 }
 0x736   : > { %v1490_v15 = vsub.f32 1.0, %v1488_v62  ;;  %v1475_v18 = vmul.f32 %v1473_v37, %v1460_v52 }
 0x738   : > { %v1477_v58 = vadd.f32 0.2548296, %v1475_v18  ;;  %v1494_v13 = vsub.f32 0.0, %v1490_v15 }
 0x73a   : > { %v1479_v19 = vmul.f32 %v1477_v58, %v1460_v52  ;;  %v1496_v1 = vsel %vm1492_vm13, %v1494_v13, %v1490_v15 }
 0x73b   : > { %v1498_v54 = vadd.f32 1.0, %v1496_v1 }
 0x73c   : > { %v1489_v42 = vmul.f32 %v1874_v6, %v1479_v19 }
 0x73d   : > { %v1500_v33 = vmul.f32 %v1498_v54, %v1422_v3 }
 0x73e   : > { %v1491_v14 = vsub.f32 1.0, %v1489_v42 }
 0x740   : > { %v1495_v50 = vsub.f32 0.0, %v1491_v14 }
 0x742   : > { %v1497_v5 = vsel %vm1493_vm14, %v1495_v50, %v1491_v14 }
 0x743   : > { %v1499_v59 = vadd.f32 1.0, %v1497_v5 }
 0x745   : > { %v1501_v56 = vmul.f32 %v1499_v59, %v1423_v63 }
 0x747   : > { %v1502_v23 = vpack.c.bf16 %v1501_v56, %v1500_v33 }
 0x749   : > { %1575 = vmatmul.bf16.vlgmr.msra.gmra.mxu0 %v1502_v23 }
 0x7c6   : > { %v1576_v45 = vpop.f32.mrf.mxu0 }
 0x7c7   : > { %v1581_v57 = vadd.f32 %v1576_v45, %v2499_v22 }
 0x7c9   : > { %v1587_v43 = vadd.f32 %v1840_v30, %v1581_v57 }
 0x7cb   : > { %1589 = vst.msk [vmem:[%s548_s20] sm:$0xff] %vm554_vm0, %v1587_v43 }
 0x7ce   : > { %v1578_v16 = vpop.f32.mrf.mxu0 }
 0x7cf   : > { %v1582_v31 = vadd.f32 %v1578_v16, %v2504_v11 }
 0x7d1   : > { %v1588_v44 = vadd.f32 %v1840_v30, %v1582_v31 }
 0x7d3   : > { %1590 = vst.msk [vmem:[%s548_s20 + $0x8] sm:$0xff] %vm554_vm0, %v1588_v44 }
 0x7d4 PF: > { %s27_s24 = sadd.s32 1, %s1883_s24  }
 0x7d5   : > { %p24_p4 = scmp.ge.s32.totalorder %s27_s24, 4  }
 0x7d7   :  { %26 = sbr.rel (!%p24_p4) target bundleno = 3 (0x3), region = 126 }

// kernel: _lambda_.12
= control target key start
LH: loop header
LB: loop body
LE: loop exit
PB: predicated region body
PF: predicated region fallthrough
CT: control target
= control target key end

     0   :  { %s681_s18 = smov 0   ;;  %s768_s0 = inlined_call_operand.vmem [shape: f32[2,4,288], index: 0, kind: input, shape index: {}]   ;;  %s769_s1 = inlined_call_operand.vmem [shape: bf16[288,64], index: 1, kind: input, shape index: {}]   ;;  %s770_s2 = inlined_call_operand.vmem [shape: f32[1,64], index: 2, kind: input, shape index: {}]   ;;  %s771_s3 = inlined_call_operand.vmem [shape: f32[1,64], index: 3, kind: input, shape index: {}]   ;;  %s772_s4 = inlined_call_operand.vmem [shape: f32[1,64], index: 4, kind: input, shape index: {}]   ;;  %s773_s5 = inlined_call_operand.vmem [shape: f32[2,4,64], index: 5, kind: output, shape index: {}]  }
   0x1 LB: > { %s525_s19 = sadd.s32 4294967295, %s648_s18   ;;  %p529_p0 = scmp.ge.s32.totalorder %s648_s18, 1  ;;  %s648_s18 = sphi %s681_s18, %s15_s18  }
   0x2   : > { %p187_p1 = scmp.lt.s32.totalorder %s648_s18, 3 }
   0x4   : > { %p188_p2 = pnand %p529_p0, %p187_p1 }
   0x5   : > { %p214_p3 = scmp.lt.s32.totalorder (!%p188_p2), %s525_s19, 1 }
   0x6   : > { %191 = sbr.rel (%p188_p2) target bundleno = 444 (0x1bc), region = 40 }
   0xb   : > { %v614_v0 = vld [vmem:[%s769_s1 + $0x38] sm:$0xff]  ;;  %v613_v2 = vld [vmem:[%s769_s1 + $0x30] sm:$0xff]  ;;  %v624_v4 = vld [vmem:[%s769_s1 + $0x88] sm:$0xff]  ;;  %s775_s19 = smov (!%p214_p3, %s525_s19), 1  ;;  %vm388_vm0 = vcmask 261120   ;;  %vm433_vm1 = vcmask 519168  }
   0xc   : > { %v622_v1 = vld [vmem:[%s769_s1 + $0x78] sm:$0xff]  ;;  %392 = vmatpush.bf16.msra.mxu0 %v614_v0  ;;  %v621_v3 = vld [vmem:[%s769_s1 + $0x70] sm:$0xff]  ;;  %424 = vmatpush.bf16.msra.mxu2 %v624_v4  ;;  %v623_v5 = vld [vmem:[%s769_s1 + $0x80] sm:$0xff]  ;;  %s625_s7 = smul.u32 12, %s775_s19  ;;  %v650_v37 = vmov 64.0   ;;  %s531_s16 = sshll.u32 %s775_s19, 2 }
   0xd   : > { %405 = vmatpush.bf16.msra.mxu1 %v622_v1  ;;  %v612_v6 = vld [vmem:[%s769_s1 + $0x28] sm:$0xff]  ;;  %v611_v10 = vld [vmem:[%s769_s1 + $0x20] sm:$0xff]  ;;  %v610_v12 = vld [vmem:[%s769_s1 + $0x18] sm:$0xff]  ;;  %638 = vrcp.f32 %v650_v37  ;;  %s222_s23 = scalar_lea.vmem %s773_s5, %s531_s16 }
   0xe   : > { %v620_v7 = vld [vmem:[%s769_s1 + $0x68] sm:$0xff]  ;;  %s218_s14 = scalar_lea.vmem %s768_s0, %s625_s7  ;;  %v619_v11 = vld [vmem:[%s769_s1 + $0x60] sm:$0xff]  ;;  %v618_v13 = vld [vmem:[%s769_s1 + $0x58] sm:$0xff] }
   0xf   : > { %v225_v8 = vld [vmem:[%s218_s14 + $0x8] sm:$0xf]  ;;  %v224_v9 = vld [vmem:[%s218_s14] sm:$0xff]  ;;  %v609_v16 = vld [vmem:[%s769_s1 + $0x10] sm:$0xff] }
  0x10   : > { %393 = vmatpush.bf16.msra.mxu0 %v613_v2  ;;  %425 = vmatpush.bf16.msra.mxu2 %v623_v5  ;;  %230 = vst [vmem:[#allocation1 + $0x10] ss:$2 sm:$0xff] %v225_v8  ;;  %v617_v17 = vld [vmem:[%s769_s1 + $0x50] sm:$0xff]  ;;  %v608_v18 = vld [vmem:[%s769_s1 + $0x8] sm:$0xff]  ;;  %v607_v20 = vld [vmem:[%s769_s1] sm:$0xff] }
  0x11   : > { %406 = vmatpush.bf16.msra.mxu1 %v621_v3  ;;  %228 = vst [vmem:[#allocation1] ss:$2 sm:$0xff] %v224_v9  ;;  %v616_v19 = vld [vmem:[%s769_s1 + $0x48] sm:$0xff]  ;;  %v615_v21 = vld [vmem:[%s769_s1 + $0x40] sm:$0xff] }
  0x12   : > { %v635_v27 = vld [vmem:[%s770_s2] ss:$0 sm:$0xff] }
  0x13   : > { %v639_v38 = vpop.eup %638  ;;  %v636_v58 = vld [vmem:[%s771_s3] ss:$0 sm:$0xff] }
  0x14   : > { %394 = vmatpush.bf16.msra.mxu0 %v612_v6  ;;  %v438_v39 = vmul.f32 64.0, %v639_v38  ;;  %vm442_vm2 = vweird.f32 %v639_v38  ;;  %v637_v60 = vld [vmem:[%s772_s4] ss:$0 sm:$0xff] }
  0x15   : > { %407 = vmatpush.bf16.msra.mxu1 %v620_v7 }
  0x16   : > { %v439_v40 = vsub.f32 1.0, %v438_v39 }
  0x17   : > { %v233_v14 = vld.sshfl [vmem:[#allocation1 + $0x10] sm:$0xff pattern:$0x75316420] }
  0x18   : > { %395 = vmatpush.bf16.msra.mxu0 %v611_v10  ;;  %v239_v15 = vpack.c.bf16 %v233_v14, %v233_v14  ;;  %v231_v22 = vld.sshfl [vmem:[#allocation1] sm:$0xff pattern:$0x75316420]  ;;  %v232_v23 = vld.sshfl [vmem:[#allocation1 + $0x8] sm:$0xff pattern:$0x75316420]  ;;  %v440_v41 = vmul.f32 %v639_v38, %v439_v40 }
  0x19   : > { %408 = vmatpush.bf16.msra.mxu1 %v619_v11  ;;  %v237_v24 = vpack.c.bf16 %v231_v22, %v231_v22  ;;  %v238_v25 = vpack.c.bf16 %v232_v23, %v232_v23 }
  0x1a   : > { %604 = vmatmul.msk.bf16.vlgmr.msra.gmra.mxu2 %vm388_vm0, %v239_v15  ;;  %v441_v42 = vadd.f32 %v639_v38, %v440_v41 }
  0x1c   : > { %396 = vmatpush.bf16.msra.mxu0 %v610_v12  ;;  %v443_v43 = vsel %vm442_vm2, %v639_v38, %v441_v42 }
  0x1d   : > { %409 = vmatpush.bf16.msra.mxu1 %v618_v13 }
  0x20   : > { %397 = vmatpush.bf16.msra.mxu0 %v609_v16 }
  0x21   : > { %410 = vmatpush.bf16.msra.mxu1 %v617_v17 }
  0x24   : > { %398 = vmatpush.bf16.msra.mxu0 %v608_v18 }
  0x25   : > { %411 = vmatpush.bf16.msra.mxu1 %v616_v19 }
  0x28   : > { %399 = vmatpush.bf16.msra.mxu0 %v607_v20 }
  0x29   : > { %412 = vmatpush.bf16.msra.mxu1 %v615_v21 }
  0x2b   : > { %400 = vmatmul.bf16.vlgmr.msra.gmra.mxu0 %v237_v24 }
  0x2c   : > { %413 = vmatmul.bf16.vlgmr.msra.gmra.mxu1 %v238_v25 }
  0x9d   : > { %v427_v26 = vpop.f32.mrf.mxu2 }
  0xa5   : > { %v429_v31 = vpop.f32.mrf.mxu2 }
  0xa8   : > { %v401_v28 = vpop.f32.mrf.mxu0 }
  0xa9   : > { %v414_v29 = vpop.f32.mrf.mxu1  ;;  %v402_v30 = vadd.f32 %v635_v27, %v401_v28 }
  0xab   : > { %v415_v32 = vadd.f32 %v414_v29, %v402_v30 }
  0xad   : > { %v428_v33 = vadd.f32 %v427_v26, %v415_v32 }
  0xaf   : > { %v434_v34 = vsel %vm433_vm1, %v428_v33, 0.0 }
  0xb0   : > { %v403_v35 = vpop.f32.mrf.mxu0  ;;  %435 = vadd.xlane.f32.xlu0 %v434_v34 }
  0xb1   : > { %v416_v36 = vpop.f32.mrf.mxu1 }
 0x123   : > { %v436_v44 = vpop.xlane.xlu0 %435 }
 0x124   : > { %v444_v45 = vmul.f32 %v443_v43, %v436_v44 }
 0x126   : > { %v445_v46 = vsub.f32 %v428_v33, %v444_v45 }
 0x128   : > { %v446_v47 = vmul.f32 %v445_v46, %v445_v46 }
 0x12a   : > { %v447_v48 = vsel %vm433_vm1, %v446_v47, 0.0 }
 0x12b   : > { %448 = vadd.xlane.f32.xlu0 %v447_v48 }
 0x19e   : > { %v449_v49 = vpop.xlane.xlu0 %448 }
 0x19f   : > { %v450_v50 = vmul.f32 %v449_v49, %v443_v43 }
 0x1a1   : > { %v451_v51 = vadd.f32 1e-05, %v450_v50 }
 0x1a3   : > { %640 = vrsqrt.f32 %v451_v51  ;;  %vm458_vm4 = vweird.f32 %v451_v51 }
 0x1a9   : > { %v641_v52 = vpop.eup %640 }
 0x1aa   : > { %v453_v53 = vmul.f32 %v641_v52, %v451_v51  ;;  %vm459_vm3 = vweird.f32 %v641_v52 }
 0x1ab   : > { %vm460_vm5 = vmor %vm458_vm4, %vm459_vm3 }
 0x1ac   : > { %v454_v54 = vmul.f32 %v641_v52, %v453_v53 }
 0x1ae   : > { %v455_v55 = vmul.f32 0.5, %v454_v54 }
 0x1b0   : > { %v456_v56 = vsub.f32 1.5, %v455_v55 }
 0x1b2   : > { %v457_v57 = vmul.f32 %v641_v52, %v456_v56 }
 0x1b4   : > { %v461_v59 = vsel %vm460_vm5, %v641_v52, %v457_v57 }
 0x1b5   : > { %v462_v61 = vmul.f32 %v461_v59, %v445_v46 }
 0x1b7   : > { %v466_v62 = vmul.f32 %v636_v58, %v462_v61 }
 0x1b9   : > { %v470_v63 = vadd.f32 %v637_v60, %v466_v62 }
 0x1bb   : > { %471 = vst.msk [vmem:[%s222_s23] sm:$0xf] %vm433_vm1, %v470_v63 }
 0x1bc PF: > { %s15_s18 = sadd.s32 1, %s648_s18  }
 0x1bd   : > { %p12_p4 = scmp.ge.s32.totalorder %s15_s18, 4  }
 0x1bf   :  { %14 = sbr.rel (!%p12_p4) target bundleno = 1 (0x1), region = 71 }

// kernel: _lambda_.15
= control target key start
LH: loop header
LB: loop body
LE: loop exit
PB: predicated region body
PF: predicated region fallthrough
CT: control target
= control target key end

     0   :  { %vm25_vm0 = vcmask 517120   ;;  %s252_s0 = inlined_call_operand.vmem [shape: f32[2,64], index: 0, kind: input, shape index: {}]   ;;  %s253_s1 = inlined_call_operand.vmem [shape: f32[1,64], index: 1, kind: input, shape index: {}]   ;;  %s254_s2 = inlined_call_operand.vmem [shape: f32[1,64], index: 2, kind: input, shape index: {}]   ;;  %s255_s3 = inlined_call_operand.vmem [shape: bf16[64,10], index: 3, kind: input, shape index: {}]   ;;  %s256_s4 = inlined_call_operand.vmem [shape: f32[1,10], index: 4, kind: input, shape index: {}]   ;;  %s257_s5 = inlined_call_operand.hbm [shape: f32[2,10], index: 5, kind: output, shape index: {}]  }
   0x1   :  { %v22_v0 = vld [vmem:[%s252_s0] sm:$0x3] }
   0x2   :  { %v26_v1 = vsel %vm25_vm0, %v22_v0, 0.0 }
   0x3   :  { %27 = vadd.xlane.f32.xlu0 %v26_v1 }
   0x4   :  { %10 = vsyncpa [#allocation3], 0  ;;  %v191_v2 = vmov 64.0   ;;  %v155_v14 = vld [vmem:[%s255_s3 + $0x18] sm:$0xff]  ;;  %v154_v15 = vld [vmem:[%s255_s3 + $0x10] sm:$0xff]  ;;  %vm100_vm5 = vcmask 523264  }
   0x5   :  { %161 = vrcp.f32 %v191_v2  ;;  %108 = vmatpush.bf16.msra.mxu0 %v155_v14  ;;  %v153_v16 = vld [vmem:[%s255_s3 + $0x8] sm:$0xff]  ;;  %v152_v17 = vld [vmem:[%s255_s3] sm:$0xff]  ;;  %s192_s7 = smov [#allocation2]   ;;  %vm117_vm6 = vcmask 74752  }
   0x6   :  { %v158_v27 = vld [vmem:[%s253_s1] ss:$0 sm:$0xff]  ;;  %s124_s8 = sshll.u32 %s192_s7, 4  ;;  %s126_s1 = sshll.u32 %s257_s5, 4  ;;  %s125_s8 = int_to_ptr.vmem [resolvable:$true] %s124_s8  ;;  %s127_s1 = int_to_ptr.hbm [resolvable:$true] %s126_s1 }
   0x7   :  { %v159_v30 = vld [vmem:[%s254_s2] ss:$0 sm:$0xff] }
   0x8   :  { %v160_v34 = vld [vmem:[%s256_s4] ss:$0 sm:$0xff] }
   0x9   :  { %109 = vmatpush.bf16.msra.mxu0 %v154_v15 }
   0xb   :  { %v162_v3 = vpop.eup %161 }
   0xc   :  { %v30_v4 = vmul.f32 64.0, %v162_v3  ;;  %vm34_vm1 = vweird.f32 %v162_v3 }
   0xd   :  { %110 = vmatpush.bf16.msra.mxu0 %v153_v16 }
   0xe   :  { %v31_v5 = vsub.f32 1.0, %v30_v4 }
  0x10   :  { %v32_v6 = vmul.f32 %v162_v3, %v31_v5 }
  0x11   :  { %111 = vmatpush.bf16.msra.mxu0 %v152_v17 }
  0x12   :  { %v33_v7 = vadd.f32 %v162_v3, %v32_v6 }
  0x14   :  { %v35_v8 = vsel %vm34_vm1, %v162_v3, %v33_v7 }
  0x76   :  { %v28_v9 = vpop.xlane.xlu0 %27 }
  0x77   :  { %v36_v10 = vmul.f32 %v35_v8, %v28_v9 }
  0x79   :  { %v37_v11 = vsub.f32 %v22_v0, %v36_v10 }
  0x7b   :  { %v38_v12 = vmul.f32 %v37_v11, %v37_v11 }
  0x7d   :  { %v39_v13 = vsel %vm25_vm0, %v38_v12, 0.0 }
  0x7e   :  { %40 = vadd.xlane.f32.xlu0 %v39_v13 }
  0xf1   :  { %v41_v18 = vpop.xlane.xlu0 %40 }
  0xf2   :  { %v42_v19 = vmul.f32 %v41_v18, %v35_v8 }
  0xf4   :  { %v43_v20 = vadd.f32 1e-05, %v42_v19 }
  0xf6   :  { %163 = vrsqrt.f32 %v43_v20  ;;  %vm50_vm3 = vweird.f32 %v43_v20 }
  0xfc   :  { %v164_v21 = vpop.eup %163 }
  0xfd   :  { %v45_v22 = vmul.f32 %v164_v21, %v43_v20  ;;  %vm51_vm2 = vweird.f32 %v164_v21 }
  0xfe   :  { %vm52_vm4 = vmor %vm50_vm3, %vm51_vm2 }
  0xff   :  { %v46_v23 = vmul.f32 %v164_v21, %v45_v22 }
 0x101   :  { %v47_v24 = vmul.f32 0.5, %v46_v23 }
 0x103   :  { %v48_v25 = vsub.f32 1.5, %v47_v24 }
 0x105   :  { %v49_v26 = vmul.f32 %v164_v21, %v48_v25 }
 0x107   :  { %v53_v28 = vsel %vm52_vm4, %v164_v21, %v49_v26 }
 0x108   :  { %v54_v29 = vmul.f32 %v53_v28, %v37_v11 }
 0x10a   :  { %v58_v31 = vmul.f32 %v158_v27, %v54_v29 }
 0x10c   :  { %v62_v32 = vadd.f32 %v159_v30, %v58_v31 }
 0x10e   :  { %v63_v33 = vpack.c.bf16 %v62_v32, %v62_v32 }
 0x110   :  { %151 = vmatmul.msk.bf16.vlgmr.msra.gmra.mxu0 %vm100_vm5, %v63_v33 }
 0x18d   :  { %v113_v35 = vpop.f32.mrf.mxu0 }
 0x18e   :  { %v114_v36 = vadd.f32 %v160_v34, %v113_v35 }
 0x190   :  { %118 = vst.msk [vmem:[#allocation2] sm:$0x3] %vm117_vm6, %v114_v36 }
 0x191   :  { %129 = dma.vmem_to_hbm [thread:$0]  %s125_s8, 32, %s127_s1, [#allocation3]  }
 0x195   :  { %v115_v37 = vpop.f32.mrf.mxu0 }
 0x196   :  { %189 = dma.done.wait [#allocation3], 32  }
 0x197   :  { %190 = vsyncadd [#allocation3], 4294967264 }
 0x198   :  { %134 = vsyncpa [#allocation3], 1 }

// kernel: _lambda_.13
= control target key start
LH: loop header
LB: loop body
LE: loop exit
PB: predicated region body
PF: predicated region fallthrough
CT: control target
= control target key end

     0   :  { %s2209_s24 = smov 0   ;;  %s2728_s0 = inlined_call_operand.vmem [shape: f32[2,5,64], index: 0, kind: input, shape index: {}]   ;;  %s2729_s1 = inlined_call_operand.vmem [shape: f32[1,64], index: 1, kind: input, shape index: {}]   ;;  %s2730_s2 = inlined_call_operand.vmem [shape: f32[1,64], index: 2, kind: input, shape index: {}]   ;;  %s2731_s3 = inlined_call_operand.vmem [shape: f32[3,9,64], index: 3, kind: input, shape index: {}]   ;;  %s2732_s4 = inlined_call_operand.vmem [shape: f32[3,64], index: 4, kind: input, shape index: {}]   ;;  %s2733_s5 = inlined_call_operand.vmem [shape: f32[3,64], index: 5, kind: input, shape index: {}]   ;;  %s2734_s6 = inlined_call_operand.vmem [shape: bf16[1,4], index: 6, kind: input, shape index: {}]   ;;  %s2735_s7 = inlined_call_operand.vmem [shape: bf16[3,64,64], index: 7, kind: input, shape index: {}]   ;;  %s2736_s8 = inlined_call_operand.vmem [shape: f32[3,64], index: 8, kind: input, shape index: {}]   ;;  %s2737_s9 = inlined_call_operand.vmem [shape: bf16[64,64], index: 9, kind: input, shape index: {}]   ;;  %s2738_s10 = inlined_call_operand.vmem [shape: f32[1,64], index: 10, kind: input, shape index: {}]   ;;  %s2739_s11 = inlined_call_operand.vmem [shape: f32[1,64], index: 11, kind: input, shape index: {}]   ;;  %s2740_s12 = inlined_call_operand.vmem [shape: f32[1,64], index: 12, kind: input, shape index: {}]   ;;  %s2741_s13 = inlined_call_operand.vmem [shape: bf16[64,256], index: 13, kind: input, shape index: {}]   ;;  %s2742_s14 = inlined_call_operand.vmem [shape: f32[1,256], index: 14, kind: input, shape index: {}]   ;;  %s2743_s15 = inlined_call_operand.vmem [shape: bf16[256,64], index: 15, kind: input, shape index: {}]   ;;  %s2744_s16 = inlined_call_operand.vmem [shape: f32[1,64], index: 16, kind: input, shape index: {}]   ;;  %s2745_s17 = inlined_call_operand.vmem [shape: f32[2,5,64], index: 17, kind: output, shape index: {}]  }
   0x1   :  { %2746 = sst [smem:[#allocation8_spill]] %s2728_s0 }
   0x2   :  { %2747 = sst [smem:[#allocation9_spill]] %s2729_s1 }
   0x3 LB: > { %s1759_s25 = sadd.s32 4294967295, %s2112_s24   ;;  %p1763_p0 = scmp.ge.s32.totalorder %s2112_s24, 1  ;;  %s2112_s24 = sphi %s2209_s24, %s27_s24  }
   0x4   : > { %p486_p1 = scmp.lt.s32.totalorder %s2112_s24, 3 }
   0x6   : > { %p487_p2 = pnand %p1763_p0, %p486_p1 }
   0x7   : > { %p536_p3 = scmp.lt.s32.totalorder (!%p487_p2), %s1759_s25, 1  ;;  %s2748_s29 = sld [smem:[#allocation8_spill]] (!%p487_p2) }
   0x8   : > { %490 = sbr.rel (%p487_p2) target bundleno = 2392 (0x958), region = 88  ;;  %s2116_s23 = smov (!%p487_p2), 80  }
   0x9   : > { %s2117_s27 = smov (!%p487_p2), 112   ;;  %s2118_s28 = smov (!%p487_p2), 96  }
   0xd   : > { %s2751_s25 = smov (!%p536_p3, %s1759_s25), 1  ;;  %vm548_vm0 = vcmask 520192   ;;  %v2114_v2 = vmov 64.0   ;;  %vm586_vm1 = vcmask 519168   ;;  %v2115_v3 = vmov 0.0   ;;  %v1984_v18 = vld [vmem:[%s2735_s7 + $0x18] sm:$0xff] }
   0xe   : > { %s1764_s26 = sshll.u32 %s2751_s25, 3  ;;  %2076 = vrcp.f32 %v2114_v2  ;;  %587 = vst.msk [vmem:[#allocation2] sm:$0xf] %vm586_vm1, %v2115_v3  ;;  %896 = vmatpush.bf16.msra.mxu2 %v1984_v18  ;;  %v1983_v19 = vld [vmem:[%s2735_s7 + $0x10] sm:$0xff]  ;;  %v1982_v20 = vld [vmem:[%s2735_s7 + $0x8] sm:$0xff]  ;;  %v1981_v24 = vld [vmem:[%s2735_s7] sm:$0xff] }
   0xf   : > { %s539_s0 = scalar_lea.vmem %s2748_s29, %s1764_s26  ;;  %588 = vst.msk [vmem:[#allocation2 + $0x4] sm:$0xf] %vm586_vm1, %v2115_v3  ;;  %s2749_s29 = sld [smem:[#allocation9_spill]]  ;;  %v2035_v29 = vld [vmem:[%s2730_s2] ss:$0 sm:$0xff]  ;;  %vm592_vm6 = vcmask 518145  }
  0x10   : > { %v2225_v0 = vld [vmem:[%s539_s0] sm:$0x1f]  ;;  %589 = vst.msk [vmem:[#allocation2 + $0x8] sm:$0xf] %vm586_vm1, %v2115_v3  ;;  %v2047_v35 = vld [vmem:[%s2731_s3 + $0x10] ss:$0 sm:$0xff] }
  0x11   : > { %v549_v1 = vsel %vm548_vm0, %v2225_v0, 0.0  ;;  %590 = vst.msk [vmem:[#allocation2 + $0xc] sm:$0xf] %vm586_vm1, %v2115_v3  ;;  %v2036_v31 = vld [vmem:[%s2731_s3] ss:$0 sm:$0xff]  ;;  %vm595_vm7 = vcmask 520195  }
  0x12   : > { %550 = vadd.xlane.f32.xlu0 %v549_v1  ;;  %897 = vmatpush.bf16.msra.mxu2 %v1983_v19  ;;  %v2037_v32 = vld [vmem:[%s2731_s3 + $0x1] ss:$0 sm:$0xff]  ;;  %v2265_v36 = vld [vmem:[%s2731_s3 + $0x11] ss:$0 sm:$0xff]  ;;  %v2270_v38 = vld [vmem:[%s2731_s3 + $0x20] ss:$0 sm:$0xff] }
  0x13   : > { %v2275_v39 = vld [vmem:[%s2731_s3 + $0x21] ss:$0 sm:$0xff]  ;;  %v2038_v44 = vld [vmem:[%s2731_s3 + $0x2] ss:$0 sm:$0xff]  ;;  %v2284_v47 = vld [vmem:[%s2731_s3 + $0x12] ss:$0 sm:$0xff] }
  0x14   : > { %v2077_v4 = vpop.eup %2076  ;;  %vm828_vm8 = vcmask 516096   ;;  %v2291_v51 = vld [vmem:[%s2731_s3 + $0x22] ss:$0 sm:$0xff]  ;;  %v2042_v54 = vld [vmem:[%s2731_s3 + $0x6] ss:$0 sm:$0xff]  ;;  %vm797_vm9 = vcmask 517120  }
  0x15   : > { %v553_v5 = vmul.f32 64.0, %v2077_v4  ;;  %vm557_vm2 = vweird.f32 %v2077_v4  ;;  %v2034_v28 = vld [vmem:[%s2749_s29] ss:$0 sm:$0xff]  ;;  %v613_v37 = vld [vmem:[#allocation2 + $0x1] sm:$0x3]  ;;  %vm888_vm10 = vcmask 523264   ;;  %s543_s29 = scalar_lea.vmem %s2745_s17, %s1764_s26 }
  0x16   : > { %898 = vmatpush.bf16.msra.mxu2 %v1982_v20  ;;  %v597_v34 = vld [vmem:[#allocation2] sm:$0x3]  ;;  %v619_v43 = vmul.f32 %v2037_v32, %v613_v37  ;;  %v624_v46 = vmul.f32 %v2265_v36, %v613_v37  ;;  %v633_v48 = vld [vmem:[#allocation2 + $0x2] sm:$0x3]  ;;  %v629_v50 = vmul.f32 %v2275_v39, %v613_v37  ;;  %v2040_v62 = vld [vmem:[%s2731_s3 + $0x4] ss:$0 sm:$0xff] }
  0x17   : > { %v554_v6 = vsub.f32 1.0, %v553_v5  ;;  %v605_v41 = vmul.f32 %v2036_v31, %v597_v34  ;;  %v608_v45 = vmul.f32 %v2047_v35, %v597_v34  ;;  %v611_v49 = vmul.f32 %v2270_v38, %v597_v34  ;;  %v2039_v57 = vld [vmem:[%s2731_s3 + $0x3] ss:$0 sm:$0xff]  ;;  %v2043_v63 = vld [vmem:[%s2731_s3 + $0x7] ss:$0 sm:$0xff] }
  0x18   : > { %v639_v53 = vmul.f32 %v2038_v44, %v633_v48  ;;  %v644_v56 = vmul.f32 %v2284_v47, %v633_v48  ;;  %v714_v58 = vld [vmem:[#allocation2 + $0xc] sm:$0x3]  ;;  %v649_v61 = vmul.f32 %v2291_v51, %v633_v48  ;;  %v2312_v1 = vld [vmem:[#allocation2 + $0xe] sm:$0x3]  ;;  %v2041_v2 = vld [vmem:[%s2731_s3 + $0x5] ss:$0 sm:$0xff] }
  0x19   : > { %v555_v7 = vmul.f32 %v2077_v4, %v554_v6  ;;  %v621_v52 = vadd.f32 %v619_v43, %v605_v41  ;;  %v626_v55 = vadd.f32 %v624_v46, %v608_v45  ;;  %v2302_v59 = vld [vmem:[#allocation2 + $0xd] sm:$0x3]  ;;  %v631_v60 = vadd.f32 %v629_v50, %v611_v49  ;;  %v2044_v3 = vld [vmem:[%s2731_s3 + $0x8] ss:$0 sm:$0xff]  ;;  %v2328_v5 = vld [vmem:[%s2731_s3 + $0x17] ss:$0 sm:$0xff] }
  0x1a   : > { %899 = vmatpush.bf16.msra.mxu2 %v1981_v24  ;;  %v2358_v19 = vmul.f32 %v2328_v5, %v2302_v59  ;;  %v2052_v50 = vld [vmem:[%s2731_s3 + $0x15] ss:$0 sm:$0xff]  ;;  %vm811_vm11 = vcmask 1041408   ;;  %vm807_vm12 = vcmask 31744   ;;  %vm1013_vm13 = vcmask 130048  }
  0x1b   : > { %v556_v8 = vadd.f32 %v2077_v4, %v555_v7  ;;  %v641_v6 = vadd.f32 %v639_v53, %v621_v52  ;;  %v2330_v7 = vmul.f32 %v2042_v54, %v714_v58  ;;  %v2360_v20 = vadd.f32 %v649_v61, %v631_v60 }
  0x1c   : > { %vm1051_vm14 = vcmask 1040384   ;;  %vm1033_vm15 = vcmask 12288   ;;  %vm1047_vm1 = vcmask 15360  }
  0x1d   : > { %v2229_v9 = vsel %vm557_vm2, %v2077_v4, %v556_v8  ;;  %v2323_v4 = vld [vmem:[%s2731_s3 + $0x16] ss:$0 sm:$0xff]  ;;  %v2333_v8 = vmul.f32 %v2043_v63, %v2302_v59 }
  0x1e   : > { %v2354_v18 = vmul.f32 %v2323_v4, %v714_v58 }
  0x85   : > { %v551_v10 = vpop.xlane.xlu0 %550 }
  0x86   : > { %v559_v11 = vmul.f32 %v2229_v9, %v551_v10  ;;  %v646_v10 = vadd.f32 %v644_v56, %v626_v55 }
  0x88   : > { %v560_v12 = vsub.f32 %v2225_v0, %v559_v11  ;;  %v2050_v11 = vld [vmem:[%s2731_s3 + $0x13] ss:$0 sm:$0xff] }
  0x8a   : > { %v561_v13 = vmul.f32 %v560_v12, %v560_v12 }
  0x8c   : > { %v562_v14 = vsel %vm548_vm0, %v561_v13, 0.0  ;;  %v2346_v13 = vld [vmem:[%s2731_s3 + $0x26] ss:$0 sm:$0xff] }
  0x8d   : > { %563 = vadd.xlane.f32.xlu0 %v562_v14 }
 0x100   : > { %v564_v15 = vpop.xlane.xlu0 %563 }
 0x101   : > { %v565_v16 = vmul.f32 %v564_v15, %v2229_v9 }
 0x103   : > { %v566_v17 = vadd.f32 1e-05, %v565_v16 }
 0x105   : > { %2078 = vrsqrt.f32 %v566_v17  ;;  %vm573_vm4 = vweird.f32 %v566_v17 }
 0x10b   : > { %v2079_v21 = vpop.eup %2078 }
 0x10c   : > { %v568_v22 = vmul.f32 %v2079_v21, %v566_v17  ;;  %vm574_vm3 = vweird.f32 %v2079_v21  ;;  %v2351_v17 = vmul.f32 %v2044_v3, %v2312_v1 }
 0x10d   : > { %vm575_vm5 = vmor %vm573_vm4, %vm574_vm3 }
 0x10e   : > { %v569_v23 = vmul.f32 %v2079_v21, %v568_v22 }
 0x110   : > { %v570_v25 = vmul.f32 0.5, %v569_v23 }
 0x112   : > { %v571_v26 = vsub.f32 1.5, %v570_v25 }
 0x114   : > { %v572_v27 = vmul.f32 %v2079_v21, %v571_v26 }
 0x116   : > { %v576_v30 = vsel %vm575_vm5, %v2079_v21, %v572_v27  ;;  %v2051_v27 = vld [vmem:[%s2731_s3 + $0x14] ss:$0 sm:$0xff] }
 0x117   : > { %v577_v33 = vmul.f32 %v576_v30, %v560_v12  ;;  %v2341_v12 = vld [vmem:[%s2731_s3 + $0x18] ss:$0 sm:$0xff] }
 0x119   : > { %v581_v40 = vmul.f32 %v2034_v28, %v577_v33  ;;  %v2371_v28 = vmul.f32 %v2341_v12, %v2312_v1 }
 0x11b   : > { %v585_v42 = vadd.f32 %v2035_v29, %v581_v40 }
 0x11d   : > { %593 = vst.msk [vmem:[#allocation2 + $0x4] sm:$0x6] %vm592_vm6, %v585_v42 }
 0x11e   : > { %596 = vst.msk [vmem:[#allocation2 + $0x6] sm:$0x18] %vm595_vm7, %v585_v42 }
 0x11f   : > { %849 = vst.msk [vmem:[#allocation3] sm:$0x1] %vm828_vm8, %v585_v42 }
 0x120   : > { %850 = vst.msk [vmem:[#allocation4] sm:$0x1] %vm828_vm8, %v585_v42 }
 0x121   : > { %851 = vst.msk [vmem:[#allocation5] sm:$0x1] %vm828_vm8, %v585_v42 }
 0x124   : > { %v598_v14 = vld [vmem:[#allocation2 + $0x4] sm:$0x3]  ;;  %v2348_v16 = vld [vmem:[#allocation2 + $0x6] sm:$0x3] }
 0x125   : > { %v614_v15 = vld [vmem:[#allocation2 + $0x5] sm:$0x3]  ;;  %v606_v21 = vmul.f32 %v2036_v31, %v598_v14  ;;  %v2362_v24 = vld [vmem:[#allocation2 + $0x8] sm:$0x3]  ;;  %v609_v26 = vmul.f32 %v2047_v35, %v598_v14  ;;  %v640_v29 = vmul.f32 %v2038_v44, %v2348_v16  ;;  %v2382_v35 = vmul.f32 %v2346_v13, %v714_v58  ;;  %v2391_v45 = vld [vmem:[#allocation2 + $0xa] sm:$0x3] }
 0x126   : > { %v620_v22 = vmul.f32 %v2037_v32, %v614_v15  ;;  %v653_v23 = vld [vmem:[#allocation2 + $0x4] sm:$0x3]  ;;  %v2374_v33 = vld [vmem:[#allocation2 + $0x9] sm:$0x3]  ;;  %v2376_v31 = vld [vmem:[#allocation2 + $0x6] sm:$0x3]  ;;  %v625_v34 = vmul.f32 %v2265_v36, %v614_v15  ;;  %v660_v40 = vmul.f32 %v2039_v57, %v2362_v24  ;;  %v645_v55 = vmul.f32 %v2284_v47, %v2348_v16 }
 0x127   : > { %v2364_v25 = vld [vmem:[#allocation2 + $0x5] sm:$0x3]  ;;  %v659_v30 = vmul.f32 %v2039_v57, %v653_v23  ;;  %v2378_v32 = vld [vmem:[#allocation2 + $0xa] sm:$0x3]  ;;  %v680_v42 = vmul.f32 %v2040_v62, %v2374_v33  ;;  %v2387_v43 = vld [vmem:[#allocation2 + $0x8] sm:$0x3]  ;;  %v699_v48 = vmul.f32 %v2041_v2, %v2376_v31  ;;  %v664_v56 = vmul.f32 %v2050_v11, %v653_v23 }
 0x128   : > { %v622_v37 = vadd.f32 %v620_v22, %v606_v21  ;;  %v679_v41 = vmul.f32 %v2040_v62, %v2364_v25  ;;  %v2389_v44 = vld [vmem:[#allocation2 + $0x9] sm:$0x3]  ;;  %v700_v36 = vmul.f32 %v2041_v2, %v2378_v32  ;;  %v719_v49 = vmul.f32 %v2042_v54, %v2387_v43 }
 0x129   : > { %v661_v46 = vadd.f32 %v659_v30, %v641_v6  ;;  %v627_v53 = vadd.f32 %v625_v34, %v609_v26  ;;  %v739_v58 = vmul.f32 %v2043_v63, %v2389_v44  ;;  %v759_v60 = vmul.f32 %v2044_v3, %v2391_v45  ;;  %v2061_v63 = vld [vmem:[%s2731_s3 + $0x23] ss:$0 sm:$0xff] }
 0x12a   : > { %v642_v52 = vadd.f32 %v640_v29, %v622_v37  ;;  %v665_v61 = vmul.f32 %v2050_v11, %v2362_v24  ;;  %v666_v54 = vadd.f32 %v664_v56, %v646_v10  ;;  %v684_v6 = vmul.f32 %v2051_v27, %v2364_v25 }
 0x12b   : > { %v681_v57 = vadd.f32 %v679_v41, %v661_v46  ;;  %v647_v2 = vadd.f32 %v645_v55, %v627_v53  ;;  %v685_v22 = vmul.f32 %v2051_v27, %v2374_v33  ;;  %v704_v26 = vmul.f32 %v2052_v50, %v2376_v31  ;;  %v2046_v53 = vld [vmem:[%s2733_s5] ss:$0 sm:$0xff] }
 0x12c   : > { %v662_v62 = vadd.f32 %v660_v40, %v642_v52  ;;  %v705_v47 = vmul.f32 %v2052_v50, %v2378_v32  ;;  %v686_v11 = vadd.f32 %v684_v6, %v666_v54  ;;  %v724_v10 = vmul.f32 %v2323_v4, %v2387_v43  ;;  %v2062_v40 = vld [vmem:[%s2731_s3 + $0x24] ss:$0 sm:$0xff]  ;;  %v2045_v4 = vld [vmem:[%s2732_s4] ss:$0 sm:$0xff]  ;;  %v2057_v54 = vld [vmem:[%s2733_s5 + $0x1] ss:$0 sm:$0xff] }
 0x12d   : > { %v701_v21 = vadd.f32 %v699_v48, %v681_v57  ;;  %v667_v3 = vadd.f32 %v665_v61, %v647_v2  ;;  %v744_v34 = vmul.f32 %v2328_v5, %v2389_v44  ;;  %v612_v27 = vmul.f32 %v2270_v38, %v598_v14  ;;  %v2063_v14 = vld [vmem:[%s2731_s3 + $0x25] ss:$0 sm:$0xff] }
 0x12e   : > { %v682_v29 = vadd.f32 %v680_v42, %v662_v62  ;;  %v630_v37 = vmul.f32 %v2275_v39, %v614_v15  ;;  %v706_v46 = vadd.f32 %v704_v26, %v686_v11  ;;  %v764_v48 = vmul.f32 %v2341_v12, %v2391_v45  ;;  %v2065_v62 = vld [vmem:[%s2731_s3 + $0x27] ss:$0 sm:$0xff]  ;;  %v2066_v26 = vld [vmem:[%s2731_s3 + $0x28] ss:$0 sm:$0xff] }
 0x12f   : > { %v721_v30 = vadd.f32 %v719_v49, %v701_v21  ;;  %v687_v42 = vadd.f32 %v685_v22, %v667_v3  ;;  %v650_v38 = vmul.f32 %v2291_v51, %v2348_v16  ;;  %v669_v39 = vmul.f32 %v2061_v63, %v653_v23  ;;  %v1988_v16 = vld [vmem:[%s2735_s7 + $0x38] sm:$0xff] }
 0x130   : > { %v702_v41 = vadd.f32 %v700_v36, %v682_v29  ;;  %v632_v5 = vadd.f32 %v630_v37, %v612_v27  ;;  %v726_v49 = vadd.f32 %v724_v10, %v706_v46  ;;  %v670_v12 = vmul.f32 %v2061_v63, %v2362_v24  ;;  %v2056_v24 = vld [vmem:[%s2732_s4 + $0x1] ss:$0 sm:$0xff]  ;;  %949 = vmatpush.bf16.msra.mxu3 %v1988_v16 }
 0x131   : > { %v741_v50 = vadd.f32 %v739_v58, %v721_v30  ;;  %v707_v36 = vadd.f32 %v705_v47, %v687_v42  ;;  %v671_v56 = vadd.f32 %v669_v39, %v2360_v20  ;;  %v689_v51 = vmul.f32 %v2062_v40, %v2364_v25 }
 0x132   : > { %v722_v15 = vadd.f32 %v2330_v7, %v702_v41  ;;  %v652_v55 = vadd.f32 %v650_v38, %v632_v5  ;;  %v746_v57 = vadd.f32 %v744_v34, %v726_v49  ;;  %v690_v58 = vmul.f32 %v2062_v40, %v2374_v33  ;;  %v804_v38 = vld [vmem:[%s2734_s6] sm:$0x1]  ;;  %v1987_v49 = vld [vmem:[%s2735_s7 + $0x30] sm:$0xff] }
 0x133   : > { %v761_v52 = vadd.f32 %v759_v60, %v741_v50  ;;  %v727_v23 = vadd.f32 %v2354_v18, %v707_v36  ;;  %v691_v20 = vadd.f32 %v689_v51, %v671_v56  ;;  %v709_v25 = vmul.f32 %v2063_v14, %v2376_v31  ;;  %v1989_v56 = vld [vmem:[%s2735_s7 + $0x40] sm:$0xff] }
 0x134   : > { %v742_v7 = vadd.f32 %v2333_v8, %v722_v15  ;;  %v672_v61 = vadd.f32 %v670_v12, %v652_v55  ;;  %v766_v2 = vadd.f32 %v764_v48, %v746_v57  ;;  %v710_v33 = vmul.f32 %v2063_v14, %v2378_v32  ;;  %v1992_v15 = vld [vmem:[%s2735_s7 + $0x58] sm:$0xff]  ;;  %v1991_v12 = vld [vmem:[%s2735_s7 + $0x50] sm:$0xff]  ;;  %950 = vmatpush.bf16.msra.mxu3 %v1987_v49  ;;  %v1985_v55 = vld [vmem:[%s2735_s7 + $0x20] sm:$0xff] }
 0x135   : > { %v775_v60 = vmul.f32 %v2045_v4, %v761_v52  ;;  %v747_v18 = vadd.f32 %v2358_v19, %v727_v23  ;;  %v711_v22 = vadd.f32 %v709_v25, %v691_v20  ;;  %v729_v31 = vmul.f32 %v2346_v13, %v2387_v43  ;;  %v1986_v52 = vld [vmem:[%s2735_s7 + $0x28] sm:$0xff]  ;;  %v2071_v25 = vld [vmem:[%s2736_s8 + $0x1] ss:$0 sm:$0xff] }
 0x136   : > { %v762_v8 = vadd.f32 %v2351_v17, %v742_v7  ;;  %v692_v21 = vadd.f32 %v690_v58, %v672_v61  ;;  %v783_v47 = vmul.f32 %v2056_v24, %v766_v2  ;;  %v749_v32 = vmul.f32 %v2065_v62, %v2389_v44 }
 0x137   : > { %v779_v6 = vadd.f32 %v2046_v53, %v775_v60  ;;  %v767_v19 = vadd.f32 %v2371_v28, %v747_v18  ;;  %v731_v29 = vadd.f32 %v729_v31, %v711_v22  ;;  %v750_v3 = vmul.f32 %v2065_v62, %v2302_v59  ;;  %v2067_v28 = vld [vmem:[%s2732_s4 + $0x2] ss:$0 sm:$0xff] }
 0x138   : > { %v776_v17 = vmul.f32 %v2045_v4, %v762_v8  ;;  %v712_v63 = vadd.f32 %v710_v33, %v692_v21  ;;  %v787_v30 = vadd.f32 %v2057_v54, %v783_v47  ;;  %v769_v34 = vmul.f32 %v2066_v26, %v2391_v45  ;;  %951 = vmatpush.bf16.msra.mxu3 %v1986_v52  ;;  %v2070_v62 = vld [vmem:[%s2736_s8 + $0x2] ss:$0 sm:$0xff]  ;;  %v2069_v33 = vld [vmem:[%s2736_s8] ss:$0 sm:$0xff] }
 0x139   : > { %798 = vst.msk [vmem:[#allocation3 + $0x1] sm:$0x3] %vm797_vm9, %v779_v6  ;;  %v784_v10 = vmul.f32 %v2056_v24, %v767_v19  ;;  %v751_v43 = vadd.f32 %v749_v32, %v731_v29  ;;  %v770_v27 = vmul.f32 %v2066_v26, %v2312_v1 }
 0x13a   : > { %v780_v11 = vadd.f32 %v2046_v53, %v776_v17  ;;  %v732_v13 = vadd.f32 %v2382_v35, %v712_v63  ;;  %799 = vst.msk [vmem:[#allocation6] sm:$0x3] %vm797_vm9, %v787_v30  ;;  %v2068_v35 = vld [vmem:[%s2733_s5 + $0x2] ss:$0 sm:$0xff]  ;;  %v1990_v53 = vld [vmem:[%s2735_s7 + $0x48] sm:$0xff] }
 0x13b   : > { %v788_v37 = vadd.f32 %v2057_v54, %v784_v10  ;;  %v771_v44 = vadd.f32 %v769_v34, %v751_v43 }
 0x13c   : > { %801 = vst.msk [vmem:[#allocation3 + $0x3] sm:$0x3] %vm797_vm9, %v780_v11  ;;  %v752_v59 = vadd.f32 %v750_v3, %v732_v13  ;;  %952 = vmatpush.bf16.msra.mxu3 %v1985_v55 }
 0x13d   : > { %802 = vst.msk [vmem:[#allocation6 + $0x2] sm:$0x3] %vm797_vm9, %v788_v37  ;;  %v791_v40 = vmul.f32 %v2067_v28, %v771_v44 }
 0x13e   : > { %v772_v45 = vadd.f32 %v770_v27, %v752_v59 }
 0x13f   : > { %v795_v41 = vadd.f32 %v2068_v35, %v791_v40 }
 0x140   : > { %v792_v1 = vmul.f32 %v2067_v28, %v772_v45 }
 0x141   : > { %800 = vst.msk [vmem:[#allocation7] sm:$0x3] %vm797_vm9, %v795_v41  ;;  %v1993_v41 = vld [vmem:[%s2737_s9] sm:$0xff] }
 0x142   : > { %v796_v46 = vadd.f32 %v2068_v35, %v792_v1 }
 0x143   : > { %v852_v42 = vld [vmem:[#allocation3] sm:$0x1f] }
 0x144   : > { %v853_v48 = vpack.c.bf16 %v852_v42, %v852_v42  ;;  %v805_v50 = vld [vmem:[#allocation6] sm:$0xf]  ;;  %803 = vst.msk [vmem:[#allocation7 + $0x2] sm:$0x3] %vm797_vm9, %v796_v46 }
 0x145   : > { %v806_v4 = vpack.c.bf16 %v805_v50, %v805_v50 }
 0x146   : > { %1802 = vmatmul.msk.bf16.vlgmr.msra.gmra.mxu2 %vm888_vm10, %v853_v48 }
 0x147   : > { %v813_v5 = vsel %vm811_vm11, %v806_v4, 0 }
 0x148   : > { %822 = vmatpush.bf16.msra.mxu0 %v813_v5 }
 0x14b   : > { %v830_v39 = vld [vmem:[#allocation7] sm:$0xf]  ;;  %1784 = vmatmul.msk.bf16.vlgmr.msra.gmra.mxu0 %vm807_vm12, %v804_v38 }
 0x14c   : > { %v831_v14 = vpack.c.bf16 %v830_v39, %v830_v39 }
 0x14e   : > { %v833_v36 = vsel %vm811_vm11, %v831_v14, 0 }
 0x14f   : > { %842 = vmatpush.bf16.msra.mxu1 %v833_v36 }
 0x152   : > { %1785 = vmatmul.msk.bf16.vlgmr.msra.gmra.mxu1 %vm807_vm12, %v804_v38 }
 0x153   : > { %1002 = vmatpush.bf16.msrb.mxu1 %v1992_v15 }
 0x157   : > { %1003 = vmatpush.bf16.msrb.mxu1 %v1991_v12 }
 0x15b   : > { %1004 = vmatpush.bf16.msrb.mxu1 %v1990_v53 }
 0x15f   : > { %1005 = vmatpush.bf16.msrb.mxu1 %v1989_v56 }
 0x1c8   : > { %v824_v51 = vpop.f32.mrf.mxu0 }
 0x1c9   : > { %v901_v16 = vpop.f32.mrf.mxu2  ;;  %829 = vst.msk [vmem:[#allocation4 + $0x1] sm:$0x1] %vm828_vm8, %v824_v51 }
 0x1ca   : > { %v902_v26 = vadd.f32 %v2069_v33, %v901_v16 }
 0x1cc   : > { %v1011_v47 = vpack.c.bf16 %v902_v26, %v902_v26 }
 0x1cf   : > { %v844_v7 = vpop.f32.mrf.mxu1 }
 0x1d0   : > { %848 = vst.msk [vmem:[#allocation5 + $0x1] sm:$0x1] %vm828_vm8, %v844_v7  ;;  %v826_v23 = vpop.f32.mrf.mxu0  ;;  %v905_v24 = vld [vmem:[#allocation4] sm:$0x3] }
 0x1d1   : > { %v903_v57 = vpop.f32.mrf.mxu2  ;;  %v906_v58 = vpack.c.bf16 %v905_v24, %v905_v24 }
 0x1d3   : > { %1827 = vmatmul.msk.bf16.vlgmr.msra.gmra.mxu3 %vm888_vm10, %v906_v58 }
 0x1d7   : > { %v958_v60 = vld [vmem:[#allocation5] sm:$0x3]  ;;  %v846_v61 = vpop.f32.mrf.mxu1 }
 0x1d8   : > { %v959_v20 = vpack.c.bf16 %v958_v60, %v958_v60 }
 0x1da   : > { %1852 = vmatmul.msk.bf16.vlgmr.msrb.gmra.mxu1 %vm888_vm10, %v959_v20 }
 0x256   : > { %v954_v8 = vpop.f32.mrf.mxu3 }
 0x257   : > { %v1007_v18 = vpop.f32.mrf.mxu1  ;;  %v955_v2 = vadd.f32 %v2071_v25, %v954_v8 }
 0x258   : > { %v1008_v54 = vadd.f32 %v2070_v62, %v1007_v18 }
 0x259   : > { %v1012_v6 = vpack.c.bf16 %v955_v2, %v955_v2 }
 0x25a   : > { %v2517_v21 = vpack.c.bf16 %v1008_v54, %v1008_v54 }
 0x25b   : > { %1261 = vrot.lane.b32.xlu0 %v1012_v6, %s2116_s23  ;;  %1075 = vrot.lane.b32.xlu2 %v1012_v6, %s2117_s27  ;;  %v1018_v22 = vsel %vm1013_vm13, %v1012_v6, 0 }
 0x25c   : > { %v1053_v31 = vsel %vm1051_vm14, %v2517_v21, 0  ;;  %1027 = vmatpush.bf16.xpose.msra.mxu1 %v1018_v22 }
 0x25d   : > { %1062 = vmatpush.bf16.msrb.mxu2 %v1053_v31 }
 0x25e   : > { %v956_v17 = vpop.f32.mrf.mxu3 }
 0x25f   : > { %v1009_v19 = vpop.f32.mrf.mxu1 }
 0x261   : > { %1171 = vmatpush.bf16.msra.mxu2 %v1993_v41 }
 0x263   : > { %1072 = vrot.lane.b32.xlu2 %v1011_v47, %s2117_s27  ;;  %1853 = vmatmul.msk.bf16.vlgmr.msra.gmra.mxu1 %vm1013_vm13, %v1011_v47 }
 0x26b   : > { %1259 = vrot.lane.b32.xlu2 %v1011_v47, %s2116_s23 }
 0x273   : > { %1177 = vrot.lane.b32.xlu2 %v1011_v47, %s2118_s28 }
 0x2b5   : > { %v1076_v63 = vpop.permute.xlu2 %1075 }
 0x2b6   : > { %v1081_v29 = vsel %vm1013_vm13, %v1076_v63, 0 }
 0x2b7   : > { %1090 = vmatpush.bf16.xpose.msrb.mxu3 %v1081_v29 }
 0x2bd   : > { %v1073_v32 = vpop.permute.xlu2 %1072 }
 0x2be   : > { %1855 = vmatmul.msk.bf16.vlgmr.msrb.gmra.mxu3 %vm1013_vm13, %v1073_v32  ;;  %v1994_v32 = vld [vmem:[%s2737_s9 + $0x8] sm:$0xff] }
 0x2bf   : > { %1149 = vmatpush.bf16.msrb.mxu1 %v1994_v32 }
 0x2c5   : > { %v1260_v44 = vpop.permute.xlu2 %1259 }
 0x2cd   : > { %v1178_v35 = vpop.permute.xlu2 %1177  ;;  %v1262_v5 = vpop.permute.xlu0 %1261 }
 0x2ce   : > { %v1267_v39 = vsel %vm1013_vm13, %v1262_v5, 0 }
 0x2e0   : > { %v1029_v3 = vpop.f32.mrf.mxu1 }
 0x2e1   : > { %v1034_v11 = vsel %vm1033_vm15, %v1029_v3, -inf }
 0x2e2   : > { %1035 = vmax.xlane.f32.xlu1 %v1034_v11  ;;  %v1995_v11 = vld [vmem:[%s2737_s9 + $0x10] sm:$0xff] }
 0x2e3   : > { %1252 = vmatpush.bf16.msra.mxu1 %v1995_v11 }
 0x2e8   : > { %v1031_v10 = vpop.f32.mrf.mxu1 }
 0x341   : > { %v1092_v30 = vpop.f32.mrf.mxu3 }
 0x342   : > { %v1096_v13 = vsel %vm1033_vm15, %v1092_v30, -inf }
 0x343   : > { %1097 = vmax.xlane.f32.xlu2 %v1096_v13 }
 0x349   : > { %v1094_v43 = vpop.f32.mrf.mxu3 }
 0x355   : > { %v1036_v34 = vpop.xlane.xlu1 %1035 }
 0x356   : > { %v1037_v27 = vsub.f32 %v1029_v3, %v1036_v34 }
 0x358   : > { %v1038_v28 = vmul.f32 1.442695, %v1037_v27 }
 0x35a   : > { %2080 = vpow2.f32 %v1038_v28 }
 0x360   : > { %v2081_v37 = vpop.eup %2080 }
 0x361   : > { %v1040_v59 = vsel %vm1033_vm15, %v2081_v37, 0.0 }
 0x362   : > { %1041 = vadd.xlane.f32.xlu1 %v1040_v59 }
 0x37b   : > { %1179 = vrot.lane.b32.xlu1 %v1012_v6, %s2118_s28 }
 0x3b6   : > { %v1098_v45 = vpop.xlane.xlu2 %1097 }
 0x3b7   : > { %v1099_v40 = vsub.f32 %v1092_v30, %v1098_v45 }
 0x3b9   : > { %v1100_v1 = vmul.f32 1.442695, %v1099_v40 }
 0x3bb   : > { %2082 = vpow2.f32 %v1100_v1 }
 0x3c1   : > { %v2083_v42 = vpop.eup %2082 }
 0x3c2   : > { %v1102_v46 = vsel %vm1033_vm15, %v2083_v42, 0.0 }
 0x3c3   : > { %1103 = vadd.xlane.f32.xlu2 %v1102_v46 }
 0x3d5   : > { %v1042_v48 = vpop.xlane.xlu1 %1041 }
 0x3d6   : > { %2084 = vrcp.f32 %v1042_v48 }
 0x3dc   : > { %v2085_v50 = vpop.eup %2084 }
 0x3dd   : > { %v1044_v4 = vmul.f32 %v2085_v50, %v2081_v37 }
 0x3df   : > { %v1045_v38 = vpack.c.bf16 %v1044_v4, %v1044_v4 }
 0x3e1   : > { %1854 = vmatmul.msk.bf16.vlgmr.msrb.gmra.mxu2 %vm1047_vm1, %v1045_v38 }
 0x3e2   : > { %1276 = vmatpush.bf16.xpose.msrb.mxu2 %v1267_v39  ;;  %v2072_v39 = vld [vmem:[%s2738_s10] ss:$0 sm:$0xff] }
 0x3ed   : > { %v1180_v14 = vpop.permute.xlu1 %1179 }
 0x3ee   : > { %v1185_v15 = vsel %vm1013_vm13, %v1180_v14, 0 }
 0x3ef   : > { %1194 = vmatpush.bf16.xpose.msra.mxu3 %v1185_v15 }
 0x3f6   : > { %1867 = vmatmul.msk.bf16.vlgmr.msra.gmra.mxu3 %vm1013_vm13, %v1178_v35  ;;  %v1996_v35 = vld [vmem:[%s2737_s9 + $0x18] sm:$0xff] }
 0x436   : > { %v1104_v8 = vpop.xlane.xlu2 %1103 }
 0x464   : > { %v1064_v36 = vpop.f32.mrf.mxu2 }
 0x465   : > { %v1068_v49 = vpack.c.bf16 %v1064_v36, %v1064_v36 }
 0x467   : > { %1866 = vmatmul.msk.bf16.vlgmr.msra.gmra.mxu2 %vm1013_vm13, %v1068_v49 }
 0x46c   : > { %v1066_v12 = vpop.f32.mrf.mxu2 }
 0x477   : > { %1874 = vmatmul.msk.bf16.vlgmr.msrb.gmra.mxu2 %vm1013_vm13, %v1260_v44 }
 0x479   : > { %v1196_v52 = vpop.f32.mrf.mxu3 }
 0x47a   : > { %v1200_v53 = vsel %vm1033_vm15, %v1196_v52, -inf }
 0x47b   : > { %1201 = vmax.xlane.f32.xlu1 %v1200_v53 }
 0x481   : > { %v1198_v55 = vpop.f32.mrf.mxu3 }
 0x4ea   : > { %v2545_v56 = vpop.f32.mrf.mxu2 }
 0x4ee   : > { %v1202_v51 = vpop.xlane.xlu1 %1201 }
 0x4ef   : > { %v1203_v16 = vsub.f32 %v1196_v52, %v1202_v51  ;;  %v2004_v51 = vld [vmem:[%s2741_s13 + $0x34] sm:$0xf0] }
 0x4f1   : > { %v1204_v7 = vmul.f32 1.442695, %v1203_v16  ;;  %v2003_v16 = vld [vmem:[%s2741_s13 + $0x34] sm:$0xf] }
 0x4f2   : > { %v1175_v23 = vpop.f32.mrf.mxu2 }
 0x4f3   : > { %2086 = vpow2.f32 %v1204_v7  ;;  %v1909_v23 = vld [vmem:[%s2741_s13 + $0x38] sm:$0xf0] }
 0x4f9   : > { %v2087_v57 = vpop.eup %2086 }
 0x4fa   : > { %v1278_v24 = vpop.f32.mrf.mxu2  ;;  %v1206_v58 = vsel %vm1033_vm15, %v2087_v57, 0.0 }
 0x4fb   : > { %1207 = vadd.xlane.f32.xlu1 %v1206_v58  ;;  %v1282_v60 = vsel %vm1033_vm15, %v1278_v24, -inf  ;;  %v1912_v58 = vor.u32 %v2003_v16, %v1909_v23 }
 0x4fc   : > { %1283 = vmax.xlane.f32.xlu0 %v1282_v60  ;;  %v2001_v60 = vld [vmem:[%s2741_s13 + $0x24] sm:$0xf] }
 0x4fd   : > { %1454 = vmatpush.bf16.msra.mxu2 %v1912_v58 }
 0x502   : > { %v1280_v61 = vpop.f32.mrf.mxu2 }
 0x503   : > { %v1901_v61 = vld [vmem:[%s2741_s13 + $0x28] sm:$0xf0] }
 0x510   : > { %1109 = vrot.lane.b32.xlu0 %v2517_v21, %s2117_s27 }
 0x514   : > { %1212 = vrot.lane.b32.xlu1 %v2517_v21, %s2118_s28 }
 0x56e   : > { %v1208_v33 = vpop.xlane.xlu1 %1207 }
 0x56f   : > { %v1284_v20 = vpop.xlane.xlu0 %1283 }
 0x570   : > { %v1285_v25 = vsub.f32 %v1278_v24, %v1284_v20  ;;  %v2002_v24 = vld [vmem:[%s2741_s13 + $0x24] sm:$0xf0] }
 0x572   : > { %v1286_v62 = vmul.f32 1.442695, %v1285_v25  ;;  %v1904_v25 = vor.u32 %v2001_v60, %v1901_v61  ;;  %v2018_v60 = vld [vmem:[%s2743_s15 + $0x68] sm:$0xff] }
 0x574   : > { %2088 = vpow2.f32 %v1286_v62  ;;  %v1891_v62 = vld [vmem:[%s2741_s13 + $0x10] sm:$0xf]  ;;  %1455 = vmatpush.bf16.msra.mxu2 %v1904_v25 }
 0x575   : > { %2090 = vrcp.f32 %v1104_v8  ;;  %v2000_v8 = vld [vmem:[%s2741_s13 + $0x14] sm:$0xf0] }
 0x576   : > { %2092 = vrcp.f32 %v1208_v33  ;;  %v1892_v33 = vor.u32 %v2000_v8, %v1891_v62  ;;  %v2008_v62 = vld [vmem:[%s2743_s15 + $0x18] sm:$0xff] }
 0x57a   : > { %v2089_v18 = vpop.eup %2088 }
 0x57b   : > { %v1288_v2 = vsel %vm1033_vm15, %v2089_v18, 0.0  ;;  %v2091_v54 = vpop.eup %2090 }
 0x57c   : > { %1289 = vadd.xlane.f32.xlu2 %v1288_v2  ;;  %v1106_v6 = vmul.f32 %v2091_v54, %v2083_v42  ;;  %v2093_v47 = vpop.eup %2092  ;;  %v1893_v2 = vld [vmem:[%s2741_s13 + $0x18] sm:$0xf0] }
 0x57d   : > { %v1210_v63 = vmul.f32 %v2093_v47, %v2087_v57  ;;  %v1899_v57 = vld [vmem:[%s2741_s13 + $0x20] sm:$0xf] }
 0x57e   : > { %v1107_v26 = vpack.c.bf16 %v1106_v6, %v1106_v6  ;;  %v1900_v20 = vor.u32 %v2002_v24, %v1899_v57  ;;  %v2009_v57 = vld [vmem:[%s2743_s15 + $0x20] sm:$0xff] }
 0x57f   : > { %v1211_v29 = vpack.c.bf16 %v1210_v63, %v1210_v63 }
 0x582   : > { %v1110_v22 = vpop.permute.xlu0 %1109 }
 0x583   : > { %v1115_v31 = vsel %vm1051_vm14, %v1110_v22, 0 }
 0x584   : > { %1124 = vmatpush.bf16.msrb.mxu0 %v1115_v31  ;;  %v1883_v31 = vld [vmem:[%s2741_s13] sm:$0xf] }
 0x586   : > { %v1213_v17 = vpop.permute.xlu1 %1212 }
 0x587   : > { %v1218_v19 = vsel %vm1051_vm14, %v1213_v17, 0  ;;  %1856 = vmatmul.msk.bf16.vlgmr.msrb.gmra.mxu0 %vm1047_vm1, %v1107_v26  ;;  %v1998_v26 = vld [vmem:[%s2741_s13 + $0x4] sm:$0xf0]  ;;  %v1997_v17 = vld [vmem:[%s2741_s13 + $0x4] sm:$0xf] }
 0x588   : > { %1227 = vmatpush.bf16.msra.mxu0 %v1218_v19  ;;  %v1885_v19 = vld [vmem:[%s2741_s13 + $0x8] sm:$0xf0] }
 0x589   : > { %v1888_v63 = vor.u32 %v1997_v17, %v1885_v19  ;;  %v2007_v17 = vld [vmem:[%s2743_s15 + $0x10] sm:$0xff] }
 0x58c   : > { %1334 = vmatpush.bf16.msrb.mxu0 %v1996_v35 }
 0x594   : > { %1294 = vrot.lane.b32.xlu2 %v2517_v21, %s2116_s23 }
 0x597   : > { %1868 = vmatmul.msk.bf16.vlgmr.msra.gmra.mxu0 %vm1047_vm1, %v1211_v29 }
 0x5ef   : > { %v1290_v3 = vpop.xlane.xlu2 %1289 }
 0x5f0   : > { %2094 = vrcp.f32 %v1290_v3 }
 0x5f6   : > { %v2095_v10 = vpop.eup %2094 }
 0x5f7   : > { %v1292_v30 = vmul.f32 %v2095_v10, %v2089_v18  ;;  %v1295_v13 = vpop.permute.xlu2 %1294  ;;  %v1999_v18 = vld [vmem:[%s2741_s13 + $0x14] sm:$0xf] }
 0x5f8   : > { %v1300_v21 = vsel %vm1051_vm14, %v1295_v13, 0  ;;  %v1896_v22 = vor.u32 %v1999_v18, %v1893_v2  ;;  %v2073_v13 = vld [vmem:[%s2739_s11] ss:$0 sm:$0xff] }
 0x5f9   : > { %v1293_v43 = vpack.c.bf16 %v1292_v30, %v1292_v30  ;;  %1309 = vmatpush.bf16.msrb.mxu3 %v1300_v21 }
 0x5fa   : > { %1456 = vmatpush.bf16.msra.mxu2 %v1896_v22 }
 0x5fc   : > { %1875 = vmatmul.msk.bf16.vlgmr.msrb.gmra.mxu3 %vm1047_vm1, %v1293_v43 }
 0x5fe   : > { %1457 = vmatpush.bf16.msra.mxu2 %v1888_v63 }
 0x604   : > { %v1126_v34 = vpop.f32.mrf.mxu0 }
 0x605   : > { %v1130_v27 = vpack.c.bf16 %v1126_v34, %v1126_v34  ;;  %v2074_v34 = vld [vmem:[%s2740_s12] ss:$0 sm:$0xff] }
 0x607   : > { %1861 = vmatmul.msk.bf16.vlgmr.msrb.gmra.mxu1 %vm1013_vm13, %v1130_v27 }
 0x60c   : > { %v1128_v28 = vpop.f32.mrf.mxu0 }
 0x614   : > { %v1229_v37 = vpop.f32.mrf.mxu0 }
 0x615   : > { %v1233_v59 = vpack.c.bf16 %v1229_v37, %v1229_v37 }
 0x617   : > { %1873 = vmatmul.msk.bf16.vlgmr.msra.gmra.mxu1 %vm1013_vm13, %v1233_v59  ;;  %v1388_v59 = vld [vmem:[%s2742_s14] sm:$0x3] }
 0x61c   : > { %v1231_v44 = vpop.f32.mrf.mxu0 }
 0x61d   : > { %v1390_v44 = vperm.slane %v1388_v59, 0 }
 0x67f   : > { %v1311_v45 = vpop.f32.mrf.mxu3 }
 0x680   : > { %v1315_v40 = vpack.c.bf16 %v1311_v45, %v1311_v45 }
 0x682   : > { %1880 = vmatmul.msk.bf16.vlgmr.msrb.gmra.mxu0 %vm1013_vm13, %v1315_v40 }
 0x684   : > { %v1151_v1 = vpop.f32.mrf.mxu1 }
 0x685   : > { %v1174_v46 = vadd.f32 %v2545_v56, %v1151_v1  ;;  %v1391_v1 = vperm.slane %v1388_v59, 1 }
 0x687   : > { %v1313_v41 = vpop.f32.mrf.mxu3 }
 0x68c   : > { %v1153_v42 = vpop.f32.mrf.mxu1 }
 0x694   : > { %v1254_v48 = vpop.f32.mrf.mxu1 }
 0x695   : > { %v1258_v50 = vadd.f32 %v1254_v48, %v1174_v46 }
 0x69c   : > { %v1256_v4 = vpop.f32.mrf.mxu1 }
 0x6ff   : > { %v1336_v5 = vpop.f32.mrf.mxu0 }
 0x700   : > { %v1340_v38 = vadd.f32 %v1336_v5, %v1258_v50 }
 0x702   : > { %v1341_v14 = vadd.f32 %v1340_v38, %v2225_v0  ;;  %v1907_v0 = vld [vmem:[%s2741_s13 + $0x30] sm:$0xf]  ;;  %v2012_v38 = vld [vmem:[%s2743_s15 + $0x38] sm:$0xff] }
 0x703   : > { %v1908_v7 = vor.u32 %v2004_v51, %v1907_v0  ;;  %1673 = vmatpush.bf16.msra.mxu3 %v2012_v38  ;;  %v2019_v51 = vld [vmem:[%s2743_s15 + $0x70] sm:$0xff] }
 0x704   : > { %v2579_v15 = vadd.f32 %v2072_v39, %v1341_v14 }
 0x705   : > { %1441 = vmatpush.bf16.msrb.mxu1 %v1908_v7 }
 0x706   : > { %v1349_v36 = vsel %vm548_vm0, %v2579_v15, 0.0 }
 0x707   : > { %v1338_v49 = vpop.f32.mrf.mxu0  ;;  %1350 = vadd.xlane.f32.xlu0 %v1349_v36 }
 0x708   : > { %v2011_v49 = vld [vmem:[%s2743_s15 + $0x30] sm:$0xff] }
 0x709   : > { %1442 = vmatpush.bf16.msrb.mxu1 %v1900_v20  ;;  %1674 = vmatpush.bf16.msra.mxu3 %v2011_v49 }
 0x70d   : > { %1443 = vmatpush.bf16.msrb.mxu1 %v1892_v33 }
 0x77a   : > { %v1351_v12 = vpop.xlane.xlu0 %1350 }
 0x77b   : > { %v1352_v52 = vmul.f32 %v1351_v12, %v2229_v9 }
 0x77d   : > { %v1353_v53 = vsub.f32 %v2579_v15, %v1352_v52  ;;  %v2020_v52 = vld [vmem:[%s2743_s15 + $0x78] sm:$0xff] }
 0x77e   : > { %1686 = vmatpush.bf16.msra.mxu0 %v2020_v52 }
 0x77f   : > { %v1354_v55 = vmul.f32 %v1353_v53, %v1353_v53 }
 0x781   : > { %v1355_v56 = vsel %vm548_vm0, %v1354_v55, 0.0 }
 0x782   : > { %1356 = vadd.xlane.f32.xlu2 %v1355_v56  ;;  %v2010_v56 = vld [vmem:[%s2743_s15 + $0x28] sm:$0xff]  ;;  %1687 = vmatpush.bf16.msra.mxu0 %v2019_v51 }
 0x783   : > { %1675 = vmatpush.bf16.msra.mxu3 %v2010_v56 }
 0x786   : > { %1688 = vmatpush.bf16.msra.mxu0 %v2018_v60 }
 0x787   : > { %1676 = vmatpush.bf16.msra.mxu3 %v2009_v57 }
 0x78b   : > { %1677 = vmatpush.bf16.msra.mxu3 %v2008_v62 }
 0x78f   : > { %1678 = vmatpush.bf16.msra.mxu3 %v2007_v17 }
 0x7f5   : > { %v1357_v54 = vpop.xlane.xlu2 %1356 }
 0x7f6   : > { %v1358_v6 = vmul.f32 %v1357_v54, %v2229_v9  ;;  %v1884_v9 = vor.u32 %v1998_v26, %v1883_v31 }
 0x7f8   : > { %v1359_v47 = vadd.f32 1e-05, %v1358_v6  ;;  %1444 = vmatpush.bf16.msrb.mxu1 %v1884_v9  ;;  %v2017_v6 = vld [vmem:[%s2743_s15 + $0x60] sm:$0xff] }
 0x7f9   : > { %1689 = vmatpush.bf16.msra.mxu0 %v2017_v6 }
 0x7fa   : > { %2096 = vrsqrt.f32 %v1359_v47  ;;  %vm1366_vm3 = vweird.f32 %v1359_v47 }
 0x800   : > { %v2097_v29 = vpop.eup %2096 }
 0x801   : > { %v1361_v32 = vmul.f32 %v2097_v29, %v1359_v47  ;;  %vm1367_vm2 = vweird.f32 %v2097_v29 }
 0x802   : > { %vm1368_vm4 = vmor %vm1366_vm3, %vm1367_vm2 }
 0x803   : > { %v1362_v3 = vmul.f32 %v2097_v29, %v1361_v32  ;;  %v2006_v32 = vld [vmem:[%s2743_s15 + $0x8] sm:$0xff] }
 0x804   : > { %1679 = vmatpush.bf16.msra.mxu3 %v2006_v32 }
 0x805   : > { %v1363_v11 = vmul.f32 0.5, %v1362_v3 }
 0x807   : > { %v1364_v10 = vsub.f32 1.5, %v1363_v11 }
 0x809   : > { %v1365_v30 = vmul.f32 %v2097_v29, %v1364_v10 }
 0x80b   : > { %v1369_v21 = vsel %vm1368_vm4, %v2097_v29, %v1365_v30  ;;  %v2016_v29 = vld [vmem:[%s2743_s15 + $0x58] sm:$0xff] }
 0x80c   : > { %v1370_v43 = vmul.f32 %v1369_v21, %v1353_v53  ;;  %1690 = vmatpush.bf16.msra.mxu0 %v2016_v29 }
 0x80e   : > { %v1374_v27 = vmul.f32 %v2073_v13, %v1370_v43  ;;  %v2015_v13 = vld [vmem:[%s2743_s15 + $0x50] sm:$0xff] }
 0x810   : > { %v1378_v28 = vadd.f32 %v2074_v34, %v1374_v27  ;;  %v2005_v27 = vld [vmem:[%s2743_s15] sm:$0xff]  ;;  %1691 = vmatpush.bf16.msra.mxu0 %v2015_v13 }
 0x811   : > { %1680 = vmatpush.bf16.msra.mxu3 %v2005_v27 }
 0x812   : > { %v1379_v37 = vpack.c.bf16 %v1378_v28, %v1378_v28 }
 0x814   : > { %1913 = vmatmul.msk.bf16.vlgmr.msrb.gmra.mxu1 %vm888_vm10, %v1379_v37  ;;  %1914 = vmatmul.msk.bf16.vlgmr.msra.gmra.mxu2 %vm888_vm10, %v1379_v37 }
 0x891   : > { %v1446_v35 = vpop.f32.mrf.mxu1 }
 0x892   : > { %v2646_v45 = vadd.f32 %v1446_v35, %v1390_v44  ;;  %v2014_v44 = vld [vmem:[%s2743_s15 + $0x48] sm:$0xff] }
 0x893   : > { %1692 = vmatpush.bf16.msra.mxu0 %v2014_v44 }
 0x894   : > { %v2649_v40 = vmul.f32 0.70710677, %v2646_v45  ;;  %v1463_v51 = vmul.f32 0.5, %v2646_v45 }
 0x896   : > { %v1467_v41 = vand.u32 2147483647, %v2649_v40  ;;  %vm1533_vm13 = vcmp.lt.f32.partialorder %v2649_v40, 0.0 }
 0x897   : > { %v1459_v42 = vpop.f32.mrf.mxu2 }
 0x898   : > { %v1469_v46 = vmul.f32 0.3275911, %v1467_v41  ;;  %v2652_v48 = vadd.f32 %v1459_v42, %v1391_v1  ;;  %v1521_v18 = vsub.f32 0.0, %v1467_v41 }
 0x899   : > { %v1448_v50 = vpop.f32.mrf.mxu1 }
 0x89a   : > { %v1471_v4 = vadd.f32 1.0, %v1469_v46  ;;  %v2655_v5 = vmul.f32 0.70710677, %v2652_v48  ;;  %v1523_v19 = vmul.f32 %v1521_v18, %v1467_v41  ;;  %v2013_v50 = vld [vmem:[%s2743_s15 + $0x40] sm:$0xff] }
 0x89b   : > { %1693 = vmatpush.bf16.msra.mxu0 %v2013_v50  ;;  %v2075_v18 = vld [vmem:[%s2744_s16] ss:$0 sm:$0xff] }
 0x89c   : > { %2098 = vrcp.f32 %v1471_v4  ;;  %v2661_v39 = vand.u32 2147483647, %v2655_v5  ;;  %v1484_v16 = vand.u32 2147483648, %v1471_v4  ;;  %v1482_v23 = vand.u32 2147483647, %v1471_v4 }
 0x89d   : > { %vm1478_vm6 = vweird.f32 %v1471_v4  ;;  %v1525_v21 = vmul.f32 1.442695, %v1523_v19  ;;  %vm1534_vm14 = vcmp.lt.f32.partialorder %v2655_v5, 0.0 }
 0x89e   : > { %v1470_v14 = vmul.f32 0.3275911, %v2661_v39  ;;  %v1485_v61 = vor.u32 1.1754944e-38, %v1484_v16  ;;  %vm1483_vm8 = vcmp.eq.f32.partialorder %v1482_v23, 8.507059e+37  ;;  %v1522_v30 = vsub.f32 0.0, %v2661_v39 }
 0x89f   : > { %v1461_v36 = vpop.f32.mrf.mxu2 }
 0x8a0   : > { %v1472_v12 = vadd.f32 1.0, %v1470_v14  ;;  %v1524_v59 = vmul.f32 %v1522_v30, %v2661_v39 }
 0x8a2   : > { %v2099_v53 = vpop.eup %2098  ;;  %2100 = vrcp.f32 %v1472_v12  ;;  %v1499_v33 = vand.u32 2147483648, %v1472_v12  ;;  %v1497_v31 = vand.u32 2147483647, %v1472_v12  ;;  %vm1493_vm10 = vweird.f32 %v1472_v12 }
 0x8a3   : > { %v1474_v55 = vmul.f32 %v2099_v53, %v1471_v4  ;;  %vm1479_vm5 = vweird.f32 %v2099_v53  ;;  %2102 = vpow2.f32 %v1525_v21  ;;  %v1527_v46 = vmul.f32 1.442695, %v1524_v59 }
 0x8a4   : > { %vm1480_vm7 = vmor %vm1478_vm6, %vm1479_vm5  ;;  %v1500_v63 = vor.u32 1.1754944e-38, %v1499_v33  ;;  %vm1498_vm12 = vcmp.eq.f32.partialorder %v1497_v31, 8.507059e+37 }
 0x8a5   : > { %v1475_v0 = vsub.f32 1.0, %v1474_v55  ;;  %2104 = vpow2.f32 %v1527_v46 }
 0x8a7   : > { %v1476_v7 = vmul.f32 %v2099_v53, %v1475_v0 }
 0x8a8   : > { %v2101_v24 = vpop.eup %2100 }
 0x8a9   : > { %v1477_v58 = vadd.f32 %v2099_v53, %v1476_v7  ;;  %v1489_v20 = vmul.f32 %v2101_v24, %v1472_v12  ;;  %vm1494_vm9 = vweird.f32 %v2101_v24  ;;  %v2103_v39 = vpop.eup %2102 }
 0x8aa   : > { %vm1495_vm11 = vmor %vm1493_vm10, %vm1494_vm9 }
 0x8ab   : > { %v1481_v25 = vsel %vm1480_vm7, %v2099_v53, %v1477_v58  ;;  %v1490_v2 = vsub.f32 1.0, %v1489_v20  ;;  %v2105_v56 = vpop.eup %2104 }
 0x8ac   : > { %v1486_v8 = vsel %vm1483_vm8, %v1485_v61, %v1481_v25  ;;  %v1464_v61 = vmul.f32 0.5, %v2652_v48 }
 0x8ad   : > { %v1503_v54 = vmul.f32 1.0614054, %v1486_v8  ;;  %v1491_v22 = vmul.f32 %v2101_v24, %v1490_v2 }
 0x8af   : > { %v1505_v26 = vadd.f32 -1.4531521, %v1503_v54  ;;  %v1492_v47 = vadd.f32 %v2101_v24, %v1491_v22 }
 0x8b1   : > { %v1507_v9 = vmul.f32 %v1505_v26, %v1486_v8  ;;  %v1496_v3 = vsel %vm1495_vm11, %v2101_v24, %v1492_v47 }
 0x8b2   : > { %v1501_v10 = vsel %vm1498_vm12, %v1500_v63, %v1496_v3 }
 0x8b3   : > { %v1509_v11 = vadd.f32 1.4214138, %v1507_v9  ;;  %v1504_v43 = vmul.f32 1.0614054, %v1501_v10 }
 0x8b5   : > { %v1511_v34 = vmul.f32 %v1509_v11, %v1486_v8  ;;  %v1506_v28 = vadd.f32 -1.4531521, %v1504_v43 }
 0x8b7   : > { %v1513_v37 = vadd.f32 -0.28449672, %v1511_v34  ;;  %v1508_v35 = vmul.f32 %v1506_v28, %v1501_v10 }
 0x8b9   : > { %v1515_v1 = vmul.f32 %v1513_v37, %v1486_v8  ;;  %v1510_v41 = vadd.f32 1.4214138, %v1508_v35 }
 0x8bb   : > { %v1517_v42 = vadd.f32 0.2548296, %v1515_v1  ;;  %v1512_v4 = vmul.f32 %v1510_v41, %v1501_v10 }
 0x8bd   : > { %v1519_v38 = vmul.f32 %v1517_v42, %v1486_v8  ;;  %v1514_v14 = vadd.f32 -0.28449672, %v1512_v4 }
 0x8bf   : > { %v1529_v36 = vmul.f32 %v2103_v39, %v1519_v38  ;;  %v1516_v49 = vmul.f32 %v1514_v14, %v1501_v10 }
 0x8c1   : > { %v1531_v12 = vsub.f32 1.0, %v1529_v36  ;;  %v1518_v52 = vadd.f32 0.2548296, %v1516_v49 }
 0x8c3   : > { %v1535_v53 = vsub.f32 0.0, %v1531_v12  ;;  %v1520_v55 = vmul.f32 %v1518_v52, %v1501_v10 }
 0x8c5   : > { %v1537_v0 = vsel %vm1533_vm13, %v1535_v53, %v1531_v12  ;;  %v1530_v7 = vmul.f32 %v2105_v56, %v1520_v55 }
 0x8c6   : > { %v1539_v16 = vadd.f32 1.0, %v1537_v0 }
 0x8c7   : > { %v1532_v57 = vsub.f32 1.0, %v1530_v7 }
 0x8c8   : > { %v1541_v23 = vmul.f32 %v1539_v16, %v1463_v51 }
 0x8c9   : > { %v1536_v58 = vsub.f32 0.0, %v1532_v57 }
 0x8ca   : > { %v1543_v24 = vpack.c.bf16 %v1541_v23, %v1541_v23 }
 0x8cb   : > { %v1538_v60 = vsel %vm1534_vm14, %v1536_v58, %v1532_v57 }
 0x8cc   : > { %1681 = vmatmul.bf16.vlgmr.msra.gmra.mxu3 %v1543_v24  ;;  %v1540_v20 = vadd.f32 1.0, %v1538_v60 }
 0x8ce   : > { %v1542_v40 = vmul.f32 %v1540_v20, %v1464_v61 }
 0x8d0   : > { %v1544_v25 = vpack.c.bf16 %v1542_v40, %v1542_v40 }
 0x8d2   : > { %1694 = vmatmul.bf16.vlgmr.msra.gmra.mxu0 %v1544_v25 }
 0x94f   : > { %v1682_v62 = vpop.f32.mrf.mxu3  ;;  %v1695_v8 = vpop.f32.mrf.mxu0 }
 0x950   : > { %v1696_v45 = vadd.f32 %v1695_v8, %v1682_v62 }
 0x952   : > { %v1699_v2 = vadd.f32 %v1696_v45, %v2579_v15 }
 0x954   : > { %v1704_v5 = vadd.f32 %v2075_v18, %v1699_v2 }
 0x956   : > { %1705 = vst.msk [vmem:[%s543_s29] sm:$0x1f] %vm548_vm0, %v1704_v5 }
 0x957   : > { %v1684_v48 = vpop.f32.mrf.mxu3  ;;  %v1697_v54 = vpop.f32.mrf.mxu0 }
 0x958 PF: > { %s27_s24 = sadd.s32 1, %s2112_s24  }
 0x959   : > { %p24_p4 = scmp.ge.s32.totalorder %s27_s24, 4  }
 0x95b   :  { %26 = sbr.rel (!%p24_p4) target bundleno = 3 (0x3), region = 124 }

</bundles_post_ra>
